<compile_context>
chip_gen: v7x
topology: tpu7x:2x2x1
jax: 0.10.0
libtpu: 0.0.40
codegen_flags: <defaults>
</compile_context>

<pallas_src>
import copy
import math

import numpy as np
import jax
import jax.numpy as jnp
from jax.experimental import pallas as pl
from jax.experimental.pallas import tpu as pltpu

NUM_VERTICES = 7
MAX_EDGE_NBR = NUM_VERTICES * (NUM_VERTICES - 1) // 2
BN_EPS = 1e-5
LANE = 128


def _round_up(v, m):
    return (v + m - 1) // m * m


# ---------------------------------------------------------------------------
# Graph encoding / pruning (pure Python glue, mirrors Model.create_matrix/prune)
# ---------------------------------------------------------------------------
def create_matrix(config):
    triu = np.triu_indices(NUM_VERTICES, k=1)
    m = np.zeros((NUM_VERTICES, NUM_VERTICES))
    m[triu] = config[:MAX_EDGE_NBR]
    return m


def prune(original_matrix, original_ops):
    matrix = copy.deepcopy(original_matrix)
    ops = copy.deepcopy(original_ops)
    n = original_matrix.shape[0]
    ops.insert(0, "input")
    ops.append("output")
    vin, frontier = {0}, [0]
    while frontier:
        top = frontier.pop()
        for v in range(top + 1, n):
            if original_matrix[top, v] and v not in vin:
                vin.add(v)
                frontier.append(v)
    vout, frontier = {n - 1}, [n - 1]
    while frontier:
        top = frontier.pop()
        for v in range(0, top):
            if original_matrix[v, top] and v not in vout:
                vout.add(v)
                frontier.append(v)
    extraneous = set(range(n)).difference(vin & vout)
    if len(extraneous) > n - 2:
        return matrix, ops, False
    matrix = np.delete(matrix, list(extraneous), axis=0)
    matrix = np.delete(matrix, list(extraneous), axis=1)
    for idx in sorted(extraneous, reverse=True):
        del ops[idx]
    if len(ops) < 3:
        return matrix, ops, False
    if np.sum(matrix) > 9:
        return matrix, ops, False
    return matrix, ops, True


# ---------------------------------------------------------------------------
# Model
# ---------------------------------------------------------------------------
class PallasModel:
    def __init__(self, config, nbr_cell, nbr_stack, nbr_filters, num_classes,
                 C_in=1, key=None):
        self.nbr_stack = nbr_stack
        self.nbr_cell = nbr_cell
        self.nbr_filters = nbr_filters
        self.num_classes = num_classes
        self.C_in = C_in

        self.org_matrix = create_matrix(config)
        self.org_ops = list(config[MAX_EDGE_NBR:MAX_EDGE_NBR + NUM_VERTICES - 2])
        self.matrix, self.ops, self.isFeasible = prune(self.org_matrix, self.org_ops)
        if not self.isFeasible:
            raise ValueError("infeasible chromosome")
        self.ops = self.ops[1:-1]

        # TODO(synk): the `Cell` class is not part of the provided source; each
        # NAS cell is approximated as one conv3x3 + BatchNorm(eval stats) + ReLU
        # following compile()'s channel-doubling progression (the pruned
        # matrix/ops only gate feasibility here).
        # layer plan: (spatial_level, Cin, Cout); level s runs at H/2^s x W/2^s
        layers = [(0, C_in, nbr_filters)]                     # stem conv (cells[0])
        for s in range(nbr_stack):
            c_out = nbr_filters * (2 ** s)
            for c in range(nbr_cell):
                if s == 0:
                    c_in_l = nbr_filters
                elif c == 0:
                    c_in_l = nbr_filters * (2 ** (s - 1))
                else:
                    c_in_l = c_out
                layers.append((s, c_in_l, c_out))
        self.layers = layers
        self.emb = nbr_filters * (2 ** (nbr_stack - 1))

        # ------------------ parameters (xavier-uniform like torch) ----------
        key = jax.random.PRNGKey(0) if key is None else key
        keys = jax.random.split(key, len(layers) + 1)

        def xavier(k, shape, fan_in, fan_out):
            bound = math.sqrt(6.0 / (fan_in + fan_out))
            return jax.random.uniform(k, shape, jnp.float32, -bound, bound)

        self.conv_w, self.conv_b = [], []
        for i, (_lvl, ci, co) in enumerate(layers):
            self.conv_w.append(xavier(keys[i], (3, 3, ci, co), ci * 9, co * 9))
            self.conv_b.append(jnp.zeros((co,), jnp.float32))
        self.cls_w = xavier(keys[len(layers)], (self.emb, num_classes),
                            self.emb, num_classes)
        self.cls_b = jnp.zeros((num_classes,), jnp.float32)

        self._cache = {}

    # ------------------------------------------------------------------ build
    def _build(self, N, H, W):
        S = self.nbr_stack
        layers = self.layers
        L = len(layers)
        assert H % (1 << (S - 1)) == 0 and W % (1 << (S - 1)) == 0

        # per-level padded-flat geometry: (H, W, Hp, Wp, Mp = Hp*Wp)
        levels = []
        for s in range(S):
            hs, ws = H >> s, W >> s
            levels.append((hs, ws, hs + 2, ws + 2, (hs + 2) * (ws + 2)))
        Mp0 = levels[0][4]
        G = _round_up(levels[0][3] + 1, 8)      # guard rows >= max |tap shift|, 8-aligned
        R = Mp0 + 2 * G                         # scratch rows
        c_max = max(max(ci, co) for _l, ci, co in layers)
        c_last = layers[-1][2]
        ncp = _round_up(self.num_classes, LANE)  # lane-dense classifier output
        bn_scale = 1.0 / math.sqrt(1.0 + BN_EPS)  # fresh eval-mode BN folded into w/b

        # --------------- constant operands (built host-side once) -----------
        w_in = [(self.conv_w[l] * bn_scale)
                .reshape(9, layers[l][1], layers[l][2]).astype(jnp.bfloat16)
                for l in range(L)]
        b_in = [(self.conv_b[l] * bn_scale).reshape(1, layers[l][2]) for l in range(L)]

        masks = []   # (Mp, 1) f32: 1 at real pixels, 0 at the padding halo rows/cols
        for hs, ws, _hp, wp, mp in levels:
            m = np.zeros((mp, 1), np.float32)
            for yy in range(1, hs + 1):
                for xx in range(1, ws + 1):
                    m[yy * wp + xx, 0] = 1.0
            masks.append(jnp.asarray(m))

        pools = []   # (4, Mp_out, Mp_in) one-hot selectors for the 2x2 window taps
        for s in range(S - 1):
            _hi, _wi, _hpi, wpi, mpi = levels[s]
            ho, wo, _hpo, wpo, mpo = levels[s + 1]
            sel = np.zeros((4, mpo, mpi), np.float32)
            for oy in range(2):
                for ox in range(2):
                    k = oy * 2 + ox
                    for yy in range(ho):
                        for xx in range(wo):
                            r_out = (yy + 1) * wpo + (xx + 1)
                            r_in = (2 * yy + oy + 1) * wpi + (2 * xx + ox + 1)
                            sel[k, r_out, r_in] = 1.0
            pools.append(jnp.asarray(sel, jnp.bfloat16))

        clsw = (jnp.zeros((c_last, ncp), jnp.float32)
                .at[:, :self.num_classes].set(self.cls_w).astype(jnp.bfloat16))
        clsb = jnp.zeros((1, ncp), jnp.float32).at[0, :self.num_classes].set(self.cls_b)

        const_inputs = w_in + b_in + pools + masks + [clsw, clsb]

        cells_per_stack = self.nbr_cell
        nbf = jnp.bfloat16
        c_in0 = layers[0][1]

        # ------------------------------- fused forward kernel ---------------
        def kernel(*args):
            pos = 0
            x_ref = args[pos]; pos += 1
            w_refs = args[pos:pos + L]; pos += L
            b_refs = args[pos:pos + L]; pos += L
            pool_refs = args[pos:pos + S - 1]; pos += S - 1
            mask_refs = args[pos:pos + S]; pos += S
            clsw_ref = args[pos]; pos += 1
            clsb_ref = args[pos]; pos += 1
            o_ref = args[pos]; pos += 1
            bufs = [args[pos], args[pos + 1]]

            # Zero the ping-pong scratch: the guard rows stay 0 forever, so the
            # shifted-tap reads below see correct zero padding with no per-tap mask.
            bufs[0][...] = jnp.zeros(bufs[0].shape, bufs[0].dtype)
            bufs[1][...] = jnp.zeros(bufs[1].shape, bufs[1].dtype)

            # Stage the (spatially zero-padded, flattened) image into buffer 0.
            bufs[0][G:G + Mp0, 0:c_in0] = x_ref[0]

            state = {"cur": 0}

            def conv(layer_idx):
                lvl, cin, cout = layers[layer_idx]
                _hs, _ws, _hp, wp, mp = levels[lvl]
                src = bufs[state["cur"]]
                dst = bufs[1 - state["cur"]]
                acc = jnp.zeros((mp, cout), jnp.float32)
                t = 0
                for dy in (-1, 0, 1):
                    for dx in (-1, 0, 1):
                        start = G + dy * wp + dx                 # static offset
                        tap = src[start:start + mp, 0:cin]       # f32 (mp, cin)
                        wt = w_refs[layer_idx][t]                # bf16 (cin, cout)
                        if cin == 1:
                            # stem: contraction dim 1 -> VPU broadcast MAC, skip MXU
                            acc = acc + tap * wt
                        else:
                            acc = acc + jnp.dot(tap.astype(nbf), wt,
                                                preferred_element_type=jnp.float32)
                        t += 1
                y = jnp.maximum(acc + b_refs[layer_idx][...], 0.0)   # bias + ReLU (f32)
                y = y * mask_refs[lvl][...]                          # re-zero halo
                dst[G:G + mp, 0:cout] = y.astype(dst.dtype)
                state["cur"] = 1 - state["cur"]

            def maxpool(level, c):
                mp_in = levels[level][4]
                mp_out = levels[level + 1][4]
                src = bufs[state["cur"]]
                dst = bufs[1 - state["cur"]]
                x = src[G:G + mp_in, 0:c].astype(nbf)
                best = None
                for k in range(4):                   # one-hot gather of each 2x2 tap
                    v = jnp.dot(pool_refs[level][k], x,
                                preferred_element_type=jnp.float32)
                    best = v if best is None else jnp.maximum(best, v)
                dst[G:G + mp_out, 0:c] = best.astype(dst.dtype)
                state["cur"] = 1 - state["cur"]

            # ---- network: stem, stacks of cells, pool between stacks ----
            li = 0
            conv(li); li += 1                        # cells[0] (stem)
            for s in range(S):
                for _ in range(cells_per_stack):
                    conv(li); li += 1
                if s != S - 1:
                    maxpool(s, layers[li - 1][2])

            # ---- global mean over H,W + linear classifier (lane-padded) ----
            # Reduce first (halo rows are already zero), then a tiny (1,C)x(C,128)
            # matmul: far fewer MXU pushes than projecting the full feature map.
            hs, ws, _hp, _wp, mp_last = levels[S - 1]
            feat = bufs[state["cur"]][G:G + mp_last, 0:c_last]       # f32 (mp, C)
            mean = (jnp.sum(feat, axis=0, keepdims=True)
                    * (1.0 / (hs * ws)))                             # f32 (1, C)
            logits = (jnp.dot(mean.astype(nbf), clsw_ref[...],
                              preferred_element_type=jnp.float32)
                      + clsb_ref[...])
            o_ref[0] = logits

        # ------------------------------- pallas_call -------------------------
        def const_spec(shape):
            nd = len(shape)
            return pl.BlockSpec(shape, lambda n, _nd=nd: (0,) * _nd)

        in_specs = [pl.BlockSpec((1, Mp0, c_in0), lambda n: (n, 0, 0))]
        in_specs += [const_spec(tuple(w.shape)) for w in w_in]
        in_specs += [const_spec(tuple(b.shape)) for b in b_in]
        in_specs += [const_spec(tuple(p.shape)) for p in pools]
        in_specs += [const_spec(tuple(m.shape)) for m in masks]
        in_specs += [const_spec((c_last, ncp)), const_spec((1, ncp))]

        call = pl.pallas_call(
            kernel,
            out_shape=jax.ShapeDtypeStruct((N, 1, ncp), jnp.float32),
            grid=(N,),
            in_specs=in_specs,
            out_specs=pl.BlockSpec((1, 1, ncp), lambda n: (n, 0, 0)),
            scratch_shapes=[pltpu.VMEM((R, c_max), jnp.float32),
                            pltpu.VMEM((R, c_max), jnp.float32)],
            compiler_params=pltpu.CompilerParams(
                dimension_semantics=("parallel",),       # batch across TCs (v7x)
                vmem_limit_bytes=32 * 1024 * 1024),      # explicit, safe on v5e/v6e/v7x
        )
        return call, const_inputs, Mp0, ncp

    # ---------------------------------------------------------------- forward
    def forward(self, x_nchw):
        N, C, H, W = x_nchw.shape
        assert C == self.C_in
        cache_key = (N, H, W)
        if cache_key not in self._cache:
            self._cache[cache_key] = self._build(N, H, W)
        call, const_inputs, Mp0, ncp = self._cache[cache_key]

        # NCHW (PyTorch) -> padded-flat NHWC rows; only the tiny network input
        # is touched here, all per-layer work happens inside the fused kernel.
        x = jnp.transpose(x_nchw.astype(jnp.float32), (0, 2, 3, 1))
        x = jnp.pad(x, ((0, 0), (1, 1), (1, 1), (0, 0)))
        x = x.reshape(N, Mp0, C)
        out = call(x, *const_inputs)
        return out.reshape(N, ncp)[:, :self.num_classes]


# ---------------------------------------------------------------------------
if __name__ == "__main__":
    # Chromosome config: 21 upper-triangular edge bits (chain 0-1-...-6) + 5 ops
    edges = np.zeros(MAX_EDGE_NBR, dtype=np.int32)
    triu = np.triu_indices(NUM_VERTICES, k=1)
    chain = {(0, 1), (1, 2), (2, 3), (3, 4), (4, 5), (5, 6)}
    for pos, (r, c) in enumerate(zip(*triu)):
        if (int(r), int(c)) in chain:
            edges[pos] = 1
    config = list(edges) + [1, 1, 2, 1, 1]

    model = PallasModel(config, nbr_cell=1, nbr_stack=2, nbr_filters=8,
                        num_classes=4, C_in=1, key=jax.random.PRNGKey(0))

    x = jax.random.normal(jax.random.PRNGKey(0), (2, 1, 16, 16), jnp.float32)  # NCHW
    out = model.forward(x)
    out = jax.block_until_ready(out)
    assert out.shape == (2, 4) and out.dtype == jnp.float32
    print("KERNEL_OK")
</pallas_src>

<mosaic_0001>
module attributes {stable_mosaic.version = 11 : i64} {
  func.func @kernel(%arg0: i32, %arg1: memref<1x324x1xf32, #tpu.memory_space<vmem>>, %arg2: memref<9x1x8xbf16, #tpu.memory_space<vmem>>, %arg3: memref<9x8x8xbf16, #tpu.memory_space<vmem>>, %arg4: memref<9x8x16xbf16, #tpu.memory_space<vmem>>, %arg5: memref<1x8xf32, #tpu.memory_space<vmem>>, %arg6: memref<1x8xf32, #tpu.memory_space<vmem>>, %arg7: memref<1x16xf32, #tpu.memory_space<vmem>>, %arg8: memref<4x100x324xbf16, #tpu.memory_space<vmem>>, %arg9: memref<324x1xf32, #tpu.memory_space<vmem>>, %arg10: memref<100x1xf32, #tpu.memory_space<vmem>>, %arg11: memref<16x128xbf16, #tpu.memory_space<vmem>>, %arg12: memref<1x128xf32, #tpu.memory_space<vmem>>, %arg13: memref<1x1x128xf32, #tpu.memory_space<vmem>>, %arg14: memref<372x16xf32, #tpu.memory_space<vmem>>, %arg15: memref<372x16xf32, #tpu.memory_space<vmem>>) attributes {dimension_semantics = [#tpu.dimension_semantics<parallel>], iteration_bounds = array<i64: 2>, scalar_prefetch = 0 : i64, scratch_operands = 2 : i64, tpu.core_type = #tpu.core_type<tc>, window_params = [{transform_indices = @transform_0, window_bounds = array<i64: 1, 324, 1>}, {pipeline_mode = #tpu.pipeline_mode<synchronous>, transform_indices = @transform_1, window_bounds = array<i64: 9, 1, 8>}, {pipeline_mode = #tpu.pipeline_mode<synchronous>, transform_indices = @transform_2, window_bounds = array<i64: 9, 8, 8>}, {pipeline_mode = #tpu.pipeline_mode<synchronous>, transform_indices = @transform_3, window_bounds = array<i64: 9, 8, 16>}, {pipeline_mode = #tpu.pipeline_mode<synchronous>, transform_indices = @transform_4, window_bounds = array<i64: 1, 8>}, {pipeline_mode = #tpu.pipeline_mode<synchronous>, transform_indices = @transform_5, window_bounds = array<i64: 1, 8>}, {pipeline_mode = #tpu.pipeline_mode<synchronous>, transform_indices = @transform_6, window_bounds = array<i64: 1, 16>}, {pipeline_mode = #tpu.pipeline_mode<synchronous>, transform_indices = @transform_7, window_bounds = array<i64: 4, 100, 324>}, {pipeline_mode = #tpu.pipeline_mode<synchronous>, transform_indices = @transform_8, window_bounds = array<i64: 324, 1>}, {pipeline_mode = #tpu.pipeline_mode<synchronous>, transform_indices = @transform_9, window_bounds = array<i64: 100, 1>}, {pipeline_mode = #tpu.pipeline_mode<synchronous>, transform_indices = @transform_10, window_bounds = array<i64: 16, 128>}, {pipeline_mode = #tpu.pipeline_mode<synchronous>, transform_indices = @transform_11, window_bounds = array<i64: 1, 128>}, {transform_indices = @transform_12, window_bounds = array<i64: 1, 1, 128>}]} {
    %cst = arith.constant 0.000000e+00 : f32
    %0 = vector.broadcast %cst : f32 to vector<372x16xf32>
    %c0 = arith.constant 0 : index
    %c0_0 = arith.constant 0 : index
    %1 = vector.load %arg14[%c0, %c0_0] : memref<372x16xf32, #tpu.memory_space<vmem>>, vector<372x16xf32>
    tpu.vector_store %arg14[%c0, %c0_0], %0 {strides = array<i32>} : memref<372x16xf32, #tpu.memory_space<vmem>>, vector<372x16xf32>,
    %cst_1 = arith.constant 0.000000e+00 : f32
    %2 = vector.broadcast %cst_1 : f32 to vector<372x16xf32>
    %c0_2 = arith.constant 0 : index
    %c0_3 = arith.constant 0 : index
    %3 = vector.load %arg15[%c0_2, %c0_3] : memref<372x16xf32, #tpu.memory_space<vmem>>, vector<372x16xf32>
    tpu.vector_store %arg15[%c0_2, %c0_3], %2 {strides = array<i32>} : memref<372x16xf32, #tpu.memory_space<vmem>>, vector<372x16xf32>,
    %c0_4 = arith.constant 0 : index
    %c0_5 = arith.constant 0 : index
    %c0_6 = arith.constant 0 : index
    %4 = vector.load %arg1[%c0_4, %c0_5, %c0_6] : memref<1x324x1xf32, #tpu.memory_space<vmem>>, vector<1x324x1xf32>
    %5 = vector.shape_cast %4 : vector<1x324x1xf32> to vector<324x1xf32>
    %c24 = arith.constant 24 : index
    %c0_7 = arith.constant 0 : index
    %6 = vector.load %arg14[%c24, %c0_7] : memref<372x16xf32, #tpu.memory_space<vmem>>, vector<324x1xf32>
    tpu.vector_store %arg14[%c24, %c0_7], %5 {strides = array<i32>} : memref<372x16xf32, #tpu.memory_space<vmem>>, vector<324x1xf32>,
    %cst_8 = arith.constant 0.000000e+00 : f32
    %7 = vector.broadcast %cst_8 : f32 to vector<324x8xf32>
    %c5 = arith.constant 5 : index
    %c0_9 = arith.constant 0 : index
    %8 = vector.load %arg14[%c5, %c0_9] : memref<372x16xf32, #tpu.memory_space<vmem>>, vector<324x1xf32>
    %c0_10 = arith.constant 0 : index
    %c0_11 = arith.constant 0 : index
    %c0_12 = arith.constant 0 : index
    %9 = vector.load %arg2[%c0_10, %c0_11, %c0_12] : memref<9x1x8xbf16, #tpu.memory_space<vmem>>, vector<1x1x8xbf16>
    %10 = vector.shape_cast %9 : vector<1x1x8xbf16> to vector<1x8xbf16>
    %11 = arith.extf %10 : vector<1x8xbf16> to vector<1x8xf32>
    %12 = vector.broadcast %8 : vector<324x1xf32> to vector<324x8xf32>
    %13 = vector.broadcast %11 : vector<1x8xf32> to vector<324x8xf32>
    %14 = arith.mulf %12, %13 : vector<324x8xf32>
    %15 = arith.addf %7, %14 : vector<324x8xf32>
    %c6 = arith.constant 6 : index
    %c0_13 = arith.constant 0 : index
    %16 = vector.load %arg14[%c6, %c0_13] : memref<372x16xf32, #tpu.memory_space<vmem>>, vector<324x1xf32>
    %c1 = arith.constant 1 : index
    %c0_14 = arith.constant 0 : index
    %c0_15 = arith.constant 0 : index
    %17 = vector.load %arg2[%c1, %c0_14, %c0_15] : memref<9x1x8xbf16, #tpu.memory_space<vmem>>, vector<1x1x8xbf16>
    %18 = vector.shape_cast %17 : vector<1x1x8xbf16> to vector<1x8xbf16>
    %19 = arith.extf %18 : vector<1x8xbf16> to vector<1x8xf32>
    %20 = vector.broadcast %16 : vector<324x1xf32> to vector<324x8xf32>
    %21 = vector.broadcast %19 : vector<1x8xf32> to vector<324x8xf32>
    %22 = arith.mulf %20, %21 : vector<324x8xf32>
    %23 = arith.addf %15, %22 : vector<324x8xf32>
    %c7 = arith.constant 7 : index
    %c0_16 = arith.constant 0 : index
    %24 = vector.load %arg14[%c7, %c0_16] : memref<372x16xf32, #tpu.memory_space<vmem>>, vector<324x1xf32>
    %c2 = arith.constant 2 : index
    %c0_17 = arith.constant 0 : index
    %c0_18 = arith.constant 0 : index
    %25 = vector.load %arg2[%c2, %c0_17, %c0_18] : memref<9x1x8xbf16, #tpu.memory_space<vmem>>, vector<1x1x8xbf16>
    %26 = vector.shape_cast %25 : vector<1x1x8xbf16> to vector<1x8xbf16>
    %27 = arith.extf %26 : vector<1x8xbf16> to vector<1x8xf32>
    %28 = vector.broadcast %24 : vector<324x1xf32> to vector<324x8xf32>
    %29 = vector.broadcast %27 : vector<1x8xf32> to vector<324x8xf32>
    %30 = arith.mulf %28, %29 : vector<324x8xf32>
    %31 = arith.addf %23, %30 : vector<324x8xf32>
    %c23 = arith.constant 23 : index
    %c0_19 = arith.constant 0 : index
    %32 = vector.load %arg14[%c23, %c0_19] : memref<372x16xf32, #tpu.memory_space<vmem>>, vector<324x1xf32>
    %c3 = arith.constant 3 : index
    %c0_20 = arith.constant 0 : index
    %c0_21 = arith.constant 0 : index
    %33 = vector.load %arg2[%c3, %c0_20, %c0_21] : memref<9x1x8xbf16, #tpu.memory_space<vmem>>, vector<1x1x8xbf16>
    %34 = vector.shape_cast %33 : vector<1x1x8xbf16> to vector<1x8xbf16>
    %35 = arith.extf %34 : vector<1x8xbf16> to vector<1x8xf32>
    %36 = vector.broadcast %32 : vector<324x1xf32> to vector<324x8xf32>
    %37 = vector.broadcast %35 : vector<1x8xf32> to vector<324x8xf32>
    %38 = arith.mulf %36, %37 : vector<324x8xf32>
    %39 = arith.addf %31, %38 : vector<324x8xf32>
    %c24_22 = arith.constant 24 : index
    %c0_23 = arith.constant 0 : index
    %40 = vector.load %arg14[%c24_22, %c0_23] : memref<372x16xf32, #tpu.memory_space<vmem>>, vector<324x1xf32>
    %c4 = arith.constant 4 : index
    %c0_24 = arith.constant 0 : index
    %c0_25 = arith.constant 0 : index
    %41 = vector.load %arg2[%c4, %c0_24, %c0_25] : memref<9x1x8xbf16, #tpu.memory_space<vmem>>, vector<1x1x8xbf16>
    %42 = vector.shape_cast %41 : vector<1x1x8xbf16> to vector<1x8xbf16>
    %43 = arith.extf %42 : vector<1x8xbf16> to vector<1x8xf32>
    %44 = vector.broadcast %40 : vector<324x1xf32> to vector<324x8xf32>
    %45 = vector.broadcast %43 : vector<1x8xf32> to vector<324x8xf32>
    %46 = arith.mulf %44, %45 : vector<324x8xf32>
    %47 = arith.addf %39, %46 : vector<324x8xf32>
    %c25 = arith.constant 25 : index
    %c0_26 = arith.constant 0 : index
    %48 = vector.load %arg14[%c25, %c0_26] : memref<372x16xf32, #tpu.memory_space<vmem>>, vector<324x1xf32>
    %c5_27 = arith.constant 5 : index
    %c0_28 = arith.constant 0 : index
    %c0_29 = arith.constant 0 : index
    %49 = vector.load %arg2[%c5_27, %c0_28, %c0_29] : memref<9x1x8xbf16, #tpu.memory_space<vmem>>, vector<1x1x8xbf16>
    %50 = vector.shape_cast %49 : vector<1x1x8xbf16> to vector<1x8xbf16>
    %51 = arith.extf %50 : vector<1x8xbf16> to vector<1x8xf32>
    %52 = vector.broadcast %48 : vector<324x1xf32> to vector<324x8xf32>
    %53 = vector.broadcast %51 : vector<1x8xf32> to vector<324x8xf32>
    %54 = arith.mulf %52, %53 : vector<324x8xf32>
    %55 = arith.addf %47, %54 : vector<324x8xf32>
    %c41 = arith.constant 41 : index
    %c0_30 = arith.constant 0 : index
    %56 = vector.load %arg14[%c41, %c0_30] : memref<372x16xf32, #tpu.memory_space<vmem>>, vector<324x1xf32>
    %c6_31 = arith.constant 6 : index
    %c0_32 = arith.constant 0 : index
    %c0_33 = arith.constant 0 : index
    %57 = vector.load %arg2[%c6_31, %c0_32, %c0_33] : memref<9x1x8xbf16, #tpu.memory_space<vmem>>, vector<1x1x8xbf16>
    %58 = vector.shape_cast %57 : vector<1x1x8xbf16> to vector<1x8xbf16>
    %59 = arith.extf %58 : vector<1x8xbf16> to vector<1x8xf32>
    %60 = vector.broadcast %56 : vector<324x1xf32> to vector<324x8xf32>
    %61 = vector.broadcast %59 : vector<1x8xf32> to vector<324x8xf32>
    %62 = arith.mulf %60, %61 : vector<324x8xf32>
    %63 = arith.addf %55, %62 : vector<324x8xf32>
    %c42 = arith.constant 42 : index
    %c0_34 = arith.constant 0 : index
    %64 = vector.load %arg14[%c42, %c0_34] : memref<372x16xf32, #tpu.memory_space<vmem>>, vector<324x1xf32>
    %c7_35 = arith.constant 7 : index
    %c0_36 = arith.constant 0 : index
    %c0_37 = arith.constant 0 : index
    %65 = vector.load %arg2[%c7_35, %c0_36, %c0_37] : memref<9x1x8xbf16, #tpu.memory_space<vmem>>, vector<1x1x8xbf16>
    %66 = vector.shape_cast %65 : vector<1x1x8xbf16> to vector<1x8xbf16>
    %67 = arith.extf %66 : vector<1x8xbf16> to vector<1x8xf32>
    %68 = vector.broadcast %64 : vector<324x1xf32> to vector<324x8xf32>
    %69 = vector.broadcast %67 : vector<1x8xf32> to vector<324x8xf32>
    %70 = arith.mulf %68, %69 : vector<324x8xf32>
    %71 = arith.addf %63, %70 : vector<324x8xf32>
    %c43 = arith.constant 43 : index
    %c0_38 = arith.constant 0 : index
    %72 = vector.load %arg14[%c43, %c0_38] : memref<372x16xf32, #tpu.memory_space<vmem>>, vector<324x1xf32>
    %c8 = arith.constant 8 : index
    %c0_39 = arith.constant 0 : index
    %c0_40 = arith.constant 0 : index
    %73 = vector.load %arg2[%c8, %c0_39, %c0_40] : memref<9x1x8xbf16, #tpu.memory_space<vmem>>, vector<1x1x8xbf16>
    %74 = vector.shape_cast %73 : vector<1x1x8xbf16> to vector<1x8xbf16>
    %75 = arith.extf %74 : vector<1x8xbf16> to vector<1x8xf32>
    %76 = vector.broadcast %72 : vector<324x1xf32> to vector<324x8xf32>
    %77 = vector.broadcast %75 : vector<1x8xf32> to vector<324x8xf32>
    %78 = arith.mulf %76, %77 : vector<324x8xf32>
    %79 = arith.addf %71, %78 : vector<324x8xf32>
    %c0_41 = arith.constant 0 : index
    %c0_42 = arith.constant 0 : index
    %80 = vector.load %arg5[%c0_41, %c0_42] : memref<1x8xf32, #tpu.memory_space<vmem>>, vector<1x8xf32>
    %81 = vector.broadcast %80 : vector<1x8xf32> to vector<324x8xf32>
    %82 = arith.addf %79, %81 : vector<324x8xf32>
    %cst_43 = arith.constant 0.000000e+00 : f32
    %83 = vector.broadcast %cst_43 : f32 to vector<324x8xf32>
    %84 = arith.maximumf %82, %83 : vector<324x8xf32>
    %c0_44 = arith.constant 0 : index
    %c0_45 = arith.constant 0 : index
    %85 = vector.load %arg9[%c0_44, %c0_45] : memref<324x1xf32, #tpu.memory_space<vmem>>, vector<324x1xf32>
    %86 = vector.broadcast %85 : vector<324x1xf32> to vector<324x8xf32>
    %87 = arith.mulf %84, %86 : vector<324x8xf32>
    %c24_46 = arith.constant 24 : index
    %c0_47 = arith.constant 0 : index
    %88 = vector.load %arg15[%c24_46, %c0_47] : memref<372x16xf32, #tpu.memory_space<vmem>>, vector<324x8xf32>
    tpu.vector_store %arg15[%c24_46, %c0_47], %87 {strides = array<i32>} : memref<372x16xf32, #tpu.memory_space<vmem>>, vector<324x8xf32>,
    %cst_48 = arith.constant 0.000000e+00 : f32
    %89 = vector.broadcast %cst_48 : f32 to vector<324x8xf32>
    %c5_49 = arith.constant 5 : index
    %c0_50 = arith.constant 0 : index
    %90 = vector.load %arg15[%c5_49, %c0_50] : memref<372x16xf32, #tpu.memory_space<vmem>>, vector<324x8xf32>
    %c0_51 = arith.constant 0 : index
    %c0_52 = arith.constant 0 : index
    %c0_53 = arith.constant 0 : index
    %91 = vector.load %arg3[%c0_51, %c0_52, %c0_53] : memref<9x8x8xbf16, #tpu.memory_space<vmem>>, vector<1x8x8xbf16>
    %92 = vector.shape_cast %91 : vector<1x8x8xbf16> to vector<8x8xbf16>
    %93 = arith.truncf %90 : vector<324x8xf32> to vector<324x8xbf16>
    %cst_54 = arith.constant dense<0.000000e+00> : vector<324x8xf32>
    %94 = tpu.matmul %93, %92, %cst_54 {dimension_numbers = #tpu.dot_dimension_numbers<[1], [0], [0], [1], [0, 0, 1, 1], [], []>} : vector<324x8xbf16>, vector<8x8xbf16>, vector<324x8xf32> -> vector<324x8xf32>
    %95 = arith.addf %89, %94 : vector<324x8xf32>
    %c6_55 = arith.constant 6 : index
    %c0_56 = arith.constant 0 : index
    %96 = vector.load %arg15[%c6_55, %c0_56] : memref<372x16xf32, #tpu.memory_space<vmem>>, vector<324x8xf32>
    %c1_57 = arith.constant 1 : index
    %c0_58 = arith.constant 0 : index
    %c0_59 = arith.constant 0 : index
    %97 = vector.load %arg3[%c1_57, %c0_58, %c0_59] : memref<9x8x8xbf16, #tpu.memory_space<vmem>>, vector<1x8x8xbf16>
    %98 = vector.shape_cast %97 : vector<1x8x8xbf16> to vector<8x8xbf16>
    %99 = arith.truncf %96 : vector<324x8xf32> to vector<324x8xbf16>
    %cst_60 = arith.constant dense<0.000000e+00> : vector<324x8xf32>
    %100 = tpu.matmul %99, %98, %cst_60 {dimension_numbers = #tpu.dot_dimension_numbers<[1], [0], [0], [1], [0, 0, 1, 1], [], []>} : vector<324x8xbf16>, vector<8x8xbf16>, vector<324x8xf32> -> vector<324x8xf32>
    %101 = arith.addf %95, %100 : vector<324x8xf32>
    %c7_61 = arith.constant 7 : index
    %c0_62 = arith.constant 0 : index
    %102 = vector.load %arg15[%c7_61, %c0_62] : memref<372x16xf32, #tpu.memory_space<vmem>>, vector<324x8xf32>
    %c2_63 = arith.constant 2 : index
    %c0_64 = arith.constant 0 : index
    %c0_65 = arith.constant 0 : index
    %103 = vector.load %arg3[%c2_63, %c0_64, %c0_65] : memref<9x8x8xbf16, #tpu.memory_space<vmem>>, vector<1x8x8xbf16>
    %104 = vector.shape_cast %103 : vector<1x8x8xbf16> to vector<8x8xbf16>
    %105 = arith.truncf %102 : vector<324x8xf32> to vector<324x8xbf16>
    %cst_66 = arith.constant dense<0.000000e+00> : vector<324x8xf32>
    %106 = tpu.matmul %105, %104, %cst_66 {dimension_numbers = #tpu.dot_dimension_numbers<[1], [0], [0], [1], [0, 0, 1, 1], [], []>} : vector<324x8xbf16>, vector<8x8xbf16>, vector<324x8xf32> -> vector<324x8xf32>
    %107 = arith.addf %101, %106 : vector<324x8xf32>
    %c23_67 = arith.constant 23 : index
    %c0_68 = arith.constant 0 : index
    %108 = vector.load %arg15[%c23_67, %c0_68] : memref<372x16xf32, #tpu.memory_space<vmem>>, vector<324x8xf32>
    %c3_69 = arith.constant 3 : index
    %c0_70 = arith.constant 0 : index
    %c0_71 = arith.constant 0 : index
    %109 = vector.load %arg3[%c3_69, %c0_70, %c0_71] : memref<9x8x8xbf16, #tpu.memory_space<vmem>>, vector<1x8x8xbf16>
    %110 = vector.shape_cast %109 : vector<1x8x8xbf16> to vector<8x8xbf16>
    %111 = arith.truncf %108 : vector<324x8xf32> to vector<324x8xbf16>
    %cst_72 = arith.constant dense<0.000000e+00> : vector<324x8xf32>
    %112 = tpu.matmul %111, %110, %cst_72 {dimension_numbers = #tpu.dot_dimension_numbers<[1], [0], [0], [1], [0, 0, 1, 1], [], []>} : vector<324x8xbf16>, vector<8x8xbf16>, vector<324x8xf32> -> vector<324x8xf32>
    %113 = arith.addf %107, %112 : vector<324x8xf32>
    %c24_73 = arith.constant 24 : index
    %c0_74 = arith.constant 0 : index
    %114 = vector.load %arg15[%c24_73, %c0_74] : memref<372x16xf32, #tpu.memory_space<vmem>>, vector<324x8xf32>
    %c4_75 = arith.constant 4 : index
    %c0_76 = arith.constant 0 : index
    %c0_77 = arith.constant 0 : index
    %115 = vector.load %arg3[%c4_75, %c0_76, %c0_77] : memref<9x8x8xbf16, #tpu.memory_space<vmem>>, vector<1x8x8xbf16>
    %116 = vector.shape_cast %115 : vector<1x8x8xbf16> to vector<8x8xbf16>
    %117 = arith.truncf %114 : vector<324x8xf32> to vector<324x8xbf16>
    %cst_78 = arith.constant dense<0.000000e+00> : vector<324x8xf32>
    %118 = tpu.matmul %117, %116, %cst_78 {dimension_numbers = #tpu.dot_dimension_numbers<[1], [0], [0], [1], [0, 0, 1, 1], [], []>} : vector<324x8xbf16>, vector<8x8xbf16>, vector<324x8xf32> -> vector<324x8xf32>
    %119 = arith.addf %113, %118 : vector<324x8xf32>
    %c25_79 = arith.constant 25 : index
    %c0_80 = arith.constant 0 : index
    %120 = vector.load %arg15[%c25_79, %c0_80] : memref<372x16xf32, #tpu.memory_space<vmem>>, vector<324x8xf32>
    %c5_81 = arith.constant 5 : index
    %c0_82 = arith.constant 0 : index
    %c0_83 = arith.constant 0 : index
    %121 = vector.load %arg3[%c5_81, %c0_82, %c0_83] : memref<9x8x8xbf16, #tpu.memory_space<vmem>>, vector<1x8x8xbf16>
    %122 = vector.shape_cast %121 : vector<1x8x8xbf16> to vector<8x8xbf16>
    %123 = arith.truncf %120 : vector<324x8xf32> to vector<324x8xbf16>
    %cst_84 = arith.constant dense<0.000000e+00> : vector<324x8xf32>
    %124 = tpu.matmul %123, %122, %cst_84 {dimension_numbers = #tpu.dot_dimension_numbers<[1], [0], [0], [1], [0, 0, 1, 1], [], []>} : vector<324x8xbf16>, vector<8x8xbf16>, vector<324x8xf32> -> vector<324x8xf32>
    %125 = arith.addf %119, %124 : vector<324x8xf32>
    %c41_85 = arith.constant 41 : index
    %c0_86 = arith.constant 0 : index
    %126 = vector.load %arg15[%c41_85, %c0_86] : memref<372x16xf32, #tpu.memory_space<vmem>>, vector<324x8xf32>
    %c6_87 = arith.constant 6 : index
    %c0_88 = arith.constant 0 : index
    %c0_89 = arith.constant 0 : index
    %127 = vector.load %arg3[%c6_87, %c0_88, %c0_89] : memref<9x8x8xbf16, #tpu.memory_space<vmem>>, vector<1x8x8xbf16>
    %128 = vector.shape_cast %127 : vector<1x8x8xbf16> to vector<8x8xbf16>
    %129 = arith.truncf %126 : vector<324x8xf32> to vector<324x8xbf16>
    %cst_90 = arith.constant dense<0.000000e+00> : vector<324x8xf32>
    %130 = tpu.matmul %129, %128, %cst_90 {dimension_numbers = #tpu.dot_dimension_numbers<[1], [0], [0], [1], [0, 0, 1, 1], [], []>} : vector<324x8xbf16>, vector<8x8xbf16>, vector<324x8xf32> -> vector<324x8xf32>
    %131 = arith.addf %125, %130 : vector<324x8xf32>
    %c42_91 = arith.constant 42 : index
    %c0_92 = arith.constant 0 : index
    %132 = vector.load %arg15[%c42_91, %c0_92] : memref<372x16xf32, #tpu.memory_space<vmem>>, vector<324x8xf32>
    %c7_93 = arith.constant 7 : index
    %c0_94 = arith.constant 0 : index
    %c0_95 = arith.constant 0 : index
    %133 = vector.load %arg3[%c7_93, %c0_94, %c0_95] : memref<9x8x8xbf16, #tpu.memory_space<vmem>>, vector<1x8x8xbf16>
    %134 = vector.shape_cast %133 : vector<1x8x8xbf16> to vector<8x8xbf16>
    %135 = arith.truncf %132 : vector<324x8xf32> to vector<324x8xbf16>
    %cst_96 = arith.constant dense<0.000000e+00> : vector<324x8xf32>
    %136 = tpu.matmul %135, %134, %cst_96 {dimension_numbers = #tpu.dot_dimension_numbers<[1], [0], [0], [1], [0, 0, 1, 1], [], []>} : vector<324x8xbf16>, vector<8x8xbf16>, vector<324x8xf32> -> vector<324x8xf32>
    %137 = arith.addf %131, %136 : vector<324x8xf32>
    %c43_97 = arith.constant 43 : index
    %c0_98 = arith.constant 0 : index
    %138 = vector.load %arg15[%c43_97, %c0_98] : memref<372x16xf32, #tpu.memory_space<vmem>>, vector<324x8xf32>
    %c8_99 = arith.constant 8 : index
    %c0_100 = arith.constant 0 : index
    %c0_101 = arith.constant 0 : index
    %139 = vector.load %arg3[%c8_99, %c0_100, %c0_101] : memref<9x8x8xbf16, #tpu.memory_space<vmem>>, vector<1x8x8xbf16>
    %140 = vector.shape_cast %139 : vector<1x8x8xbf16> to vector<8x8xbf16>
    %141 = arith.truncf %138 : vector<324x8xf32> to vector<324x8xbf16>
    %cst_102 = arith.constant dense<0.000000e+00> : vector<324x8xf32>
    %142 = tpu.matmul %141, %140, %cst_102 {dimension_numbers = #tpu.dot_dimension_numbers<[1], [0], [0], [1], [0, 0, 1, 1], [], []>} : vector<324x8xbf16>, vector<8x8xbf16>, vector<324x8xf32> -> vector<324x8xf32>
    %143 = arith.addf %137, %142 : vector<324x8xf32>
    %c0_103 = arith.constant 0 : index
    %c0_104 = arith.constant 0 : index
    %144 = vector.load %arg6[%c0_103, %c0_104] : memref<1x8xf32, #tpu.memory_space<vmem>>, vector<1x8xf32>
    %145 = vector.broadcast %144 : vector<1x8xf32> to vector<324x8xf32>
    %146 = arith.addf %143, %145 : vector<324x8xf32>
    %cst_105 = arith.constant 0.000000e+00 : f32
    %147 = vector.broadcast %cst_105 : f32 to vector<324x8xf32>
    %148 = arith.maximumf %146, %147 : vector<324x8xf32>
    %c0_106 = arith.constant 0 : index
    %c0_107 = arith.constant 0 : index
    %149 = vector.load %arg9[%c0_106, %c0_107] : memref<324x1xf32, #tpu.memory_space<vmem>>, vector<324x1xf32>
    %150 = vector.broadcast %149 : vector<324x1xf32> to vector<324x8xf32>
    %151 = arith.mulf %148, %150 : vector<324x8xf32>
    %c24_108 = arith.constant 24 : index
    %c0_109 = arith.constant 0 : index
    %152 = vector.load %arg14[%c24_108, %c0_109] : memref<372x16xf32, #tpu.memory_space<vmem>>, vector<324x8xf32>
    tpu.vector_store %arg14[%c24_108, %c0_109], %151 {strides = array<i32>} : memref<372x16xf32, #tpu.memory_space<vmem>>, vector<324x8xf32>,
    %c24_110 = arith.constant 24 : index
    %c0_111 = arith.constant 0 : index
    %153 = vector.load %arg14[%c24_110, %c0_111] : memref<372x16xf32, #tpu.memory_space<vmem>>, vector<324x8xf32>
    %154 = arith.truncf %153 : vector<324x8xf32> to vector<324x8xbf16>
    %c0_112 = arith.constant 0 : index
    %c0_113 = arith.constant 0 : index
    %c0_114 = arith.constant 0 : index
    %155 = vector.load %arg8[%c0_112, %c0_113, %c0_114] : memref<4x100x324xbf16, #tpu.memory_space<vmem>>, vector<1x100x324xbf16>
    %156 = vector.shape_cast %155 : vector<1x100x324xbf16> to vector<100x324xbf16>
    %cst_115 = arith.constant dense<0.000000e+00> : vector<100x8xf32>
    %157 = tpu.matmul %156, %154, %cst_115 {dimension_numbers = #tpu.dot_dimension_numbers<[1], [0], [0], [1], [0, 0, 1, 1], [], []>} : vector<100x324xbf16>, vector<324x8xbf16>, vector<100x8xf32> -> vector<100x8xf32>
    %c1_116 = arith.constant 1 : index
    %c0_117 = arith.constant 0 : index
    %c0_118 = arith.constant 0 : index
    %158 = vector.load %arg8[%c1_116, %c0_117, %c0_118] : memref<4x100x324xbf16, #tpu.memory_space<vmem>>, vector<1x100x324xbf16>
    %159 = vector.shape_cast %158 : vector<1x100x324xbf16> to vector<100x324xbf16>
    %cst_119 = arith.constant dense<0.000000e+00> : vector<100x8xf32>
    %160 = tpu.matmul %159, %154, %cst_119 {dimension_numbers = #tpu.dot_dimension_numbers<[1], [0], [0], [1], [0, 0, 1, 1], [], []>} : vector<100x324xbf16>, vector<324x8xbf16>, vector<100x8xf32> -> vector<100x8xf32>
    %161 = arith.maximumf %157, %160 : vector<100x8xf32>
    %c2_120 = arith.constant 2 : index
    %c0_121 = arith.constant 0 : index
    %c0_122 = arith.constant 0 : index
    %162 = vector.load %arg8[%c2_120, %c0_121, %c0_122] : memref<4x100x324xbf16, #tpu.memory_space<vmem>>, vector<1x100x324xbf16>
    %163 = vector.shape_cast %162 : vector<1x100x324xbf16> to vector<100x324xbf16>
    %cst_123 = arith.constant dense<0.000000e+00> : vector<100x8xf32>
    %164 = tpu.matmul %163, %154, %cst_123 {dimension_numbers = #tpu.dot_dimension_numbers<[1], [0], [0], [1], [0, 0, 1, 1], [], []>} : vector<100x324xbf16>, vector<324x8xbf16>, vector<100x8xf32> -> vector<100x8xf32>
    %165 = arith.maximumf %161, %164 : vector<100x8xf32>
    %c3_124 = arith.constant 3 : index
    %c0_125 = arith.constant 0 : index
    %c0_126 = arith.constant 0 : index
    %166 = vector.load %arg8[%c3_124, %c0_125, %c0_126] : memref<4x100x324xbf16, #tpu.memory_space<vmem>>, vector<1x100x324xbf16>
    %167 = vector.shape_cast %166 : vector<1x100x324xbf16> to vector<100x324xbf16>
    %cst_127 = arith.constant dense<0.000000e+00> : vector<100x8xf32>
    %168 = tpu.matmul %167, %154, %cst_127 {dimension_numbers = #tpu.dot_dimension_numbers<[1], [0], [0], [1], [0, 0, 1, 1], [], []>} : vector<100x324xbf16>, vector<324x8xbf16>, vector<100x8xf32> -> vector<100x8xf32>
    %169 = arith.maximumf %165, %168 : vector<100x8xf32>
    %c24_128 = arith.constant 24 : index
    %c0_129 = arith.constant 0 : index
    %170 = vector.load %arg15[%c24_128, %c0_129] : memref<372x16xf32, #tpu.memory_space<vmem>>, vector<100x8xf32>
    tpu.vector_store %arg15[%c24_128, %c0_129], %169 {strides = array<i32>} : memref<372x16xf32, #tpu.memory_space<vmem>>, vector<100x8xf32>,
    %cst_130 = arith.constant 0.000000e+00 : f32
    %171 = vector.broadcast %cst_130 : f32 to vector<100x16xf32>
    %c13 = arith.constant 13 : index
    %c0_131 = arith.constant 0 : index
    %172 = vector.load %arg15[%c13, %c0_131] : memref<372x16xf32, #tpu.memory_space<vmem>>, vector<100x8xf32>
    %c0_132 = arith.constant 0 : index
    %c0_133 = arith.constant 0 : index
    %c0_134 = arith.constant 0 : index
    %173 = vector.load %arg4[%c0_132, %c0_133, %c0_134] : memref<9x8x16xbf16, #tpu.memory_space<vmem>>, vector<1x8x16xbf16>
    %174 = vector.shape_cast %173 : vector<1x8x16xbf16> to vector<8x16xbf16>
    %175 = arith.truncf %172 : vector<100x8xf32> to vector<100x8xbf16>
    %cst_135 = arith.constant dense<0.000000e+00> : vector<100x16xf32>
    %176 = tpu.matmul %175, %174, %cst_135 {dimension_numbers = #tpu.dot_dimension_numbers<[1], [0], [0], [1], [0, 0, 1, 1], [], []>} : vector<100x8xbf16>, vector<8x16xbf16>, vector<100x16xf32> -> vector<100x16xf32>
    %177 = arith.addf %171, %176 : vector<100x16xf32>
    %c14 = arith.constant 14 : index
    %c0_136 = arith.constant 0 : index
    %178 = vector.load %arg15[%c14, %c0_136] : memref<372x16xf32, #tpu.memory_space<vmem>>, vector<100x8xf32>
    %c1_137 = arith.constant 1 : index
    %c0_138 = arith.constant 0 : index
    %c0_139 = arith.constant 0 : index
    %179 = vector.load %arg4[%c1_137, %c0_138, %c0_139] : memref<9x8x16xbf16, #tpu.memory_space<vmem>>, vector<1x8x16xbf16>
    %180 = vector.shape_cast %179 : vector<1x8x16xbf16> to vector<8x16xbf16>
    %181 = arith.truncf %178 : vector<100x8xf32> to vector<100x8xbf16>
    %cst_140 = arith.constant dense<0.000000e+00> : vector<100x16xf32>
    %182 = tpu.matmul %181, %180, %cst_140 {dimension_numbers = #tpu.dot_dimension_numbers<[1], [0], [0], [1], [0, 0, 1, 1], [], []>} : vector<100x8xbf16>, vector<8x16xbf16>, vector<100x16xf32> -> vector<100x16xf32>
    %183 = arith.addf %177, %182 : vector<100x16xf32>
    %c15 = arith.constant 15 : index
    %c0_141 = arith.constant 0 : index
    %184 = vector.load %arg15[%c15, %c0_141] : memref<372x16xf32, #tpu.memory_space<vmem>>, vector<100x8xf32>
    %c2_142 = arith.constant 2 : index
    %c0_143 = arith.constant 0 : index
    %c0_144 = arith.constant 0 : index
    %185 = vector.load %arg4[%c2_142, %c0_143, %c0_144] : memref<9x8x16xbf16, #tpu.memory_space<vmem>>, vector<1x8x16xbf16>
    %186 = vector.shape_cast %185 : vector<1x8x16xbf16> to vector<8x16xbf16>
    %187 = arith.truncf %184 : vector<100x8xf32> to vector<100x8xbf16>
    %cst_145 = arith.constant dense<0.000000e+00> : vector<100x16xf32>
    %188 = tpu.matmul %187, %186, %cst_145 {dimension_numbers = #tpu.dot_dimension_numbers<[1], [0], [0], [1], [0, 0, 1, 1], [], []>} : vector<100x8xbf16>, vector<8x16xbf16>, vector<100x16xf32> -> vector<100x16xf32>
    %189 = arith.addf %183, %188 : vector<100x16xf32>
    %c23_146 = arith.constant 23 : index
    %c0_147 = arith.constant 0 : index
    %190 = vector.load %arg15[%c23_146, %c0_147] : memref<372x16xf32, #tpu.memory_space<vmem>>, vector<100x8xf32>
    %c3_148 = arith.constant 3 : index
    %c0_149 = arith.constant 0 : index
    %c0_150 = arith.constant 0 : index
    %191 = vector.load %arg4[%c3_148, %c0_149, %c0_150] : memref<9x8x16xbf16, #tpu.memory_space<vmem>>, vector<1x8x16xbf16>
    %192 = vector.shape_cast %191 : vector<1x8x16xbf16> to vector<8x16xbf16>
    %193 = arith.truncf %190 : vector<100x8xf32> to vector<100x8xbf16>
    %cst_151 = arith.constant dense<0.000000e+00> : vector<100x16xf32>
    %194 = tpu.matmul %193, %192, %cst_151 {dimension_numbers = #tpu.dot_dimension_numbers<[1], [0], [0], [1], [0, 0, 1, 1], [], []>} : vector<100x8xbf16>, vector<8x16xbf16>, vector<100x16xf32> -> vector<100x16xf32>
    %195 = arith.addf %189, %194 : vector<100x16xf32>
    %c24_152 = arith.constant 24 : index
    %c0_153 = arith.constant 0 : index
    %196 = vector.load %arg15[%c24_152, %c0_153] : memref<372x16xf32, #tpu.memory_space<vmem>>, vector<100x8xf32>
    %c4_154 = arith.constant 4 : index
    %c0_155 = arith.constant 0 : index
    %c0_156 = arith.constant 0 : index
    %197 = vector.load %arg4[%c4_154, %c0_155, %c0_156] : memref<9x8x16xbf16, #tpu.memory_space<vmem>>, vector<1x8x16xbf16>
    %198 = vector.shape_cast %197 : vector<1x8x16xbf16> to vector<8x16xbf16>
    %199 = arith.truncf %196 : vector<100x8xf32> to vector<100x8xbf16>
    %cst_157 = arith.constant dense<0.000000e+00> : vector<100x16xf32>
    %200 = tpu.matmul %199, %198, %cst_157 {dimension_numbers = #tpu.dot_dimension_numbers<[1], [0], [0], [1], [0, 0, 1, 1], [], []>} : vector<100x8xbf16>, vector<8x16xbf16>, vector<100x16xf32> -> vector<100x16xf32>
    %201 = arith.addf %195, %200 : vector<100x16xf32>
    %c25_158 = arith.constant 25 : index
    %c0_159 = arith.constant 0 : index
    %202 = vector.load %arg15[%c25_158, %c0_159] : memref<372x16xf32, #tpu.memory_space<vmem>>, vector<100x8xf32>
    %c5_160 = arith.constant 5 : index
    %c0_161 = arith.constant 0 : index
    %c0_162 = arith.constant 0 : index
    %203 = vector.load %arg4[%c5_160, %c0_161, %c0_162] : memref<9x8x16xbf16, #tpu.memory_space<vmem>>, vector<1x8x16xbf16>
    %204 = vector.shape_cast %203 : vector<1x8x16xbf16> to vector<8x16xbf16>
    %205 = arith.truncf %202 : vector<100x8xf32> to vector<100x8xbf16>
    %cst_163 = arith.constant dense<0.000000e+00> : vector<100x16xf32>
    %206 = tpu.matmul %205, %204, %cst_163 {dimension_numbers = #tpu.dot_dimension_numbers<[1], [0], [0], [1], [0, 0, 1, 1], [], []>} : vector<100x8xbf16>, vector<8x16xbf16>, vector<100x16xf32> -> vector<100x16xf32>
    %207 = arith.addf %201, %206 : vector<100x16xf32>
    %c33 = arith.constant 33 : index
    %c0_164 = arith.constant 0 : index
    %208 = vector.load %arg15[%c33, %c0_164] : memref<372x16xf32, #tpu.memory_space<vmem>>, vector<100x8xf32>
    %c6_165 = arith.constant 6 : index
    %c0_166 = arith.constant 0 : index
    %c0_167 = arith.constant 0 : index
    %209 = vector.load %arg4[%c6_165, %c0_166, %c0_167] : memref<9x8x16xbf16, #tpu.memory_space<vmem>>, vector<1x8x16xbf16>
    %210 = vector.shape_cast %209 : vector<1x8x16xbf16> to vector<8x16xbf16>
    %211 = arith.truncf %208 : vector<100x8xf32> to vector<100x8xbf16>
    %cst_168 = arith.constant dense<0.000000e+00> : vector<100x16xf32>
    %212 = tpu.matmul %211, %210, %cst_168 {dimension_numbers = #tpu.dot_dimension_numbers<[1], [0], [0], [1], [0, 0, 1, 1], [], []>} : vector<100x8xbf16>, vector<8x16xbf16>, vector<100x16xf32> -> vector<100x16xf32>
    %213 = arith.addf %207, %212 : vector<100x16xf32>
    %c34 = arith.constant 34 : index
    %c0_169 = arith.constant 0 : index
    %214 = vector.load %arg15[%c34, %c0_169] : memref<372x16xf32, #tpu.memory_space<vmem>>, vector<100x8xf32>
    %c7_170 = arith.constant 7 : index
    %c0_171 = arith.constant 0 : index
    %c0_172 = arith.constant 0 : index
    %215 = vector.load %arg4[%c7_170, %c0_171, %c0_172] : memref<9x8x16xbf16, #tpu.memory_space<vmem>>, vector<1x8x16xbf16>
    %216 = vector.shape_cast %215 : vector<1x8x16xbf16> to vector<8x16xbf16>
    %217 = arith.truncf %214 : vector<100x8xf32> to vector<100x8xbf16>
    %cst_173 = arith.constant dense<0.000000e+00> : vector<100x16xf32>
    %218 = tpu.matmul %217, %216, %cst_173 {dimension_numbers = #tpu.dot_dimension_numbers<[1], [0], [0], [1], [0, 0, 1, 1], [], []>} : vector<100x8xbf16>, vector<8x16xbf16>, vector<100x16xf32> -> vector<100x16xf32>
    %219 = arith.addf %213, %218 : vector<100x16xf32>
    %c35 = arith.constant 35 : index
    %c0_174 = arith.constant 0 : index
    %220 = vector.load %arg15[%c35, %c0_174] : memref<372x16xf32, #tpu.memory_space<vmem>>, vector<100x8xf32>
    %c8_175 = arith.constant 8 : index
    %c0_176 = arith.constant 0 : index
    %c0_177 = arith.constant 0 : index
    %221 = vector.load %arg4[%c8_175, %c0_176, %c0_177] : memref<9x8x16xbf16, #tpu.memory_space<vmem>>, vector<1x8x16xbf16>
    %222 = vector.shape_cast %221 : vector<1x8x16xbf16> to vector<8x16xbf16>
    %223 = arith.truncf %220 : vector<100x8xf32> to vector<100x8xbf16>
    %cst_178 = arith.constant dense<0.000000e+00> : vector<100x16xf32>
    %224 = tpu.matmul %223, %222, %cst_178 {dimension_numbers = #tpu.dot_dimension_numbers<[1], [0], [0], [1], [0, 0, 1, 1], [], []>} : vector<100x8xbf16>, vector<8x16xbf16>, vector<100x16xf32> -> vector<100x16xf32>
    %225 = arith.addf %219, %224 : vector<100x16xf32>
    %c0_179 = arith.constant 0 : index
    %c0_180 = arith.constant 0 : index
    %226 = vector.load %arg7[%c0_179, %c0_180] : memref<1x16xf32, #tpu.memory_space<vmem>>, vector<1x16xf32>
    %227 = vector.broadcast %226 : vector<1x16xf32> to vector<100x16xf32>
    %228 = arith.addf %225, %227 : vector<100x16xf32>
    %cst_181 = arith.constant 0.000000e+00 : f32
    %229 = vector.broadcast %cst_181 : f32 to vector<100x16xf32>
    %230 = arith.maximumf %228, %229 : vector<100x16xf32>
    %c0_182 = arith.constant 0 : index
    %c0_183 = arith.constant 0 : index
    %231 = vector.load %arg10[%c0_182, %c0_183] : memref<100x1xf32, #tpu.memory_space<vmem>>, vector<100x1xf32>
    %232 = vector.broadcast %231 : vector<100x1xf32> to vector<100x16xf32>
    %233 = arith.mulf %230, %232 : vector<100x16xf32>
    %c24_184 = arith.constant 24 : index
    %c0_185 = arith.constant 0 : index
    %234 = vector.load %arg14[%c24_184, %c0_185] : memref<372x16xf32, #tpu.memory_space<vmem>>, vector<100x16xf32>
    tpu.vector_store %arg14[%c24_184, %c0_185], %233 {strides = array<i32>} : memref<372x16xf32, #tpu.memory_space<vmem>>, vector<100x16xf32>,
    %c24_186 = arith.constant 24 : index
    %c0_187 = arith.constant 0 : index
    %235 = vector.load %arg14[%c24_186, %c0_187] : memref<372x16xf32, #tpu.memory_space<vmem>>, vector<100x16xf32>
    %cst_188 = arith.constant dense<0.000000e+00> : vector<16xf32>
    %236 = vector.multi_reduction <add>, %235, %cst_188 [0] : vector<100x16xf32> to vector<16xf32>
    %237 = vector.shape_cast %236 : vector<16xf32> to vector<1x16xf32>
    %cst_189 = arith.constant 1.562500e-02 : f32
    %238 = vector.broadcast %cst_189 : f32 to vector<1x16xf32>
    %239 = arith.mulf %237, %238 : vector<1x16xf32>
    %240 = arith.truncf %239 : vector<1x16xf32> to vector<1x16xbf16>
    %c0_190 = arith.constant 0 : index
    %c0_191 = arith.constant 0 : index
    %241 = vector.load %arg11[%c0_190, %c0_191] : memref<16x128xbf16, #tpu.memory_space<vmem>>, vector<16x128xbf16>
    %cst_192 = arith.constant dense<0.000000e+00> : vector<1x128xf32>
    %242 = tpu.matmul %240, %241, %cst_192 {dimension_numbers = #tpu.dot_dimension_numbers<[1], [0], [0], [1], [0, 0, 1, 1], [], []>} : vector<1x16xbf16>, vector<16x128xbf16>, vector<1x128xf32> -> vector<1x128xf32>
    %c0_193 = arith.constant 0 : index
    %c0_194 = arith.constant 0 : index
    %243 = vector.load %arg12[%c0_193, %c0_194] : memref<1x128xf32, #tpu.memory_space<vmem>>, vector<1x128xf32>
    %244 = arith.addf %242, %243 : vector<1x128xf32>
    %c0_195 = arith.constant 0 : index
    %c0_196 = arith.constant 0 : index
    %c0_197 = arith.constant 0 : index
    %245 = vector.load %arg13[%c0_195, %c0_196, %c0_197] : memref<1x1x128xf32, #tpu.memory_space<vmem>>, vector<1x1x128xf32>
    %246 = vector.shape_cast %245 : vector<1x1x128xf32> to vector<1x128xf32>
    %247 = vector.shape_cast %244 : vector<1x128xf32> to vector<1x1x128xf32>
    tpu.vector_store %arg13[%c0_195, %c0_196, %c0_197], %247 {strides = array<i32>} : memref<1x1x128xf32, #tpu.memory_space<vmem>>, vector<1x1x128xf32>,
    return
  }
  func.func @transform_0(%arg0: i32) -> (i32, i32, i32) {
    %c0_i32 = arith.constant 0 : i32
    %c0_i32_0 = arith.constant 0 : i32
    %c0_i32_1 = arith.constant 0 : i32
    return %arg0, %c0_i32, %c0_i32_0 : i32, i32, i32
  }
  func.func @transform_1(%arg0: i32) -> (i32, i32, i32) {
    %c0_i32 = arith.constant 0 : i32
    %c0_i32_0 = arith.constant 0 : i32
    %c0_i32_1 = arith.constant 0 : i32
    %c0_i32_2 = arith.constant 0 : i32
    return %c0_i32, %c0_i32_0, %c0_i32_1 : i32, i32, i32
  }
  func.func @transform_2(%arg0: i32) -> (i32, i32, i32) {
    %c0_i32 = arith.constant 0 : i32
    %c0_i32_0 = arith.constant 0 : i32
    %c0_i32_1 = arith.constant 0 : i32
    %c0_i32_2 = arith.constant 0 : i32
    return %c0_i32, %c0_i32_0, %c0_i32_1 : i32, i32, i32
  }
  func.func @transform_3(%arg0: i32) -> (i32, i32, i32) {
    %c0_i32 = arith.constant 0 : i32
    %c0_i32_0 = arith.constant 0 : i32
    %c0_i32_1 = arith.constant 0 : i32
    %c0_i32_2 = arith.constant 0 : i32
    return %c0_i32, %c0_i32_0, %c0_i32_1 : i32, i32, i32
  }
  func.func @transform_4(%arg0: i32) -> (i32, i32) {
    %c0_i32 = arith.constant 0 : i32
    %c0_i32_0 = arith.constant 0 : i32
    %c0_i32_1 = arith.constant 0 : i32
    return %c0_i32, %c0_i32_0 : i32, i32
  }
  func.func @transform_5(%arg0: i32) -> (i32, i32) {
    %c0_i32 = arith.constant 0 : i32
    %c0_i32_0 = arith.constant 0 : i32
    %c0_i32_1 = arith.constant 0 : i32
    return %c0_i32, %c0_i32_0 : i32, i32
  }
  func.func @transform_6(%arg0: i32) -> (i32, i32) {
    %c0_i32 = arith.constant 0 : i32
    %c0_i32_0 = arith.constant 0 : i32
    %c0_i32_1 = arith.constant 0 : i32
    return %c0_i32, %c0_i32_0 : i32, i32
  }
  func.func @transform_7(%arg0: i32) -> (i32, i32, i32) {
    %c0_i32 = arith.constant 0 : i32
    %c0_i32_0 = arith.constant 0 : i32
    %c0_i32_1 = arith.constant 0 : i32
    %c0_i32_2 = arith.constant 0 : i32
    return %c0_i32, %c0_i32_0, %c0_i32_1 : i32, i32, i32
  }
  func.func @transform_8(%arg0: i32) -> (i32, i32) {
    %c0_i32 = arith.constant 0 : i32
    %c0_i32_0 = arith.constant 0 : i32
    %c0_i32_1 = arith.constant 0 : i32
    return %c0_i32, %c0_i32_0 : i32, i32
  }
  func.func @transform_9(%arg0: i32) -> (i32, i32) {
    %c0_i32 = arith.constant 0 : i32
    %c0_i32_0 = arith.constant 0 : i32
    %c0_i32_1 = arith.constant 0 : i32
    return %c0_i32, %c0_i32_0 : i32, i32
  }
  func.func @transform_10(%arg0: i32) -> (i32, i32) {
    %c0_i32 = arith.constant 0 : i32
    %c0_i32_0 = arith.constant 0 : i32
    %c0_i32_1 = arith.constant 0 : i32
    return %c0_i32, %c0_i32_0 : i32, i32
  }
  func.func @transform_11(%arg0: i32) -> (i32, i32) {
    %c0_i32 = arith.constant 0 : i32
    %c0_i32_0 = arith.constant 0 : i32
    %c0_i32_1 = arith.constant 0 : i32
    return %c0_i32, %c0_i32_0 : i32, i32
  }
  func.func @transform_12(%arg0: i32) -> (i32, i32, i32) {
    %c0_i32 = arith.constant 0 : i32
    %c0_i32_0 = arith.constant 0 : i32
    %c0_i32_1 = arith.constant 0 : i32
    return %arg0, %c0_i32, %c0_i32_0 : i32, i32, i32
  }
}

</mosaic_0001>

<bundles_post_ra>
// kernel: tpu_custom_call.1
= control target key start
LH: loop header
LB: loop body
LE: loop exit
PB: predicated region body
PF: predicated region fallthrough
CT: control target
= control target key end

     0   :  { %s18260_s0 = inlined_call_operand.vmem [shape: f32[2,324,1], index: 0, kind: input, shape index: {}]   ;;  %s18261_s1 = inlined_call_operand.vmem [shape: bf16[9,1,8], index: 1, kind: input, shape index: {}]   ;;  %s18262_s2 = inlined_call_operand.vmem [shape: bf16[9,8,8], index: 2, kind: input, shape index: {}]   ;;  %s18263_s3 = inlined_call_operand.vmem [shape: bf16[9,8,16], index: 3, kind: input, shape index: {}]   ;;  %s18264_s4 = inlined_call_operand.vmem [shape: f32[1,8], index: 4, kind: input, shape index: {}]   ;;  %s18265_s5 = inlined_call_operand.vmem [shape: f32[1,8], index: 5, kind: input, shape index: {}]   ;;  %s18266_s6 = inlined_call_operand.vmem [shape: f32[1,16], index: 6, kind: input, shape index: {}]   ;;  %s18267_s7 = inlined_call_operand.vmem [shape: bf16[4,100,324], index: 7, kind: input, shape index: {}]   ;;  %s18268_s8 = inlined_call_operand.vmem [shape: f32[324,1], index: 8, kind: input, shape index: {}]   ;;  %s18269_s9 = inlined_call_operand.vmem [shape: f32[100,1], index: 9, kind: input, shape index: {}]   ;;  %s18270_s10 = inlined_call_operand.vmem [shape: bf16[16,128], index: 10, kind: input, shape index: {}]   ;;  %s18271_s11 = inlined_call_operand.vmem [shape: f32[1,128], index: 11, kind: input, shape index: {}]   ;;  %s18272_s12 = inlined_call_operand.hbm [shape: f32[2,1,128], index: 12, kind: output, shape index: {}]  }
   0x1   :  { %18280 = sst [smem:[#allocation30_spill]] %s18260_s0 }
   0x2   :  { %17 = vsyncpa [#allocation5], 0 }
   0x3   :  { %19 = vsyncpa [#allocation5 + $0x1], 0  ;;  %s13236_s21 = smov 0   ;;  %s13238_s22 = smov 0  }
   0x4   :  { %s13240_s23 = smov 0   ;;  %s13242_s24 = smov 0  }
   0x5 LB: > { %s13257_s25 = sadd.s32 4294967295, %s13165_s24   ;;  %s10713_s26 = sadd.s32 4294967294, %s13165_s24   ;;  %s13165_s24 = sphi %s13242_s24, %s18379_s24   ;;  %s13161_s23 = sphi %s13240_s23, %s18378_s23   ;;  %s13157_s22 = sphi %s13238_s22, %s18377_s22   ;;  %s13153_s21 = sphi %s13236_s21, %s18376_s21  }
   0x6   : > { %s13261_s27 = sadd.s32 1, %s13165_s24   ;;  %s289_s28 = sadd.s32 1, %s13161_s23 }
   0x7   : > { %s286_s29 = ssub.s32 %s13165_s24, %s13261_s27  ;;  %p299_p0 = scmp.ne.s32.totalorder %s13161_s23, %s13157_s22 }
   0x8   : > { %p287_p1 = scmp.eq.s32.totalorder %s286_s29, 0  ;;  %p300_p2 = scmp.eq.s32.totalorder %s13257_s25, 1 }
   0x9   : > { %p305_p3 = scmp.ne.s32.totalorder %s13157_s22, %s13153_s21  ;;  %p306_p4 = scmp.eq.s32.totalorder %s10713_s26, 1 }
   0xa   : > { %s13272_s30 = scalar_select %p287_p1, %s13161_s23, %s289_s28  }
   0xb   : > { %p13274_p5 = por %p300_p2, %p299_p0  ;;  %p13278_p6 = por %p306_p4, %p305_p3 }
   0xc   : > { %p10716_p7 = scmp.ge.s32.totalorder %s13165_s24, 1  ;;  %p365_p8 = scmp.lt.s32.totalorder %s13165_s24, 3 }
   0xe   : > { %p366_p9 = pnand %p10716_p7, %p365_p8 }
  0x10   : > { %369 = sbr.rel (%p366_p9) target bundleno = 3062 (0xbf6), region = 68 }
  0x17   : > { %vm412_vm0 = vcmask 130048   ;;  %p406_p10 = scmp.lt.s32.totalorder %s13257_s25, 1  ;;  %v13167_v0 = vmov 0   ;;  %v18273_v1 = vmov 0.0   ;;  %vm549_vm1 = vcmask 7168   ;;  %s18283_s0 = sld [smem:[#allocation30_spill]] }
  0x18   : > { %12990 = vset.pattern.permute.xlu1 %v13167_v0  ;;  %12989 = vset.pattern.permute.xlu0 %v13167_v0  ;;  %413 = vst.msk [vmem:[#allocation2] sm:$0xff] %vm412_vm0, %v18273_v1  ;;  %414 = vst.msk [vmem:[#allocation2 + $0x8] sm:$0xff] %vm412_vm0, %v18273_v1  ;;  %v3696_v55 = vld [vmem:[%s18268_s8 + $0x8] sm:$0xff]  ;;  %v3695_v56 = vld [vmem:[%s18268_s8] sm:$0xff]  ;;  %vm4215_vm2 = vcmask 1043456   ;;  %vm13169_vm3 = vmmov 0  }
  0x19   : > { %415 = vst.msk [vmem:[#allocation2 + $0x10] sm:$0xff] %vm412_vm0, %v18273_v1  ;;  %416 = vst.msk [vmem:[#allocation2 + $0x18] sm:$0xff] %vm412_vm0, %v18273_v1  ;;  %s407_s15 = scalar_select %p406_p10, %s13257_s25, 1  ;;  %11744 = vmatprep.subr.bf16.mxu0 %v18273_v1  ;;  %11830 = vmatprep.subr.bf16.mxu1 %v18273_v1  ;;  %v10727_v57 = vld [vmem:[%s18262_s2 + $0x4] sm:$0xf]  ;;  %vm3982_vm4 = vcmask 64512  }
  0x1a   : > { %417 = vst.msk [vmem:[#allocation2 + $0x20] sm:$0xff] %vm412_vm0, %v18273_v1  ;;  %418 = vst.msk [vmem:[#allocation2 + $0x28] sm:$0xff] %vm412_vm0, %v18273_v1  ;;  %v4217_v60 = vsel %vm4215_vm2, %v10727_v57, 0  ;;  %v4066_v61 = vld [vmem:[%s18262_s2] sm:$0xf]  ;;  %11746 = vmatprep.mubr.msk.bf16.mxu0 %vm13169_vm3, %v18273_v1  ;;  %11832 = vmatprep.mubr.msk.bf16.mxu1 %vm13169_vm3, %v18273_v1  ;;  %vm590_vm5 = vcmask 3072  }
  0x1b   : > { %419 = vst.msk [vmem:[#allocation2 + $0x30] sm:$0xff] %vm412_vm0, %v18273_v1  ;;  %420 = vst.msk [vmem:[#allocation2 + $0x38] sm:$0xff] %vm412_vm0, %v18273_v1  ;;  %s12946_s16 = smul.u32 328, %s407_s15  ;;  %11745 = vmatpush3.bf16.msra.mxu0 %v4217_v60  ;;  %v4483_v62 = vsel %vm4215_vm2, %v4066_v61, 0  ;;  %v3700_v60 = vld [vmem:[%s18268_s8 + $0x28] sm:$0xff]  ;;  %v3699_v61 = vld [vmem:[%s18268_s8 + $0x20] sm:$0xff] }
  0x1c   : > { %421 = vst.msk [vmem:[#allocation2 + $0x40] sm:$0xff] %vm412_vm0, %v18273_v1  ;;  %422 = vst.msk [vmem:[#allocation2 + $0x48] sm:$0xff] %vm412_vm0, %v18273_v1  ;;  %11831 = vmatpush3.bf16.msra.mxu1 %v4483_v62  ;;  %11916 = vmatprep.subr.bf16.mxu0 %v18273_v1  ;;  %vm4023_vm6 = vcmask 60416   ;;  %vm7909_vm7 = vcmask 1041408   ;;  %vm7887_vm8 = vcmask 556032   ;;  %vm459_vm9 = vcmask 125952  }
  0x1d   : > { %423 = vst.msk [vmem:[#allocation2 + $0x50] sm:$0xff] %vm412_vm0, %v18273_v1  ;;  %424 = vst.msk [vmem:[#allocation2 + $0x58] sm:$0xff] %vm412_vm0, %v18273_v1  ;;  %s13477_s19 = scalar_lea.vmem %s18283_s0, %s12946_s16  ;;  %12002 = vmatprep.subr.bf16.mxu1 %v18273_v1  ;;  %s404_s17 = sand.u32 1, %s13157_s22  }
  0x1e   : > { %425 = vst.msk [vmem:[#allocation2 + $0x60] sm:$0xff] %vm412_vm0, %v18273_v1  ;;  %426 = vst.msk [vmem:[#allocation2 + $0x68] sm:$0xff] %vm412_vm0, %v18273_v1  ;;  %v508_v2 = vld [vmem:[%s13477_s19] sm:$0xff]  ;;  %v509_v3 = vld [vmem:[%s13477_s19 + $0x8] sm:$0xff]  ;;  %s11189_s26 = sshll.u32 %s13257_s25, 4  ;;  %s405_s28 = scalar_lea.vmem [#allocation4], %s404_s17 }
  0x1f   : > { %427 = vst.msk [vmem:[#allocation2 + $0x70] sm:$0xff] %vm412_vm0, %v18273_v1  ;;  %428 = vst.msk [vmem:[#allocation2 + $0x78] sm:$0xff] %vm412_vm0, %v18273_v1  ;;  %v510_v4 = vld [vmem:[%s13477_s19 + $0x10] sm:$0xff]  ;;  %v926_v5 = vld [vmem:[#allocation2 + $0x6] sm:$0xff]  ;;  %s10658_s29 = sshll.u32 %s405_s28, 4  ;;  %s18218_s16 = scalar_lea.hbm %s18272_s12, %s11189_s26  ;;  %s18220_s29 = int_to_ptr.vmem [resolvable:$true] %s10658_s29 }
  0x20   : > { %429 = vst.msk [vmem:[#allocation2 + $0x80] sm:$0xff] %vm412_vm0, %v18273_v1  ;;  %430 = vst.msk [vmem:[#allocation2 + $0x88] sm:$0xff] %vm412_vm0, %v18273_v1  ;;  %v592_v6 = vld [vmem:[#allocation2 + $0x5] sm:$0xff]  ;;  %972 = vperm.xlu1 %12990, %v926_v5   ;;  %v927_v7 = vld [vmem:[#allocation2 + $0xe] sm:$0xff]  ;;  %s10646_s18 = scalar_lea.sflag [#allocation5], %s404_s17  ;;  %s13103_s25 = scalar_lea.vmem %s18220_s29, 16 }
  0x21   : > { %431 = vst.msk [vmem:[#allocation2 + $0x90] sm:$0xff] %vm412_vm0, %v18273_v1  ;;  %432 = vst.msk [vmem:[#allocation2 + $0x98] sm:$0xff] %vm412_vm0, %v18273_v1  ;;  %637 = vperm.xlu0 %12989, %v592_v6   ;;  %v593_v8 = vld [vmem:[#allocation2 + $0xd] sm:$0xff]  ;;  %v511_v9 = vld [vmem:[%s13477_s19 + $0x18] sm:$0xff]  ;;  %p13104_p11 = scmp.ne.s32.totalorder %s18220_s29, %s13103_s25  ;;  %s13170_s20 = smov [#allocation4]  }
  0x22   : > { %433 = vst.msk [vmem:[#allocation2 + $0xa0] sm:$0xff] %vm412_vm0, %v18273_v1  ;;  %434 = vst.msk [vmem:[#allocation2 + $0xa8] sm:$0xff] %vm412_vm0, %v18273_v1  ;;  %v512_v10 = vld [vmem:[%s13477_s19 + $0x20] sm:$0xff]  ;;  %v513_v11 = vld [vmem:[%s13477_s19 + $0x28] sm:$0xff]  ;;  %s13107_s0 = sshll.u32 %s13170_s20, 4  ;;  %s13108_s0 = int_to_ptr.vmem [resolvable:$false] %s13107_s0 }
  0x23   : > { %435 = vst.msk [vmem:[#allocation2 + $0xb0] sm:$0xff] %vm412_vm0, %v18273_v1  ;;  %436 = vst.msk [vmem:[#allocation2 + $0xb8] sm:$0xff] %vm412_vm0, %v18273_v1  ;;  %v514_v12 = vld [vmem:[%s13477_s19 + $0x30] sm:$0xff]  ;;  %v515_v13 = vld [vmem:[%s13477_s19 + $0x38] sm:$0xff]  ;;  %p13105_p12 = pnand %p13104_p11, %p13274_p5  ;;  %p13110_p0 = scmp.lt.s32.totalorder %s18220_s29, %s13108_s0 }
  0x24   : > { %437 = vst.msk [vmem:[#allocation2 + $0xc0] sm:$0xff] %vm412_vm0, %v18273_v1  ;;  %438 = vst.msk [vmem:[#allocation2 + $0xc8] sm:$0xff] %vm412_vm0, %v18273_v1  ;;  %v516_v14 = vld [vmem:[%s13477_s19 + $0x40] sm:$0xff]  ;;  %v1262_v15 = vld [vmem:[#allocation2 + $0xf] sm:$0xff]  ;;  %977 = vperm.xlu1 %12990, %v927_v7  }
  0x25   : > { %439 = vst.msk [vmem:[#allocation2 + $0xd0] sm:$0xff] %vm412_vm0, %v18273_v1  ;;  %440 = vst.msk [vmem:[#allocation2 + $0xd8] sm:$0xff] %vm412_vm0, %v18273_v1  ;;  %v1261_v16 = vld [vmem:[#allocation2 + $0x7] sm:$0xff]  ;;  %642 = vperm.xlu0 %12989, %v593_v8   ;;  %v518_v28 = vld [vmem:[%s13477_s19 + $0x50] sm:$0xff]  ;;  %p13106_p13 = pneg %p13105_p12 }
  0x26   : > { %441 = vst.msk [vmem:[#allocation2 + $0xe0] sm:$0xff] %vm412_vm0, %v18273_v1  ;;  %442 = vst.msk [vmem:[#allocation2 + $0xe8] sm:$0xff] %vm412_vm0, %v18273_v1  ;;  %v517_v27 = vld [vmem:[%s13477_s19 + $0x48] sm:$0xff]  ;;  %v519_v43 = vld [vmem:[%s13477_s19 + $0x58] sm:$0xff] }
  0x27   : > { %443 = vst.msk [vmem:[#allocation2 + $0xf0] sm:$0xff] %vm412_vm0, %v18273_v1  ;;  %444 = vst.msk [vmem:[#allocation2 + $0xf8] sm:$0xff] %vm412_vm0, %v18273_v1  ;;  %v520_v44 = vld [vmem:[%s13477_s19 + $0x60] sm:$0xff]  ;;  %v521_v6 = vld [vmem:[%s13477_s19 + $0x68] sm:$0xff] }
  0x28   : > { %445 = vst.msk [vmem:[#allocation2 + $0x100] sm:$0xff] %vm412_vm0, %v18273_v1  ;;  %446 = vst.msk [vmem:[#allocation2 + $0x108] sm:$0xff] %vm412_vm0, %v18273_v1  ;;  %1312 = vperm.xlu1 %12990, %v1262_v15   ;;  %v522_v7 = vld [vmem:[%s13477_s19 + $0x70] sm:$0xff] }
  0x29   : > { %447 = vst.msk [vmem:[#allocation2 + $0x110] sm:$0xff] %vm412_vm0, %v18273_v1  ;;  %448 = vst.msk [vmem:[#allocation2 + $0x118] sm:$0xff] %vm412_vm0, %v18273_v1  ;;  %1307 = vperm.xlu0 %12989, %v1261_v16  }
  0x2a   : > { %449 = vst.msk [vmem:[#allocation2 + $0x120] sm:$0xff] %vm412_vm0, %v18273_v1  ;;  %450 = vst.msk [vmem:[#allocation2 + $0x128] sm:$0xff] %vm412_vm0, %v18273_v1 }
  0x2b   : > { %451 = vst.msk [vmem:[#allocation2 + $0x130] sm:$0xff] %vm412_vm0, %v18273_v1  ;;  %452 = vst.msk [vmem:[#allocation2 + $0x138] sm:$0xff] %vm412_vm0, %v18273_v1 }
  0x2c   : > { %453 = vst.msk [vmem:[#allocation2 + $0x140] sm:$0xff] %vm412_vm0, %v18273_v1  ;;  %454 = vst.msk [vmem:[#allocation2 + $0x148] sm:$0xff] %vm412_vm0, %v18273_v1 }
  0x2d   : > { %455 = vst.msk [vmem:[#allocation2 + $0x150] sm:$0xff] %vm412_vm0, %v18273_v1  ;;  %456 = vst.msk [vmem:[#allocation2 + $0x158] sm:$0xff] %vm412_vm0, %v18273_v1 }
  0x2e   : > { %457 = vst.msk [vmem:[#allocation2 + $0x160] sm:$0xff] %vm412_vm0, %v18273_v1  ;;  %458 = vst.msk [vmem:[#allocation2 + $0x168] sm:$0xff] %vm412_vm0, %v18273_v1 }
  0x2f   : > { %461 = vst.msk [vmem:[#allocation3] sm:$0xff] %vm412_vm0, %v18273_v1  ;;  %462 = vst.msk [vmem:[#allocation3 + $0x8] sm:$0xff] %vm412_vm0, %v18273_v1 }
  0x30   : > { %463 = vst.msk [vmem:[#allocation3 + $0x10] sm:$0xff] %vm412_vm0, %v18273_v1  ;;  %464 = vst.msk [vmem:[#allocation3 + $0x18] sm:$0xff] %vm412_vm0, %v18273_v1 }
  0x31   : > { %465 = vst.msk [vmem:[#allocation3 + $0x20] sm:$0xff] %vm412_vm0, %v18273_v1  ;;  %466 = vst.msk [vmem:[#allocation3 + $0x28] sm:$0xff] %vm412_vm0, %v18273_v1 }
  0x32   : > { %467 = vst.msk [vmem:[#allocation3 + $0x30] sm:$0xff] %vm412_vm0, %v18273_v1  ;;  %468 = vst.msk [vmem:[#allocation3 + $0x38] sm:$0xff] %vm412_vm0, %v18273_v1 }
  0x33   : > { %469 = vst.msk [vmem:[#allocation3 + $0x40] sm:$0xff] %vm412_vm0, %v18273_v1  ;;  %470 = vst.msk [vmem:[#allocation3 + $0x48] sm:$0xff] %vm412_vm0, %v18273_v1 }
  0x34   : > { %471 = vst.msk [vmem:[#allocation3 + $0x50] sm:$0xff] %vm412_vm0, %v18273_v1  ;;  %472 = vst.msk [vmem:[#allocation3 + $0x58] sm:$0xff] %vm412_vm0, %v18273_v1 }
  0x35   : > { %473 = vst.msk [vmem:[#allocation3 + $0x60] sm:$0xff] %vm412_vm0, %v18273_v1  ;;  %474 = vst.msk [vmem:[#allocation3 + $0x68] sm:$0xff] %vm412_vm0, %v18273_v1 }
  0x36   : > { %475 = vst.msk [vmem:[#allocation3 + $0x70] sm:$0xff] %vm412_vm0, %v18273_v1  ;;  %476 = vst.msk [vmem:[#allocation3 + $0x78] sm:$0xff] %vm412_vm0, %v18273_v1  ;;  %v4088_v63 = vld [vmem:[#allocation3 + $0x6] sm:$0xff] }
  0x37   : > { %477 = vst.msk [vmem:[#allocation3 + $0x80] sm:$0xff] %vm412_vm0, %v18273_v1  ;;  %478 = vst.msk [vmem:[#allocation3 + $0x88] sm:$0xff] %vm412_vm0, %v18273_v1  ;;  %v4089_v0 = vld [vmem:[#allocation3 + $0xe] sm:$0xff] }
  0x38   : > { %479 = vst.msk [vmem:[#allocation3 + $0x90] sm:$0xff] %vm412_vm0, %v18273_v1  ;;  %480 = vst.msk [vmem:[#allocation3 + $0x98] sm:$0xff] %vm412_vm0, %v18273_v1 }
  0x39   : > { %481 = vst.msk [vmem:[#allocation3 + $0xa0] sm:$0xff] %vm412_vm0, %v18273_v1  ;;  %482 = vst.msk [vmem:[#allocation3 + $0xa8] sm:$0xff] %vm412_vm0, %v18273_v1 }
  0x3a   : > { %483 = vst.msk [vmem:[#allocation3 + $0xb0] sm:$0xff] %vm412_vm0, %v18273_v1  ;;  %484 = vst.msk [vmem:[#allocation3 + $0xb8] sm:$0xff] %vm412_vm0, %v18273_v1 }
  0x3b   : > { %485 = vst.msk [vmem:[#allocation3 + $0xc0] sm:$0xff] %vm412_vm0, %v18273_v1  ;;  %486 = vst.msk [vmem:[#allocation3 + $0xc8] sm:$0xff] %vm412_vm0, %v18273_v1 }
  0x3c   : > { %487 = vst.msk [vmem:[#allocation3 + $0xd0] sm:$0xff] %vm412_vm0, %v18273_v1  ;;  %488 = vst.msk [vmem:[#allocation3 + $0xd8] sm:$0xff] %vm412_vm0, %v18273_v1 }
  0x3d   : > { %489 = vst.msk [vmem:[#allocation3 + $0xe0] sm:$0xff] %vm412_vm0, %v18273_v1  ;;  %490 = vst.msk [vmem:[#allocation3 + $0xe8] sm:$0xff] %vm412_vm0, %v18273_v1 }
  0x3e   : > { %491 = vst.msk [vmem:[#allocation3 + $0xf0] sm:$0xff] %vm412_vm0, %v18273_v1  ;;  %492 = vst.msk [vmem:[#allocation3 + $0xf8] sm:$0xff] %vm412_vm0, %v18273_v1 }
  0x3f   : > { %493 = vst.msk [vmem:[#allocation3 + $0x100] sm:$0xff] %vm412_vm0, %v18273_v1  ;;  %494 = vst.msk [vmem:[#allocation3 + $0x108] sm:$0xff] %vm412_vm0, %v18273_v1 }
  0x40   : > { %495 = vst.msk [vmem:[#allocation3 + $0x110] sm:$0xff] %vm412_vm0, %v18273_v1  ;;  %496 = vst.msk [vmem:[#allocation3 + $0x118] sm:$0xff] %vm412_vm0, %v18273_v1 }
  0x41   : > { %497 = vst.msk [vmem:[#allocation3 + $0x120] sm:$0xff] %vm412_vm0, %v18273_v1  ;;  %498 = vst.msk [vmem:[#allocation3 + $0x128] sm:$0xff] %vm412_vm0, %v18273_v1 }
  0x42   : > { %499 = vst.msk [vmem:[#allocation3 + $0x130] sm:$0xff] %vm412_vm0, %v18273_v1  ;;  %500 = vst.msk [vmem:[#allocation3 + $0x138] sm:$0xff] %vm412_vm0, %v18273_v1 }
  0x43   : > { %501 = vst.msk [vmem:[#allocation3 + $0x140] sm:$0xff] %vm412_vm0, %v18273_v1  ;;  %502 = vst.msk [vmem:[#allocation3 + $0x148] sm:$0xff] %vm412_vm0, %v18273_v1 }
  0x44   : > { %503 = vst.msk [vmem:[#allocation3 + $0x150] sm:$0xff] %vm412_vm0, %v18273_v1  ;;  %504 = vst.msk [vmem:[#allocation3 + $0x158] sm:$0xff] %vm412_vm0, %v18273_v1 }
  0x45   : > { %505 = vst.msk [vmem:[#allocation3 + $0x160] sm:$0xff] %vm412_vm0, %v18273_v1  ;;  %506 = vst.msk [vmem:[#allocation3 + $0x168] sm:$0xff] %vm412_vm0, %v18273_v1 }
  0x46   : > { %550 = vst.msk [vmem:[#allocation2 + $0x18] sm:$0xff] %vm549_vm1, %v508_v2  ;;  %551 = vst.msk [vmem:[#allocation2 + $0x20] sm:$0xff] %vm549_vm1, %v509_v3  ;;  %v4025_v2 = vld [vmem:[#allocation3 + $0x5] sm:$0xff]  ;;  %v4131_v3 = vpack.c.bf16 %v4089_v0, %v4088_v63 }
  0x47   : > { %552 = vst.msk [vmem:[#allocation2 + $0x28] sm:$0xff] %vm549_vm1, %v510_v4  ;;  %553 = vst.msk [vmem:[#allocation2 + $0x30] sm:$0xff] %vm549_vm1, %v511_v9  ;;  %v4026_v4 = vld [vmem:[#allocation3 + $0xd] sm:$0xff] }
  0x48   : > { %554 = vst.msk [vmem:[#allocation2 + $0x38] sm:$0xff] %vm549_vm1, %v512_v10  ;;  %555 = vst.msk [vmem:[#allocation2 + $0x40] sm:$0xff] %vm549_vm1, %v513_v11  ;;  %v4067_v5 = vpack.c.bf16 %v4026_v4, %v4025_v2  ;;  %11747 = vmatmul.mubr.msk.bf16.vlgmr.msra.gmra.mrb[0].mxu0 %vm3982_vm4, %v4131_v3 }
  0x49   : > { %556 = vst.msk [vmem:[#allocation2 + $0x48] sm:$0xff] %vm549_vm1, %v514_v12  ;;  %557 = vst.msk [vmem:[#allocation2 + $0x50] sm:$0xff] %vm549_vm1, %v515_v13  ;;  %11750 = vmatprep.mubr.msk.bf16.mxu0 %vm13169_vm3, %v18273_v1 }
  0x4a   : > { %558 = vst.msk [vmem:[#allocation2 + $0x58] sm:$0xff] %vm549_vm1, %v516_v14  ;;  %559 = vst.msk [vmem:[#allocation2 + $0x60] sm:$0xff] %vm549_vm1, %v517_v27  ;;  %11833 = vmatmul.mubr.msk.bf16.vlgmr.msra.gmra.mrb[0].mxu1 %vm3982_vm4, %v4067_v5  ;;  %v840_v5 = vlaneseq }
  0x4b   : > { %560 = vst.msk [vmem:[#allocation2 + $0x68] sm:$0xff] %vm549_vm1, %v518_v28  ;;  %561 = vst.msk [vmem:[#allocation2 + $0x70] sm:$0xff] %vm549_vm1, %v519_v43  ;;  %11836 = vmatprep.mubr.msk.bf16.mxu1 %vm13169_vm3, %v18273_v1 }
  0x4c   : > { %562 = vst.msk [vmem:[#allocation2 + $0x78] sm:$0xff] %vm549_vm1, %v520_v44  ;;  %563 = vst.msk [vmem:[#allocation2 + $0x80] sm:$0xff] %vm549_vm1, %v521_v6  ;;  %v525_v6 = vld [vmem:[%s13477_s19 + $0x88] sm:$0xff] }
  0x4d   : > { %v1597_v17 = vld [vmem:[#allocation2 + $0x1f] sm:$0xff]  ;;  %v1596_v18 = vld [vmem:[#allocation2 + $0x17] sm:$0xff]  ;;  %564 = vst.msk [vmem:[#allocation2 + $0x88] sm:$0xff] %vm549_vm1, %v522_v7  ;;  %567 = vst.msk [vmem:[#allocation2 + $0xa0] sm:$0xff] %vm549_vm1, %v525_v6 }
  0x4e   : > { %1647 = vperm.xlu1 %12990, %v1597_v17   ;;  %1642 = vperm.xlu0 %12989, %v1596_v18   ;;  %v1932_v19 = vld [vmem:[#allocation2 + $0x20] sm:$0xff]  ;;  %v1931_v20 = vld [vmem:[#allocation2 + $0x18] sm:$0xff]  ;;  %v2601_v30 = vld [vmem:[#allocation2 + $0x29] sm:$0xff] }
  0x4f   : > { %v595_v21 = vld [vmem:[#allocation2 + $0x1d] sm:$0xff]  ;;  %v594_v22 = vld [vmem:[#allocation2 + $0x15] sm:$0xff]  ;;  %v1598_v32 = vld [vmem:[#allocation2 + $0x27] sm:$0xff] }
  0x50   : > { %v929_v23 = vld [vmem:[#allocation2 + $0x1e] sm:$0xff]  ;;  %v928_v24 = vld [vmem:[#allocation2 + $0x16] sm:$0xff]  ;;  %v2936_v34 = vld [vmem:[#allocation2 + $0x2a] sm:$0xff] }
  0x51   : > { %v2267_v25 = vld [vmem:[#allocation2 + $0x21] sm:$0xff]  ;;  %v2266_v26 = vld [vmem:[#allocation2 + $0x19] sm:$0xff]  ;;  %v2602_v29 = vld [vmem:[#allocation2 + $0x31] sm:$0xff] }
  0x52   : > { %1982 = vperm.xlu1 %12990, %v1932_v19   ;;  %1977 = vperm.xlu0 %12989, %v1931_v20   ;;  %v1599_v31 = vld [vmem:[#allocation2 + $0x2f] sm:$0xff]  ;;  %v596_v40 = vld [vmem:[#allocation2 + $0x25] sm:$0xff]  ;;  %v2603_v46 = vld [vmem:[#allocation2 + $0x39] sm:$0xff] }
  0x53   : > { %v2937_v33 = vld [vmem:[#allocation2 + $0x32] sm:$0xff]  ;;  %v1933_v36 = vld [vmem:[#allocation2 + $0x28] sm:$0xff]  ;;  %v1601_v47 = vld [vmem:[#allocation2 + $0x3f] sm:$0xff] }
  0x54   : > { %v1934_v35 = vld [vmem:[#allocation2 + $0x30] sm:$0xff]  ;;  %v930_v42 = vld [vmem:[#allocation2 + $0x26] sm:$0xff]  ;;  %v2938_v50 = vld [vmem:[#allocation2 + $0x3a] sm:$0xff] }
  0x55   : > { %v3272_v37 = vld [vmem:[#allocation2 + $0x33] sm:$0xff]  ;;  %v3271_v38 = vld [vmem:[#allocation2 + $0x2b] sm:$0xff]  ;;  %v2604_v45 = vld [vmem:[#allocation2 + $0x41] sm:$0xff] }
  0x56   : > { %652 = vperm.xlu1 %12990, %v595_v21   ;;  %647 = vperm.xlu0 %12989, %v594_v22   ;;  %v597_v39 = vld [vmem:[#allocation2 + $0x2d] sm:$0xff]  ;;  %v1600_v48 = vld [vmem:[#allocation2 + $0x37] sm:$0xff]  ;;  %v2939_v49 = vld [vmem:[#allocation2 + $0x42] sm:$0xff] }
  0x57   : > { %v931_v41 = vld [vmem:[#allocation2 + $0x2e] sm:$0xff]  ;;  %v1936_v51 = vld [vmem:[#allocation2 + $0x40] sm:$0xff]  ;;  %v1935_v52 = vld [vmem:[#allocation2 + $0x38] sm:$0xff] }
  0x58   : > { %v3274_v53 = vld [vmem:[#allocation2 + $0x43] sm:$0xff]  ;;  %v3273_v54 = vld [vmem:[#allocation2 + $0x3b] sm:$0xff]  ;;  %v2606_v10 = vld [vmem:[#allocation2 + $0x51] sm:$0xff] }
  0x59   : > { %v599_v58 = vld [vmem:[#allocation2 + $0x3d] sm:$0xff]  ;;  %v598_v59 = vld [vmem:[#allocation2 + $0x35] sm:$0xff]  ;;  %v2605_v11 = vld [vmem:[#allocation2 + $0x49] sm:$0xff] }
  0x5a   : > { %987 = vperm.xlu1 %12990, %v929_v23   ;;  %982 = vperm.xlu0 %12989, %v928_v24   ;;  %v933_v8 = vld [vmem:[#allocation2 + $0x3e] sm:$0xff]  ;;  %v932_v9 = vld [vmem:[#allocation2 + $0x36] sm:$0xff]  ;;  %v1602_v13 = vld [vmem:[#allocation2 + $0x47] sm:$0xff] }
  0x5b   : > { %v1603_v12 = vld [vmem:[#allocation2 + $0x4f] sm:$0xff]  ;;  %v3698_v22 = vld [vmem:[%s18268_s8 + $0x18] sm:$0xff]  ;;  %v600_v27 = vld [vmem:[#allocation2 + $0x45] sm:$0xff] }
  0x5c   : > { %v2941_v14 = vld [vmem:[#allocation2 + $0x52] sm:$0xff]  ;;  %v2940_v15 = vld [vmem:[#allocation2 + $0x4a] sm:$0xff]  ;;  %v13573_v44 = vld [vmem:[#allocation2 + $0x5f] sm:$0xff] }
  0x5d   : > { %v1938_v16 = vld [vmem:[#allocation2 + $0x50] sm:$0xff]  ;;  %v3277_v57 = vld [vmem:[#allocation2 + $0x5b] sm:$0xff]  ;;  %v10724_v6 = vld [vmem:[%s18261_s1 + $0x7] sm:$0x1] }
  0x5e   : > { %2317 = vperm.xlu1 %12990, %v2267_v25   ;;  %2312 = vperm.xlu0 %12989, %v2266_v26   ;;  %v3275_v19 = vld [vmem:[#allocation2 + $0x4b] sm:$0xff]  ;;  %v603_v0 = vld [vmem:[#allocation2 + $0x5d] sm:$0xff]  ;;  %v602_v2 = vld [vmem:[#allocation2 + $0x55] sm:$0xff] }
  0x5f   : > { %v3697_v23 = vld [vmem:[%s18268_s8 + $0x10] sm:$0xff] }
  0x60   : > { %v601_v26 = vld [vmem:[#allocation2 + $0x4d] sm:$0xff] }
  0x61   : > { %v526_v7 = vld [vmem:[%s13477_s19 + $0x90] sm:$0xff] }
  0x62   : > { %1322 = vperm.xlu1 %12990, %v1597_v17   ;;  %1317 = vperm.xlu0 %12989, %v1596_v18   ;;  %v1937_v17 = vld [vmem:[#allocation2 + $0x48] sm:$0xff]  ;;  %v3276_v18 = vld [vmem:[#allocation2 + $0x53] sm:$0xff]  ;;  %568 = vst.msk [vmem:[#allocation2 + $0xa8] sm:$0xff] %vm549_vm1, %v526_v7 }
  0x63   : > { %v13688_v7 = vld [vmem:[#allocation2 + $0x6f] sm:$0xff] }
  0x66   : > { %2652 = vperm.xlu1 %12990, %v2602_v29   ;;  %2647 = vperm.xlu0 %12989, %v2601_v30  }
  0x6a   : > { %1657 = vperm.xlu1 %12990, %v1599_v31   ;;  %1652 = vperm.xlu0 %12989, %v1598_v32  }
  0x6e   : > { %2987 = vperm.xlu1 %12990, %v2937_v33   ;;  %2982 = vperm.xlu0 %12989, %v2936_v34   ;;  %v934_v33 = vld [vmem:[#allocation2 + $0x46] sm:$0xff] }
  0x72   : > { %1992 = vperm.xlu1 %12990, %v1934_v35   ;;  %1987 = vperm.xlu0 %12989, %v1933_v36  }
  0x76   : > { %3322 = vperm.xlu1 %12990, %v3272_v37   ;;  %3317 = vperm.xlu0 %12989, %v3271_v38  }
  0x7a   : > { %662 = vperm.xlu1 %12990, %v597_v39   ;;  %657 = vperm.xlu0 %12989, %v596_v40   ;;  %v2608_v40 = vld [vmem:[#allocation2 + $0x61] sm:$0xff] }
  0x7e   : > { %997 = vperm.xlu1 %12990, %v931_v41   ;;  %992 = vperm.xlu0 %12989, %v930_v42   ;;  %v2607_v41 = vld [vmem:[#allocation2 + $0x59] sm:$0xff] }
  0x82   : > { %2327 = vperm.xlu1 %12990, %v2602_v29   ;;  %2322 = vperm.xlu0 %12989, %v2601_v30   ;;  %v523_v30 = vld [vmem:[%s13477_s19 + $0x78] sm:$0xff] }
  0x83   : > { %565 = vst.msk [vmem:[#allocation2 + $0x90] sm:$0xff] %vm549_vm1, %v523_v30 }
  0x86   : > { %1332 = vperm.xlu1 %12990, %v1599_v31   ;;  %1327 = vperm.xlu0 %12989, %v1598_v32   ;;  %v524_v31 = vld [vmem:[%s13477_s19 + $0x80] sm:$0xff]  ;;  %v935_v32 = vld [vmem:[#allocation2 + $0x4e] sm:$0xff] }
  0x87   : > { %566 = vst.msk [vmem:[#allocation2 + $0x98] sm:$0xff] %vm549_vm1, %v524_v31 }
  0x8a   : > { %2662 = vperm.xlu1 %12990, %v2604_v45   ;;  %2657 = vperm.xlu0 %12989, %v2603_v46  }
  0x8e   : > { %1667 = vperm.xlu1 %12990, %v1601_v47   ;;  %1662 = vperm.xlu0 %12989, %v1600_v48  }
  0x92   : > { %2997 = vperm.xlu1 %12990, %v2939_v49   ;;  %2992 = vperm.xlu0 %12989, %v2938_v50   ;;  %v2942_v49 = vld [vmem:[#allocation2 + $0x5a] sm:$0xff] }
  0x96   : > { %2002 = vperm.xlu1 %12990, %v1936_v51   ;;  %1997 = vperm.xlu0 %12989, %v1935_v52   ;;  %v1940_v52 = vld [vmem:[#allocation2 + $0x60] sm:$0xff] }
  0x9a   : > { %3332 = vperm.xlu1 %12990, %v3274_v53   ;;  %3327 = vperm.xlu0 %12989, %v3273_v54   ;;  %v1939_v53 = vld [vmem:[#allocation2 + $0x58] sm:$0xff] }
  0x9e   : > { %3743 = vperm.xlu1 %12990, %v3696_v55   ;;  %3738 = vperm.xlu0 %12989, %v3695_v56   ;;  %v3278_v56 = vld [vmem:[#allocation2 + $0x63] sm:$0xff] }
  0x9f   : > { %v13535_v20 = vpop.permute.xlu1 %972 }
  0xa0   : > { %v13537_v21 = vpop.permute.xlu0 %637 }
  0xa2   : > { %672 = vperm.xlu1 %12990, %v599_v58   ;;  %667 = vperm.xlu0 %12989, %v598_v59  }
  0xa3   : > { %v13545_v24 = vpop.permute.xlu1 %977 }
  0xa4   : > { %v13547_v25 = vpop.permute.xlu0 %642 }
  0xa6   : > { %1007 = vperm.xlu1 %12990, %v933_v8   ;;  %1002 = vperm.xlu0 %12989, %v932_v9   ;;  %v937_v8 = vld [vmem:[#allocation2 + $0x5e] sm:$0xff]  ;;  %v936_v9 = vld [vmem:[#allocation2 + $0x56] sm:$0xff] }
  0xa7   : > { %v13549_v28 = vpop.permute.xlu1 %1312 }
  0xa8   : > { %v13551_v29 = vpop.permute.xlu0 %1307 }
  0xaa   : > { %2337 = vperm.xlu1 %12990, %v2604_v45   ;;  %2332 = vperm.xlu0 %12989, %v2603_v46   ;;  %v13575_v45 = vld [vmem:[#allocation2 + $0x57] sm:$0xff] }
  0xae   : > { %1342 = vperm.xlu1 %12990, %v1601_v47   ;;  %1337 = vperm.xlu0 %12989, %v1600_v48   ;;  %v2943_v48 = vld [vmem:[#allocation2 + $0x62] sm:$0xff] }
  0xb2   : > { %2672 = vperm.xlu1 %12990, %v2606_v10   ;;  %2667 = vperm.xlu0 %12989, %v2605_v11  }
  0xb6   : > { %1677 = vperm.xlu1 %12990, %v1603_v12   ;;  %1672 = vperm.xlu0 %12989, %v1602_v13  }
  0xba   : > { %3007 = vperm.xlu1 %12990, %v2941_v14   ;;  %3002 = vperm.xlu0 %12989, %v2940_v15   ;;  %v633_v14 = vld [vmem:[%s18261_s1] sm:$0x1]  ;;  %v10719_v15 = vld [vmem:[%s18261_s1 + $0x2] sm:$0x1] }
  0xbe   : > { %2012 = vperm.xlu1 %12990, %v1938_v16   ;;  %2007 = vperm.xlu0 %12989, %v1937_v17  }
  0xc2   : > { %3342 = vperm.xlu1 %12990, %v3276_v18   ;;  %3337 = vperm.xlu0 %12989, %v3275_v19  }
  0xc6   : > { %3753 = vperm.xlu1 %12990, %v3698_v22   ;;  %3748 = vperm.xlu0 %12989, %v3697_v23   ;;  %v634_v22 = vunpack.c.l.bf16 %v633_v14  ;;  %v10720_v23 = vld [vmem:[%s18261_s1 + $0x3] sm:$0x1] }
  0xc7   : > { %v1639_v30 = vunpack.c.l.bf16 %v10720_v23 }
  0xca   : > { %682 = vperm.xlu1 %12990, %v601_v26   ;;  %677 = vperm.xlu0 %12989, %v600_v27   ;;  %v1304_v26 = vunpack.c.l.bf16 %v10719_v15  ;;  %v10721_v27 = vld [vmem:[%s18261_s1 + $0x4] sm:$0x1] }
  0xcd   : > { %v13557_v34 = vpop.permute.xlu1 %1647  ;;  %v13559_v35 = vpop.permute.xlu0 %1642 }
  0xce   : > { %1017 = vperm.xlu1 %12990, %v935_v32   ;;  %1012 = vperm.xlu0 %12989, %v934_v33  }
  0xd1   : > { %v13561_v36 = vpop.permute.xlu1 %1982  ;;  %v13563_v37 = vpop.permute.xlu0 %1977 }
  0xd2   : > { %2347 = vperm.xlu1 %12990, %v2606_v10   ;;  %2342 = vperm.xlu0 %12989, %v2605_v11  }
  0xd5   : > { %v13565_v38 = vpop.permute.xlu1 %652  ;;  %v13567_v39 = vpop.permute.xlu0 %647 }
  0xd6   : > { %1352 = vperm.xlu1 %12990, %v1603_v12   ;;  %1347 = vperm.xlu0 %12989, %v1602_v13   ;;  %v841_v12 = vshrl.u32 %v840_v5, 7  ;;  %v10718_v13 = vld [vmem:[%s18261_s1 + $0x1] sm:$0x1] }
  0xd7   : > { %v969_v19 = vunpack.c.l.bf16 %v10718_v13  ;;  %v10725_v13 = vld [vmem:[%s18261_s1 + $0x8] sm:$0x1] }
  0xd8   : > { %v13630_v18 = vsub.s32 0, %v841_v12 }
  0xd9   : > { %v13569_v42 = vpop.permute.xlu1 %987  ;;  %v13571_v43 = vpop.permute.xlu0 %982 }
  0xda   : > { %2682 = vperm.xlu1 %12990, %v2608_v40   ;;  %2677 = vperm.xlu0 %12989, %v2607_v41   ;;  %v13643_v33 = vrot.slane %v969_v19, %v13630_v18 }
  0xdd   : > { %v13577_v46 = vpop.permute.xlu1 %2317  ;;  %v13579_v47 = vpop.permute.xlu0 %2312 }
  0xde   : > { %1687 = vperm.xlu1 %12990, %v13573_v44   ;;  %1682 = vperm.xlu0 %12989, %v13575_v45  }
  0xe1   : > { %v13583_v50 = vpop.permute.xlu1 %1322  ;;  %v13585_v51 = vpop.permute.xlu0 %1317 }
  0xe2   : > { %3017 = vperm.xlu1 %12990, %v2943_v48   ;;  %3012 = vperm.xlu0 %12989, %v2942_v49   ;;  %v13646_v48 = vrot.slane %v634_v22, %v13630_v18  ;;  %v1974_v49 = vunpack.c.l.bf16 %v10721_v27  ;;  %v2979_v22 = vunpack.c.l.bf16 %v10724_v6  ;;  %v2944_v27 = vld [vmem:[#allocation2 + $0x6a] sm:$0xff] }
  0xe3   : > { %v1941_v6 = vld [vmem:[#allocation2 + $0x68] sm:$0xff] }
  0xe4   : > { %v13683_v5 = vrot.slane %v1974_v49, %v13630_v18 }
  0xe5   : > { %v13587_v54 = vpop.permute.xlu1 %2652  ;;  %v13589_v55 = vpop.permute.xlu0 %2647 }
  0xe6   : > { %2022 = vperm.xlu1 %12990, %v1940_v52   ;;  %2017 = vperm.xlu0 %12989, %v1939_v53   ;;  %v13656_v52 = vld [vmem:[#allocation2 + $0x71] sm:$0xff]  ;;  %v13658_v53 = vld [vmem:[#allocation2 + $0x69] sm:$0xff]  ;;  %v2185_v23 = vmul.f32 %v13683_v5, %v13561_v36 }
  0xe9   : > { %v13591_v58 = vpop.permute.xlu1 %1657  ;;  %v13593_v59 = vpop.permute.xlu0 %1652 }
  0xea   : > { %3352 = vperm.xlu1 %12990, %v3278_v56   ;;  %3347 = vperm.xlu0 %12989, %v3277_v57   ;;  %v1180_v56 = vmul.f32 %v13643_v33, %v13545_v24  ;;  %v845_v57 = vmul.f32 %v13646_v48, %v13547_v25  ;;  %v844_v24 = vmul.f32 %v13646_v48, %v13537_v21 }
  0xed   : > { %v13601_v62 = vpop.permute.xlu1 %2987  ;;  %v13603_v63 = vpop.permute.xlu0 %2982 }
  0xee   : > { %3763 = vperm.xlu1 %12990, %v3700_v60   ;;  %3758 = vperm.xlu0 %12989, %v3699_v61   ;;  %v13665_v60 = vrot.slane %v1639_v30, %v13630_v18 }
  0xf0   : > { %v1850_v12 = vmul.f32 %v13665_v60, %v13557_v34 }
  0xf1   : > { %v13605_v3 = vpop.permute.xlu1 %1992  ;;  %v13607_v4 = vpop.permute.xlu0 %1987 }
  0xf2   : > { %692 = vperm.xlu1 %12990, %v603_v0   ;;  %687 = vperm.xlu0 %12989, %v602_v2   ;;  %v1179_v2 = vmul.f32 %v13643_v33, %v13535_v20  ;;  %v13690_v20 = vld [vmem:[#allocation2 + $0x67] sm:$0xff] }
  0xf4   : > { %v1220_v19 = vadd.f32 %v1179_v2, %v844_v24  ;;  %v13726_v24 = vrot.slane %v2979_v22, %v13630_v18 }
  0xf5   : > { %v13613_v10 = vpop.permute.xlu1 %3322  ;;  %v13615_v11 = vpop.permute.xlu0 %3317 }
  0xf6   : > { %1027 = vperm.xlu1 %12990, %v937_v8   ;;  %1022 = vperm.xlu0 %12989, %v936_v9   ;;  %v1221_v9 = vadd.f32 %v1180_v56, %v845_v57  ;;  %v3314_v56 = vunpack.c.l.bf16 %v10725_v13  ;;  %v3189_v22 = vmul.f32 %v13726_v24, %v13603_v63  ;;  %v3702_v63 = vld [vmem:[%s18268_s8 + $0x38] sm:$0xff] }
  0xf9   : > { %v13626_v16 = vpop.permute.xlu1 %662  ;;  %v13628_v17 = vpop.permute.xlu0 %657 }
  0xfa   : > { %2357 = vperm.xlu1 %12990, %v2608_v40   ;;  %2352 = vperm.xlu0 %12989, %v2607_v41   ;;  %v10722_v40 = vld [vmem:[%s18261_s1 + $0x5] sm:$0x1]  ;;  %v13654_v41 = vrot.slane %v1304_v26, %v13630_v18  ;;  %v2945_v26 = vld [vmem:[#allocation2 + $0x72] sm:$0xff] }
  0xfc   : > { %v1515_v25 = vmul.f32 %v13654_v41, %v13549_v28  ;;  %v1514_v21 = vmul.f32 %v13654_v41, %v13551_v29  ;;  %v1849_v29 = vmul.f32 %v13665_v60, %v13559_v35 }
  0xfd   : > { %v13638_v31 = vpop.permute.xlu1 %997  ;;  %v13640_v32 = vpop.permute.xlu0 %992 }
  0xfe   : > { %1362 = vperm.xlu1 %12990, %v13573_v44   ;;  %1357 = vperm.xlu0 %12989, %v13575_v45   ;;  %v2309_v44 = vunpack.c.l.bf16 %v10722_v40  ;;  %v10723_v45 = vld [vmem:[%s18261_s1 + $0x6] sm:$0x1]  ;;  %v1556_v34 = vadd.f32 %v1515_v25, %v1221_v9  ;;  %v1555_v30 = vadd.f32 %v1514_v21, %v1220_v19  ;;  %v2184_v40 = vmul.f32 %v13683_v5, %v13563_v37  ;;  %v1942_v25 = vld [vmem:[#allocation2 + $0x70] sm:$0xff] }
  0xff   : > { %v2644_v8 = vunpack.c.l.bf16 %v10723_v45  ;;  %v13733_v9 = vrot.slane %v3314_v56, %v13630_v18  ;;  %v3701_v56 = vld [vmem:[%s18268_s8 + $0x30] sm:$0xff] }
 0x100   : > { %v13697_v28 = vrot.slane %v2309_v44, %v13630_v18  ;;  %v1891_v35 = vadd.f32 %v1850_v12, %v1556_v34  ;;  %v1890_v2 = vadd.f32 %v1849_v29, %v1555_v30  ;;  %v3190_v29 = vmul.f32 %v13726_v24, %v13601_v62  ;;  %v3279_v34 = vld [vmem:[#allocation2 + $0x6b] sm:$0xff] }
 0x101   : > { %v13670_v61 = vpop.permute.xlu1 %2327  ;;  %v13672_v0 = vpop.permute.xlu0 %2322  ;;  %v13715_v49 = vrot.slane %v2644_v8, %v13630_v18  ;;  %v3525_v18 = vmul.f32 %v13733_v9, %v13613_v10 }
 0x102   : > { %2692 = vperm.xlu1 %12990, %v13656_v52   ;;  %2687 = vperm.xlu0 %12989, %v13658_v53   ;;  %v2520_v57 = vmul.f32 %v13697_v28, %v13577_v46  ;;  %v2519_v36 = vmul.f32 %v13697_v28, %v13579_v47  ;;  %v2226_v37 = vadd.f32 %v2185_v23, %v1891_v35 }
 0x103   : > { %v2225_v21 = vadd.f32 %v2184_v40, %v1890_v2  ;;  %v2855_v46 = vmul.f32 %v13715_v49, %v13587_v54  ;;  %v2854_v8 = vmul.f32 %v13715_v49, %v13589_v55  ;;  %v3280_v54 = vld [vmem:[#allocation2 + $0x73] sm:$0xff]  ;;  %v13764_v2 = vld [vmem:[%s18264_s4] ss:$0 sm:$0xff] }
 0x104   : > { %v2561_v12 = vadd.f32 %v2520_v57, %v2226_v37  ;;  %v604_v37 = vld [vmem:[#allocation2 + $0x65] sm:$0xff] }
 0x105   : > { %v13702_v14 = vpop.permute.xlu1 %1332  ;;  %v13704_v15 = vpop.permute.xlu0 %1327  ;;  %v2560_v19 = vadd.f32 %v2519_v36, %v2225_v21  ;;  %v605_v36 = vld [vmem:[#allocation2 + $0x6d] sm:$0xff] }
 0x106   : > { %1697 = vperm.xlu1 %12990, %v13688_v7   ;;  %1692 = vperm.xlu0 %12989, %v13690_v20   ;;  %v2896_v55 = vadd.f32 %v2855_v46, %v2561_v12  ;;  %v528_v12 = vld [vmem:[%s13477_s19 + $0xa0] sm:$0xff] }
 0x107   : > { %v2895_v23 = vadd.f32 %v2854_v8, %v2560_v19  ;;  %v527_v8 = vld [vmem:[%s13477_s19 + $0x98] sm:$0xff]  ;;  %v939_v19 = vld [vmem:[#allocation2 + $0x6e] sm:$0xff]  ;;  %570 = vst.msk [vmem:[#allocation2 + $0xb8] sm:$0xff] %vm549_vm1, %v528_v12 }
 0x108   : > { %v3231_v62 = vadd.f32 %v3190_v29, %v2896_v55  ;;  %v938_v29 = vld [vmem:[#allocation2 + $0x66] sm:$0xff]  ;;  %569 = vst.msk [vmem:[#allocation2 + $0xb0] sm:$0xff] %vm549_vm1, %v527_v8 }
 0x109   : > { %v13719_v44 = vpop.permute.xlu1 %2662  ;;  %v13721_v45 = vpop.permute.xlu0 %2657  ;;  %v3230_v40 = vadd.f32 %v3189_v22, %v2895_v23 }
 0x10a   : > { %3027 = vperm.xlu1 %12990, %v2945_v26   ;;  %3022 = vperm.xlu0 %12989, %v2944_v27   ;;  %v3524_v26 = vmul.f32 %v13733_v9, %v13615_v11  ;;  %v3566_v10 = vadd.f32 %v3525_v18, %v3231_v62 }
 0x10c   : > { %v3565_v11 = vadd.f32 %v3524_v26, %v3230_v40 }
 0x10d   : > { %v13735_v47 = vpop.permute.xlu1 %1667  ;;  %v13737_v13 = vpop.permute.xlu0 %1662 }
 0x10e   : > { %2032 = vperm.xlu1 %12990, %v1942_v25   ;;  %2027 = vperm.xlu0 %12989, %v1941_v6   ;;  %v3614_v25 = vadd.f32 %v13764_v2, %v3566_v10  ;;  %v3613_v6 = vadd.f32 %v13764_v2, %v3565_v11  ;;  %v13792_v10 = vld [vmem:[#allocation2 + $0x79] sm:$0xff] }
 0x110   : > { %v3655_v22 = vmax.f32 %v3614_v25, 0.0 }
 0x111   : > { %v13747_v27 = vpop.permute.xlu1 %2997  ;;  %v13749_v30 = vpop.permute.xlu0 %2992 }
 0x112   : > { %3362 = vperm.xlu1 %12990, %v3280_v54   ;;  %3357 = vperm.xlu0 %12989, %v3279_v34   ;;  %v3654_v54 = vmax.f32 %v3613_v6, 0.0 }
 0x115   : > { %v13757_v35 = vpop.permute.xlu1 %2002  ;;  %v13759_v57 = vpop.permute.xlu0 %1997 }
 0x116   : > { %3773 = vperm.xlu1 %12990, %v3702_v63   ;;  %3768 = vperm.xlu0 %12989, %v3701_v56   ;;  %v13790_v56 = vld [vmem:[#allocation2 + $0x81] sm:$0xff] }
 0x119   : > { %v13768_v21 = vpop.permute.xlu1 %3332  ;;  %v13770_v46 = vpop.permute.xlu0 %3327 }
 0x11a   : > { %702 = vperm.xlu1 %12990, %v605_v36   ;;  %697 = vperm.xlu0 %12989, %v604_v37  }
 0x11d   : > { %v3744_v34 = vpop.permute.xlu1 %3743  ;;  %v3739_v55 = vpop.permute.xlu0 %3738 }
 0x11e   : > { %v3942_v23 = vmul.f32 %v3744_v34, %v3655_v22  ;;  %v3941_v18 = vmul.f32 %v3739_v55, %v3654_v54  ;;  %1037 = vperm.xlu1 %12990, %v939_v19   ;;  %1032 = vperm.xlu0 %12989, %v938_v29   ;;  %v1517_v19 = vmul.f32 %v13654_v41, %v13583_v50  ;;  %v13812_v29 = vld [vmem:[#allocation2 + $0x77] sm:$0xff] }
 0x11f   : > { %v1516_v22 = vmul.f32 %v13654_v41, %v13585_v51  ;;  %v1852_v50 = vmul.f32 %v13665_v60, %v13591_v58  ;;  %v2186_v58 = vmul.f32 %v13683_v5, %v13607_v4  ;;  %v2857_v4 = vmul.f32 %v13715_v49, %v13719_v44 }
 0x120   : > { %3984 = vst.msk [vmem:[#allocation3 + $0x20] sm:$0xff] %vm3982_vm4, %v3942_v23  ;;  %3983 = vst.msk [vmem:[#allocation3 + $0x18] sm:$0xff] %vm3982_vm4, %v3941_v18  ;;  %v2187_v23 = vmul.f32 %v13683_v5, %v13605_v3  ;;  %v2947_v18 = vld [vmem:[#allocation2 + $0x82] sm:$0xff] }
 0x121   : > { %v13778_v26 = vpop.permute.xlu1 %672  ;;  %v13780_v62 = vpop.permute.xlu0 %667 }
 0x122   : > { %2367 = vperm.xlu1 %12990, %v13656_v52   ;;  %2362 = vperm.xlu0 %12989, %v13658_v53   ;;  %v1182_v52 = vmul.f32 %v13643_v33, %v13569_v42  ;;  %v13810_v42 = vld [vmem:[#allocation2 + $0x7f] sm:$0xff] }
 0x125   : > { %v13784_v40 = vpop.permute.xlu1 %1007  ;;  %v13786_v63 = vpop.permute.xlu0 %1002 }
 0x126   : > { %1372 = vperm.xlu1 %12990, %v13688_v7   ;;  %1367 = vperm.xlu0 %12989, %v13690_v20   ;;  %v1181_v7 = vmul.f32 %v13643_v33, %v13571_v43  ;;  %v847_v20 = vmul.f32 %v13646_v48, %v13565_v38  ;;  %v846_v43 = vmul.f32 %v13646_v48, %v13567_v39 }
 0x127   : > { %v4090_v11 = vld [vmem:[#allocation3 + $0x16] sm:$0xff]  ;;  %v4091_v36 = vld [vmem:[#allocation3 + $0x1e] sm:$0xff]  ;;  %v1851_v39 = vmul.f32 %v13665_v60, %v13593_v59 }
 0x128   : > { %v4027_v37 = vld [vmem:[#allocation3 + $0x15] sm:$0xff]  ;;  %v4132_v25 = vpack.c.bf16 %v4091_v36, %v4090_v11  ;;  %v4028_v6 = vld [vmem:[#allocation3 + $0x1d] sm:$0xff]  ;;  %v1223_v38 = vadd.f32 %v1182_v52, %v847_v20  ;;  %v1222_v55 = vadd.f32 %v1181_v7, %v846_v43  ;;  %v1944_v7 = vld [vmem:[#allocation2 + $0x80] sm:$0xff] }
 0x129   : > { %v13796_v53 = vpop.permute.xlu1 %2337  ;;  %v13798_v8 = vpop.permute.xlu0 %2332  ;;  %v4068_v12 = vpack.c.bf16 %v4028_v6, %v4027_v37  ;;  %v2946_v11 = vld [vmem:[#allocation2 + $0x7a] sm:$0xff] }
 0x12a   : > { %2702 = vperm.xlu1 %12990, %v13790_v56   ;;  %2697 = vperm.xlu0 %12989, %v13792_v10   ;;  %v1558_v51 = vadd.f32 %v1517_v19, %v1223_v38  ;;  %v1557_v36 = vadd.f32 %v1516_v22, %v1222_v55  ;;  %v1943_v20 = vld [vmem:[#allocation2 + $0x78] sm:$0xff]  ;;  %v3191_v55 = vmul.f32 %v13726_v24, %v13749_v30  ;;  %v3704_v30 = vld [vmem:[%s18268_s8 + $0x48] sm:$0xff] }
 0x12b   : > { %11751 = vmatmul.mubr.msk.bf16.gmra.mrb[4].mxu0 %vm3982_vm4, %v4132_v25  ;;  %11837 = vmatmul.mubr.msk.bf16.gmra.mrb[4].mxu1 %vm3982_vm4, %v4068_v12  ;;  %v2522_v25 = vmul.f32 %v13697_v28, %v13670_v61  ;;  %v2521_v12 = vmul.f32 %v13697_v28, %v13672_v0  ;;  %v2856_v61 = vmul.f32 %v13715_v49, %v13721_v45 }
 0x12c   : > { %11754 = vmatprep.mubr.msk.bf16.mxu0 %vm13169_vm3, %v18273_v1  ;;  %11840 = vmatprep.mubr.msk.bf16.mxu1 %vm13169_vm3, %v18273_v1  ;;  %v1893_v37 = vadd.f32 %v1852_v50, %v1558_v51  ;;  %v1892_v52 = vadd.f32 %v1851_v39, %v1557_v36  ;;  %v3192_v0 = vmul.f32 %v13726_v24, %v13747_v27  ;;  %v3282_v39 = vld [vmem:[#allocation2 + $0x83] sm:$0xff]  ;;  %v3281_v51 = vld [vmem:[#allocation2 + $0x7b] sm:$0xff] }
 0x12d   : > { %v13824_v54 = vpop.permute.xlu1 %1342  ;;  %v13826_v34 = vpop.permute.xlu0 %1337  ;;  %v3527_v45 = vmul.f32 %v13733_v9, %v13768_v21  ;;  %v3703_v21 = vld [vmem:[%s18268_s8 + $0x40] sm:$0xff] }
 0x12e   : > { %1707 = vperm.xlu1 %12990, %v13810_v42   ;;  %1702 = vperm.xlu0 %12989, %v13812_v29   ;;  %v2228_v3 = vadd.f32 %v2187_v23, %v1893_v37  ;;  %v2227_v19 = vadd.f32 %v2186_v58, %v1892_v52 }
 0x130   : > { %v2563_v43 = vadd.f32 %v2522_v25, %v2228_v3  ;;  %v2562_v50 = vadd.f32 %v2521_v12, %v2227_v19  ;;  %v607_v12 = vld [vmem:[#allocation2 + $0x7d] sm:$0xff]  ;;  %v606_v3 = vld [vmem:[#allocation2 + $0x75] sm:$0xff] }
 0x131   : > { %v13838_v6 = vpop.permute.xlu1 %2672  ;;  %v13840_v59 = vpop.permute.xlu0 %2667 }
 0x132   : > { %3037 = vperm.xlu1 %12990, %v2947_v18   ;;  %3032 = vperm.xlu0 %12989, %v2946_v11   ;;  %v2898_v44 = vadd.f32 %v2857_v4, %v2563_v43  ;;  %v2897_v23 = vadd.f32 %v2856_v61, %v2562_v50  ;;  %v3526_v18 = vmul.f32 %v13733_v9, %v13770_v46  ;;  %v529_v61 = vld [vmem:[%s13477_s19 + $0xa8] sm:$0xff]  ;;  %v530_v43 = vld [vmem:[%s13477_s19 + $0xb0] sm:$0xff]  ;;  %v941_v50 = vld [vmem:[#allocation2 + $0x7e] sm:$0xff] }
 0x133   : > { %571 = vst.msk [vmem:[#allocation2 + $0xc0] sm:$0xff] %vm549_vm1, %v529_v61  ;;  %572 = vst.msk [vmem:[#allocation2 + $0xc8] sm:$0xff] %vm549_vm1, %v530_v43 }
 0x134   : > { %v3233_v27 = vadd.f32 %v3192_v0, %v2898_v44  ;;  %v3232_v58 = vadd.f32 %v3191_v55, %v2897_v23  ;;  %v940_v0 = vld [vmem:[#allocation2 + $0x76] sm:$0xff] }
 0x135   : > { %v13848_v22 = vpop.permute.xlu1 %1677  ;;  %v13850_v38 = vpop.permute.xlu0 %1672 }
 0x136   : > { %2042 = vperm.xlu1 %12990, %v1944_v7   ;;  %2037 = vperm.xlu0 %12989, %v1943_v20   ;;  %v3568_v37 = vadd.f32 %v3527_v45, %v3233_v27  ;;  %v3567_v46 = vadd.f32 %v3526_v18, %v3232_v58 }
 0x138   : > { %v3616_v7 = vadd.f32 %v13764_v2, %v3568_v37  ;;  %v3615_v20 = vadd.f32 %v13764_v2, %v3567_v46  ;;  %v13900_v37 = vld [vmem:[#allocation2 + $0x89] sm:$0xff] }
 0x139   : > { %v13860_v11 = vpop.permute.xlu1 %3007  ;;  %v13862_v36 = vpop.permute.xlu0 %3002 }
 0x13a   : > { %3372 = vperm.xlu1 %12990, %v3282_v39   ;;  %3367 = vperm.xlu0 %12989, %v3281_v51   ;;  %v3657_v55 = vmax.f32 %v3616_v7, 0.0  ;;  %v3656_v39 = vmax.f32 %v3615_v20, 0.0 }
 0x13d   : > { %v13870_v25 = vpop.permute.xlu1 %2012  ;;  %v13872_v52 = vpop.permute.xlu0 %2007 }
 0x13e   : > { %3783 = vperm.xlu1 %12990, %v3704_v30   ;;  %3778 = vperm.xlu0 %12989, %v3703_v21   ;;  %v13898_v21 = vld [vmem:[#allocation2 + $0x91] sm:$0xff] }
 0x141   : > { %v13876_v19 = vpop.permute.xlu1 %3342  ;;  %v13878_v4 = vpop.permute.xlu0 %3337 }
 0x142   : > { %712 = vperm.xlu1 %12990, %v607_v12   ;;  %707 = vperm.xlu0 %12989, %v606_v3  }
 0x145   : > { %v3754_v51 = vpop.permute.xlu1 %3753  ;;  %v3749_v44 = vpop.permute.xlu0 %3748 }
 0x146   : > { %v3944_v23 = vmul.f32 %v3754_v51, %v3657_v55  ;;  %v3943_v45 = vmul.f32 %v3749_v44, %v3656_v39  ;;  %1047 = vperm.xlu1 %12990, %v941_v50   ;;  %1042 = vperm.xlu0 %12989, %v940_v0   ;;  %v1519_v50 = vmul.f32 %v13654_v41, %v13702_v14  ;;  %v13920_v0 = vld [vmem:[#allocation2 + $0x87] sm:$0xff] }
 0x147   : > { %v1518_v55 = vmul.f32 %v13654_v41, %v13704_v15  ;;  %v1854_v14 = vmul.f32 %v13665_v60, %v13735_v47  ;;  %v2188_v47 = vmul.f32 %v13683_v5, %v13759_v57  ;;  %v2859_v57 = vmul.f32 %v13715_v49, %v13838_v6 }
 0x148   : > { %3986 = vst.msk [vmem:[#allocation3 + $0x30] sm:$0xff] %vm3982_vm4, %v3944_v23  ;;  %3985 = vst.msk [vmem:[#allocation3 + $0x28] sm:$0xff] %vm3982_vm4, %v3943_v45  ;;  %v2189_v23 = vmul.f32 %v13683_v5, %v13757_v35  ;;  %v2949_v45 = vld [vmem:[#allocation2 + $0x92] sm:$0xff] }
 0x149   : > { %v13886_v18 = vpop.permute.xlu1 %682  ;;  %v13888_v27 = vpop.permute.xlu0 %677 }
 0x14a   : > { %2377 = vperm.xlu1 %12990, %v13790_v56   ;;  %2372 = vperm.xlu0 %12989, %v13792_v10   ;;  %v1184_v56 = vmul.f32 %v13643_v33, %v13638_v31  ;;  %v13918_v31 = vld [vmem:[#allocation2 + $0x8f] sm:$0xff] }
 0x14d   : > { %v13892_v58 = vpop.permute.xlu1 %1017  ;;  %v13894_v30 = vpop.permute.xlu0 %1012 }
 0x14e   : > { %1382 = vperm.xlu1 %12990, %v13810_v42   ;;  %1377 = vperm.xlu0 %12989, %v13812_v29   ;;  %v1183_v42 = vmul.f32 %v13643_v33, %v13640_v32  ;;  %v849_v29 = vmul.f32 %v13646_v48, %v13626_v16  ;;  %v848_v32 = vmul.f32 %v13646_v48, %v13628_v17 }
 0x14f   : > { %v4092_v46 = vld [vmem:[#allocation3 + $0x26] sm:$0xff]  ;;  %v4093_v12 = vld [vmem:[#allocation3 + $0x2e] sm:$0xff]  ;;  %v1853_v17 = vmul.f32 %v13665_v60, %v13737_v13 }
 0x150   : > { %v4133_v3 = vpack.c.bf16 %v4093_v12, %v4092_v46  ;;  %v4029_v7 = vld [vmem:[#allocation3 + $0x25] sm:$0xff]  ;;  %v4030_v20 = vld [vmem:[#allocation3 + $0x2d] sm:$0xff]  ;;  %v1225_v16 = vadd.f32 %v1184_v56, %v849_v29  ;;  %v1224_v44 = vadd.f32 %v1183_v42, %v848_v32  ;;  %v1946_v42 = vld [vmem:[#allocation2 + $0x90] sm:$0xff] }
 0x151   : > { %v13904_v10 = vpop.permute.xlu1 %2347  ;;  %v13906_v61 = vpop.permute.xlu0 %2342  ;;  %v4069_v43 = vpack.c.bf16 %v4030_v20, %v4029_v7  ;;  %v2948_v46 = vld [vmem:[#allocation2 + $0x8a] sm:$0xff]  ;;  %v2524_v7 = vmul.f32 %v13697_v28, %v13796_v53  ;;  %v2858_v53 = vmul.f32 %v13715_v49, %v13840_v59  ;;  %v3529_v59 = vmul.f32 %v13733_v9, %v13876_v19 }
 0x152   : > { %2712 = vperm.xlu1 %12990, %v13898_v21   ;;  %2707 = vperm.xlu0 %12989, %v13900_v37   ;;  %v1560_v15 = vadd.f32 %v1519_v50, %v1225_v16  ;;  %v1559_v12 = vadd.f32 %v1518_v55, %v1224_v44  ;;  %v1945_v29 = vld [vmem:[#allocation2 + $0x88] sm:$0xff]  ;;  %v3193_v44 = vmul.f32 %v13726_v24, %v13862_v36  ;;  %v3706_v36 = vld [vmem:[%s18268_s8 + $0x58] sm:$0xff]  ;;  %v3705_v19 = vld [vmem:[%s18268_s8 + $0x50] sm:$0xff] }
 0x153   : > { %11755 = vmatmul.mubr.msk.bf16.gmra.mrb[8].mxu0 %vm3982_vm4, %v4133_v3  ;;  %11841 = vmatmul.mubr.msk.bf16.gmra.mrb[8].mxu1 %vm3982_vm4, %v4069_v43  ;;  %v2523_v43 = vmul.f32 %v13697_v28, %v13798_v8  ;;  %v3194_v8 = vmul.f32 %v13726_v24, %v13860_v11 }
 0x154   : > { %11758 = vmatprep.mubr.msk.bf16.mxu0 %vm13169_vm3, %v18273_v1  ;;  %11844 = vmatprep.mubr.msk.bf16.mxu1 %vm13169_vm3, %v18273_v1  ;;  %v1895_v3 = vadd.f32 %v1854_v14, %v1560_v15  ;;  %v1894_v56 = vadd.f32 %v1853_v17, %v1559_v12  ;;  %v3284_v17 = vld [vmem:[#allocation2 + $0x93] sm:$0xff]  ;;  %v3283_v15 = vld [vmem:[#allocation2 + $0x8b] sm:$0xff] }
 0x155   : > { %v13932_v39 = vpop.permute.xlu1 %1352  ;;  %v13934_v51 = vpop.permute.xlu0 %1347 }
 0x156   : > { %1717 = vperm.xlu1 %12990, %v13918_v31   ;;  %1712 = vperm.xlu0 %12989, %v13920_v0   ;;  %v2230_v35 = vadd.f32 %v2189_v23, %v1895_v3  ;;  %v2229_v50 = vadd.f32 %v2188_v47, %v1894_v56 }
 0x158   : > { %v2565_v32 = vadd.f32 %v2524_v7, %v2230_v35  ;;  %v2564_v14 = vadd.f32 %v2523_v43, %v2229_v50  ;;  %v609_v43 = vld [vmem:[#allocation2 + $0x8d] sm:$0xff]  ;;  %v608_v35 = vld [vmem:[#allocation2 + $0x85] sm:$0xff] }
 0x159   : > { %v13946_v20 = vpop.permute.xlu1 %2682  ;;  %v13948_v13 = vpop.permute.xlu0 %2677 }
 0x15a   : > { %3047 = vperm.xlu1 %12990, %v2949_v45   ;;  %3042 = vperm.xlu0 %12989, %v2948_v46   ;;  %v2900_v6 = vadd.f32 %v2859_v57, %v2565_v32  ;;  %v2899_v23 = vadd.f32 %v2858_v53, %v2564_v14  ;;  %v3528_v45 = vmul.f32 %v13733_v9, %v13878_v4  ;;  %v531_v53 = vld [vmem:[%s13477_s19 + $0xb8] sm:$0xff]  ;;  %v532_v32 = vld [vmem:[%s13477_s19 + $0xc0] sm:$0xff]  ;;  %v943_v14 = vld [vmem:[#allocation2 + $0x8e] sm:$0xff] }
 0x15b   : > { %573 = vst.msk [vmem:[#allocation2 + $0xd0] sm:$0xff] %vm549_vm1, %v531_v53  ;;  %574 = vst.msk [vmem:[#allocation2 + $0xd8] sm:$0xff] %vm549_vm1, %v532_v32  ;;  %v4519_v53 = vpop.f32.mrb[0].mxu1 }
 0x15c   : > { %v3235_v11 = vadd.f32 %v3194_v8, %v2900_v6  ;;  %v3234_v47 = vadd.f32 %v3193_v44, %v2899_v23  ;;  %v942_v8 = vld [vmem:[#allocation2 + $0x86] sm:$0xff] }
 0x15d   : > { %v13956_v55 = vpop.permute.xlu1 %1687  ;;  %v13958_v16 = vpop.permute.xlu0 %1682 }
 0x15e   : > { %2052 = vperm.xlu1 %12990, %v1946_v42   ;;  %2047 = vperm.xlu0 %12989, %v1945_v29   ;;  %v3570_v3 = vadd.f32 %v3529_v59, %v3235_v11  ;;  %v3569_v4 = vadd.f32 %v3528_v45, %v3234_v47 }
 0x160   : > { %v3618_v42 = vadd.f32 %v13764_v2, %v3570_v3  ;;  %v3617_v29 = vadd.f32 %v13764_v2, %v3569_v4  ;;  %v14008_v3 = vld [vmem:[#allocation2 + $0x99] sm:$0xff] }
 0x161   : > { %v13968_v46 = vpop.permute.xlu1 %3017  ;;  %v13970_v12 = vpop.permute.xlu0 %3012 }
 0x162   : > { %3382 = vperm.xlu1 %12990, %v3284_v17   ;;  %3377 = vperm.xlu0 %12989, %v3283_v15   ;;  %v3659_v44 = vmax.f32 %v3618_v42, 0.0  ;;  %v3658_v17 = vmax.f32 %v3617_v29, 0.0 }
 0x165   : > { %v13978_v7 = vpop.permute.xlu1 %2022  ;;  %v13980_v56 = vpop.permute.xlu0 %2017 }
 0x166   : > { %3793 = vperm.xlu1 %12990, %v3706_v36   ;;  %3788 = vperm.xlu0 %12989, %v3705_v19   ;;  %v14006_v19 = vld [vmem:[#allocation2 + $0xa1] sm:$0xff] }
 0x169   : > { %v13984_v50 = vpop.permute.xlu1 %3352  ;;  %v13986_v57 = vpop.permute.xlu0 %3347 }
 0x16a   : > { %722 = vperm.xlu1 %12990, %v609_v43   ;;  %717 = vperm.xlu0 %12989, %v608_v35  }
 0x16d   : > { %v3764_v15 = vpop.permute.xlu1 %3763  ;;  %v3759_v6 = vpop.permute.xlu0 %3758 }
 0x16e   : > { %v3946_v23 = vmul.f32 %v3764_v15, %v3659_v44  ;;  %v3945_v59 = vmul.f32 %v3759_v6, %v3658_v17  ;;  %1057 = vperm.xlu1 %12990, %v943_v14   ;;  %1052 = vperm.xlu0 %12989, %v942_v8   ;;  %v1185_v8 = vmul.f32 %v13643_v33, %v13786_v63  ;;  %v11834_v17 = vpop.f32.mrb[1].mxu1  ;;  %v14028_v6 = vld [vmem:[#allocation2 + $0x9f] sm:$0xff] }
 0x16f   : > { %v851_v15 = vmul.f32 %v13646_v48, %v13778_v26  ;;  %v850_v63 = vmul.f32 %v13646_v48, %v13780_v62 }
 0x170   : > { %3988 = vst.msk [vmem:[#allocation3 + $0x40] sm:$0xff] %vm3982_vm4, %v3946_v23  ;;  %3987 = vst.msk [vmem:[#allocation3 + $0x38] sm:$0xff] %vm3982_vm4, %v3945_v59  ;;  %v14030_v23 = vld [vmem:[#allocation2 + $0x97] sm:$0xff]  ;;  %v1520_v59 = vmul.f32 %v13654_v41, %v13826_v34  ;;  %v1855_v34 = vmul.f32 %v13665_v60, %v13850_v38  ;;  %v2526_v38 = vmul.f32 %v13697_v28, %v13904_v10 }
 0x171   : > { %v13994_v45 = vpop.permute.xlu1 %692  ;;  %v13996_v11 = vpop.permute.xlu0 %687  ;;  %v2860_v10 = vmul.f32 %v13715_v49, %v13948_v13  ;;  %v3531_v13 = vmul.f32 %v13733_v9, %v13984_v50  ;;  %v3707_v50 = vld [vmem:[%s18268_s8 + $0x60] sm:$0xff] }
 0x172   : > { %2387 = vperm.xlu1 %12990, %v13898_v21   ;;  %2382 = vperm.xlu0 %12989, %v13900_v37   ;;  %v4253_v21 = vpop.f32.mrb[0].mxu0  ;;  %v1186_v37 = vmul.f32 %v13643_v33, %v13784_v40  ;;  %v1521_v40 = vmul.f32 %v13654_v41, %v13824_v54  ;;  %v4522_v54 = vpop.f32.mrb[2].mxu1 }
 0x173   : > { %v11748_v44 = vpop.f32.mrb[1].mxu0 }
 0x174   : > { %v4256_v26 = vpop.f32.mrb[2].mxu0  ;;  %v2950_v44 = vld [vmem:[#allocation2 + $0x9a] sm:$0xff] }
 0x175   : > { %v14000_v47 = vpop.permute.xlu1 %1027  ;;  %v14002_v36 = vpop.permute.xlu0 %1022  ;;  %v14046_v62 = vadd.f32 %v4522_v54, %v4256_v26 }
 0x176   : > { %1392 = vperm.xlu1 %12990, %v13918_v31   ;;  %1387 = vperm.xlu0 %12989, %v13920_v0   ;;  %v14016_v0 = vadd.f32 %v4519_v53, %v4253_v21  ;;  %v11749_v21 = vpop.f32.mrb[3].mxu0  ;;  %v11835_v53 = vpop.f32.mrb[3].mxu1 }
 0x177   : > { %v4094_v4 = vld [vmem:[#allocation3 + $0x36] sm:$0xff]  ;;  %v4095_v43 = vld [vmem:[#allocation3 + $0x3e] sm:$0xff]  ;;  %18285 = vst [vmem:[#allocation8_spill] sm:$0xff] %v14046_v62 }
 0x178   : > { %v4134_v35 = vpack.c.bf16 %v4095_v43, %v4094_v4  ;;  %v4031_v42 = vld [vmem:[#allocation3 + $0x35] sm:$0xff]  ;;  %v4032_v29 = vld [vmem:[#allocation3 + $0x3d] sm:$0xff]  ;;  %18284 = vst [vmem:[#allocation7_spill] sm:$0xff] %v14016_v0  ;;  %v1227_v4 = vadd.f32 %v1186_v37, %v851_v15  ;;  %v1856_v43 = vmul.f32 %v13665_v60, %v13848_v22  ;;  %v2191_v22 = vmul.f32 %v13683_v5, %v13870_v25 }
 0x179   : > { %v14012_v32 = vpop.permute.xlu1 %2357  ;;  %v14014_v14 = vpop.permute.xlu0 %2352  ;;  %v4070_v31 = vpack.c.bf16 %v4032_v29, %v4031_v42  ;;  %v1226_v29 = vadd.f32 %v1185_v8, %v850_v63  ;;  %v2190_v15 = vmul.f32 %v13683_v5, %v13872_v52  ;;  %v2861_v52 = vmul.f32 %v13715_v49, %v13946_v20 }
 0x17a   : > { %2722 = vperm.xlu1 %12990, %v14006_v19   ;;  %2717 = vperm.xlu0 %12989, %v14008_v3   ;;  %v1562_v37 = vadd.f32 %v1521_v40, %v1227_v4  ;;  %v2525_v40 = vmul.f32 %v13697_v28, %v13906_v61  ;;  %v1948_v4 = vld [vmem:[#allocation2 + $0xa0] sm:$0xff]  ;;  %v3196_v61 = vmul.f32 %v13726_v24, %v13968_v46 }
 0x17b   : > { %11759 = vmatmul.mubr.msk.bf16.gmra.mrb[12].mxu0 %vm3982_vm4, %v4134_v35  ;;  %11845 = vmatmul.mubr.msk.bf16.gmra.mrb[12].mxu1 %vm3982_vm4, %v4070_v31  ;;  %v2951_v31 = vld [vmem:[#allocation2 + $0xa2] sm:$0xff]  ;;  %v1561_v17 = vadd.f32 %v1520_v59, %v1226_v29  ;;  %v1947_v59 = vld [vmem:[#allocation2 + $0x98] sm:$0xff] }
 0x17c   : > { %11762 = vmatprep.mubr.msk.bf16.mxu0 %vm13169_vm3, %v18273_v1  ;;  %11848 = vmatprep.mubr.msk.bf16.mxu1 %vm13169_vm3, %v18273_v1  ;;  %v1897_v8 = vadd.f32 %v1856_v43, %v1562_v37  ;;  %v3195_v37 = vmul.f32 %v13726_v24, %v13970_v12  ;;  %v3708_v12 = vld [vmem:[%s18268_s8 + $0x68] sm:$0xff] }
 0x17d   : > { %v14042_v35 = vpop.permute.xlu1 %1362  ;;  %v14044_v42 = vpop.permute.xlu0 %1357  ;;  %v1896_v54 = vadd.f32 %v1855_v34, %v1561_v17  ;;  %v3530_v17 = vmul.f32 %v13733_v9, %v13986_v57 }
 0x17e   : > { %1727 = vperm.xlu1 %12990, %v14028_v6   ;;  %1722 = vperm.xlu0 %12989, %v14030_v23   ;;  %v2232_v25 = vadd.f32 %v2191_v22, %v1897_v8  ;;  %v3286_v22 = vld [vmem:[#allocation2 + $0xa3] sm:$0xff] }
 0x17f   : > { %v2231_v29 = vadd.f32 %v2190_v15, %v1896_v54 }
 0x180   : > { %v2567_v43 = vadd.f32 %v2526_v38, %v2232_v25 }
 0x181   : > { %v14058_v63 = vpop.permute.xlu1 %2692  ;;  %v14060_v26 = vpop.permute.xlu0 %2687  ;;  %v2566_v34 = vadd.f32 %v2525_v40, %v2231_v29 }
 0x182   : > { %3057 = vperm.xlu1 %12990, %v2951_v31   ;;  %3052 = vperm.xlu0 %12989, %v2950_v44   ;;  %v3285_v31 = vld [vmem:[#allocation2 + $0x9b] sm:$0xff]  ;;  %v2902_v20 = vadd.f32 %v2861_v52, %v2567_v43 }
 0x183   : > { %v2901_v44 = vadd.f32 %v2860_v10, %v2566_v34  ;;  %v533_v34 = vld [vmem:[%s13477_s19 + $0xc8] sm:$0xff] }
 0x184   : > { %v3237_v46 = vadd.f32 %v3196_v61, %v2902_v20  ;;  %v534_v61 = vld [vmem:[%s13477_s19 + $0xd0] sm:$0xff]  ;;  %575 = vst.msk [vmem:[#allocation2 + $0xe0] sm:$0xff] %vm549_vm1, %v533_v34 }
 0x185   : > { %v14068_v21 = vpop.permute.xlu1 %1697  ;;  %v14070_v53 = vpop.permute.xlu0 %1692  ;;  %v3236_v38 = vadd.f32 %v3195_v37, %v2901_v44  ;;  %v945_v37 = vld [vmem:[#allocation2 + $0x9e] sm:$0xff]  ;;  %576 = vst.msk [vmem:[#allocation2 + $0xe8] sm:$0xff] %vm549_vm1, %v534_v61 }
 0x186   : > { %2062 = vperm.xlu1 %12990, %v1948_v4   ;;  %2057 = vperm.xlu0 %12989, %v1947_v59   ;;  %v3572_v54 = vadd.f32 %v3531_v13, %v3237_v46  ;;  %v611_v4 = vld [vmem:[#allocation2 + $0x9d] sm:$0xff]  ;;  %v610_v59 = vld [vmem:[#allocation2 + $0x95] sm:$0xff] }
 0x187   : > { %v3571_v57 = vadd.f32 %v3530_v17, %v3236_v38 }
 0x188   : > { %v3620_v29 = vadd.f32 %v13764_v2, %v3572_v54 }
 0x189   : > { %v14080_v15 = vpop.permute.xlu1 %3027  ;;  %v14082_v8 = vpop.permute.xlu0 %3022  ;;  %v3619_v52 = vadd.f32 %v13764_v2, %v3571_v57  ;;  %v14118_v57 = vld [vmem:[#allocation2 + $0xb1] sm:$0xff] }
 0x18a   : > { %3392 = vperm.xlu1 %12990, %v3286_v22   ;;  %3387 = vperm.xlu0 %12989, %v3285_v31   ;;  %v944_v22 = vld [vmem:[#allocation2 + $0x96] sm:$0xff]  ;;  %v3661_v31 = vmax.f32 %v3620_v29, 0.0 }
 0x18b   : > { %v3660_v20 = vmax.f32 %v3619_v52, 0.0 }
 0x18d   : > { %v14090_v40 = vpop.permute.xlu1 %2032  ;;  %v14092_v25 = vpop.permute.xlu0 %2027 }
 0x18e   : > { %3803 = vperm.xlu1 %12990, %v3708_v12   ;;  %3798 = vperm.xlu0 %12989, %v3707_v50  }
 0x191   : > { %v14096_v10 = vpop.permute.xlu1 %3362  ;;  %v14098_v43 = vpop.permute.xlu0 %3357 }
 0x192   : > { %732 = vperm.xlu1 %12990, %v611_v4   ;;  %727 = vperm.xlu0 %12989, %v610_v59   ;;  %v14120_v4 = vld [vmem:[#allocation2 + $0xa9] sm:$0xff] }
 0x195   : > { %v3774_v44 = vpop.permute.xlu1 %3773  ;;  %v3769_v13 = vpop.permute.xlu0 %3768 }
 0x196   : > { %v3948_v17 = vmul.f32 %v3774_v44, %v3661_v31  ;;  %v3947_v46 = vmul.f32 %v3769_v13, %v3660_v20  ;;  %1067 = vperm.xlu1 %12990, %v945_v37   ;;  %1062 = vperm.xlu0 %12989, %v944_v22   ;;  %v1523_v31 = vmul.f32 %v13654_v41, %v13932_v39  ;;  %v14140_v20 = vld [vmem:[#allocation2 + $0xa7] sm:$0xff] }
 0x197   : > { %v1522_v44 = vmul.f32 %v13654_v41, %v13934_v51  ;;  %v1858_v39 = vmul.f32 %v13665_v60, %v13956_v55  ;;  %v2192_v55 = vmul.f32 %v13683_v5, %v13980_v56  ;;  %v2863_v56 = vmul.f32 %v13715_v49, %v14058_v63 }
 0x198   : > { %3990 = vst.msk [vmem:[#allocation3 + $0x50] sm:$0xff] %vm3982_vm4, %v3948_v17  ;;  %3989 = vst.msk [vmem:[#allocation3 + $0x48] sm:$0xff] %vm3982_vm4, %v3947_v46 }
 0x199   : > { %v14106_v38 = vpop.permute.xlu1 %702  ;;  %v14108_v12 = vpop.permute.xlu0 %697 }
 0x19a   : > { %2397 = vperm.xlu1 %12990, %v14006_v19   ;;  %2392 = vperm.xlu0 %12989, %v14008_v3   ;;  %v1188_v19 = vmul.f32 %v13643_v33, %v13892_v58  ;;  %v14138_v58 = vld [vmem:[#allocation2 + $0xaf] sm:$0xff] }
 0x19d   : > { %v14112_v50 = vpop.permute.xlu1 %1037  ;;  %v14114_v54 = vpop.permute.xlu0 %1032 }
 0x19e   : > { %1402 = vperm.xlu1 %12990, %v14028_v6   ;;  %1397 = vperm.xlu0 %12989, %v14030_v23   ;;  %v1187_v6 = vmul.f32 %v13643_v33, %v13894_v30  ;;  %v853_v23 = vmul.f32 %v13646_v48, %v13886_v18  ;;  %v852_v30 = vmul.f32 %v13646_v48, %v13888_v27 }
 0x19f   : > { %v4096_v59 = vld [vmem:[#allocation3 + $0x46] sm:$0xff]  ;;  %v4097_v29 = vld [vmem:[#allocation3 + $0x4e] sm:$0xff]  ;;  %v1857_v27 = vmul.f32 %v13665_v60, %v13958_v16 }
 0x1a0   : > { %v4033_v52 = vld [vmem:[#allocation3 + $0x45] sm:$0xff]  ;;  %v4135_v34 = vpack.c.bf16 %v4097_v29, %v4096_v59  ;;  %v4034_v61 = vld [vmem:[#allocation3 + $0x4d] sm:$0xff]  ;;  %v1229_v18 = vadd.f32 %v1188_v19, %v853_v23  ;;  %v1228_v46 = vadd.f32 %v1187_v6, %v852_v30  ;;  %v2193_v59 = vmul.f32 %v13683_v5, %v13978_v7  ;;  %v2953_v29 = vld [vmem:[#allocation2 + $0xb2] sm:$0xff] }
 0x1a1   : > { %v14124_v3 = vpop.permute.xlu1 %2367  ;;  %v14126_v37 = vpop.permute.xlu0 %2362  ;;  %v4071_v22 = vpack.c.bf16 %v4034_v61, %v4033_v52  ;;  %v2952_v52 = vld [vmem:[#allocation2 + $0xaa] sm:$0xff]  ;;  %v2528_v19 = vmul.f32 %v13697_v28, %v14012_v32  ;;  %v2527_v23 = vmul.f32 %v13697_v28, %v14014_v14  ;;  %v2862_v32 = vmul.f32 %v13715_v49, %v14060_v26 }
 0x1a2   : > { %2732 = vperm.xlu1 %12990, %v14118_v57   ;;  %2727 = vperm.xlu0 %12989, %v14120_v4   ;;  %v1564_v51 = vadd.f32 %v1523_v31, %v1229_v18  ;;  %v1950_v31 = vld [vmem:[#allocation2 + $0xb0] sm:$0xff]  ;;  %v1949_v30 = vld [vmem:[#allocation2 + $0xa8] sm:$0xff]  ;;  %v3198_v14 = vmul.f32 %v13726_v24, %v14080_v15  ;;  %v3533_v26 = vmul.f32 %v13733_v9, %v14096_v10 }
 0x1a3   : > { %11763 = vmatmul.mubr.msk.bf16.gmra.mrb[16].mxu0 %vm3982_vm4, %v4135_v34  ;;  %11849 = vmatmul.mubr.msk.bf16.gmra.mrb[16].mxu1 %vm3982_vm4, %v4071_v22  ;;  %v1563_v34 = vadd.f32 %v1522_v44, %v1228_v46 }
 0x1a4   : > { %11766 = vmatprep.mubr.msk.bf16.mxu0 %vm13169_vm3, %v18273_v1  ;;  %11852 = vmatprep.mubr.msk.bf16.mxu1 %vm13169_vm3, %v18273_v1  ;;  %v1899_v61 = vadd.f32 %v1858_v39, %v1564_v51  ;;  %v3197_v51 = vmul.f32 %v13726_v24, %v14082_v8  ;;  %v3710_v8 = vld [vmem:[%s18268_s8 + $0x78] sm:$0xff] }
 0x1a5   : > { %v14152_v13 = vpop.permute.xlu1 %1372  ;;  %v14154_v17 = vpop.permute.xlu0 %1367  ;;  %v1898_v6 = vadd.f32 %v1857_v27, %v1563_v34  ;;  %v3532_v34 = vmul.f32 %v13733_v9, %v14098_v43 }
 0x1a6   : > { %1737 = vperm.xlu1 %12990, %v14138_v58   ;;  %1732 = vperm.xlu0 %12989, %v14140_v20   ;;  %v2234_v7 = vadd.f32 %v2193_v59, %v1899_v61  ;;  %v3288_v59 = vld [vmem:[#allocation2 + $0xb3] sm:$0xff] }
 0x1a7   : > { %v2233_v44 = vadd.f32 %v2192_v55, %v1898_v6  ;;  %v3709_v6 = vld [vmem:[%s18268_s8 + $0x70] sm:$0xff] }
 0x1a8   : > { %v2569_v18 = vadd.f32 %v2528_v19, %v2234_v7 }
 0x1a9   : > { %v14166_v22 = vpop.permute.xlu1 %2702  ;;  %v14168_v16 = vpop.permute.xlu0 %2697  ;;  %v2568_v27 = vadd.f32 %v2527_v23, %v2233_v44 }
 0x1aa   : > { %3067 = vperm.xlu1 %12990, %v2953_v29   ;;  %3062 = vperm.xlu0 %12989, %v2952_v52   ;;  %v3287_v29 = vld [vmem:[#allocation2 + $0xab] sm:$0xff]  ;;  %v2904_v63 = vadd.f32 %v2863_v56, %v2569_v18 }
 0x1ab   : > { %v2903_v52 = vadd.f32 %v2862_v32, %v2568_v27  ;;  %v947_v27 = vld [vmem:[#allocation2 + $0xae] sm:$0xff] }
 0x1ac   : > { %v3239_v15 = vadd.f32 %v3198_v14, %v2904_v63  ;;  %v946_v14 = vld [vmem:[#allocation2 + $0xa6] sm:$0xff] }
 0x1ad   : > { %v14176_v39 = vpop.permute.xlu1 %1707  ;;  %v14178_v46 = vpop.permute.xlu0 %1702  ;;  %v3238_v19 = vadd.f32 %v3197_v51, %v2903_v52  ;;  %v535_v51 = vld [vmem:[%s13477_s19 + $0xd8] sm:$0xff] }
 0x1ae   : > { %2072 = vperm.xlu1 %12990, %v1950_v31   ;;  %2067 = vperm.xlu0 %12989, %v1949_v30   ;;  %v3574_v10 = vadd.f32 %v3533_v26, %v3239_v15  ;;  %v613_v31 = vld [vmem:[#allocation2 + $0xad] sm:$0xff]  ;;  %v612_v30 = vld [vmem:[#allocation2 + $0xa5] sm:$0xff]  ;;  %577 = vst.msk [vmem:[#allocation2 + $0xf0] sm:$0xff] %vm549_vm1, %v535_v51 }
 0x1af   : > { %v3573_v23 = vadd.f32 %v3532_v34, %v3238_v19 }
 0x1b0   : > { %v3622_v44 = vadd.f32 %v13764_v2, %v3574_v10  ;;  %v14226_v10 = vld [vmem:[#allocation2 + $0xc1] sm:$0xff] }
 0x1b1   : > { %v14188_v55 = vpop.permute.xlu1 %3037  ;;  %v14190_v61 = vpop.permute.xlu0 %3032  ;;  %v3621_v56 = vadd.f32 %v13764_v2, %v3573_v23  ;;  %v14228_v23 = vld [vmem:[#allocation2 + $0xb9] sm:$0xff] }
 0x1b2   : > { %3402 = vperm.xlu1 %12990, %v3288_v59   ;;  %3397 = vperm.xlu0 %12989, %v3287_v29   ;;  %v536_v59 = vld [vmem:[%s13477_s19 + $0xe0] sm:$0xff]  ;;  %v3663_v29 = vmax.f32 %v3622_v44, 0.0 }
 0x1b3   : > { %v3662_v63 = vmax.f32 %v3621_v56, 0.0  ;;  %578 = vst.msk [vmem:[#allocation2 + $0xf8] sm:$0xff] %vm549_vm1, %v536_v59  ;;  %v1525_v59 = vmul.f32 %v13654_v41, %v14042_v35  ;;  %v1860_v35 = vmul.f32 %v13665_v60, %v14068_v21  ;;  %v2194_v21 = vmul.f32 %v13683_v5, %v14092_v25 }
 0x1b4   : > { %v2865_v25 = vmul.f32 %v13715_v49, %v14166_v22 }
 0x1b5   : > { %v14198_v43 = vpop.permute.xlu1 %2042  ;;  %v14200_v7 = vpop.permute.xlu0 %2037 }
 0x1b6   : > { %3813 = vperm.xlu1 %12990, %v3710_v8   ;;  %3808 = vperm.xlu0 %12989, %v3709_v6  }
 0x1b9   : > { %v14204_v32 = vpop.permute.xlu1 %3372  ;;  %v14206_v18 = vpop.permute.xlu0 %3367 }
 0x1ba   : > { %742 = vperm.xlu1 %12990, %v613_v31   ;;  %737 = vperm.xlu0 %12989, %v612_v30  }
 0x1bd   : > { %v3784_v52 = vpop.permute.xlu1 %3783  ;;  %v3779_v26 = vpop.permute.xlu0 %3778 }
 0x1be   : > { %v3950_v34 = vmul.f32 %v3784_v52, %v3663_v29  ;;  %v3949_v2 = vmul.f32 %v3779_v26, %v3662_v63  ;;  %1077 = vperm.xlu1 %12990, %v947_v27   ;;  %1072 = vperm.xlu0 %12989, %v946_v14   ;;  %v14248_v29 = vld [vmem:[#allocation2 + $0xb7] sm:$0xff]  ;;  %v1524_v63 = vmul.f32 %v13654_v41, %v14044_v42 }
 0x1c0   : > { %3992 = vst.msk [vmem:[#allocation3 + $0x60] sm:$0xff] %vm3982_vm4, %v3950_v34  ;;  %3991 = vst.msk [vmem:[#allocation3 + $0x58] sm:$0xff] %vm3982_vm4, %v3949_v2  ;;  %v2195_v2 = vmul.f32 %v13683_v5, %v14090_v40 }
 0x1c1   : > { %v14214_v15 = vpop.permute.xlu1 %712  ;;  %v14216_v19 = vpop.permute.xlu0 %707 }
 0x1c2   : > { %2407 = vperm.xlu1 %12990, %v14118_v57   ;;  %2402 = vperm.xlu0 %12989, %v14120_v4   ;;  %v1190_v57 = vmul.f32 %v13643_v33, %v14000_v47  ;;  %v14246_v47 = vld [vmem:[#allocation2 + $0xbf] sm:$0xff] }
 0x1c5   : > { %v14220_v8 = vpop.permute.xlu1 %1047  ;;  %v14222_v6 = vpop.permute.xlu0 %1042 }
 0x1c6   : > { %1412 = vperm.xlu1 %12990, %v14138_v58   ;;  %1407 = vperm.xlu0 %12989, %v14140_v20   ;;  %v1189_v58 = vmul.f32 %v13643_v33, %v14002_v36  ;;  %v855_v20 = vmul.f32 %v13646_v48, %v13994_v45  ;;  %v854_v36 = vmul.f32 %v13646_v48, %v13996_v11 }
 0x1c7   : > { %v4098_v31 = vld [vmem:[#allocation3 + $0x56] sm:$0xff]  ;;  %v4099_v30 = vld [vmem:[#allocation3 + $0x5e] sm:$0xff]  ;;  %v1859_v11 = vmul.f32 %v13665_v60, %v14070_v53 }
 0x1c8   : > { %v4035_v44 = vld [vmem:[#allocation3 + $0x55] sm:$0xff]  ;;  %v4136_v56 = vpack.c.bf16 %v4099_v30, %v4098_v31  ;;  %v4036_v27 = vld [vmem:[#allocation3 + $0x5d] sm:$0xff]  ;;  %v1231_v45 = vadd.f32 %v1190_v57, %v855_v20  ;;  %v1230_v34 = vadd.f32 %v1189_v58, %v854_v36  ;;  %v2955_v31 = vld [vmem:[#allocation2 + $0xc2] sm:$0xff]  ;;  %v2529_v58 = vmul.f32 %v13697_v28, %v14126_v37 }
 0x1c9   : > { %v14232_v4 = vpop.permute.xlu1 %2377  ;;  %v14234_v14 = vpop.permute.xlu0 %2372  ;;  %v4072_v51 = vpack.c.bf16 %v4036_v27, %v4035_v44  ;;  %v2954_v30 = vld [vmem:[#allocation2 + $0xba] sm:$0xff]  ;;  %v2530_v27 = vmul.f32 %v13697_v28, %v14124_v3  ;;  %v2864_v3 = vmul.f32 %v13715_v49, %v14168_v16  ;;  %v3200_v37 = vmul.f32 %v13726_v24, %v14188_v55 }
 0x1ca   : > { %2742 = vperm.xlu1 %12990, %v14226_v10   ;;  %2737 = vperm.xlu0 %12989, %v14228_v23   ;;  %v1566_v42 = vadd.f32 %v1525_v59, %v1231_v45  ;;  %v1565_v44 = vadd.f32 %v1524_v63, %v1230_v34  ;;  %v1952_v20 = vld [vmem:[#allocation2 + $0xc0] sm:$0xff]  ;;  %v1951_v59 = vld [vmem:[#allocation2 + $0xb8] sm:$0xff]  ;;  %v3535_v16 = vmul.f32 %v13733_v9, %v14204_v32 }
 0x1cb   : > { %11767 = vmatmul.mubr.msk.bf16.gmra.mrb[20].mxu0 %vm3982_vm4, %v4136_v56  ;;  %11853 = vmatmul.mubr.msk.bf16.gmra.mrb[20].mxu1 %vm3982_vm4, %v4072_v51 }
 0x1cc   : > { %11770 = vmatprep.mubr.msk.bf16.mxu0 %vm13169_vm3, %v18273_v1  ;;  %11856 = vmatprep.mubr.msk.bf16.mxu1 %vm13169_vm3, %v18273_v1  ;;  %v1901_v56 = vadd.f32 %v1860_v35, %v1566_v42  ;;  %v1900_v51 = vadd.f32 %v1859_v11, %v1565_v44  ;;  %v3199_v11 = vmul.f32 %v13726_v24, %v14190_v61  ;;  %v3290_v42 = vld [vmem:[#allocation2 + $0xc3] sm:$0xff] }
 0x1cd   : > { %v14260_v52 = vpop.permute.xlu1 %1382  ;;  %v14262_v26 = vpop.permute.xlu0 %1377  ;;  %v3712_v61 = vld [vmem:[%s18268_s8 + $0x88] sm:$0xff] }
 0x1ce   : > { %1747 = vperm.xlu1 %12990, %v14246_v47   ;;  %1742 = vperm.xlu0 %12989, %v14248_v29   ;;  %v2236_v40 = vadd.f32 %v2195_v2, %v1901_v56  ;;  %v2235_v36 = vadd.f32 %v2194_v21, %v1900_v51  ;;  %v3289_v2 = vld [vmem:[#allocation2 + $0xbb] sm:$0xff] }
 0x1d0   : > { %v2571_v63 = vadd.f32 %v2530_v27, %v2236_v40  ;;  %v2570_v34 = vadd.f32 %v2529_v58, %v2235_v36  ;;  %v3711_v27 = vld [vmem:[%s18268_s8 + $0x80] sm:$0xff] }
 0x1d1   : > { %v14274_v57 = vpop.permute.xlu1 %2712  ;;  %v14276_v53 = vpop.permute.xlu0 %2707  ;;  %v615_v40 = vld [vmem:[#allocation2 + $0xbd] sm:$0xff] }
 0x1d2   : > { %3077 = vperm.xlu1 %12990, %v2955_v31   ;;  %3072 = vperm.xlu0 %12989, %v2954_v30   ;;  %v2906_v22 = vadd.f32 %v2865_v25, %v2571_v63  ;;  %v2905_v31 = vadd.f32 %v2864_v3, %v2570_v34  ;;  %v3534_v30 = vmul.f32 %v13733_v9, %v14206_v18  ;;  %v949_v34 = vld [vmem:[#allocation2 + $0xbe] sm:$0xff] }
 0x1d4   : > { %v3241_v55 = vadd.f32 %v3200_v37, %v2906_v22  ;;  %v3240_v56 = vadd.f32 %v3199_v11, %v2905_v31  ;;  %v948_v37 = vld [vmem:[#allocation2 + $0xb6] sm:$0xff] }
 0x1d5   : > { %v14284_v45 = vpop.permute.xlu1 %1717  ;;  %v14286_v35 = vpop.permute.xlu0 %1712  ;;  %v538_v22 = vld [vmem:[%s13477_s19 + $0xf0] sm:$0xff] }
 0x1d6   : > { %2082 = vperm.xlu1 %12990, %v1952_v20   ;;  %2077 = vperm.xlu0 %12989, %v1951_v59   ;;  %v3576_v32 = vadd.f32 %v3535_v16, %v3241_v55  ;;  %v3575_v51 = vadd.f32 %v3534_v30, %v3240_v56  ;;  %v614_v20 = vld [vmem:[#allocation2 + $0xb5] sm:$0xff]  ;;  %v14313_v59 = vld [vmem:[%s18264_s4] ss:$0 sm:$0xff]  ;;  %580 = vst.msk [vmem:[#allocation2 + $0x108] sm:$0xff] %vm549_vm1, %v538_v22 }
 0x1d7   : > { %v857_v22 = vmul.f32 %v13646_v48, %v14106_v38 }
 0x1d8   : > { %v3624_v36 = vadd.f32 %v14313_v59, %v3576_v32  ;;  %v3623_v25 = vadd.f32 %v14313_v59, %v3575_v51  ;;  %v14339_v51 = vld [vmem:[#allocation2 + $0xd1] sm:$0xff] }
 0x1d9   : > { %v14296_v44 = vpop.permute.xlu1 %3047  ;;  %v14298_v21 = vpop.permute.xlu0 %3042 }
 0x1da   : > { %3412 = vperm.xlu1 %12990, %v3290_v42   ;;  %3407 = vperm.xlu0 %12989, %v3289_v2   ;;  %v3665_v11 = vmax.f32 %v3624_v36, 0.0  ;;  %v3664_v42 = vmax.f32 %v3623_v25, 0.0  ;;  %v537_v2 = vld [vmem:[%s13477_s19 + $0xe8] sm:$0xff] }
 0x1db   : > { %579 = vst.msk [vmem:[#allocation2 + $0x100] sm:$0xff] %vm549_vm1, %v537_v2  ;;  %v14357_v2 = vld [vmem:[#allocation2 + $0xc7] sm:$0xff] }
 0x1dd   : > { %v14306_v58 = vpop.permute.xlu1 %2052  ;;  %v14308_v18 = vpop.permute.xlu0 %2047 }
 0x1de   : > { %3823 = vperm.xlu1 %12990, %v3712_v61   ;;  %3818 = vperm.xlu0 %12989, %v3711_v27  }
 0x1e1   : > { %v14317_v3 = vpop.permute.xlu1 %3382  ;;  %v14319_v63 = vpop.permute.xlu0 %3377 }
 0x1e2   : > { %752 = vperm.xlu1 %12990, %v615_v40   ;;  %747 = vperm.xlu0 %12989, %v614_v20   ;;  %v14341_v40 = vld [vmem:[#allocation2 + $0xc9] sm:$0xff] }
 0x1e5   : > { %v3794_v31 = vpop.permute.xlu1 %3793  ;;  %v3789_v16 = vpop.permute.xlu0 %3788 }
 0x1e6   : > { %v3952_v30 = vmul.f32 %v3794_v31, %v3665_v11  ;;  %v3951_v55 = vmul.f32 %v3789_v16, %v3664_v42  ;;  %1087 = vperm.xlu1 %12990, %v949_v34   ;;  %1082 = vperm.xlu0 %12989, %v948_v37   ;;  %v1192_v42 = vmul.f32 %v13643_v33, %v14112_v50 }
 0x1e7   : > { %v1527_v50 = vmul.f32 %v13654_v41, %v14152_v13  ;;  %v1526_v31 = vmul.f32 %v13654_v41, %v14154_v17  ;;  %v1862_v13 = vmul.f32 %v13665_v60, %v14176_v39  ;;  %v2197_v17 = vmul.f32 %v13683_v5, %v14198_v43  ;;  %v1953_v43 = vld [vmem:[#allocation2 + $0xc8] sm:$0xff] }
 0x1e8   : > { %3994 = vst.msk [vmem:[#allocation3 + $0x70] sm:$0xff] %vm3982_vm4, %v3952_v30  ;;  %3993 = vst.msk [vmem:[#allocation3 + $0x68] sm:$0xff] %vm3982_vm4, %v3951_v55  ;;  %v1233_v38 = vadd.f32 %v1192_v42, %v857_v22  ;;  %v2531_v22 = vmul.f32 %v13697_v28, %v14234_v14 }
 0x1e9   : > { %v14327_v56 = vpop.permute.xlu1 %722  ;;  %v14329_v61 = vpop.permute.xlu0 %717 }
 0x1ea   : > { %2417 = vperm.xlu1 %12990, %v14226_v10   ;;  %2412 = vperm.xlu0 %12989, %v14228_v23  }
 0x1ed   : > { %v14333_v27 = vpop.permute.xlu1 %1057  ;;  %v14335_v32 = vpop.permute.xlu0 %1052 }
 0x1ee   : > { %1422 = vperm.xlu1 %12990, %v14246_v47   ;;  %1417 = vperm.xlu0 %12989, %v14248_v29   ;;  %v1191_v47 = vmul.f32 %v13643_v33, %v14114_v54  ;;  %v14355_v29 = vld [vmem:[#allocation2 + $0xcf] sm:$0xff]  ;;  %v856_v54 = vmul.f32 %v13646_v48, %v14108_v12 }
 0x1ef   : > { %v4100_v20 = vld [vmem:[#allocation3 + $0x66] sm:$0xff]  ;;  %v4101_v36 = vld [vmem:[#allocation3 + $0x6e] sm:$0xff]  ;;  %v2957_v12 = vld [vmem:[#allocation2 + $0xd2] sm:$0xff] }
 0x1f0   : > { %v4037_v25 = vld [vmem:[#allocation3 + $0x65] sm:$0xff]  ;;  %v4137_v34 = vpack.c.bf16 %v4101_v36, %v4100_v20  ;;  %v4038_v37 = vld [vmem:[#allocation3 + $0x6d] sm:$0xff]  ;;  %v1232_v55 = vadd.f32 %v1191_v47, %v856_v54  ;;  %v1861_v20 = vmul.f32 %v13665_v60, %v14178_v46  ;;  %v2532_v47 = vmul.f32 %v13697_v28, %v14232_v4 }
 0x1f1   : > { %v14343_v10 = vpop.permute.xlu1 %2387  ;;  %v14345_v23 = vpop.permute.xlu0 %2382  ;;  %v4073_v11 = vpack.c.bf16 %v4038_v37, %v4037_v25  ;;  %v2956_v36 = vld [vmem:[#allocation2 + $0xca] sm:$0xff]  ;;  %v1568_v25 = vadd.f32 %v1527_v50, %v1233_v38  ;;  %v2196_v37 = vmul.f32 %v13683_v5, %v14200_v7  ;;  %v2867_v7 = vmul.f32 %v13715_v49, %v14274_v57 }
 0x1f2   : > { %2752 = vperm.xlu1 %12990, %v14339_v51   ;;  %2747 = vperm.xlu0 %12989, %v14341_v40   ;;  %v1954_v50 = vld [vmem:[#allocation2 + $0xd0] sm:$0xff]  ;;  %v2866_v38 = vmul.f32 %v13715_v49, %v14276_v53  ;;  %v3201_v57 = vmul.f32 %v13726_v24, %v14298_v21 }
 0x1f3   : > { %11771 = vmatmul.mubr.msk.bf16.gmra.mrb[24].mxu0 %vm3982_vm4, %v4137_v34  ;;  %11857 = vmatmul.mubr.msk.bf16.gmra.mrb[24].mxu1 %vm3982_vm4, %v4073_v11  ;;  %v1567_v34 = vadd.f32 %v1526_v31, %v1232_v55  ;;  %v1903_v42 = vadd.f32 %v1862_v13, %v1568_v25 }
 0x1f4   : > { %11774 = vmatprep.mubr.msk.bf16.mxu0 %vm13169_vm3, %v18273_v1  ;;  %11860 = vmatprep.mubr.msk.bf16.mxu1 %vm13169_vm3, %v18273_v1 }
 0x1f5   : > { %v14371_v16 = vpop.permute.xlu1 %1392  ;;  %v14373_v30 = vpop.permute.xlu0 %1387  ;;  %v1902_v46 = vadd.f32 %v1861_v20, %v1567_v34  ;;  %v2238_v54 = vadd.f32 %v2197_v17, %v1903_v42  ;;  %v3292_v34 = vld [vmem:[#allocation2 + $0xd3] sm:$0xff] }
 0x1f6   : > { %1757 = vperm.xlu1 %12990, %v14355_v29   ;;  %1752 = vperm.xlu0 %12989, %v14357_v2  }
 0x1f7   : > { %v2237_v31 = vadd.f32 %v2196_v37, %v1902_v46  ;;  %v2573_v4 = vadd.f32 %v2532_v47, %v2238_v54  ;;  %v3291_v37 = vld [vmem:[#allocation2 + $0xcb] sm:$0xff] }
 0x1f9   : > { %v14385_v11 = vpop.permute.xlu1 %2722  ;;  %v14387_v39 = vpop.permute.xlu0 %2717  ;;  %v2572_v14 = vadd.f32 %v2531_v22, %v2237_v31  ;;  %v2908_v42 = vadd.f32 %v2867_v7, %v2573_v4  ;;  %v3536_v22 = vmul.f32 %v13733_v9, %v14319_v63 }
 0x1fa   : > { %3087 = vperm.xlu1 %12990, %v2957_v12   ;;  %3082 = vperm.xlu0 %12989, %v2956_v36   ;;  %v3202_v36 = vmul.f32 %v13726_v24, %v14296_v44 }
 0x1fb   : > { %v2907_v54 = vadd.f32 %v2866_v38, %v2572_v14  ;;  %v3714_v38 = vld [vmem:[%s18268_s8 + $0x98] sm:$0xff] }
 0x1fc   : > { %v3243_v7 = vadd.f32 %v3202_v36, %v2908_v42  ;;  %v617_v36 = vld [vmem:[#allocation2 + $0xcd] sm:$0xff] }
 0x1fd   : > { %v14397_v13 = vpop.permute.xlu1 %1727  ;;  %v14399_v55 = vpop.permute.xlu0 %1722  ;;  %v3242_v4 = vadd.f32 %v3201_v57, %v2907_v54  ;;  %v616_v57 = vld [vmem:[#allocation2 + $0xc5] sm:$0xff]  ;;  %v539_v54 = vld [vmem:[%s13477_s19 + $0xf8] sm:$0xff] }
 0x1fe   : > { %v4261_v12 = vpop.f32.mrb[4].mxu0  ;;  %v4527_v20 = vpop.f32.mrb[4].mxu1  ;;  %2092 = vperm.xlu1 %12990, %v1954_v50   ;;  %2087 = vperm.xlu0 %12989, %v1953_v43   ;;  %v3537_v50 = vmul.f32 %v13733_v9, %v14317_v3  ;;  %v3713_v3 = vld [vmem:[%s18268_s8 + $0x90] sm:$0xff]  ;;  %581 = vst.msk [vmem:[#allocation2 + $0x110] sm:$0xff] %vm549_vm1, %v539_v54 }
 0x1ff   : > { %v14405_v25 = vadd.f32 %v4527_v20, %v4261_v12  ;;  %v11752_v17 = vpop.f32.mrb[5].mxu0  ;;  %v11838_v53 = vpop.f32.mrb[5].mxu1  ;;  %v3577_v20 = vadd.f32 %v3536_v22, %v3242_v4 }
 0x200   : > { %v4264_v46 = vpop.f32.mrb[6].mxu0  ;;  %v4530_v47 = vpop.f32.mrb[6].mxu1  ;;  %v3578_v63 = vadd.f32 %v3537_v50, %v3243_v7  ;;  %v540_v50 = vld [vmem:[%s13477_s19 + $0x100] sm:$0xff] }
 0x201   : > { %18286 = vst [vmem:[#allocation9_spill] sm:$0xff] %v14405_v25  ;;  %v14411_v44 = vadd.f32 %v4530_v47, %v4264_v46  ;;  %v11753_v43 = vpop.f32.mrb[7].mxu0  ;;  %v11839_v21 = vpop.f32.mrb[7].mxu1  ;;  %v951_v46 = vld [vmem:[#allocation2 + $0xce] sm:$0xff]  ;;  %v950_v47 = vld [vmem:[#allocation2 + $0xc6] sm:$0xff]  ;;  %582 = vst.msk [vmem:[#allocation2 + $0x118] sm:$0xff] %vm549_vm1, %v540_v50 }
 0x202   : > { %v14413_v31 = vpop.permute.xlu1 %3057  ;;  %v14415_v12 = vpop.permute.xlu0 %3052  ;;  %3422 = vperm.xlu1 %12990, %v3292_v34   ;;  %3417 = vperm.xlu0 %12989, %v3291_v37   ;;  %v3626_v53 = vadd.f32 %v14313_v59, %v3578_v63  ;;  %v3625_v34 = vadd.f32 %v14313_v59, %v3577_v20 }
 0x203   : > { %18287 = vst [vmem:[#allocation10_spill] sm:$0xff] %v14411_v44 }
 0x204   : > { %v3667_v22 = vmax.f32 %v3626_v53, 0.0  ;;  %v3666_v43 = vmax.f32 %v3625_v34, 0.0  ;;  %v14453_v53 = vld [vmem:[#allocation2 + $0xd9] sm:$0xff] }
 0x206   : > { %v14423_v14 = vpop.permute.xlu1 %2062  ;;  %v14425_v17 = vpop.permute.xlu0 %2057  ;;  %3833 = vperm.xlu1 %12990, %v3714_v38   ;;  %3828 = vperm.xlu0 %12989, %v3713_v3  }
 0x20a   : > { %v14429_v37 = vpop.permute.xlu1 %3392  ;;  %v14431_v42 = vpop.permute.xlu0 %3387  ;;  %762 = vperm.xlu1 %12990, %v617_v36   ;;  %757 = vperm.xlu0 %12989, %v616_v57   ;;  %v14451_v57 = vld [vmem:[#allocation2 + $0xe1] sm:$0xff] }
 0x20e   : > { %v3804_v21 = vpop.permute.xlu1 %3803  ;;  %v3799_v7 = vpop.permute.xlu0 %3798  ;;  %1097 = vperm.xlu1 %12990, %v951_v46   ;;  %1092 = vperm.xlu0 %12989, %v950_v47  }
 0x20f   : > { %v3954_v4 = vmul.f32 %v3804_v21, %v3667_v22  ;;  %v3953_v38 = vmul.f32 %v3799_v7, %v3666_v43  ;;  %v1193_v22 = vmul.f32 %v13643_v33, %v14222_v6  ;;  %v14466_v43 = vld [vmem:[#allocation2 + $0xdf] sm:$0xff]  ;;  %v14468_v21 = vld [vmem:[#allocation2 + $0xd7] sm:$0xff]  ;;  %v859_v7 = vmul.f32 %v13646_v48, %v14214_v15 }
 0x210   : > { %v1529_v6 = vmul.f32 %v13654_v41, %v14260_v52  ;;  %v1863_v52 = vmul.f32 %v13665_v60, %v14286_v35  ;;  %v2534_v35 = vmul.f32 %v13697_v28, %v14343_v10 }
 0x211   : > { %3996 = vst.msk [vmem:[#allocation3 + $0x80] sm:$0xff] %vm3982_vm4, %v3954_v4  ;;  %3995 = vst.msk [vmem:[#allocation3 + $0x78] sm:$0xff] %vm3982_vm4, %v3953_v38  ;;  %v1528_v4 = vmul.f32 %v13654_v41, %v14262_v26  ;;  %v2959_v26 = vld [vmem:[#allocation2 + $0xe2] sm:$0xff] }
 0x212   : > { %v14439_v3 = vpop.permute.xlu1 %732  ;;  %v14441_v63 = vpop.permute.xlu0 %727  ;;  %2427 = vperm.xlu1 %12990, %v14339_v51   ;;  %2422 = vperm.xlu0 %12989, %v14341_v40  }
 0x216   : > { %v14445_v20 = vpop.permute.xlu1 %1067  ;;  %v14447_v36 = vpop.permute.xlu0 %1062  ;;  %1432 = vperm.xlu1 %12990, %v14355_v29   ;;  %1427 = vperm.xlu0 %12989, %v14357_v2   ;;  %v1194_v2 = vmul.f32 %v13643_v33, %v14220_v8  ;;  %v858_v8 = vmul.f32 %v13646_v48, %v14216_v19  ;;  %v1864_v19 = vmul.f32 %v13665_v60, %v14284_v45 }
 0x218   : > { %v4102_v34 = vld [vmem:[#allocation3 + $0x76] sm:$0xff]  ;;  %v4103_v46 = vld [vmem:[#allocation3 + $0x7e] sm:$0xff]  ;;  %v1235_v15 = vadd.f32 %v1194_v2, %v859_v7  ;;  %v2533_v7 = vmul.f32 %v13697_v28, %v14345_v23  ;;  %v3294_v23 = vld [vmem:[#allocation2 + $0xe3] sm:$0xff] }
 0x219   : > { %v4039_v47 = vld [vmem:[#allocation3 + $0x75] sm:$0xff]  ;;  %v4138_v54 = vpack.c.bf16 %v4103_v46, %v4102_v34  ;;  %v4040_v50 = vld [vmem:[#allocation3 + $0x7d] sm:$0xff]  ;;  %v1234_v46 = vadd.f32 %v1193_v22, %v858_v8  ;;  %v1956_v8 = vld [vmem:[#allocation2 + $0xe0] sm:$0xff] }
 0x21a   : > { %v14455_v51 = vpop.permute.xlu1 %2397  ;;  %v14457_v40 = vpop.permute.xlu0 %2392  ;;  %2762 = vperm.xlu1 %12990, %v14451_v57   ;;  %2757 = vperm.xlu0 %12989, %v14453_v53   ;;  %v4074_v29 = vpack.c.bf16 %v4040_v50, %v4039_v47  ;;  %v2958_v47 = vld [vmem:[#allocation2 + $0xda] sm:$0xff] }
 0x21b   : > { %11775 = vmatmul.mubr.msk.bf16.gmra.mrb[28].mxu0 %vm3982_vm4, %v4138_v54  ;;  %v1570_v54 = vadd.f32 %v1529_v6, %v1235_v15  ;;  %v1569_v50 = vadd.f32 %v1528_v4, %v1234_v46  ;;  %v1955_v6 = vld [vmem:[#allocation2 + $0xd8] sm:$0xff]  ;;  %v2868_v15 = vmul.f32 %v13715_v49, %v14387_v39 }
 0x21c   : > { %11861 = vmatmul.mubr.msk.bf16.gmra.mrb[28].mxu1 %vm3982_vm4, %v4074_v29  ;;  %11778 = vmatprep.mubr.msk.bf16.mxu0 %vm13169_vm3, %v18273_v1  ;;  %v2199_v29 = vmul.f32 %v13683_v5, %v14306_v58 }
 0x21d   : > { %11864 = vmatprep.mubr.msk.bf16.mxu1 %vm13169_vm3, %v18273_v1  ;;  %v2198_v1 = vmul.f32 %v13683_v5, %v14308_v18  ;;  %v1905_v45 = vadd.f32 %v1864_v19, %v1570_v54  ;;  %v1904_v22 = vadd.f32 %v1863_v52, %v1569_v50  ;;  %v2869_v18 = vmul.f32 %v13715_v49, %v14385_v11  ;;  %v3293_v54 = vld [vmem:[#allocation2 + $0xdb] sm:$0xff] }
 0x21e   : > { %v14483_v38 = vpop.permute.xlu1 %1402  ;;  %v14485_v34 = vpop.permute.xlu0 %1397  ;;  %1767 = vperm.xlu1 %12990, %v14466_v43   ;;  %1762 = vperm.xlu0 %12989, %v14468_v21   ;;  %v3203_v11 = vmul.f32 %v13726_v24, %v14415_v12 }
 0x21f   : > { %v2240_v58 = vadd.f32 %v2199_v29, %v1905_v45  ;;  %v2239_v4 = vadd.f32 %v2198_v1, %v1904_v22  ;;  %v3204_v1 = vmul.f32 %v13726_v24, %v14413_v31 }
 0x221   : > { %v2575_v52 = vadd.f32 %v2534_v35, %v2240_v58  ;;  %v2574_v10 = vadd.f32 %v2533_v7, %v2239_v4  ;;  %v3539_v7 = vmul.f32 %v13733_v9, %v14429_v37  ;;  %v3715_v37 = vld [vmem:[%s18268_s8 + $0xa0] sm:$0xff] }
 0x222   : > { %v14497_v44 = vpop.permute.xlu1 %2732  ;;  %v14499_v2 = vpop.permute.xlu0 %2727  ;;  %3097 = vperm.xlu1 %12990, %v2959_v26   ;;  %3092 = vperm.xlu0 %12989, %v2958_v47  }
 0x223   : > { %v2910_v45 = vadd.f32 %v2869_v18, %v2575_v52  ;;  %v2909_v22 = vadd.f32 %v2868_v15, %v2574_v10  ;;  %v3716_v18 = vld [vmem:[%s18268_s8 + $0xa8] sm:$0xff] }
 0x225   : > { %v3245_v15 = vadd.f32 %v3204_v1, %v2910_v45  ;;  %v953_v45 = vld [vmem:[#allocation2 + $0xde] sm:$0xff] }
 0x226   : > { %v14509_v46 = vpop.permute.xlu1 %1737  ;;  %v4269_v19 = vpop.f32.mrb[8].mxu0  ;;  %2102 = vperm.xlu1 %12990, %v1956_v8   ;;  %2097 = vperm.xlu0 %12989, %v1955_v6   ;;  %v3538_v6 = vmul.f32 %v13733_v9, %v14431_v42  ;;  %v3244_v42 = vadd.f32 %v3203_v11, %v2909_v22  ;;  %v952_v22 = vld [vmem:[#allocation2 + $0xd6] sm:$0xff] }
 0x227   : > { %v4535_v26 = vpop.f32.mrb[8].mxu1  ;;  %v14511_v47 = vpop.permute.xlu0 %1732  ;;  %v3580_v52 = vadd.f32 %v3539_v7, %v3245_v15  ;;  %v542_v7 = vld [vmem:[%s13477_s19 + $0x110] sm:$0xff] }
 0x228   : > { %v14517_v50 = vadd.f32 %v4535_v26, %v4269_v19  ;;  %v11756_v39 = vpop.f32.mrb[9].mxu0  ;;  %v11842_v29 = vpop.f32.mrb[9].mxu1  ;;  %v3579_v10 = vadd.f32 %v3538_v6, %v3244_v42  ;;  %584 = vst.msk [vmem:[#allocation2 + $0x128] sm:$0xff] %vm549_vm1, %v542_v7 }
 0x229   : > { %v4272_v8 = vpop.f32.mrb[10].mxu0  ;;  %v4538_v35 = vpop.f32.mrb[10].mxu1  ;;  %v618_v39 = vld [vmem:[#allocation2 + $0xd5] sm:$0xff]  ;;  %v3628_v29 = vadd.f32 %v14313_v59, %v3580_v52 }
 0x22a   : > { %18288 = vst [vmem:[#allocation11_spill] sm:$0xff] %v14517_v50  ;;  %v14523_v58 = vadd.f32 %v4538_v35, %v4272_v8  ;;  %v11757_v31 = vpop.f32.mrb[11].mxu0  ;;  %v11843_v4 = vpop.f32.mrb[11].mxu1  ;;  %3432 = vperm.xlu1 %12990, %v3294_v23   ;;  %3427 = vperm.xlu0 %12989, %v3293_v54   ;;  %v619_v54 = vld [vmem:[#allocation2 + $0xdd] sm:$0xff]  ;;  %v3627_v8 = vadd.f32 %v14313_v59, %v3579_v10  ;;  %v541_v35 = vld [vmem:[%s13477_s19 + $0x108] sm:$0xff] }
 0x22b   : > { %v14525_v12 = vpop.permute.xlu1 %3067  ;;  %v14527_v19 = vpop.permute.xlu0 %3062  ;;  %583 = vst.msk [vmem:[#allocation2 + $0x120] sm:$0xff] %vm549_vm1, %v541_v35  ;;  %v3669_v6 = vmax.f32 %v3628_v29, 0.0  ;;  %v14565_v29 = vld [vmem:[#allocation2 + $0xe9] sm:$0xff] }
 0x22c   : > { %18289 = vst [vmem:[#allocation12_spill] sm:$0xff] %v14523_v58  ;;  %v3668_v31 = vmax.f32 %v3627_v8, 0.0 }
 0x22e   : > { %3843 = vperm.xlu1 %12990, %v3716_v18   ;;  %3838 = vperm.xlu0 %12989, %v3715_v37  }
 0x22f   : > { %v14535_v26 = vpop.permute.xlu1 %2072  ;;  %v14537_v23 = vpop.permute.xlu0 %2067 }
 0x232   : > { %772 = vperm.xlu1 %12990, %v619_v54   ;;  %767 = vperm.xlu0 %12989, %v618_v39   ;;  %v14563_v39 = vld [vmem:[#allocation2 + $0xf1] sm:$0xff] }
 0x233   : > { %v14541_v1 = vpop.permute.xlu1 %3402  ;;  %v14543_v11 = vpop.permute.xlu0 %3397 }
 0x236   : > { %1107 = vperm.xlu1 %12990, %v953_v45   ;;  %1102 = vperm.xlu0 %12989, %v952_v22  }
 0x237   : > { %v3814_v4 = vpop.permute.xlu1 %3813  ;;  %v3809_v18 = vpop.permute.xlu0 %3808 }
 0x238   : > { %v3956_v37 = vmul.f32 %v3814_v4, %v3669_v6  ;;  %v3955_v15 = vmul.f32 %v3809_v18, %v3668_v31  ;;  %v14577_v31 = vld [vmem:[#allocation2 + $0xef] sm:$0xff]  ;;  %v14579_v4 = vld [vmem:[#allocation2 + $0xe7] sm:$0xff]  ;;  %v861_v18 = vmul.f32 %v13646_v48, %v14327_v56 }
 0x23a   : > { %3998 = vst.msk [vmem:[#allocation3 + $0x90] sm:$0xff] %vm3982_vm4, %v3956_v37  ;;  %3997 = vst.msk [vmem:[#allocation3 + $0x88] sm:$0xff] %vm3982_vm4, %v3955_v15  ;;  %2437 = vperm.xlu1 %12990, %v14451_v57   ;;  %2432 = vperm.xlu0 %12989, %v14453_v53   ;;  %v1530_v37 = vmul.f32 %v13654_v41, %v14373_v30  ;;  %v18290_v15 = vmov 0.0  }
 0x23b   : > { %v14553_v42 = vpop.permute.xlu1 %742  ;;  %v14555_v52 = vpop.permute.xlu0 %737 }
 0x23e   : > { %1442 = vperm.xlu1 %12990, %v14466_v43   ;;  %1437 = vperm.xlu0 %12989, %v14468_v21   ;;  %v1196_v43 = vmul.f32 %v13643_v33, %v14333_v27  ;;  %v1195_v21 = vmul.f32 %v13643_v33, %v14335_v32  ;;  %v860_v27 = vmul.f32 %v13646_v48, %v14329_v61 }
 0x23f   : > { %v14559_v10 = vpop.permute.xlu1 %1077  ;;  %v14561_v54 = vpop.permute.xlu0 %1072  ;;  %v1531_v32 = vmul.f32 %v13654_v41, %v14371_v16  ;;  %v1866_v61 = vmul.f32 %v13665_v60, %v14397_v13  ;;  %v1865_v16 = vmul.f32 %v13665_v60, %v14399_v55  ;;  %v2200_v13 = vmul.f32 %v13683_v5, %v14425_v17 }
 0x240   : > { %v1237_v56 = vadd.f32 %v1196_v43, %v861_v18  ;;  %v2201_v43 = vmul.f32 %v13683_v5, %v14423_v14  ;;  %v2536_v18 = vmul.f32 %v13697_v28, %v14455_v51  ;;  %v2871_v17 = vmul.f32 %v13715_v49, %v14497_v44 }
 0x241   : > { %v4104_v8 = vld [vmem:[#allocation3 + $0x86] sm:$0xff]  ;;  %v4105_v57 = vld [vmem:[#allocation3 + $0x8e] sm:$0xff]  ;;  %v3206_v44 = vmul.f32 %v13726_v24, %v14525_v12 }
 0x242   : > { %v4041_v45 = vld [vmem:[#allocation3 + $0x85] sm:$0xff]  ;;  %2772 = vperm.xlu1 %12990, %v14563_v39   ;;  %2767 = vperm.xlu0 %12989, %v14565_v29   ;;  %v4139_v53 = vpack.c.bf16 %v4105_v57, %v4104_v8  ;;  %v4042_v22 = vld [vmem:[#allocation3 + $0x8d] sm:$0xff]  ;;  %v1236_v8 = vadd.f32 %v1195_v21, %v860_v27  ;;  %v2535_v27 = vmul.f32 %v13697_v28, %v14457_v40 }
 0x243   : > { %v14573_v35 = vpop.permute.xlu1 %2407  ;;  %v14575_v7 = vpop.permute.xlu0 %2402  ;;  %v4075_v6 = vpack.c.bf16 %v4042_v22, %v4041_v45  ;;  %v2961_v45 = vld [vmem:[#allocation2 + $0xf2] sm:$0xff]  ;;  %v1572_v22 = vadd.f32 %v1531_v32, %v1237_v56  ;;  %v1957_v56 = vld [vmem:[#allocation2 + $0xe8] sm:$0xff] }
 0x244   : > { %11779 = vmatmul.mubr.msk.bf16.gmra.mrb[32].mxu0 %vm3982_vm4, %v4139_v53  ;;  %v2960_v53 = vld [vmem:[#allocation2 + $0xea] sm:$0xff] }
 0x245   : > { %11865 = vmatmul.mubr.msk.bf16.gmra.mrb[32].mxu1 %vm3982_vm4, %v4075_v6  ;;  %11782 = vmatprep.mubr.msk.bf16.mxu0 %vm13169_vm3, %v18290_v15  ;;  %v1571_v6 = vadd.f32 %v1530_v37, %v1236_v8  ;;  %v1907_v55 = vadd.f32 %v1866_v61, %v1572_v22  ;;  %v1958_v37 = vld [vmem:[#allocation2 + $0xf0] sm:$0xff]  ;;  %v2870_v61 = vmul.f32 %v13715_v49, %v14499_v2 }
 0x246   : > { %1777 = vperm.xlu1 %12990, %v14577_v31   ;;  %1772 = vperm.xlu0 %12989, %v14579_v4   ;;  %v3205_v2 = vmul.f32 %v13726_v24, %v14527_v19 }
 0x247   : > { %v14599_v57 = vpop.permute.xlu1 %1412  ;;  %v14601_v30 = vpop.permute.xlu0 %1407  ;;  %11868 = vmatprep.mubr.msk.bf16.mxu1 %vm13169_vm3, %v18290_v15  ;;  %v1906_v21 = vadd.f32 %v1865_v16, %v1571_v6  ;;  %v2242_v14 = vadd.f32 %v2201_v43, %v1907_v55  ;;  %v3296_v43 = vld [vmem:[#allocation2 + $0xf3] sm:$0xff] }
 0x249   : > { %v2241_v8 = vadd.f32 %v2200_v13, %v1906_v21  ;;  %v2577_v51 = vadd.f32 %v2536_v18, %v2242_v14  ;;  %v3295_v13 = vld [vmem:[#allocation2 + $0xeb] sm:$0xff]  ;;  %v3541_v14 = vmul.f32 %v13733_v9, %v14541_v1 }
 0x24a   : > { %3107 = vperm.xlu1 %12990, %v2961_v45   ;;  %3102 = vperm.xlu0 %12989, %v2960_v53   ;;  %v3717_v1 = vld [vmem:[%s18268_s8 + $0xb0] sm:$0xff] }
 0x24b   : > { %v14613_v58 = vpop.permute.xlu1 %2742  ;;  %v14615_v32 = vpop.permute.xlu0 %2737  ;;  %v2576_v40 = vadd.f32 %v2535_v27, %v2241_v8  ;;  %v3540_v8 = vmul.f32 %v13733_v9, %v14543_v11 }
 0x24e   : > { %v4277_v16 = vpop.f32.mrb[12].mxu0  ;;  %v4543_v45 = vpop.f32.mrb[12].mxu1  ;;  %2112 = vperm.xlu1 %12990, %v1958_v37   ;;  %2107 = vperm.xlu0 %12989, %v1957_v56   ;;  %v2912_v37 = vadd.f32 %v2871_v17, %v2577_v51  ;;  %v2911_v56 = vadd.f32 %v2870_v61, %v2576_v40  ;;  %v3718_v17 = vld [vmem:[%s18268_s8 + $0xb8] sm:$0xff] }
 0x24f   : > { %v14621_v53 = vpop.permute.xlu1 %1747  ;;  %v14623_v22 = vadd.f32 %v4543_v45, %v4277_v16  ;;  %v14625_v6 = vpop.permute.xlu0 %1742 }
 0x250   : > { %v11760_v55 = vpop.f32.mrb[13].mxu0  ;;  %v11846_v21 = vpop.f32.mrb[13].mxu1  ;;  %v3247_v61 = vadd.f32 %v3206_v44, %v2912_v37  ;;  %v3246_v11 = vadd.f32 %v3205_v2, %v2911_v56  ;;  %v955_v37 = vld [vmem:[#allocation2 + $0xee] sm:$0xff]  ;;  %v954_v56 = vld [vmem:[#allocation2 + $0xe6] sm:$0xff] }
 0x251   : > { %18291 = vst [vmem:[#allocation13_spill] sm:$0xff] %v14623_v22  ;;  %v4280_v18 = vpop.f32.mrb[14].mxu0  ;;  %v4546_v27 = vpop.f32.mrb[14].mxu1  ;;  %v620_v55 = vld [vmem:[#allocation2 + $0xe5] sm:$0xff] }
 0x252   : > { %v14635_v16 = vadd.f32 %v4546_v27, %v4280_v18  ;;  %v11761_v45 = vpop.f32.mrb[15].mxu0  ;;  %v11847_v22 = vpop.f32.mrb[15].mxu1  ;;  %3442 = vperm.xlu1 %12990, %v3296_v43   ;;  %3437 = vperm.xlu0 %12989, %v3295_v13   ;;  %v3582_v51 = vadd.f32 %v3541_v14, %v3247_v61  ;;  %v3581_v40 = vadd.f32 %v3540_v8, %v3246_v11  ;;  %v621_v13 = vld [vmem:[#allocation2 + $0xed] sm:$0xff]  ;;  %v543_v27 = vld [vmem:[%s13477_s19 + $0x118] sm:$0xff]  ;;  %v544_v14 = vld [vmem:[%s13477_s19 + $0x120] sm:$0xff] }
 0x253   : > { %v14637_v12 = vpop.permute.xlu1 %3077  ;;  %v14639_v19 = vpop.permute.xlu0 %3072  ;;  %585 = vst.msk [vmem:[#allocation2 + $0x130] sm:$0xff] %vm549_vm1, %v543_v27  ;;  %586 = vst.msk [vmem:[#allocation2 + $0x138] sm:$0xff] %vm549_vm1, %v544_v14 }
 0x254   : > { %18292 = vst [vmem:[#allocation14_spill] sm:$0xff] %v14635_v16  ;;  %v3630_v21 = vadd.f32 %v14313_v59, %v3582_v51  ;;  %v3629_v18 = vadd.f32 %v14313_v59, %v3581_v40 }
 0x256   : > { %3853 = vperm.xlu1 %12990, %v3718_v17   ;;  %3848 = vperm.xlu0 %12989, %v3717_v1   ;;  %v3671_v8 = vmax.f32 %v3630_v21, 0.0  ;;  %v3670_v45 = vmax.f32 %v3629_v18, 0.0  ;;  %v14675_v21 = vld [vmem:[#allocation2 + $0x101] sm:$0xff]  ;;  %v14677_v18 = vld [vmem:[#allocation2 + $0xf9] sm:$0xff] }
 0x257   : > { %v14647_v22 = vpop.permute.xlu1 %2082  ;;  %v14649_v43 = vpop.permute.xlu0 %2077 }
 0x25a   : > { %782 = vperm.xlu1 %12990, %v621_v13   ;;  %777 = vperm.xlu0 %12989, %v620_v55  }
 0x25b   : > { %v14653_v44 = vpop.permute.xlu1 %3412  ;;  %v14655_v2 = vpop.permute.xlu0 %3407 }
 0x25e   : > { %1117 = vperm.xlu1 %12990, %v955_v37   ;;  %1112 = vperm.xlu0 %12989, %v954_v56  }
 0x25f   : > { %v3824_v17 = vpop.permute.xlu1 %3823  ;;  %v3819_v1 = vpop.permute.xlu0 %3818 }
 0x260   : > { %v3958_v61 = vmul.f32 %v3824_v17, %v3671_v8  ;;  %v3957_v11 = vmul.f32 %v3819_v1, %v3670_v45  ;;  %v14689_v17 = vld [vmem:[#allocation2 + $0xff] sm:$0xff]  ;;  %v14691_v1 = vld [vmem:[#allocation2 + $0xf7] sm:$0xff] }
 0x262   : > { %4000 = vst.msk [vmem:[#allocation3 + $0xa0] sm:$0xff] %vm3982_vm4, %v3958_v61  ;;  %3999 = vst.msk [vmem:[#allocation3 + $0x98] sm:$0xff] %vm3982_vm4, %v3957_v11  ;;  %2447 = vperm.xlu1 %12990, %v14563_v39   ;;  %2442 = vperm.xlu0 %12989, %v14565_v29   ;;  %v863_v61 = vmul.f32 %v13646_v48, %v14439_v3  ;;  %v1532_v11 = vmul.f32 %v13654_v41, %v14485_v34 }
 0x263   : > { %v14665_v51 = vpop.permute.xlu1 %752  ;;  %v14667_v40 = vpop.permute.xlu0 %747 }
 0x266   : > { %1452 = vperm.xlu1 %12990, %v14577_v31   ;;  %1447 = vperm.xlu0 %12989, %v14579_v4   ;;  %v1198_v31 = vmul.f32 %v13643_v33, %v14445_v20  ;;  %v1197_v4 = vmul.f32 %v13643_v33, %v14447_v36  ;;  %v862_v20 = vmul.f32 %v13646_v48, %v14441_v63 }
 0x267   : > { %v14671_v13 = vpop.permute.xlu1 %1087  ;;  %v14673_v55 = vpop.permute.xlu0 %1082  ;;  %v1533_v36 = vmul.f32 %v13654_v41, %v14483_v38  ;;  %v1868_v63 = vmul.f32 %v13665_v60, %v14509_v46  ;;  %v1867_v38 = vmul.f32 %v13665_v60, %v14511_v47  ;;  %v2202_v46 = vmul.f32 %v13683_v5, %v14537_v23 }
 0x268   : > { %v1239_v3 = vadd.f32 %v1198_v31, %v863_v61  ;;  %v2203_v31 = vmul.f32 %v13683_v5, %v14535_v26  ;;  %v2538_v61 = vmul.f32 %v13697_v28, %v14573_v35  ;;  %v2873_v23 = vmul.f32 %v13715_v49, %v14613_v58 }
 0x269   : > { %v4106_v37 = vld [vmem:[#allocation3 + $0x96] sm:$0xff]  ;;  %v4107_v39 = vld [vmem:[#allocation3 + $0x9e] sm:$0xff]  ;;  %v3208_v58 = vmul.f32 %v13726_v24, %v14637_v12 }
 0x26a   : > { %v4043_v56 = vld [vmem:[#allocation3 + $0x95] sm:$0xff]  ;;  %2782 = vperm.xlu1 %12990, %v14675_v21   ;;  %2777 = vperm.xlu0 %12989, %v14677_v18   ;;  %v4140_v29 = vpack.c.bf16 %v4107_v39, %v4106_v37  ;;  %v4044_v27 = vld [vmem:[#allocation3 + $0x9d] sm:$0xff]  ;;  %v1238_v37 = vadd.f32 %v1197_v4, %v862_v20  ;;  %v2537_v20 = vmul.f32 %v13697_v28, %v14575_v7 }
 0x26b   : > { %v14685_v14 = vpop.permute.xlu1 %2417  ;;  %v14687_v8 = vpop.permute.xlu0 %2412  ;;  %v4076_v45 = vpack.c.bf16 %v4044_v27, %v4043_v56  ;;  %v2963_v56 = vld [vmem:[#allocation2 + $0x102] sm:$0xff]  ;;  %v1574_v27 = vadd.f32 %v1533_v36, %v1239_v3  ;;  %v1959_v3 = vld [vmem:[#allocation2 + $0xf8] sm:$0xff] }
 0x26c   : > { %11783 = vmatmul.mubr.msk.bf16.gmra.mrb[36].mxu0 %vm3982_vm4, %v4140_v29  ;;  %v2962_v29 = vld [vmem:[#allocation2 + $0xfa] sm:$0xff] }
 0x26d   : > { %11869 = vmatmul.mubr.msk.bf16.gmra.mrb[36].mxu1 %vm3982_vm4, %v4076_v45  ;;  %11786 = vmatprep.mubr.msk.bf16.mxu0 %vm13169_vm3, %v18290_v15  ;;  %v1573_v45 = vadd.f32 %v1532_v11, %v1238_v37  ;;  %v1909_v47 = vadd.f32 %v1868_v63, %v1574_v27  ;;  %v1960_v11 = vld [vmem:[#allocation2 + $0x100] sm:$0xff]  ;;  %v2872_v63 = vmul.f32 %v13715_v49, %v14615_v32 }
 0x26e   : > { %1787 = vperm.xlu1 %12990, %v14689_v17   ;;  %1782 = vperm.xlu0 %12989, %v14691_v1   ;;  %v3207_v32 = vmul.f32 %v13726_v24, %v14639_v19 }
 0x26f   : > { %v14711_v39 = vpop.permute.xlu1 %1422  ;;  %v14713_v34 = vpop.permute.xlu0 %1417  ;;  %11872 = vmatprep.mubr.msk.bf16.mxu1 %vm13169_vm3, %v18290_v15  ;;  %v1908_v4 = vadd.f32 %v1867_v38, %v1573_v45  ;;  %v2244_v26 = vadd.f32 %v2203_v31, %v1909_v47  ;;  %v3298_v31 = vld [vmem:[#allocation2 + $0x103] sm:$0xff] }
 0x271   : > { %v2243_v37 = vadd.f32 %v2202_v46, %v1908_v4  ;;  %v2579_v35 = vadd.f32 %v2538_v61, %v2244_v26  ;;  %v3297_v46 = vld [vmem:[#allocation2 + $0xfb] sm:$0xff]  ;;  %v3543_v26 = vmul.f32 %v13733_v9, %v14653_v44 }
 0x272   : > { %3117 = vperm.xlu1 %12990, %v2963_v56   ;;  %3112 = vperm.xlu0 %12989, %v2962_v29   ;;  %v3719_v44 = vld [vmem:[%s18268_s8 + $0xc0] sm:$0xff] }
 0x273   : > { %v14725_v16 = vpop.permute.xlu1 %2752  ;;  %v14727_v36 = vpop.permute.xlu0 %2747  ;;  %v2578_v7 = vadd.f32 %v2537_v20, %v2243_v37  ;;  %v3542_v37 = vmul.f32 %v13733_v9, %v14655_v2 }
 0x276   : > { %v4285_v38 = vpop.f32.mrb[16].mxu0  ;;  %v4551_v56 = vpop.f32.mrb[16].mxu1  ;;  %2122 = vperm.xlu1 %12990, %v1960_v11   ;;  %2117 = vperm.xlu0 %12989, %v1959_v3   ;;  %v2914_v11 = vadd.f32 %v2873_v23, %v2579_v35  ;;  %v2913_v3 = vadd.f32 %v2872_v63, %v2578_v7  ;;  %v3720_v23 = vld [vmem:[%s18268_s8 + $0xc8] sm:$0xff] }
 0x277   : > { %v14733_v29 = vpop.permute.xlu1 %1757  ;;  %v14735_v27 = vadd.f32 %v4551_v56, %v4285_v38  ;;  %v14737_v45 = vpop.permute.xlu0 %1752 }
 0x278   : > { %v11764_v47 = vpop.f32.mrb[17].mxu0  ;;  %v11850_v4 = vpop.f32.mrb[17].mxu1  ;;  %v3249_v63 = vadd.f32 %v3208_v58, %v2914_v11  ;;  %v3248_v2 = vadd.f32 %v3207_v32, %v2913_v3  ;;  %v957_v11 = vld [vmem:[#allocation2 + $0xfe] sm:$0xff]  ;;  %v956_v3 = vld [vmem:[#allocation2 + $0xf6] sm:$0xff] }
 0x279   : > { %18293 = vst [vmem:[#allocation15_spill] sm:$0xff] %v14735_v27  ;;  %v4288_v61 = vpop.f32.mrb[18].mxu0  ;;  %v4554_v20 = vpop.f32.mrb[18].mxu1  ;;  %v622_v47 = vld [vmem:[#allocation2 + $0xf5] sm:$0xff] }
 0x27a   : > { %v14747_v38 = vadd.f32 %v4554_v20, %v4288_v61  ;;  %v11765_v56 = vpop.f32.mrb[19].mxu0  ;;  %v11851_v27 = vpop.f32.mrb[19].mxu1  ;;  %3452 = vperm.xlu1 %12990, %v3298_v31   ;;  %3447 = vperm.xlu0 %12989, %v3297_v46   ;;  %v3584_v35 = vadd.f32 %v3543_v26, %v3249_v63  ;;  %v3583_v7 = vadd.f32 %v3542_v37, %v3248_v2  ;;  %v623_v46 = vld [vmem:[#allocation2 + $0xfd] sm:$0xff]  ;;  %v545_v20 = vld [vmem:[%s13477_s19 + $0x128] sm:$0xff]  ;;  %v546_v26 = vld [vmem:[%s13477_s19 + $0x130] sm:$0xff] }
 0x27b   : > { %v14749_v12 = vpop.permute.xlu1 %3087  ;;  %v14751_v19 = vpop.permute.xlu0 %3082  ;;  %587 = vst.msk [vmem:[#allocation2 + $0x140] sm:$0xff] %vm549_vm1, %v545_v20  ;;  %588 = vst.msk [vmem:[#allocation2 + $0x148] sm:$0xff] %vm549_vm1, %v546_v26 }
 0x27c   : > { %18294 = vst [vmem:[#allocation16_spill] sm:$0xff] %v14747_v38  ;;  %v3632_v4 = vadd.f32 %v14313_v59, %v3584_v35  ;;  %v3631_v61 = vadd.f32 %v14313_v59, %v3583_v7 }
 0x27e   : > { %3863 = vperm.xlu1 %12990, %v3720_v23   ;;  %3858 = vperm.xlu0 %12989, %v3719_v44   ;;  %v3673_v37 = vmax.f32 %v3632_v4, 0.0  ;;  %v3672_v56 = vmax.f32 %v3631_v61, 0.0  ;;  %v14789_v4 = vld [vmem:[#allocation2 + $0x109] sm:$0xff] }
 0x27f   : > { %v14759_v27 = vpop.permute.xlu1 %2092  ;;  %v14761_v31 = vpop.permute.xlu0 %2087 }
 0x282   : > { %792 = vperm.xlu1 %12990, %v623_v46   ;;  %787 = vperm.xlu0 %12989, %v622_v47   ;;  %v14787_v47 = vld [vmem:[#allocation2 + $0x111] sm:$0xff] }
 0x283   : > { %v14765_v58 = vpop.permute.xlu1 %3422  ;;  %v14767_v32 = vpop.permute.xlu0 %3417 }
 0x286   : > { %1127 = vperm.xlu1 %12990, %v957_v11   ;;  %1122 = vperm.xlu0 %12989, %v956_v3  }
 0x287   : > { %v3834_v23 = vpop.permute.xlu1 %3833  ;;  %v3829_v44 = vpop.permute.xlu0 %3828 }
 0x288   : > { %v3960_v63 = vmul.f32 %v3834_v23, %v3673_v37  ;;  %v3959_v59 = vmul.f32 %v3829_v44, %v3672_v56  ;;  %v14801_v56 = vld [vmem:[#allocation2 + $0x10f] sm:$0xff]  ;;  %v14803_v23 = vld [vmem:[#allocation2 + $0x107] sm:$0xff]  ;;  %v865_v44 = vmul.f32 %v13646_v48, %v14553_v42 }
 0x28a   : > { %4002 = vst.msk [vmem:[#allocation3 + $0xb0] sm:$0xff] %vm3982_vm4, %v3960_v63  ;;  %4001 = vst.msk [vmem:[#allocation3 + $0xa8] sm:$0xff] %vm3982_vm4, %v3959_v59  ;;  %2457 = vperm.xlu1 %12990, %v14675_v21   ;;  %2452 = vperm.xlu0 %12989, %v14677_v18   ;;  %v1534_v63 = vmul.f32 %v13654_v41, %v14601_v30 }
 0x28b   : > { %v14777_v2 = vpop.permute.xlu1 %762  ;;  %v14779_v35 = vpop.permute.xlu0 %757 }
 0x28e   : > { %1462 = vperm.xlu1 %12990, %v14689_v17   ;;  %1457 = vperm.xlu0 %12989, %v14691_v1   ;;  %v1200_v17 = vmul.f32 %v13643_v33, %v14559_v10  ;;  %v1199_v1 = vmul.f32 %v13643_v33, %v14561_v54  ;;  %v864_v10 = vmul.f32 %v13646_v48, %v14555_v52 }
 0x28f   : > { %v14783_v7 = vpop.permute.xlu1 %1097  ;;  %v14785_v46 = vpop.permute.xlu0 %1092  ;;  %v1535_v54 = vmul.f32 %v13654_v41, %v14599_v57  ;;  %v1870_v52 = vmul.f32 %v13665_v60, %v14621_v53  ;;  %v1869_v57 = vmul.f32 %v13665_v60, %v14625_v6  ;;  %v2204_v53 = vmul.f32 %v13683_v5, %v14649_v43 }
 0x290   : > { %v1241_v42 = vadd.f32 %v1200_v17, %v865_v44  ;;  %v1240_v59 = vadd.f32 %v1199_v1, %v864_v10  ;;  %v2205_v17 = vmul.f32 %v13683_v5, %v14647_v22  ;;  %v2539_v44 = vmul.f32 %v13697_v28, %v14687_v8 }
 0x291   : > { %v4108_v61 = vld [vmem:[#allocation3 + $0xa6] sm:$0xff]  ;;  %v4109_v21 = vld [vmem:[#allocation3 + $0xae] sm:$0xff]  ;;  %v2875_v43 = vmul.f32 %v13715_v49, %v14725_v16  ;;  %v3210_v16 = vmul.f32 %v13726_v24, %v14749_v12 }
 0x292   : > { %v4045_v11 = vld [vmem:[#allocation3 + $0xa5] sm:$0xff]  ;;  %2792 = vperm.xlu1 %12990, %v14787_v47   ;;  %2787 = vperm.xlu0 %12989, %v14789_v4   ;;  %v4141_v18 = vpack.c.bf16 %v4109_v21, %v4108_v61  ;;  %v4046_v3 = vld [vmem:[#allocation3 + $0xad] sm:$0xff]  ;;  %v2965_v21 = vld [vmem:[#allocation2 + $0x112] sm:$0xff] }
 0x293   : > { %v14797_v20 = vpop.permute.xlu1 %2427  ;;  %v14799_v26 = vpop.permute.xlu0 %2422  ;;  %v4077_v37 = vpack.c.bf16 %v4046_v3, %v4045_v11  ;;  %v2964_v11 = vld [vmem:[#allocation2 + $0x10a] sm:$0xff]  ;;  %v1575_v3 = vadd.f32 %v1534_v63, %v1240_v59 }
 0x294   : > { %11787 = vmatmul.mubr.msk.bf16.gmra.mrb[40].mxu0 %vm3982_vm4, %v4141_v18  ;;  %v1576_v18 = vadd.f32 %v1535_v54, %v1241_v42  ;;  %v1962_v63 = vld [vmem:[#allocation2 + $0x110] sm:$0xff]  ;;  %v1961_v42 = vld [vmem:[#allocation2 + $0x108] sm:$0xff] }
 0x295   : > { %11873 = vmatmul.mubr.msk.bf16.gmra.mrb[40].mxu1 %vm3982_vm4, %v4077_v37  ;;  %11790 = vmatprep.mubr.msk.bf16.mxu0 %vm13169_vm3, %v18290_v15  ;;  %v1910_v1 = vadd.f32 %v1869_v57, %v1575_v3  ;;  %v2540_v37 = vmul.f32 %v13697_v28, %v14685_v14 }
 0x296   : > { %1797 = vperm.xlu1 %12990, %v14801_v56   ;;  %1792 = vperm.xlu0 %12989, %v14803_v23   ;;  %v1911_v6 = vadd.f32 %v1870_v52, %v1576_v18  ;;  %v2874_v52 = vmul.f32 %v13715_v49, %v14727_v36  ;;  %v3209_v36 = vmul.f32 %v13726_v24, %v14751_v19 }
 0x297   : > { %v14823_v61 = vpop.permute.xlu1 %1432  ;;  %v14825_v30 = vpop.permute.xlu0 %1427  ;;  %11876 = vmatprep.mubr.msk.bf16.mxu1 %vm13169_vm3, %v18290_v15  ;;  %v2245_v59 = vadd.f32 %v2204_v53, %v1910_v1  ;;  %v3299_v53 = vld [vmem:[#allocation2 + $0x10b] sm:$0xff] }
 0x298   : > { %v2246_v22 = vadd.f32 %v2205_v17, %v1911_v6  ;;  %v3300_v17 = vld [vmem:[#allocation2 + $0x113] sm:$0xff] }
 0x299   : > { %v2580_v8 = vadd.f32 %v2539_v44, %v2245_v59  ;;  %v3544_v59 = vmul.f32 %v13733_v9, %v14767_v32 }
 0x29a   : > { %3127 = vperm.xlu1 %12990, %v2965_v21   ;;  %3122 = vperm.xlu0 %12989, %v2964_v11   ;;  %v2581_v14 = vadd.f32 %v2540_v37, %v2246_v22  ;;  %v3545_v22 = vmul.f32 %v13733_v9, %v14765_v58  ;;  %v3721_v58 = vld [vmem:[%s18268_s8 + $0xd0] sm:$0xff] }
 0x29b   : > { %v14837_v10 = vpop.permute.xlu1 %2762  ;;  %v14839_v54 = vpop.permute.xlu0 %2757 }
 0x29e   : > { %v4293_v57 = vpop.f32.mrb[20].mxu0  ;;  %v4559_v21 = vpop.f32.mrb[20].mxu1  ;;  %2132 = vperm.xlu1 %12990, %v1962_v63   ;;  %2127 = vperm.xlu0 %12989, %v1961_v42   ;;  %v2916_v63 = vadd.f32 %v2875_v43, %v2581_v14  ;;  %v2915_v42 = vadd.f32 %v2874_v52, %v2580_v8  ;;  %v3722_v52 = vld [vmem:[%s18268_s8 + $0xd8] sm:$0xff] }
 0x29f   : > { %v14845_v11 = vpop.permute.xlu1 %1767  ;;  %v14847_v18 = vadd.f32 %v4559_v21, %v4293_v57  ;;  %v14849_v3 = vpop.permute.xlu0 %1762  ;;  %v547_v8 = vld [vmem:[%s13477_s19 + $0x138] sm:$0xff] }
 0x2a0   : > { %v11768_v6 = vpop.f32.mrb[21].mxu0  ;;  %v11854_v1 = vpop.f32.mrb[21].mxu1  ;;  %v3251_v32 = vadd.f32 %v3210_v16, %v2916_v63  ;;  %v3250_v14 = vadd.f32 %v3209_v36, %v2915_v42  ;;  %589 = vst.msk [vmem:[#allocation2 + $0x150] sm:$0xff] %vm549_vm1, %v547_v8  ;;  %v14881_v16 = vld [vmem:[%s18264_s4] ss:$0 sm:$0xff] }
 0x2a1   : > { %18295 = vst [vmem:[#allocation17_spill] sm:$0xff] %v14847_v18  ;;  %v4296_v37 = vpop.f32.mrb[22].mxu0  ;;  %v4562_v44 = vpop.f32.mrb[22].mxu1 }
 0x2a2   : > { %v14859_v57 = vadd.f32 %v4562_v44, %v4296_v37  ;;  %v11769_v21 = vpop.f32.mrb[23].mxu0  ;;  %v11855_v12 = vpop.f32.mrb[23].mxu1  ;;  %3462 = vperm.xlu1 %12990, %v3300_v17   ;;  %3457 = vperm.xlu0 %12989, %v3299_v53   ;;  %v3586_v6 = vadd.f32 %v3545_v22, %v3251_v32  ;;  %v3585_v1 = vadd.f32 %v3544_v59, %v3250_v14  ;;  %v625_v37 = vld [vmem:[#allocation2 + $0x10d] sm:$0xff]  ;;  %v624_v44 = vld [vmem:[#allocation2 + $0x105] sm:$0xff] }
 0x2a3   : > { %v14861_v19 = vpop.permute.xlu1 %3097  ;;  %v14863_v43 = vpop.permute.xlu0 %3092  ;;  %v548_v21 = vld [vmem:[%s13477_s19 + $0x140] sm:$0xf]  ;;  %v959_v59 = vld [vmem:[#allocation2 + $0x10e] sm:$0xff]  ;;  %v958_v12 = vld [vmem:[#allocation2 + $0x106] sm:$0xff]  ;;  %s13109_s19 = scalar_lea.vmem %s13108_s0, 32 }
 0x2a4   : > { %18296 = vst [vmem:[#allocation18_spill] sm:$0xff] %v14859_v57  ;;  %v3634_v36 = vadd.f32 %v14881_v16, %v3586_v6  ;;  %v3633_v63 = vadd.f32 %v14881_v16, %v3585_v1  ;;  %591 = vst.msk [vmem:[#allocation2 + $0x158] sm:$0xf] %vm590_vm5, %v548_v21  ;;  %v867_v57 = vmul.f32 %v13646_v48, %v14665_v51  ;;  %p13111_p1 = scmp.lt.s32.totalorder %s13109_s19, %s13103_s25 }
 0x2a6   : > { %3873 = vperm.xlu1 %12990, %v3722_v52   ;;  %3868 = vperm.xlu0 %12989, %v3721_v58   ;;  %v3675_v52 = vmax.f32 %v3634_v36, 0.0  ;;  %v3674_v58 = vmax.f32 %v3633_v63, 0.0  ;;  %v14903_v36 = vld [vmem:[#allocation2 + $0x121] sm:$0xff]  ;;  %v14905_v63 = vld [vmem:[#allocation2 + $0x119] sm:$0xff]  ;;  %p13112_p2 = por %p13111_p1, %p13110_p0 }
 0x2a7   : > { %v14873_v17 = vpop.permute.xlu1 %2102  ;;  %v14875_v53 = vpop.permute.xlu0 %2097 }
 0x2a8   : > { %v2208_v50 = vmul.f32 %v13683_v5, %v14875_v53  ;;  %p13113_p3 = pnand %p13112_p2, %p13106_p13 }
 0x2aa   : > { %802 = vperm.xlu1 %12990, %v625_v37   ;;  %797 = vperm.xlu0 %12989, %v624_v44  }
 0x2ab   : > { %v14885_v42 = vpop.permute.xlu1 %3432  ;;  %v14887_v22 = vpop.permute.xlu0 %3427 }
 0x2ae   : > { %1137 = vperm.xlu1 %12990, %v959_v59   ;;  %1132 = vperm.xlu0 %12989, %v958_v12  }
 0x2af   : > { %v3844_v32 = vpop.permute.xlu1 %3843  ;;  %v3839_v14 = vpop.permute.xlu0 %3838 }
 0x2b0   : > { %v3962_v8 = vmul.f32 %v3844_v32, %v3675_v52  ;;  %v3961_v37 = vmul.f32 %v3839_v14, %v3674_v58 }
 0x2b2   : > { %4004 = vst.msk [vmem:[#allocation3 + $0xc0] sm:$0xff] %vm3982_vm4, %v3962_v8  ;;  %4003 = vst.msk [vmem:[#allocation3 + $0xb8] sm:$0xff] %vm3982_vm4, %v3961_v37  ;;  %2467 = vperm.xlu1 %12990, %v14787_v47   ;;  %2462 = vperm.xlu0 %12989, %v14789_v4   ;;  %v14917_v8 = vld [vmem:[#allocation2 + $0x11f] sm:$0xff]  ;;  %v14919_v37 = vld [vmem:[#allocation2 + $0x117] sm:$0xff] }
 0x2b3   : > { %v14893_v6 = vpop.permute.xlu1 %772  ;;  %v14895_v1 = vpop.permute.xlu0 %767 }
 0x2b6   : > { %1472 = vperm.xlu1 %12990, %v14801_v56   ;;  %1467 = vperm.xlu0 %12989, %v14803_v23   ;;  %v1202_v56 = vmul.f32 %v13643_v33, %v14671_v13  ;;  %v1201_v23 = vmul.f32 %v13643_v33, %v14673_v55  ;;  %v866_v13 = vmul.f32 %v13646_v48, %v14667_v40 }
 0x2b7   : > { %v14899_v44 = vpop.permute.xlu1 %1107  ;;  %v14901_v21 = vpop.permute.xlu0 %1102  ;;  %v1537_v55 = vmul.f32 %v13654_v41, %v14711_v39  ;;  %v1872_v40 = vmul.f32 %v13665_v60, %v14733_v29  ;;  %v1871_v39 = vmul.f32 %v13665_v60, %v14737_v45  ;;  %v2206_v29 = vmul.f32 %v13683_v5, %v14761_v31 }
 0x2b8   : > { %v1243_v51 = vadd.f32 %v1202_v56, %v867_v57  ;;  %v2207_v57 = vmul.f32 %v13683_v5, %v14759_v27  ;;  %v2877_v31 = vmul.f32 %v13715_v49, %v14837_v10  ;;  %v3212_v10 = vmul.f32 %v13726_v24, %v14861_v19 }
 0x2b9   : > { %v4110_v59 = vld [vmem:[#allocation3 + $0xb6] sm:$0xff]  ;;  %v4111_v47 = vld [vmem:[#allocation3 + $0xbe] sm:$0xff] }
 0x2ba   : > { %v4047_v12 = vld [vmem:[#allocation3 + $0xb5] sm:$0xff]  ;;  %2802 = vperm.xlu1 %12990, %v14903_v36   ;;  %2797 = vperm.xlu0 %12989, %v14905_v63   ;;  %v4142_v4 = vpack.c.bf16 %v4111_v47, %v4110_v59  ;;  %v4048_v52 = vld [vmem:[#allocation3 + $0xbd] sm:$0xff]  ;;  %v1536_v59 = vmul.f32 %v13654_v41, %v14713_v34  ;;  %v1242_v47 = vadd.f32 %v1201_v23, %v866_v13 }
 0x2bb   : > { %v14913_v58 = vpop.permute.xlu1 %2437  ;;  %v14915_v32 = vpop.permute.xlu0 %2432  ;;  %v4078_v14 = vpack.c.bf16 %v4048_v52, %v4047_v12  ;;  %v2966_v52 = vld [vmem:[#allocation2 + $0x11a] sm:$0xff]  ;;  %v2542_v23 = vmul.f32 %v13697_v28, %v14797_v20  ;;  %v2541_v13 = vmul.f32 %v13697_v28, %v14799_v26 }
 0x2bc   : > { %11791 = vmatmul.mubr.msk.bf16.gmra.mrb[44].mxu0 %vm3982_vm4, %v4142_v4  ;;  %v2967_v4 = vld [vmem:[#allocation2 + $0x122] sm:$0xff]  ;;  %v1577_v18 = vadd.f32 %v1536_v59, %v1242_v47 }
 0x2bd   : > { %11877 = vmatmul.mubr.msk.bf16.gmra.mrb[44].mxu1 %vm3982_vm4, %v4078_v14  ;;  %11794 = vmatprep.mubr.msk.bf16.mxu0 %vm13169_vm3, %v18290_v15  ;;  %v1578_v14 = vadd.f32 %v1537_v55, %v1243_v51  ;;  %v1964_v59 = vld [vmem:[#allocation2 + $0x120] sm:$0xff]  ;;  %v1963_v51 = vld [vmem:[#allocation2 + $0x118] sm:$0xff] }
 0x2be   : > { %1807 = vperm.xlu1 %12990, %v14917_v8   ;;  %1802 = vperm.xlu0 %12989, %v14919_v37   ;;  %v1912_v56 = vadd.f32 %v1871_v39, %v1577_v18  ;;  %v2876_v18 = vmul.f32 %v13715_v49, %v14839_v54  ;;  %v3211_v54 = vmul.f32 %v13726_v24, %v14863_v43 }
 0x2bf   : > { %v14939_v12 = vpop.permute.xlu1 %1442  ;;  %v14941_v34 = vpop.permute.xlu0 %1437  ;;  %11880 = vmatprep.mubr.msk.bf16.mxu1 %vm13169_vm3, %v18290_v15  ;;  %v1913_v45 = vadd.f32 %v1872_v40, %v1578_v14 }
 0x2c0   : > { %v2247_v47 = vadd.f32 %v2206_v29, %v1912_v56  ;;  %v3301_v29 = vld [vmem:[#allocation2 + $0x11b] sm:$0xff] }
 0x2c1   : > { %v2248_v27 = vadd.f32 %v2207_v57, %v1913_v45  ;;  %v3302_v57 = vld [vmem:[#allocation2 + $0x123] sm:$0xff] }
 0x2c2   : > { %3137 = vperm.xlu1 %12990, %v2967_v4   ;;  %3132 = vperm.xlu0 %12989, %v2966_v52   ;;  %v2582_v26 = vadd.f32 %v2541_v13, %v2247_v47  ;;  %v3546_v47 = vmul.f32 %v13733_v9, %v14887_v22 }
 0x2c3   : > { %v14953_v38 = vpop.permute.xlu1 %2772  ;;  %v14955_v55 = vpop.permute.xlu0 %2767  ;;  %v2583_v20 = vadd.f32 %v2542_v23, %v2248_v27  ;;  %v3547_v27 = vmul.f32 %v13733_v9, %v14885_v42  ;;  %v3723_v42 = vld [vmem:[%s18268_s8 + $0xe0] sm:$0xff] }
 0x2c6   : > { %v4301_v40 = vpop.f32.mrb[24].mxu0  ;;  %v4567_v39 = vpop.f32.mrb[24].mxu1  ;;  %2142 = vperm.xlu1 %12990, %v1964_v59   ;;  %2137 = vperm.xlu0 %12989, %v1963_v51   ;;  %v2918_v59 = vadd.f32 %v2877_v31, %v2583_v20  ;;  %v2917_v51 = vadd.f32 %v2876_v18, %v2582_v26  ;;  %v3724_v31 = vld [vmem:[%s18268_s8 + $0xe8] sm:$0xff] }
 0x2c7   : > { %v14961_v4 = vpop.permute.xlu1 %1777  ;;  %v14963_v52 = vadd.f32 %v4567_v39, %v4301_v40  ;;  %v14965_v14 = vpop.permute.xlu0 %1772 }
 0x2c8   : > { %v11772_v45 = vpop.f32.mrb[25].mxu0  ;;  %v11858_v56 = vpop.f32.mrb[25].mxu1  ;;  %v3253_v18 = vadd.f32 %v3212_v10, %v2918_v59  ;;  %v3252_v22 = vadd.f32 %v3211_v54, %v2917_v51  ;;  %v961_v54 = vld [vmem:[#allocation2 + $0x11e] sm:$0xff]  ;;  %v960_v59 = vld [vmem:[#allocation2 + $0x116] sm:$0xff] }
 0x2c9   : > { %18297 = vst [vmem:[#allocation19_spill] sm:$0xff] %v14963_v52  ;;  %v4304_v23 = vpop.f32.mrb[26].mxu0  ;;  %v4570_v13 = vpop.f32.mrb[26].mxu1  ;;  %v626_v45 = vld [vmem:[#allocation2 + $0x115] sm:$0xff] }
 0x2ca   : > { %v14975_v40 = vadd.f32 %v4570_v13, %v4304_v23  ;;  %v11773_v39 = vpop.f32.mrb[27].mxu0  ;;  %v11859_v52 = vpop.f32.mrb[27].mxu1  ;;  %3472 = vperm.xlu1 %12990, %v3302_v57   ;;  %3467 = vperm.xlu0 %12989, %v3301_v29   ;;  %v3588_v20 = vadd.f32 %v3547_v27, %v3253_v18  ;;  %v3587_v26 = vadd.f32 %v3546_v47, %v3252_v22  ;;  %v627_v29 = vld [vmem:[#allocation2 + $0x11d] sm:$0xff] }
 0x2cb   : > { %v14977_v19 = vpop.permute.xlu1 %3107  ;;  %v14979_v43 = vpop.permute.xlu0 %3102 }
 0x2cc   : > { %18298 = vst [vmem:[#allocation20_spill] sm:$0xff] %v14975_v40  ;;  %v3636_v56 = vadd.f32 %v14881_v16, %v3588_v20  ;;  %v3635_v23 = vadd.f32 %v14881_v16, %v3587_v26 }
 0x2ce   : > { %3883 = vperm.xlu1 %12990, %v3724_v31   ;;  %3878 = vperm.xlu0 %12989, %v3723_v42   ;;  %v3677_v51 = vmax.f32 %v3636_v56, 0.0  ;;  %v3676_v27 = vmax.f32 %v3635_v23, 0.0 }
 0x2cf   : > { %v14987_v52 = vpop.permute.xlu1 %2112  ;;  %v14989_v57 = vpop.permute.xlu0 %2107 }
 0x2d2   : > { %812 = vperm.xlu1 %12990, %v627_v29   ;;  %807 = vperm.xlu0 %12989, %v626_v45   ;;  %v15011_v29 = vld [vmem:[#allocation2 + $0x131] sm:$0xff]  ;;  %v15013_v45 = vld [vmem:[#allocation2 + $0x129] sm:$0xff] }
 0x2d3   : > { %v14993_v13 = vpop.permute.xlu1 %3442  ;;  %v14995_v10 = vpop.permute.xlu0 %3437 }
 0x2d6   : > { %1147 = vperm.xlu1 %12990, %v961_v54   ;;  %1142 = vperm.xlu0 %12989, %v960_v59  }
 0x2d7   : > { %v3854_v47 = vpop.permute.xlu1 %3853  ;;  %v3849_v39 = vpop.permute.xlu0 %3848 }
 0x2d8   : > { %v3964_v31 = vmul.f32 %v3854_v47, %v3677_v51  ;;  %v3963_v42 = vmul.f32 %v3849_v39, %v3676_v27  ;;  %v15021_v51 = vld [vmem:[#allocation2 + $0x12f] sm:$0xff]  ;;  %v15023_v27 = vld [vmem:[#allocation2 + $0x127] sm:$0xff]  ;;  %v1204_v47 = vmul.f32 %v13643_v33, %v14783_v7  ;;  %v1203_v39 = vmul.f32 %v13643_v33, %v14785_v46 }
 0x2d9   : > { %v868_v7 = vmul.f32 %v13646_v48, %v14779_v35  ;;  %v1538_v46 = vmul.f32 %v13654_v41, %v14825_v30  ;;  %v1873_v35 = vmul.f32 %v13665_v60, %v14849_v3  ;;  %v2209_v30 = vmul.f32 %v13683_v5, %v14873_v17 }
 0x2da   : > { %4006 = vst.msk [vmem:[#allocation3 + $0xd0] sm:$0xff] %vm3982_vm4, %v3964_v31  ;;  %4005 = vst.msk [vmem:[#allocation3 + $0xc8] sm:$0xff] %vm3982_vm4, %v3963_v42  ;;  %2477 = vperm.xlu1 %12990, %v14903_v36   ;;  %2472 = vperm.xlu0 %12989, %v14905_v63   ;;  %v869_v31 = vmul.f32 %v13646_v48, %v14777_v2  ;;  %v1539_v42 = vmul.f32 %v13654_v41, %v14823_v61 }
 0x2db   : > { %v15001_v18 = vpop.permute.xlu1 %782  ;;  %v15003_v22 = vpop.permute.xlu0 %777  ;;  %v1874_v61 = vmul.f32 %v13665_v60, %v14845_v11  ;;  %v1965_v11 = vld [vmem:[#allocation2 + $0x128] sm:$0xff]  ;;  %v2544_v3 = vmul.f32 %v13697_v28, %v14913_v58  ;;  %v2543_v17 = vmul.f32 %v13697_v28, %v14915_v32  ;;  %v3214_v32 = vmul.f32 %v13726_v24, %v14977_v19 }
 0x2dc   : > { %v1245_v2 = vadd.f32 %v1204_v47, %v869_v31  ;;  %v1966_v31 = vld [vmem:[#allocation2 + $0x130] sm:$0xff] }
 0x2dd   : > { %v3303_v58 = vld [vmem:[#allocation2 + $0x12b] sm:$0xff] }
 0x2de   : > { %1482 = vperm.xlu1 %12990, %v14917_v8   ;;  %1477 = vperm.xlu0 %12989, %v14919_v37  }
 0x2df   : > { %v15007_v20 = vpop.permute.xlu1 %1117  ;;  %v15009_v26 = vpop.permute.xlu0 %1112 }
 0x2e1   : > { %v4112_v56 = vld [vmem:[#allocation3 + $0xc6] sm:$0xff]  ;;  %v4113_v36 = vld [vmem:[#allocation3 + $0xce] sm:$0xff] }
 0x2e2   : > { %v4049_v23 = vld [vmem:[#allocation3 + $0xc5] sm:$0xff]  ;;  %2812 = vperm.xlu1 %12990, %v15011_v29   ;;  %2807 = vperm.xlu0 %12989, %v15013_v45   ;;  %v4143_v63 = vpack.c.bf16 %v4113_v36, %v4112_v56  ;;  %v4050_v54 = vld [vmem:[#allocation3 + $0xcd] sm:$0xff] }
 0x2e3   : > { %v15017_v8 = vpop.permute.xlu1 %2447  ;;  %v15019_v37 = vpop.permute.xlu0 %2442  ;;  %v4079_v59 = vpack.c.bf16 %v4050_v54, %v4049_v23  ;;  %v2969_v23 = vld [vmem:[#allocation2 + $0x132] sm:$0xff]  ;;  %v1244_v54 = vadd.f32 %v1203_v39, %v868_v7 }
 0x2e4   : > { %11795 = vmatmul.mubr.msk.bf16.gmra.mrb[48].mxu0 %vm3982_vm4, %v4143_v63  ;;  %v2968_v63 = vld [vmem:[#allocation2 + $0x12a] sm:$0xff] }
 0x2e5   : > { %11881 = vmatmul.mubr.msk.bf16.gmra.mrb[48].mxu1 %vm3982_vm4, %v4079_v59  ;;  %11798 = vmatprep.mubr.msk.bf16.mxu0 %vm13169_vm3, %v18290_v15  ;;  %v1580_v59 = vadd.f32 %v1539_v42, %v1245_v2  ;;  %v1579_v40 = vadd.f32 %v1538_v46, %v1244_v54  ;;  %v2879_v46 = vmul.f32 %v13715_v49, %v14953_v38  ;;  %v3304_v54 = vld [vmem:[#allocation2 + $0x133] sm:$0xff] }
 0x2e6   : > { %1817 = vperm.xlu1 %12990, %v15021_v51   ;;  %1812 = vperm.xlu0 %12989, %v15023_v27  }
 0x2e7   : > { %v15043_v56 = vpop.permute.xlu1 %1452  ;;  %v15045_v36 = vpop.permute.xlu0 %1447  ;;  %11884 = vmatprep.mubr.msk.bf16.mxu1 %vm13169_vm3, %v18290_v15  ;;  %v1915_v39 = vadd.f32 %v1874_v61, %v1580_v59  ;;  %v1914_v42 = vadd.f32 %v1873_v35, %v1579_v40 }
 0x2e9   : > { %v2250_v7 = vadd.f32 %v2209_v30, %v1915_v39  ;;  %v2249_v53 = vadd.f32 %v2208_v50, %v1914_v42  ;;  %v3213_v50 = vmul.f32 %v13726_v24, %v14979_v43  ;;  %v3549_v39 = vmul.f32 %v13733_v9, %v14993_v13  ;;  %v3726_v43 = vld [vmem:[%s18268_s8 + $0xf8] sm:$0xff]  ;;  %v3725_v13 = vld [vmem:[%s18268_s8 + $0xf0] sm:$0xff] }
 0x2ea   : > { %3147 = vperm.xlu1 %12990, %v2969_v23   ;;  %3142 = vperm.xlu0 %12989, %v2968_v63   ;;  %v2878_v63 = vmul.f32 %v13715_v49, %v14955_v55 }
 0x2eb   : > { %v15057_v25 = vpop.permute.xlu1 %2782  ;;  %v15059_v47 = vpop.permute.xlu0 %2777  ;;  %v2585_v40 = vadd.f32 %v2544_v3, %v2250_v7  ;;  %v2584_v30 = vadd.f32 %v2543_v17, %v2249_v53  ;;  %v3548_v7 = vmul.f32 %v13733_v9, %v14995_v10 }
 0x2ed   : > { %v2919_v19 = vadd.f32 %v2878_v63, %v2584_v30 }
 0x2ee   : > { %v4309_v23 = vpop.f32.mrb[28].mxu0  ;;  %2152 = vperm.xlu1 %12990, %v1966_v31   ;;  %2147 = vperm.xlu0 %12989, %v1965_v11   ;;  %v2920_v11 = vadd.f32 %v2879_v46, %v2585_v40  ;;  %v629_v40 = vld [vmem:[#allocation2 + $0x12d] sm:$0xff] }
 0x2ef   : > { %v15069_v2 = vpop.permute.xlu1 %1787  ;;  %v4575_v61 = vpop.f32.mrb[28].mxu1  ;;  %v3254_v63 = vadd.f32 %v3213_v50, %v2919_v19  ;;  %v962_v50 = vld [vmem:[#allocation2 + $0x126] sm:$0xff] }
 0x2f0   : > { %v15073_v35 = vadd.f32 %v4575_v61, %v4309_v23  ;;  %v15075_v59 = vpop.permute.xlu0 %1782  ;;  %v11776_v38 = vpop.f32.mrb[29].mxu0  ;;  %v3255_v46 = vadd.f32 %v3214_v32, %v2920_v11  ;;  %v963_v11 = vld [vmem:[#allocation2 + $0x12e] sm:$0xff] }
 0x2f1   : > { %v11862_v31 = vpop.f32.mrb[29].mxu1  ;;  %v4312_v55 = vpop.f32.mrb[30].mxu0  ;;  %v3589_v10 = vadd.f32 %v3548_v7, %v3254_v63  ;;  %v628_v38 = vld [vmem:[#allocation2 + $0x125] sm:$0xff] }
 0x2f2   : > { %18299 = vst [vmem:[#allocation21_spill] sm:$0xff] %v15073_v35  ;;  %v4578_v42 = vpop.f32.mrb[30].mxu1  ;;  %v11777_v3 = vpop.f32.mrb[31].mxu0  ;;  %3482 = vperm.xlu1 %12990, %v3304_v54   ;;  %3477 = vperm.xlu0 %12989, %v3303_v58   ;;  %v3590_v54 = vadd.f32 %v3549_v39, %v3255_v46 }
 0x2f3   : > { %v15083_v23 = vadd.f32 %v4578_v42, %v4312_v55  ;;  %v11863_v17 = vpop.f32.mrb[31].mxu1  ;;  %v15085_v53 = vpop.permute.xlu1 %3117  ;;  %v3637_v32 = vadd.f32 %v14881_v16, %v3589_v10  ;;  %v15119_v10 = vld [vmem:[#allocation2 + $0x139] sm:$0xff] }
 0x2f4   : > { %v15093_v61 = vpop.permute.xlu0 %3112  ;;  %v3638_v31 = vadd.f32 %v14881_v16, %v3590_v54  ;;  %v15117_v54 = vld [vmem:[#allocation2 + $0x141] sm:$0xff] }
 0x2f5   : > { %18300 = vst [vmem:[#allocation22_spill] sm:$0xff] %v15083_v23  ;;  %v3678_v19 = vmax.f32 %v3637_v32, 0.0 }
 0x2f6   : > { %3893 = vperm.xlu1 %12990, %v3726_v43   ;;  %3888 = vperm.xlu0 %12989, %v3725_v13   ;;  %v3679_v42 = vmax.f32 %v3638_v31, 0.0 }
 0x2f7   : > { %v15095_v58 = vpop.permute.xlu1 %2122 }
 0x2f8   : > { %v15097_v30 = vpop.permute.xlu0 %2117 }
 0x2fa   : > { %822 = vperm.xlu1 %12990, %v629_v40   ;;  %817 = vperm.xlu0 %12989, %v628_v38  }
 0x2fb   : > { %v15100_v55 = vpop.permute.xlu1 %3452 }
 0x2fc   : > { %v15103_v39 = vpop.permute.xlu0 %3447 }
 0x2fe   : > { %1157 = vperm.xlu1 %12990, %v963_v11   ;;  %1152 = vperm.xlu0 %12989, %v962_v50   ;;  %v1206_v11 = vmul.f32 %v13643_v33, %v14899_v44  ;;  %v870_v44 = vmul.f32 %v13646_v48, %v14895_v1 }
 0x2ff   : > { %v3864_v3 = vpop.permute.xlu1 %3863 }
 0x300   : > { %v3966_v7 = vmul.f32 %v3864_v3, %v3679_v42  ;;  %v3859_v17 = vpop.permute.xlu0 %3858  ;;  %v15133_v3 = vld [vmem:[#allocation2 + $0x137] sm:$0xff] }
 0x301   : > { %v3965_v43 = vmul.f32 %v3859_v17, %v3678_v19  ;;  %v1205_v19 = vmul.f32 %v13643_v33, %v14901_v21  ;;  %v1541_v17 = vmul.f32 %v13654_v41, %v14939_v12  ;;  %v2971_v21 = vld [vmem:[#allocation2 + $0x142] sm:$0xff]  ;;  %v1876_v12 = vmul.f32 %v13665_v60, %v14961_v4 }
 0x302   : > { %4008 = vst.msk [vmem:[#allocation3 + $0xe0] sm:$0xff] %vm3982_vm4, %v3966_v7  ;;  %2487 = vperm.xlu1 %12990, %v15011_v29   ;;  %2482 = vperm.xlu0 %12989, %v15013_v45   ;;  %v871_v7 = vmul.f32 %v13646_v48, %v14893_v6 }
 0x303   : > { %4007 = vst.msk [vmem:[#allocation3 + $0xd8] sm:$0xff] %vm3982_vm4, %v3965_v43  ;;  %v15109_v13 = vpop.permute.xlu1 %792  ;;  %v1540_v43 = vmul.f32 %v13654_v41, %v14941_v34  ;;  %v1246_v1 = vadd.f32 %v1205_v19, %v870_v44  ;;  %v1875_v34 = vmul.f32 %v13665_v60, %v14965_v14  ;;  %v2546_v19 = vmul.f32 %v13697_v28, %v15017_v8  ;;  %v1967_v14 = vld [vmem:[#allocation2 + $0x138] sm:$0xff]  ;;  %v3306_v8 = vld [vmem:[#allocation2 + $0x143] sm:$0xff] }
 0x304   : > { %v15111_v46 = vpop.permute.xlu0 %787  ;;  %v1247_v6 = vadd.f32 %v1206_v11, %v871_v7  ;;  %v2210_v11 = vmul.f32 %v13683_v5, %v14989_v57  ;;  %v1968_v7 = vld [vmem:[#allocation2 + $0x140] sm:$0xff] }
 0x306   : > { %1492 = vperm.xlu1 %12990, %v15021_v51   ;;  %1487 = vperm.xlu0 %12989, %v15023_v27   ;;  %v15127_v27 = vld [vmem:[#allocation2 + $0x13f] sm:$0xff] }
 0x307   : > { %v15115_v63 = vpop.permute.xlu1 %1127 }
 0x308   : > { %v15121_v40 = vpop.permute.xlu0 %1122 }
 0x30a   : > { %2822 = vperm.xlu1 %12990, %v15117_v54   ;;  %2817 = vperm.xlu0 %12989, %v15119_v10   ;;  %v4114_v29 = vld [vmem:[#allocation3 + $0xd6] sm:$0xff]  ;;  %v4115_v45 = vld [vmem:[#allocation3 + $0xde] sm:$0xff] }
 0x30b   : > { %v4051_v38 = vld [vmem:[#allocation3 + $0xd5] sm:$0xff]  ;;  %v15125_v31 = vpop.permute.xlu1 %2457  ;;  %v4144_v51 = vpack.c.bf16 %v4115_v45, %v4114_v29  ;;  %v4052_v32 = vld [vmem:[#allocation3 + $0xdd] sm:$0xff] }
 0x30c   : > { %v15131_v50 = vpop.permute.xlu0 %2452  ;;  %v4080_v42 = vpack.c.bf16 %v4052_v32, %v4051_v38  ;;  %v2970_v38 = vld [vmem:[#allocation2 + $0x13a] sm:$0xff]  ;;  %v2211_v32 = vmul.f32 %v13683_v5, %v14987_v52  ;;  %v2545_v52 = vmul.f32 %v13697_v28, %v15019_v37 }
 0x30d   : > { %11799 = vmatmul.mubr.msk.bf16.gmra.mrb[52].mxu0 %vm3982_vm4, %v4144_v51  ;;  %v1582_v51 = vadd.f32 %v1541_v17, %v1247_v6  ;;  %v2880_v6 = vmul.f32 %v13715_v49, %v15059_v47 }
 0x30e   : > { %11885 = vmatmul.mubr.msk.bf16.gmra.mrb[52].mxu1 %vm3982_vm4, %v4080_v42  ;;  %1827 = vperm.xlu1 %12990, %v15127_v27   ;;  %v1581_v42 = vadd.f32 %v1540_v43, %v1246_v1  ;;  %v2881_v43 = vmul.f32 %v13715_v49, %v15057_v25  ;;  %v3215_v25 = vmul.f32 %v13726_v24, %v15093_v61  ;;  %v15196_v61 = vld [vmem:[%s18268_s8 + $0x108] sm:$0xff] }
 0x30f   : > { %v15148_v29 = vpop.permute.xlu1 %1462  ;;  %1822 = vperm.xlu0 %12989, %v15133_v3   ;;  %11802 = vmatprep.mubr.msk.bf16.mxu0 %vm13169_vm3, %v18290_v15  ;;  %v1917_v23 = vadd.f32 %v1876_v12, %v1582_v51 }
 0x310   : > { %v15155_v45 = vpop.permute.xlu0 %1457  ;;  %11888 = vmatprep.mubr.msk.bf16.mxu1 %vm13169_vm3, %v18290_v15  ;;  %v1916_v17 = vadd.f32 %v1875_v34, %v1581_v42  ;;  %v3305_v42 = vld [vmem:[#allocation2 + $0x13b] sm:$0xff] }
 0x312   : > { %3157 = vperm.xlu1 %12990, %v2971_v21   ;;  %v2252_v21 = vadd.f32 %v2211_v32, %v1917_v23  ;;  %v2251_v57 = vadd.f32 %v2210_v11, %v1916_v17  ;;  %v3216_v23 = vmul.f32 %v13726_v24, %v15085_v53 }
 0x313   : > { %v15165_v4 = vpop.permute.xlu1 %2792  ;;  %3152 = vperm.xlu0 %12989, %v2970_v38  }
 0x314   : > { %v15169_v44 = vpop.permute.xlu0 %2787  ;;  %v2587_v1 = vadd.f32 %v2546_v19, %v2252_v21  ;;  %v2586_v37 = vadd.f32 %v2545_v52, %v2251_v57  ;;  %v3551_v21 = vmul.f32 %v13733_v9, %v15100_v55  ;;  %v3550_v52 = vmul.f32 %v13733_v9, %v15103_v39  ;;  %v15205_v55 = vld [vmem:[%s18268_s8 + $0x100] sm:$0xff] }
 0x316   : > { %2162 = vperm.xlu1 %12990, %v1968_v7   ;;  %v2922_v7 = vadd.f32 %v2881_v43, %v2587_v1  ;;  %v2921_v19 = vadd.f32 %v2880_v6, %v2586_v37  ;;  %v964_v1 = vld [vmem:[#allocation2 + $0x136] sm:$0xff] }
 0x317   : > { %v15177_v12 = vpop.permute.xlu1 %1797  ;;  %v4317_v38 = vpop.f32.mrb[32].mxu0  ;;  %2157 = vperm.xlu0 %12989, %v1967_v14   ;;  %v630_v37 = vld [vmem:[#allocation2 + $0x135] sm:$0xff] }
 0x318   : > { %v4583_v51 = vpop.f32.mrb[32].mxu1  ;;  %v15179_v34 = vpop.permute.xlu0 %1792  ;;  %v3257_v39 = vadd.f32 %v3216_v23, %v2922_v7  ;;  %v3256_v6 = vadd.f32 %v3215_v25, %v2921_v19 }
 0x319   : > { %v15185_v32 = vadd.f32 %v4583_v51, %v4317_v38  ;;  %v11780_v47 = vpop.f32.mrb[33].mxu0  ;;  %v11866_v11 = vpop.f32.mrb[33].mxu1 }
 0x31a   : > { %v4320_v17 = vpop.f32.mrb[34].mxu0  ;;  %v4586_v14 = vpop.f32.mrb[34].mxu1  ;;  %3492 = vperm.xlu1 %12990, %v3306_v8   ;;  %v3591_v8 = vadd.f32 %v3550_v52, %v3256_v6 }
 0x31b   : > { %18301 = vst [vmem:[#allocation23_spill] sm:$0xff] %v15185_v32  ;;  %v15191_v57 = vadd.f32 %v4586_v14, %v4320_v17  ;;  %v11781_v53 = vpop.f32.mrb[35].mxu0  ;;  %v11867_v35 = vpop.f32.mrb[35].mxu1  ;;  %3487 = vperm.xlu0 %12989, %v3305_v42   ;;  %v15221_v14 = vld [vmem:[#allocation2 + $0x149] sm:$0xff] }
 0x31c   : > { %v15198_v43 = vpop.permute.xlu1 %3127  ;;  %v15200_v38 = vpop.permute.xlu0 %3122  ;;  %v3592_v35 = vadd.f32 %v3551_v21, %v3257_v39  ;;  %v3639_v11 = vadd.f32 %v14881_v16, %v3591_v8  ;;  %v1634_v39 = vld [vmem:[#allocation2 + $0x147] sm:$0xff] }
 0x31d   : > { %18302 = vst [vmem:[#allocation24_spill] sm:$0xff] %v15191_v57  ;;  %v1969_v32 = vld [vmem:[#allocation2 + $0x148] sm:$0xff] }
 0x31e   : > { %3903 = vperm.xlu1 %12990, %v15196_v61   ;;  %v3640_v47 = vadd.f32 %v14881_v16, %v3592_v35  ;;  %v3680_v17 = vmax.f32 %v3639_v11, 0.0  ;;  %v2973_v35 = vld [vmem:[#allocation2 + $0x152] sm:$0xff] }
 0x31f   : > { %3898 = vperm.xlu0 %12989, %v15205_v55  }
 0x320   : > { %v15209_v51 = vpop.permute.xlu1 %2132  ;;  %v15211_v42 = vpop.permute.xlu0 %2127  ;;  %v3681_v7 = vmax.f32 %v3640_v47, 0.0 }
 0x322   : > { %1162 = vperm.xlu1 %12990, %v964_v1  }
 0x323   : > { %827 = vperm.xlu0 %12989, %v630_v37   ;;  %v2972_v37 = vld [vmem:[#allocation2 + $0x14a] sm:$0xff] }
 0x324   : > { %v15215_v23 = vpop.permute.xlu1 %3462  ;;  %v15217_v25 = vpop.permute.xlu0 %3457 }
 0x326   : > { %2497 = vperm.xlu1 %12990, %v15117_v54  }
 0x327   : > { %2492 = vperm.xlu0 %12989, %v15119_v10   ;;  %v15231_v10 = vld [vmem:[#allocation2 + $0x151] sm:$0xff] }
 0x328   : > { %v3874_v19 = vpop.permute.xlu1 %3873  ;;  %v3869_v21 = vpop.permute.xlu0 %3868 }
 0x329   : > { %v3968_v52 = vmul.f32 %v3874_v19, %v3681_v7  ;;  %v3967_v53 = vmul.f32 %v3869_v21, %v3680_v17 }
 0x32a   : > { %2827 = vperm.xlu1 %12990, %v15221_v14  }
 0x32b   : > { %4010 = vst.msk [vmem:[#allocation3 + $0xf0] sm:$0xff] %vm3982_vm4, %v3968_v52  ;;  %4009 = vst.msk [vmem:[#allocation3 + $0xe8] sm:$0xff] %vm3982_vm4, %v3967_v53  ;;  %1497 = vperm.xlu0 %12989, %v15133_v3   ;;  %v10770_v3 = vld [vmem:[%s18262_s2 + $0x8] sm:$0xf] }
 0x32c   : > { %v15227_v54 = vpop.permute.xlu1 %802  ;;  %v15229_v6 = vpop.permute.xlu0 %797  ;;  %v4813_v47 = vsel %vm4215_vm2, %v10770_v3, 0  ;;  %v3307_v52 = vld [vmem:[#allocation2 + $0x14b] sm:$0xff]  ;;  %v1208_v3 = vmul.f32 %v13643_v33, %v15007_v20  ;;  %v872_v20 = vmul.f32 %v13646_v48, %v15003_v22 }
 0x32d   : > { %11917 = vmatpush3.bf16.msra.mxu0 %v4813_v47  ;;  %v1543_v47 = vmul.f32 %v13654_v41, %v15043_v56  ;;  %v3308_v56 = vld [vmem:[#allocation2 + $0x153] sm:$0xff] }
 0x32e   : > { %1832 = vperm.xlu1 %12990, %v1634_v39   ;;  %12088 = vmatprep.subr.bf16.mxu0 %v18290_v15 }
 0x32f   : > { %2832 = vperm.xlu0 %12989, %v15231_v10  }
 0x330   : > { %v15234_v8 = vpop.permute.xlu1 %1137  ;;  %v15236_v1 = vpop.permute.xlu0 %1132 }
 0x332   : > { %3167 = vperm.xlu1 %12990, %v2973_v35   ;;  %v4116_v11 = vld [vmem:[#allocation3 + $0xe6] sm:$0xff]  ;;  %v4117_v7 = vld [vmem:[#allocation3 + $0xee] sm:$0xff]  ;;  %v1207_v35 = vmul.f32 %v13643_v33, %v15009_v26  ;;  %v1542_v26 = vmul.f32 %v13654_v41, %v15045_v36  ;;  %v2213_v36 = vmul.f32 %v13683_v5, %v15095_v58  ;;  %v2547_v58 = vmul.f32 %v13697_v28, %v15131_v50 }
 0x333   : > { %v4053_v17 = vld [vmem:[#allocation3 + $0xe5] sm:$0xff]  ;;  %3162 = vperm.xlu0 %12989, %v2972_v37   ;;  %v4145_v19 = vpack.c.bf16 %v4117_v7, %v4116_v11  ;;  %v4054_v21 = vld [vmem:[#allocation3 + $0xed] sm:$0xff]  ;;  %v873_v37 = vmul.f32 %v13646_v48, %v15001_v18  ;;  %v15260_v11 = vld [vmem:[%s18268_s8 + $0x110] sm:$0xff]  ;;  %v1878_v7 = vmul.f32 %v13665_v60, %v15069_v2  ;;  %v3218_v50 = vmul.f32 %v13726_v24, %v15198_v43 }
 0x334   : > { %v15243_v53 = vpop.permute.xlu1 %2467  ;;  %v15245_v39 = vpop.permute.xlu0 %2462  ;;  %v4081_v57 = vpack.c.bf16 %v4054_v21, %v4053_v17  ;;  %v1248_v17 = vadd.f32 %v1207_v35, %v872_v20  ;;  %v15290_v2 = vld [vmem:[%s18268_s8 + $0x118] sm:$0xff]  ;;  %v2548_v35 = vmul.f32 %v13697_v28, %v15125_v31  ;;  %v15317_v43 = vld [vmem:[%s18268_s8 + $0x120] sm:$0xff] }
 0x335   : > { %11803 = vmatmul.mubr.msk.bf16.gmra.mrb[56].mxu0 %vm3982_vm4, %v4145_v19  ;;  %v1877_v19 = vmul.f32 %v13665_v60, %v15075_v59 }
 0x336   : > { %11889 = vmatmul.mubr.msk.bf16.gmra.mrb[56].mxu1 %vm3982_vm4, %v4081_v57  ;;  %3497 = vperm.xlu1 %12990, %v3307_v52   ;;  %v1583_v21 = vadd.f32 %v1542_v26, %v1248_v17  ;;  %v2212_v52 = vmul.f32 %v13683_v5, %v15097_v30  ;;  %v2974_v26 = vld [vmem:[#allocation2 + $0x15a] sm:$0xff] }
 0x337   : > { %2167 = vperm.xlu0 %12989, %v1969_v32   ;;  %11806 = vmatprep.mubr.msk.bf16.mxu0 %vm13169_vm3, %v18290_v15  ;;  %v1249_v32 = vadd.f32 %v1208_v3, %v873_v37  ;;  %v2639_v17 = vld [vmem:[#allocation2 + $0x159] sm:$0xff] }
 0x338   : > { %v15268_v57 = vpop.permute.xlu1 %1472  ;;  %v15270_v18 = vpop.permute.xlu0 %1467  ;;  %11892 = vmatprep.mubr.msk.bf16.mxu1 %vm13169_vm3, %v18290_v15  ;;  %v1918_v37 = vadd.f32 %v1877_v19, %v1583_v21  ;;  %v3217_v21 = vmul.f32 %v13726_v24, %v15200_v38 }
 0x339   : > { %v1584_v22 = vadd.f32 %v1543_v47, %v1249_v32  ;;  %v2883_v47 = vmul.f32 %v13715_v49, %v15165_v4  ;;  %v2882_v32 = vmul.f32 %v13715_v49, %v15169_v44 }
 0x33a   : > { %3908 = vperm.xlu1 %12990, %v15260_v11  }
 0x33b   : > { %3502 = vperm.xlu0 %12989, %v3308_v56   ;;  %v1919_v59 = vadd.f32 %v1878_v7, %v1584_v22  ;;  %v2253_v56 = vadd.f32 %v2212_v52, %v1918_v37  ;;  %v3553_v37 = vmul.f32 %v13733_v9, %v15215_v23 }
 0x33c   : > { %v15283_v62 = vpop.permute.xlu1 %2802  ;;  %v15285_v3 = vpop.permute.xlu0 %2797 }
 0x33d   : > { %v2254_v30 = vadd.f32 %v2213_v36, %v1919_v59  ;;  %v2588_v36 = vadd.f32 %v2547_v58, %v2253_v56  ;;  %v3552_v58 = vmul.f32 %v13733_v9, %v15217_v25 }
 0x33e   : > { %2502 = vperm.xlu1 %12990, %v15221_v14  }
 0x33f   : > { %v4325_v20 = vpop.f32.mrb[36].mxu0  ;;  %3913 = vperm.xlu0 %12989, %v15290_v2   ;;  %v2589_v19 = vadd.f32 %v2548_v35, %v2254_v30 }
 0x340   : > { %v15302_v7 = vpop.permute.xlu1 %1807  ;;  %v4591_v31 = vpop.f32.mrb[36].mxu1 }
 0x341   : > { %v15306_v14 = vadd.f32 %v4591_v31, %v4325_v20  ;;  %v15308_v22 = vpop.permute.xlu0 %1802  ;;  %v11784_v4 = vpop.f32.mrb[37].mxu0  ;;  %v2924_v44 = vadd.f32 %v2883_v47, %v2589_v19  ;;  %v2923_v20 = vadd.f32 %v2882_v32, %v2588_v36  ;;  %v3309_v47 = vld [vmem:[#allocation2 + $0x15b] sm:$0xff]  ;;  %v15331_v32 = vld [vmem:[%s18268_s8 + $0x130] sm:$0xff]  ;;  %v15338_v36 = vld [vmem:[%s18268_s8 + $0x128] sm:$0xff] }
 0x342   : > { %v11870_v52 = vpop.f32.mrb[37].mxu1  ;;  %v4328_v59 = vpop.f32.mrb[38].mxu0  ;;  %3172 = vperm.xlu1 %12990, %v2974_v26   ;;  %18305 = vst [vmem:[#allocation27_spill] sm:$0xff] %v15331_v32 }
 0x343   : > { %18303 = vst [vmem:[#allocation25_spill] sm:$0xff] %v15306_v14  ;;  %v4594_v35 = vpop.f32.mrb[38].mxu1  ;;  %v11785_v30 = vpop.f32.mrb[39].mxu0  ;;  %2837 = vperm.xlu0 %12989, %v2639_v17   ;;  %v3259_v31 = vadd.f32 %v3218_v50, %v2924_v44  ;;  %v3258_v19 = vadd.f32 %v3217_v21, %v2923_v20  ;;  %v965_v52 = vld [vmem:[#allocation2 + $0x13e] sm:$0xff]  ;;  %v1635_v20 = vld [vmem:[#allocation2 + $0x14f] sm:$0xff]  ;;  %v1209_v14 = vmul.f32 %v13643_v33, %v15121_v40 }
 0x344   : > { %v15321_v38 = vadd.f32 %v4594_v35, %v4328_v59  ;;  %v11871_v56 = vpop.f32.mrb[39].mxu1  ;;  %v15323_v26 = vpop.permute.xlu1 %3137 }
 0x345   : > { %v15325_v23 = vpop.permute.xlu0 %3132  ;;  %v3594_v17 = vadd.f32 %v3553_v37, %v3259_v31  ;;  %v3593_v25 = vadd.f32 %v3552_v58, %v3258_v19  ;;  %v631_v37 = vld [vmem:[#allocation2 + $0x13d] sm:$0xff] }
 0x346   : > { %18304 = vst [vmem:[#allocation26_spill] sm:$0xff] %v15321_v38  ;;  %3918 = vperm.xlu1 %12990, %v15317_v43  }
 0x347   : > { %3507 = vperm.xlu0 %12989, %v3309_v47   ;;  %v3642_v21 = vadd.f32 %v14881_v16, %v3594_v17  ;;  %v3641_v44 = vadd.f32 %v14881_v16, %v3593_v25  ;;  %v632_v17 = vld [vmem:[#allocation2 + $0x145] sm:$0xf]  ;;  %v1970_v25 = vld [vmem:[#allocation2 + $0x150] sm:$0xff] }
 0x348   : > { %v15333_v4 = vpop.permute.xlu1 %2142 }
 0x349   : > { %v15340_v50 = vpop.permute.xlu0 %2137  ;;  %v3683_v30 = vmax.f32 %v3642_v21, 0.0  ;;  %v3682_v56 = vmax.f32 %v3641_v44, 0.0  ;;  %v966_v44 = vld [vmem:[#allocation2 + $0x146] sm:$0xf] }
 0x34a   : > { %3928 = vperm.xlu1 %12990, %v15331_v32  }
 0x34b   : > { %3923 = vperm.xlu0 %12989, %v15338_v36  }
 0x34c   : > { %v15345_v59 = vpop.permute.xlu1 %3472 }
 0x34d   : > { %v15348_v35 = vpop.permute.xlu0 %3467 }
 0x34e   : > { %1167 = vperm.xlu1 %12990, %v965_v52  }
 0x34f   : > { %832 = vperm.xlu0 %12989, %v631_v37  }
 0x350   : > { %v3884_v58 = vpop.permute.xlu1 %3883 }
 0x351   : > { %v3970_v47 = vmul.f32 %v3884_v58, %v3683_v30  ;;  %v3879_v31 = vpop.permute.xlu0 %3878  ;;  %v2640_v30 = vld [vmem:[#allocation2 + $0x161] sm:$0xff] }
 0x352   : > { %v3969_v19 = vmul.f32 %v3879_v31, %v3682_v56  ;;  %1837 = vperm.xlu1 %12990, %v1635_v20  }
 0x353   : > { %4012 = vst.msk [vmem:[#allocation3 + $0x100] sm:$0xff] %vm3982_vm4, %v3970_v47  ;;  %1502 = vperm.xlu0 %12989, %v15127_v27  }
 0x354   : > { %4011 = vst.msk [vmem:[#allocation3 + $0xf8] sm:$0xff] %vm3982_vm4, %v3969_v19  ;;  %v15353_v16 = vpop.permute.xlu1 %812  ;;  %v1301_v19 = vld [vmem:[#allocation2 + $0x147] sm:$0xf] }
 0x355   : > { %v15355_v52 = vpop.permute.xlu0 %807 }
 0x356   : > { %837 = vperm.xlu1 %12990, %v632_v17   ;;  %v1210_v17 = vmul.f32 %v13643_v33, %v15115_v63  ;;  %v874_v63 = vmul.f32 %v13646_v48, %v15111_v46  ;;  %v1879_v46 = vmul.f32 %v13665_v60, %v15179_v34 }
 0x357   : > { %2172 = vperm.xlu0 %12989, %v1970_v25  }
 0x358   : > { %v15357_v21 = vpop.permute.xlu1 %1147 }
 0x359   : > { %v15359_v37 = vpop.permute.xlu0 %1142 }
 0x35a   : > { %2507 = vperm.xlu1 %12990, %v15231_v10   ;;  %v875_v10 = vmul.f32 %v13646_v48, %v15109_v13 }
 0x35b   : > { %1172 = vperm.xlu0 %12989, %v966_v44   ;;  %v4118_v27 = vld [vmem:[#allocation3 + $0xf6] sm:$0xff]  ;;  %v4119_v20 = vld [vmem:[#allocation3 + $0xfe] sm:$0xff]  ;;  %v1545_v44 = vmul.f32 %v13654_v41, %v15148_v29  ;;  %v1880_v29 = vmul.f32 %v13665_v60, %v15177_v12 }
 0x35c   : > { %v4055_v58 = vld [vmem:[#allocation3 + $0xf5] sm:$0xff]  ;;  %v15362_v56 = vpop.permute.xlu1 %2477  ;;  %v4146_v47 = vpack.c.bf16 %v4119_v20, %v4118_v27  ;;  %v4056_v31 = vld [vmem:[#allocation3 + $0xfd] sm:$0xff]  ;;  %v2975_v27 = vld [vmem:[#allocation2 + $0x162] sm:$0xff]  ;;  %v1544_v20 = vmul.f32 %v13654_v41, %v15155_v45  ;;  %v1251_v13 = vadd.f32 %v1210_v17, %v875_v10  ;;  %v2214_v17 = vmul.f32 %v13683_v5, %v15211_v42 }
 0x35d   : > { %v15366_v25 = vpop.permute.xlu0 %2472  ;;  %v4082_v38 = vpack.c.bf16 %v4056_v31, %v4055_v58  ;;  %v1636_v58 = vld [vmem:[#allocation2 + $0x157] sm:$0xf]  ;;  %v3310_v31 = vld [vmem:[#allocation2 + $0x163] sm:$0xff]  ;;  %v2885_v42 = vmul.f32 %v13715_v49, %v15283_v62 }
 0x35e   : > { %11807 = vmatmul.mubr.msk.bf16.gmra.mrb[60].mxu0 %vm3982_vm4, %v4146_v47  ;;  %2842 = vperm.xlu1 %12990, %v2640_v30   ;;  %v1250_v30 = vadd.f32 %v1209_v14, %v874_v63  ;;  %v1586_v45 = vadd.f32 %v1545_v44, %v1251_v13  ;;  %v2215_v47 = vmul.f32 %v13683_v5, %v15209_v51  ;;  %v1971_v12 = vld [vmem:[#allocation2 + $0x158] sm:$0xf]  ;;  %v10792_v51 = vld [vmem:[%s18262_s2 + $0xc] sm:$0xf] }
 0x35f   : > { %11893 = vmatmul.mubr.msk.bf16.gmra.mrb[60].mxu1 %vm3982_vm4, %v4082_v38  ;;  %1507 = vperm.xlu0 %12989, %v1301_v19   ;;  %v2550_v14 = vmul.f32 %v13697_v28, %v15243_v53  ;;  %v2549_v44 = vmul.f32 %v13697_v28, %v15245_v39  ;;  %v5184_v53 = vsel %vm4215_vm2, %v10792_v51, 0 }
 0x360   : > { %v15380_v40 = vpop.permute.xlu1 %1482  ;;  %11810 = vmatprep.mubr.msk.bf16.mxu0 %vm13169_vm3, %v18290_v15  ;;  %11896 = vmatprep.mubr.msk.bf16.mxu1 %vm13169_vm3, %v18290_v15  ;;  %v1585_v19 = vadd.f32 %v1544_v20, %v1250_v30  ;;  %v1921_v0 = vadd.f32 %v1880_v29, %v1586_v45  ;;  %v2884_v29 = vmul.f32 %v13715_v49, %v15285_v3 }
 0x361   : > { %v15388_v38 = vpop.permute.xlu0 %1477  ;;  %12003 = vmatpush3.bf16.msra.mxu1 %v5184_v53  ;;  %v3219_v3 = vmul.f32 %v13726_v24, %v15325_v23  ;;  %v3554_v53 = vmul.f32 %v13733_v9, %v15348_v35  ;;  %v2976_v23 = vld [vmem:[#allocation2 + $0x16a] sm:$0xf]  ;;  %v15441_v35 = vld [vmem:[%s18268_s8 + $0x138] sm:$0xff] }
 0x362   : > { %3177 = vperm.xlu1 %12990, %v2975_v27   ;;  %v1920_v34 = vadd.f32 %v1879_v46, %v1585_v19  ;;  %v2256_v27 = vadd.f32 %v2215_v47, %v1921_v0  ;;  %v2306_v46 = vld [vmem:[#allocation2 + $0x159] sm:$0xf]  ;;  %v3220_v0 = vmul.f32 %v13726_v24, %v15323_v26  ;;  %12174 = vmatprep.subr.bf16.mxu1 %v18290_v15 }
 0x363   : > { %1842 = vperm.xlu0 %12989, %v1636_v58   ;;  %v2641_v58 = vld [vmem:[#allocation2 + $0x169] sm:$0xf] }
 0x364   : > { %v15396_v10 = vpop.permute.xlu1 %2812  ;;  %v2255_v13 = vadd.f32 %v2214_v17, %v1920_v34  ;;  %v2591_v45 = vadd.f32 %v2550_v14, %v2256_v27  ;;  %v3555_v14 = vmul.f32 %v13733_v9, %v15345_v59  ;;  %v3311_v27 = vld [vmem:[#allocation2 + $0x16b] sm:$0xf] }
 0x365   : > { %v15400_v63 = vpop.permute.xlu0 %2807 }
 0x366   : > { %3512 = vperm.xlu1 %12990, %v3310_v31   ;;  %v2590_v19 = vadd.f32 %v2549_v44, %v2255_v13  ;;  %v2926_v34 = vadd.f32 %v2885_v42, %v2591_v45 }
 0x367   : > { %v4333_v20 = vpop.f32.mrb[40].mxu0  ;;  %2177 = vperm.xlu0 %12989, %v1971_v12  }
 0x368   : > { %v15412_v30 = vpop.permute.xlu1 %1817  ;;  %v4599_v39 = vpop.f32.mrb[40].mxu1 }
 0x369   : > { %v15416_v47 = vadd.f32 %v4599_v39, %v4333_v20  ;;  %v15418_v62 = vpop.permute.xlu0 %1812  ;;  %v11788_v31 = vpop.f32.mrb[41].mxu0  ;;  %v2925_v20 = vadd.f32 %v2884_v29, %v2590_v19  ;;  %v3735_v29 = vld [vmem:[%s18268_s8 + $0x140] sm:$0xf] }
 0x36a   : > { %v11874_v17 = vpop.f32.mrb[41].mxu1  ;;  %v4336_v12 = vpop.f32.mrb[42].mxu0  ;;  %2847 = vperm.xlu1 %12990, %v2641_v58   ;;  %v3261_v31 = vadd.f32 %v3220_v0, %v2926_v34  ;;  %v15449_v0 = vld [vmem:[%s18264_s4] ss:$0 sm:$0xff] }
 0x36b   : > { %18306 = vst [vmem:[#allocation28_spill] sm:$0xff] %v15416_v47  ;;  %v4602_v51 = vpop.f32.mrb[42].mxu1  ;;  %v11789_v26 = vpop.f32.mrb[43].mxu0  ;;  %2512 = vperm.xlu0 %12989, %v2306_v46   ;;  %v3260_v42 = vadd.f32 %v3219_v3, %v2925_v20  ;;  %v7388_v17 = vld [vmem:[%s18268_s8 + $0x88] sm:$0xff]  ;;  %v7394_v47 = vld [vmem:[%s18268_s8 + $0xb8] sm:$0xff] }
 0x36c   : > { %v15427_v39 = vadd.f32 %v4602_v51, %v4336_v12  ;;  %v11875_v44 = vpop.f32.mrb[43].mxu1  ;;  %v15429_v13 = vpop.permute.xlu1 %3147  ;;  %v3596_v59 = vadd.f32 %v3555_v14, %v3261_v31  ;;  %v7387_v14 = vld [vmem:[%s18268_s8 + $0x80] sm:$0xff] }
 0x36d   : > { %v15431_v58 = vpop.permute.xlu0 %3142  ;;  %v3595_v46 = vadd.f32 %v3554_v53, %v3260_v42  ;;  %v7371_v44 = vld [vmem:[%s18268_s8] sm:$0xff] }
 0x36e   : > { %18307 = vst [vmem:[#allocation29_spill] sm:$0xff] %v15427_v39  ;;  %3517 = vperm.xlu1 %12990, %v3311_v27   ;;  %v3644_v3 = vadd.f32 %v15449_v0, %v3596_v59  ;;  %v7372_v27 = vld [vmem:[%s18268_s8 + $0x8] sm:$0xff]  ;;  %v7390_v59 = vld [vmem:[%s18268_s8 + $0x98] sm:$0xff] }
 0x36f   : > { %3182 = vperm.xlu0 %12989, %v2976_v23   ;;  %v3643_v34 = vadd.f32 %v15449_v0, %v3595_v46  ;;  %v7389_v46 = vld [vmem:[%s18268_s8 + $0x90] sm:$0xff] }
 0x370   : > { %v15436_v45 = vpop.permute.xlu1 %2152  ;;  %v3685_v26 = vmax.f32 %v3644_v3, 0.0 }
 0x371   : > { %v15443_v19 = vpop.permute.xlu0 %2147  ;;  %v3684_v53 = vmax.f32 %v3643_v34, 0.0 }
 0x372   : > { %3938 = vperm.xlu1 %12990, %v3735_v29  }
 0x373   : > { %3933 = vperm.xlu0 %12989, %v15441_v35  }
 0x374   : > { %v15455_v12 = vpop.permute.xlu1 %3482 }
 0x375   : > { %v15461_v51 = vpop.permute.xlu0 %3477  ;;  %v3557_v32 = vmul.f32 %v13733_v9, %v15455_v12  ;;  %v7395_v12 = vld [vmem:[%s18268_s8 + $0xc0] sm:$0xff] }
 0x376   : > { %7499 = vperm.xlu1 %12990, %v7388_v17   ;;  %v7374_v17 = vld [vmem:[%s18268_s8 + $0x18] sm:$0xff] }
 0x377   : > { %7494 = vperm.xlu0 %12989, %v7387_v14   ;;  %v7373_v14 = vld [vmem:[%s18268_s8 + $0x10] sm:$0xff] }
 0x378   : > { %v3894_v20 = vpop.permute.xlu1 %3893 }
 0x379   : > { %v3972_v23 = vmul.f32 %v3894_v20, %v3685_v26  ;;  %v3889_v31 = vpop.permute.xlu0 %3888 }
 0x37a   : > { %v3971_v42 = vmul.f32 %v3889_v31, %v3684_v53  ;;  %7419 = vperm.xlu1 %12990, %v7372_v27   ;;  %v7392_v27 = vld [vmem:[%s18268_s8 + $0xa8] sm:$0xff] }
 0x37b   : > { %4014 = vst.msk [vmem:[#allocation3 + $0x110] sm:$0xff] %vm3982_vm4, %v3972_v23  ;;  %7414 = vperm.xlu0 %12989, %v7371_v44  }
 0x37c   : > { %4013 = vst.msk [vmem:[#allocation3 + $0x108] sm:$0xff] %vm3982_vm4, %v3971_v42  ;;  %v15474_v29 = vpop.permute.xlu1 %822 }
 0x37d   : > { %v15479_v3 = vpop.permute.xlu0 %817 }
 0x37e   : > { %7509 = vperm.xlu1 %12990, %v7390_v59   ;;  %v7391_v59 = vld [vmem:[%s18268_s8 + $0xa0] sm:$0xff] }
 0x37f   : > { %7504 = vperm.xlu0 %12989, %v7389_v46   ;;  %v1212_v46 = vmul.f32 %v13643_v33, %v15234_v8  ;;  %v7376_v8 = vld [vmem:[%s18268_s8 + $0x28] sm:$0xff] }
 0x380   : > { %v15484_v34 = vpop.permute.xlu1 %1157 }
 0x381   : > { %v15489_v26 = vpop.permute.xlu0 %1152 }
 0x382   : > { %7429 = vperm.xlu1 %12990, %v7374_v17  }
 0x383   : > { %7424 = vperm.xlu0 %12989, %v7373_v14   ;;  %v4120_v20 = vld [vmem:[#allocation3 + $0x106] sm:$0xff]  ;;  %v4121_v53 = vld [vmem:[#allocation3 + $0x10e] sm:$0xff]  ;;  %v1211_v14 = vmul.f32 %v13643_v33, %v15236_v1  ;;  %v1546_v1 = vmul.f32 %v13654_v41, %v15270_v18  ;;  %v1881_v18 = vmul.f32 %v13665_v60, %v15308_v22  ;;  %v7393_v22 = vld [vmem:[%s18268_s8 + $0xb0] sm:$0xff] }
 0x384   : > { %v4057_v44 = vld [vmem:[#allocation3 + $0x105] sm:$0xff]  ;;  %v15494_v23 = vpop.permute.xlu1 %2487  ;;  %v4147_v31 = vpack.c.bf16 %v4121_v53, %v4120_v20  ;;  %v4058_v42 = vld [vmem:[#allocation3 + $0x10d] sm:$0xff]  ;;  %v877_v20 = vmul.f32 %v13646_v48, %v15227_v54  ;;  %v1547_v53 = vmul.f32 %v13654_v41, %v15268_v57 }
 0x385   : > { %v15501_v17 = vpop.permute.xlu0 %2482  ;;  %v4083_v39 = vpack.c.bf16 %v4058_v42, %v4057_v44  ;;  %v876_v44 = vmul.f32 %v13646_v48, %v15229_v6  ;;  %v7375_v54 = vld [vmem:[%s18268_s8 + $0x20] sm:$0xff] }
 0x386   : > { %11811 = vmatmul.mubr.msk.bf16.gmra.mrb[64].mxu0 %vm3982_vm4, %v4147_v31  ;;  %7519 = vperm.xlu1 %12990, %v7392_v27   ;;  %v1253_v57 = vadd.f32 %v1212_v46, %v877_v20 }
 0x387   : > { %11897 = vmatmul.mubr.msk.bf16.gmra.mrb[64].mxu1 %vm3982_vm4, %v4083_v39  ;;  %7514 = vperm.xlu0 %12989, %v7391_v59   ;;  %v1882_v39 = vmul.f32 %v13665_v60, %v15302_v7  ;;  %v1252_v31 = vadd.f32 %v1211_v14, %v876_v44  ;;  %v2217_v59 = vmul.f32 %v13683_v5, %v15333_v4 }
 0x388   : > { %v15518_v27 = vpop.permute.xlu1 %1492  ;;  %11814 = vmatprep.mubr.msk.bf16.mxu0 %vm13169_vm3, %v18290_v15  ;;  %11900 = vmatprep.mubr.msk.bf16.mxu1 %vm13169_vm3, %v18290_v15  ;;  %v1588_v42 = vadd.f32 %v1547_v53, %v1253_v57  ;;  %v2216_v7 = vmul.f32 %v13683_v5, %v15340_v50  ;;  %v2552_v53 = vmul.f32 %v13697_v28, %v15362_v56  ;;  %v7378_v57 = vld [vmem:[%s18268_s8 + $0x38] sm:$0xff] }
 0x389   : > { %v15529_v6 = vpop.permute.xlu0 %1487  ;;  %v1587_v46 = vadd.f32 %v1546_v1, %v1252_v31  ;;  %v2551_v44 = vmul.f32 %v13697_v28, %v15366_v25  ;;  %v2887_v50 = vmul.f32 %v13715_v49, %v15396_v10  ;;  %v2886_v56 = vmul.f32 %v13715_v49, %v15400_v63  ;;  %v7377_v25 = vld [vmem:[%s18268_s8 + $0x30] sm:$0xff] }
 0x38a   : > { %7439 = vperm.xlu1 %12990, %v7376_v8   ;;  %v1923_v14 = vadd.f32 %v1882_v39, %v1588_v42  ;;  %v3222_v10 = vmul.f32 %v13726_v24, %v15429_v13  ;;  %v3221_v63 = vmul.f32 %v13726_v24, %v15431_v58  ;;  %v7396_v13 = vld [vmem:[%s18268_s8 + $0xc8] sm:$0xff] }
 0x38b   : > { %7434 = vperm.xlu0 %12989, %v7375_v54   ;;  %v1922_v8 = vadd.f32 %v1881_v18, %v1587_v46 }
 0x38c   : > { %v15540_v20 = vpop.permute.xlu1 %2822  ;;  %v2258_v1 = vadd.f32 %v2217_v59, %v1923_v14 }
 0x38d   : > { %v15547_v4 = vpop.permute.xlu0 %2817  ;;  %v2257_v39 = vadd.f32 %v2216_v7, %v1922_v8 }
 0x38e   : > { %7529 = vperm.xlu1 %12990, %v7394_v47   ;;  %v2593_v47 = vadd.f32 %v2552_v53, %v2258_v1 }
 0x38f   : > { %v4341_v54 = vpop.f32.mrb[44].mxu0  ;;  %7524 = vperm.xlu0 %12989, %v7393_v22   ;;  %v2592_v7 = vadd.f32 %v2551_v44, %v2257_v39  ;;  %v3556_v44 = vmul.f32 %v13733_v9, %v15461_v51  ;;  %v7380_v51 = vld [vmem:[%s18268_s8 + $0x48] sm:$0xff] }
 0x390   : > { %v15558_v31 = vpop.permute.xlu1 %1827  ;;  %v4607_v18 = vpop.f32.mrb[44].mxu1  ;;  %v2928_v8 = vadd.f32 %v2887_v50, %v2593_v47 }
 0x391   : > { %v15565_v42 = vadd.f32 %v4607_v18, %v4341_v54  ;;  %v15567_v59 = vpop.permute.xlu0 %1822  ;;  %v11792_v46 = vpop.f32.mrb[45].mxu0  ;;  %v2927_v54 = vadd.f32 %v2886_v56, %v2592_v7  ;;  %v7379_v7 = vld [vmem:[%s18268_s8 + $0x40] sm:$0xff] }
 0x392   : > { %v11878_v22 = vpop.f32.mrb[45].mxu1  ;;  %v4344_v14 = vpop.f32.mrb[46].mxu0  ;;  %7449 = vperm.xlu1 %12990, %v7378_v57   ;;  %v3263_v50 = vadd.f32 %v3222_v10, %v2928_v8  ;;  %v7397_v8 = vld [vmem:[%s18268_s8 + $0xd0] sm:$0xff] }
 0x393   : > { %v4610_v53 = vpop.f32.mrb[46].mxu1  ;;  %v11793_v1 = vpop.f32.mrb[47].mxu0  ;;  %7444 = vperm.xlu0 %12989, %v7377_v25   ;;  %v3262_v25 = vadd.f32 %v3221_v63, %v2927_v54 }
 0x394   : > { %v15578_v39 = vadd.f32 %v4610_v53, %v4344_v14  ;;  %v11879_v58 = vpop.f32.mrb[47].mxu1  ;;  %v15580_v18 = vpop.permute.xlu1 %3157  ;;  %v3598_v47 = vadd.f32 %v3557_v32, %v3263_v50  ;;  %v7398_v32 = vld [vmem:[%s18268_s8 + $0xd8] sm:$0xff] }
 0x395   : > { %v15585_v57 = vpop.permute.xlu0 %3152  ;;  %v3597_v56 = vadd.f32 %v3556_v44, %v3262_v25  ;;  %v7381_v58 = vld [vmem:[%s18268_s8 + $0x50] sm:$0xff] }
 0x396   : > { %7539 = vperm.xlu1 %12990, %v7396_v13   ;;  %v3646_v10 = vadd.f32 %v15449_v0, %v3598_v47  ;;  %v7382_v13 = vld [vmem:[%s18268_s8 + $0x58] sm:$0xff] }
 0x397   : > { %7534 = vperm.xlu0 %12989, %v7395_v12   ;;  %v3645_v14 = vadd.f32 %v15449_v0, %v3597_v56  ;;  %v1213_v12 = vmul.f32 %v13643_v33, %v15359_v37  ;;  %v1548_v56 = vmul.f32 %v13654_v41, %v15388_v38  ;;  %v1214_v37 = vmul.f32 %v13643_v33, %v15357_v21 }
 0x398   : > { %v15590_v46 = vpop.permute.xlu1 %2162  ;;  %v3687_v1 = vmax.f32 %v3646_v10, 0.0  ;;  %v1883_v38 = vmul.f32 %v13665_v60, %v15418_v62  ;;  %v1549_v21 = vmul.f32 %v13654_v41, %v15380_v40  ;;  %v1884_v62 = vmul.f32 %v13665_v60, %v15412_v30  ;;  %v7402_v30 = vld [vmem:[%s18268_s8 + $0xf8] sm:$0xff] }
 0x399   : > { %v15595_v22 = vpop.permute.xlu0 %2157  ;;  %v3686_v44 = vmax.f32 %v3645_v14, 0.0 }
 0x39a   : > { %7459 = vperm.xlu1 %12990, %v7380_v51   ;;  %v878_v51 = vmul.f32 %v13646_v48, %v15355_v52  ;;  %v7399_v52 = vld [vmem:[%s18268_s8 + $0xe0] sm:$0xff] }
 0x39b   : > { %7454 = vperm.xlu0 %12989, %v7379_v7   ;;  %v7400_v7 = vld [vmem:[%s18268_s8 + $0xe8] sm:$0xff] }
 0x39c   : > { %v15601_v63 = vpop.permute.xlu1 %3492 }
 0x39d   : > { %v15607_v53 = vpop.permute.xlu0 %3487 }
 0x39e   : > { %7549 = vperm.xlu1 %12990, %v7398_v32   ;;  %v1254_v32 = vadd.f32 %v1213_v12, %v878_v51  ;;  %v2553_v12 = vmul.f32 %v13697_v28, %v15501_v17  ;;  %v2888_v51 = vmul.f32 %v13715_v49, %v15547_v4  ;;  %v1215_v17 = vmul.f32 %v13643_v33, %v15489_v26 }
 0x39f   : > { %7544 = vperm.xlu0 %12989, %v7397_v8   ;;  %v879_v8 = vmul.f32 %v13646_v48, %v15353_v16  ;;  %v7383_v16 = vld [vmem:[%s18268_s8 + $0x60] sm:$0xff]  ;;  %v3223_v4 = vmul.f32 %v13726_v24, %v15585_v57  ;;  %v880_v26 = vmul.f32 %v13646_v48, %v15479_v3  ;;  %v3558_v57 = vmul.f32 %v13733_v9, %v15607_v53  ;;  %v7386_v3 = vld [vmem:[%s18268_s8 + $0x78] sm:$0xff] }
 0x3a0   : > { %v3904_v54 = vpop.permute.xlu1 %3903  ;;  %v1885_v53 = vmul.f32 %v13665_v60, %v15567_v59  ;;  %v881_v59 = vmul.f32 %v13646_v48, %v15474_v29 }
 0x3a1   : > { %v3974_v50 = vmul.f32 %v3904_v54, %v3687_v1  ;;  %v3899_v25 = vpop.permute.xlu0 %3898  ;;  %v1589_v1 = vadd.f32 %v1548_v56, %v1254_v32  ;;  %v7384_v54 = vld [vmem:[%s18268_s8 + $0x68] sm:$0xff] }
 0x3a2   : > { %v3973_v47 = vmul.f32 %v3899_v25, %v3686_v44  ;;  %7469 = vperm.xlu1 %12990, %v7382_v13   ;;  %v2218_v13 = vmul.f32 %v13683_v5, %v15443_v19  ;;  %v1255_v44 = vadd.f32 %v1214_v37, %v879_v8  ;;  %v2219_v25 = vmul.f32 %v13683_v5, %v15436_v45  ;;  %v7401_v8 = vld [vmem:[%s18268_s8 + $0xf0] sm:$0xff] }
 0x3a3   : > { %4016 = vst.msk [vmem:[#allocation3 + $0x120] sm:$0xff] %vm3982_vm4, %v3974_v50  ;;  %7464 = vperm.xlu0 %12989, %v7381_v58   ;;  %v1924_v40 = vadd.f32 %v1883_v38, %v1589_v1 }
 0x3a4   : > { %4015 = vst.msk [vmem:[#allocation3 + $0x118] sm:$0xff] %vm3982_vm4, %v3973_v47  ;;  %v15628_v10 = vpop.permute.xlu1 %1162  ;;  %v1590_v50 = vadd.f32 %v1549_v21, %v1255_v44  ;;  %v2554_v21 = vmul.f32 %v13697_v28, %v15494_v23  ;;  %v2889_v23 = vmul.f32 %v13715_v49, %v15540_v20 }
 0x3a5   : > { %v15635_v14 = vpop.permute.xlu0 %827  ;;  %v2259_v47 = vadd.f32 %v2218_v13, %v1924_v40  ;;  %v1256_v40 = vadd.f32 %v1215_v17, %v880_v26 }
 0x3a6   : > { %7559 = vperm.xlu1 %12990, %v7400_v7  }
 0x3a7   : > { %7554 = vperm.xlu0 %12989, %v7399_v52   ;;  %v1925_v52 = vadd.f32 %v1884_v62, %v1590_v50  ;;  %v2594_v1 = vadd.f32 %v2553_v12, %v2259_v47  ;;  %v1550_v62 = vmul.f32 %v13654_v41, %v15529_v6  ;;  %v7385_v6 = vld [vmem:[%s18268_s8 + $0x70] sm:$0xff]  ;;  %v3224_v50 = vmul.f32 %v13726_v24, %v15580_v18 }
 0x3a8   : > { %v15648_v58 = vpop.permute.xlu1 %2497  ;;  %v1216_v47 = vmul.f32 %v13643_v33, %v15484_v34  ;;  %v1551_v18 = vmul.f32 %v13654_v41, %v15518_v27 }
 0x3a9   : > { %v2493_v19 = vpop.permute.xlu0 %2492  ;;  %v2260_v44 = vadd.f32 %v2219_v25, %v1925_v52 }
 0x3aa   : > { %7479 = vperm.xlu1 %12990, %v7384_v54  }
 0x3ab   : > { %7474 = vperm.xlu0 %12989, %v7383_v16   ;;  %v4122_v56 = vld [vmem:[#allocation3 + $0x116] sm:$0xff]  ;;  %v4123_v7 = vld [vmem:[#allocation3 + $0x11e] sm:$0xff]  ;;  %v2929_v16 = vadd.f32 %v2888_v51, %v2594_v1  ;;  %v2595_v20 = vadd.f32 %v2554_v21, %v2260_v44  ;;  %v1591_v51 = vadd.f32 %v1550_v62, %v1256_v40  ;;  %v1257_v21 = vadd.f32 %v1216_v47, %v881_v59 }
 0x3ac   : > { %v4059_v37 = vld [vmem:[#allocation3 + $0x115] sm:$0xff]  ;;  %v2828_v32 = vpop.permute.xlu1 %2827  ;;  %v4148_v38 = vpack.c.bf16 %v4123_v7, %v4122_v56  ;;  %v4060_v45 = vld [vmem:[#allocation3 + $0x11d] sm:$0xff]  ;;  %v2220_v7 = vmul.f32 %v13683_v5, %v15595_v22  ;;  %v1886_v22 = vmul.f32 %v13665_v60, %v15558_v31 }
 0x3ad   : > { %v15671_v13 = vpop.permute.xlu0 %1497  ;;  %v4084_v54 = vpack.c.bf16 %v4060_v45, %v4059_v37  ;;  %v3264_v25 = vadd.f32 %v3223_v4, %v2929_v16  ;;  %v2930_v56 = vadd.f32 %v2889_v23, %v2595_v20  ;;  %v3559_v37 = vmul.f32 %v13733_v9, %v15601_v63 }
 0x3ae   : > { %11815 = vmatmul.mubr.msk.bf16.gmra.mrb[68].mxu0 %vm3982_vm4, %v4148_v38  ;;  %7569 = vperm.xlu1 %12990, %v7402_v30   ;;  %v1926_v38 = vadd.f32 %v1885_v53, %v1591_v51  ;;  %v2555_v45 = vmul.f32 %v13697_v28, %v2493_v19  ;;  %v2890_v4 = vmul.f32 %v13715_v49, %v2828_v32 }
 0x3af   : > { %11901 = vmatmul.mubr.msk.bf16.gmra.mrb[68].mxu1 %vm3982_vm4, %v4084_v54  ;;  %7564 = vperm.xlu0 %12989, %v7401_v8   ;;  %v3599_v52 = vadd.f32 %v3558_v57, %v3264_v25  ;;  %v3265_v34 = vadd.f32 %v3224_v50, %v2930_v56  ;;  %v1592_v54 = vadd.f32 %v1551_v18, %v1257_v21 }
 0x3b0   : > { %v15686_v12 = vpop.permute.xlu1 %1832  ;;  %11818 = vmatprep.mubr.msk.bf16.mxu0 %vm13169_vm3, %v18290_v15  ;;  %11904 = vmatprep.mubr.msk.bf16.mxu1 %vm13169_vm3, %v18290_v15  ;;  %v2261_v63 = vadd.f32 %v2220_v7, %v1926_v38  ;;  %v2221_v19 = vmul.f32 %v13683_v5, %v15590_v46  ;;  %v1217_v32 = vmul.f32 %v13643_v33, %v15628_v10 }
 0x3b1   : > { %v2833_v30 = vpop.permute.xlu0 %2832  ;;  %v3600_v1 = vadd.f32 %v3559_v37, %v3265_v34  ;;  %v3647_v27 = vadd.f32 %v15449_v0, %v3599_v52  ;;  %v1927_v57 = vadd.f32 %v1886_v22, %v1592_v54 }
 0x3b2   : > { %7489 = vperm.xlu1 %12990, %v7386_v3   ;;  %v2596_v62 = vadd.f32 %v2555_v45, %v2261_v63  ;;  %v2556_v3 = vmul.f32 %v13697_v28, %v15648_v58  ;;  %v2891_v58 = vmul.f32 %v13715_v49, %v2833_v30 }
 0x3b3   : > { %7484 = vperm.xlu0 %12989, %v7385_v6   ;;  %v3688_v25 = vmax.f32 %v3647_v27, 0.0  ;;  %v3648_v10 = vadd.f32 %v15449_v0, %v3600_v1  ;;  %v2262_v47 = vadd.f32 %v2221_v19, %v1927_v57 }
 0x3b4   : > { %v3168_v17 = vpop.permute.xlu1 %3167  ;;  %v2931_v6 = vadd.f32 %v2890_v4, %v2596_v62 }
 0x3b5   : > { %v3163_v8 = vpop.permute.xlu0 %3162  ;;  %v2597_v18 = vadd.f32 %v2556_v3, %v2262_v47  ;;  %v3226_v38 = vmul.f32 %v13726_v24, %v3168_v17  ;;  %v10443_v3 = vld [vmem:[%s18269_s9 + $0x8] sm:$0xff] }
 0x3b6   : > { %7579 = vperm.xlu1 %12990, %v15196_v61   ;;  %v3225_v31 = vmul.f32 %v13726_v24, %v3163_v8 }
 0x3b7   : > { %v4349_v29 = vpop.f32.mrb[48].mxu0  ;;  %7574 = vperm.xlu0 %12989, %v15205_v55   ;;  %v882_v55 = vmul.f32 %v13646_v48, %v15635_v14  ;;  %v1552_v14 = vmul.f32 %v13654_v41, %v15671_v13  ;;  %v3689_v13 = vmax.f32 %v3648_v10, 0.0  ;;  %v2932_v45 = vadd.f32 %v2891_v58, %v2597_v18 }
 0x3b8   : > { %v3498_v44 = vpop.permute.xlu1 %3497  ;;  %v4615_v26 = vpop.f32.mrb[48].mxu1  ;;  %v3266_v7 = vadd.f32 %v3225_v31, %v2931_v6 }
 0x3b9   : > { %v15719_v23 = vadd.f32 %v4615_v26, %v4349_v29  ;;  %v2168_v61 = vpop.permute.xlu0 %2167  ;;  %v11796_v16 = vpop.f32.mrb[49].mxu0  ;;  %v3560_v20 = vmul.f32 %v13733_v9, %v3498_v44  ;;  %v1258_v59 = vadd.f32 %v1217_v32, %v882_v55  ;;  %v7411_v44 = vld [vmem:[%s18268_s8 + $0x140] sm:$0xf] }
 0x3ba   : > { %v11882_v46 = vpop.f32.mrb[49].mxu1  ;;  %v4352_v40 = vpop.f32.mrb[50].mxu0  ;;  %7589 = vperm.xlu1 %12990, %v15290_v2   ;;  %v2222_v8 = vmul.f32 %v13683_v5, %v2168_v61  ;;  %v10444_v61 = vld [vmem:[%s18269_s9 + $0x10] sm:$0xff] }
 0x3bb   : > { %v4618_v53 = vpop.f32.mrb[50].mxu1  ;;  %v11797_v50 = vpop.f32.mrb[51].mxu0  ;;  %7584 = vperm.xlu0 %12989, %v15260_v11   ;;  %v1887_v11 = vmul.f32 %v13665_v60, %v15686_v12  ;;  %v3601_v34 = vadd.f32 %v3560_v20, %v3266_v7  ;;  %v1593_v30 = vadd.f32 %v1552_v14, %v1258_v59  ;;  %v3267_v12 = vadd.f32 %v3226_v38, %v2932_v45  ;;  %v10446_v7 = vld [vmem:[%s18269_s9 + $0x20] sm:$0xff] }
 0x3bc   : > { %v15734_v51 = vadd.f32 %v4618_v53, %v4352_v40  ;;  %v11883_v56 = vpop.f32.mrb[51].mxu1  ;;  %v3909_v2 = vpop.permute.xlu1 %3908 }
 0x3bd   : > { %v3975_v37 = vmul.f32 %v3909_v2, %v3688_v25  ;;  %v3503_v52 = vpop.permute.xlu0 %3502  ;;  %v1928_v1 = vadd.f32 %v1887_v11, %v1593_v30  ;;  %v3649_v29 = vadd.f32 %v15449_v0, %v3601_v34  ;;  %v10448_v34 = vld [vmem:[%s18269_s9 + $0x30] sm:$0xff] }
 0x3be   : > { %7599 = vperm.xlu1 %12990, %v15338_v36   ;;  %v3561_v21 = vmul.f32 %v13733_v9, %v3503_v52  ;;  %v18308_v36 = vld [vmem:[#allocation27_spill] sm:$0xff] }
 0x3bf   : > { %4017 = vst.msk [vmem:[#allocation3 + $0x128] sm:$0xff] %vm3982_vm4, %v3975_v37  ;;  %7594 = vperm.xlu0 %12989, %v15317_v43   ;;  %v10442_v43 = vld [vmem:[%s18269_s9] sm:$0xff]  ;;  %v2263_v27 = vadd.f32 %v2222_v8, %v1928_v1  ;;  %v3690_v31 = vmax.f32 %v3649_v29, 0.0  ;;  %v10445_v37 = vld [vmem:[%s18269_s9 + $0x18] sm:$0xff] }
 0x3c0   : > { %v2503_v22 = vpop.permute.xlu1 %2502  ;;  %v3602_v54 = vadd.f32 %v3561_v21, %v3267_v12  ;;  %v10450_v21 = vld [vmem:[%s18269_s9 + $0x40] sm:$0xff] }
 0x3c1   : > { %v3914_v63 = vpop.permute.xlu0 %3913  ;;  %v2557_v17 = vmul.f32 %v13697_v28, %v2503_v22  ;;  %v10449_v22 = vld [vmem:[%s18269_s9 + $0x38] sm:$0xff] }
 0x3c2   : > { %v3976_v4 = vmul.f32 %v3914_v63, %v3689_v13  ;;  %7609 = vperm.xlu1 %12990, %v15441_v35   ;;  %v3650_v55 = vadd.f32 %v15449_v0, %v3602_v54  ;;  %v10447_v13 = vld [vmem:[%s18269_s9 + $0x28] sm:$0xff] }
 0x3c3   : > { %7604 = vperm.xlu0 %12989, %v18308_v36   ;;  %v2598_v62 = vadd.f32 %v2557_v17, %v2263_v27 }
 0x3c4   : > { %4018 = vst.msk [vmem:[#allocation3 + $0x130] sm:$0xff] %vm3982_vm4, %v3976_v4  ;;  %v3173_v19 = vpop.permute.xlu1 %3172  ;;  %v3691_v58 = vmax.f32 %v3650_v55, 0.0 }
 0x3c5   : > { %v2838_v26 = vpop.permute.xlu0 %2837  ;;  %v3227_v16 = vmul.f32 %v13726_v24, %v3173_v19 }
 0x3c6   : > { %v2892_v35 = vmul.f32 %v13715_v49, %v2838_v26  ;;  %10457 = vperm.xlu1 %12990, %v10442_v43   ;;  %v4124_v53 = vld [vmem:[#allocation3 + $0x126] sm:$0xff]  ;;  %v10451_v26 = vld [vmem:[%s18269_s9 + $0x48] sm:$0xff] }
 0x3c7   : > { %7614 = vperm.xlu0 %12989, %v7411_v44   ;;  %v4061_v25 = vld [vmem:[#allocation3 + $0x125] sm:$0xff]  ;;  %v10452_v44 = vld [vmem:[%s18269_s9 + $0x50] sm:$0xff] }
 0x3c8   : > { %v2933_v57 = vadd.f32 %v2892_v35, %v2598_v62  ;;  %v3919_v32 = vpop.permute.xlu1 %3918 }
 0x3c9   : > { %v3977_v46 = vmul.f32 %v3919_v32, %v3690_v31  ;;  %v3508_v40 = vpop.permute.xlu0 %3507 }
 0x3ca   : > { %v3268_v6 = vadd.f32 %v3227_v16, %v2933_v57  ;;  %v3562_v20 = vmul.f32 %v13733_v9, %v3508_v40  ;;  %10467 = vperm.xlu1 %12990, %v10444_v61   ;;  %v10454_v16 = vld [vmem:[%s18269_s9 + $0x60] sm:$0xf]  ;;  %v10453_v57 = vld [vmem:[%s18269_s9 + $0x58] sm:$0xff] }
 0x3cb   : > { %4019 = vst.msk [vmem:[#allocation3 + $0x138] sm:$0xff] %vm3982_vm4, %v3977_v46  ;;  %10462 = vperm.xlu0 %12989, %v10443_v3   ;;  %v4125_v50 = vld [vmem:[#allocation3 + $0x12e] sm:$0xff] }
 0x3cc   : > { %v4062_v10 = vld [vmem:[#allocation3 + $0x12d] sm:$0xff]  ;;  %v3603_v47 = vadd.f32 %v3562_v20, %v3268_v6  ;;  %v3929_v14 = vpop.permute.xlu1 %3928  ;;  %v4149_v56 = vpack.c.bf16 %v4125_v50, %v4124_v53 }
 0x3cd   : > { %v4085_v2 = vpack.c.bf16 %v4062_v10, %v4061_v25  ;;  %v3924_v52 = vpop.permute.xlu0 %3923 }
 0x3ce   : > { %v3651_v59 = vadd.f32 %v15449_v0, %v3603_v47  ;;  %v3978_v18 = vmul.f32 %v3924_v52, %v3691_v58  ;;  %11819 = vmatmul.mubr.msk.bf16.gmra.mrb[72].mxu0 %vm3982_vm4, %v4149_v56  ;;  %10477 = vperm.xlu1 %12990, %v10446_v7  }
 0x3cf   : > { %11905 = vmatmul.mubr.msk.bf16.gmra.mrb[72].mxu1 %vm3982_vm4, %v4085_v2  ;;  %10472 = vperm.xlu0 %12989, %v10445_v37  }
 0x3d0   : > { %v3692_v11 = vmax.f32 %v3651_v59, 0.0  ;;  %4020 = vst.msk [vmem:[#allocation3 + $0x140] sm:$0xff] %vm3982_vm4, %v3978_v18  ;;  %v1168_v38 = vpop.permute.xlu1 %1167  ;;  %11822 = vmatprep.mubr.msk.bf16.mxu0 %vm13169_vm3, %v18290_v15  ;;  %11908 = vmatprep.mubr.msk.bf16.mxu1 %vm13169_vm3, %v18290_v15  ;;  %v4685_v59 = vld [vmem:[#allocation3 + $0x7] sm:$0xff]  ;;  %v4686_v18 = vld [vmem:[#allocation3 + $0xf] sm:$0xff] }
 0x3d1   : > { %v833_v30 = vpop.permute.xlu0 %832  ;;  %v1218_v1 = vmul.f32 %v13643_v33, %v1168_v38 }
 0x3d2   : > { %v3979_v45 = vmul.f32 %v3929_v14, %v3692_v11  ;;  %10487 = vperm.xlu1 %12990, %v10448_v34   ;;  %v883_v12 = vmul.f32 %v13646_v48, %v833_v30  ;;  %v4126_v17 = vld [vmem:[#allocation3 + $0x136] sm:$0xff] }
 0x3d3   : > { %10482 = vperm.xlu0 %12989, %v10447_v13   ;;  %v4063_v36 = vld [vmem:[#allocation3 + $0x135] sm:$0xff] }
 0x3d4   : > { %4021 = vst.msk [vmem:[#allocation3 + $0x148] sm:$0xff] %vm3982_vm4, %v3979_v45  ;;  %v1838_v8 = vpop.permute.xlu1 %1837  ;;  %v1259_v35 = vadd.f32 %v1218_v1, %v883_v12 }
 0x3d5   : > { %v1503_v63 = vpop.permute.xlu0 %1502  ;;  %v1888_v46 = vmul.f32 %v13665_v60, %v1838_v8 }
 0x3d6   : > { %10497 = vperm.xlu1 %12990, %v10450_v21   ;;  %v1553_v43 = vmul.f32 %v13654_v41, %v1503_v63  ;;  %v5057_v63 = vld [vmem:[#allocation3 + $0x1f] sm:$0xff] }
 0x3d7   : > { %10492 = vperm.xlu0 %12989, %v10449_v22   ;;  %v4127_v4 = vld [vmem:[#allocation3 + $0x13e] sm:$0xff] }
 0x3d8   : > { %v4064_v29 = vld [vmem:[#allocation3 + $0x13d] sm:$0xff]  ;;  %v838_v27 = vpop.permute.xlu1 %837  ;;  %v4150_v54 = vpack.c.bf16 %v4127_v4, %v4126_v17  ;;  %v1594_v31 = vadd.f32 %v1553_v43, %v1259_v35  ;;  %v4728_v17 = vpack.c.bf16 %v4686_v18, %v4685_v59  ;;  %v10814_v4 = vld [vmem:[%s18262_s2 + $0x10] sm:$0xf]  ;;  %v5062_v59 = vld [vmem:[#allocation3 + $0x47] sm:$0xff] }
 0x3d9   : > { %v4086_v19 = vpack.c.bf16 %v4064_v29, %v4063_v36  ;;  %v2173_v62 = vpop.permute.xlu0 %2172  ;;  %v884_v45 = vmul.f32 %v13646_v48, %v838_v27  ;;  %v5056_v22 = vld [vmem:[#allocation3 + $0x17] sm:$0xff]  ;;  %v5063_v18 = vld [vmem:[#allocation3 + $0x4f] sm:$0xff] }
 0x3da   : > { %11823 = vmatmul.mubr.msk.bf16.gmra.mrb[76].mxu0 %vm3982_vm4, %v4150_v54  ;;  %10507 = vperm.xlu1 %12990, %v10452_v44   ;;  %v1929_v40 = vadd.f32 %v1888_v46, %v1594_v31  ;;  %v2223_v6 = vmul.f32 %v13683_v5, %v2173_v62  ;;  %v5099_v54 = vpack.c.bf16 %v5057_v63, %v5056_v22 }
 0x3db   : > { %11909 = vmatmul.mubr.msk.bf16.gmra.mrb[76].mxu1 %vm3982_vm4, %v4086_v19  ;;  %10502 = vperm.xlu0 %12989, %v10451_v26   ;;  %v4128_v55 = vld [vmem:[#allocation3 + $0x146] sm:$0xf]  ;;  %v5555_v19 = vsel %vm4215_vm2, %v10814_v4, 0 }
 0x3dc   : > { %v2508_v61 = vpop.permute.xlu1 %2507  ;;  %11826 = vmatprep.mubr.msk.bf16.mxu0 %vm13169_vm3, %v18290_v15  ;;  %11912 = vmatprep.mubr.msk.bf16.mxu1 %vm13169_vm3, %v18290_v15  ;;  %v4065_v3 = vld [vmem:[#allocation3 + $0x145] sm:$0xf]  ;;  %v4151_v50 = vpack.c.bf16 %v4128_v55, %v4128_v55  ;;  %v2264_v11 = vadd.f32 %v2223_v6, %v1929_v40 }
 0x3dd   : > { %v1173_v32 = vpop.permute.xlu0 %1172  ;;  %v4087_v25 = vpack.c.bf16 %v4065_v3, %v4065_v3  ;;  %v2558_v14 = vmul.f32 %v13697_v28, %v2508_v61 }
 0x3de   : > { %10517 = vperm.xlu1 %12990, %v10454_v16   ;;  %v1219_v7 = vmul.f32 %v13643_v33, %v1173_v32  ;;  %v5058_v16 = vld [vmem:[#allocation3 + $0x27] sm:$0xff] }
 0x3df   : > { %10512 = vperm.xlu0 %12989, %v10453_v57   ;;  %v2599_v1 = vadd.f32 %v2558_v14, %v2264_v11  ;;  %v5059_v57 = vld [vmem:[#allocation3 + $0x2f] sm:$0xff]  ;;  %v5061_v14 = vld [vmem:[#allocation3 + $0x3f] sm:$0xff]  ;;  %v5064_v11 = vld [vmem:[#allocation3 + $0x57] sm:$0xff] }
 0x3e0   : > { %v2843_v20 = vpop.permute.xlu1 %2842  ;;  %v4357_v53 = vpop.f32.mrb[52].mxu0  ;;  %v1260_v36 = vadd.f32 %v1219_v7, %v884_v45  ;;  %v5100_v46 = vpack.c.bf16 %v5059_v57, %v5058_v16 }
 0x3e1   : > { %v4623_v10 = vpop.f32.mrb[52].mxu1  ;;  %v1508_v47 = vpop.permute.xlu0 %1507  ;;  %v2893_v38 = vmul.f32 %v13715_v49, %v2843_v20 }
 0x3e2   : > { %v15817_v58 = vadd.f32 %v4623_v10, %v4357_v53  ;;  %v11800_v56 = vpop.f32.mrb[53].mxu0  ;;  %v11886_v2 = vpop.f32.mrb[53].mxu1  ;;  %11827 = vmatmul.mubr.msk.bf16.gmra.mrb[80].mxu0 %vm3982_vm4, %v4151_v50  ;;  %v1554_v33 = vmul.f32 %v13654_v41, %v1508_v47  ;;  %v5060_v47 = vld [vmem:[#allocation3 + $0x37] sm:$0xff] }
 0x3e3   : > { %11913 = vmatmul.mubr.msk.bf16.gmra.mrb[80].mxu1 %vm3982_vm4, %v4087_v25  ;;  %v4360_v37 = vpop.f32.mrb[54].mxu0  ;;  %v4626_v52 = vpop.f32.mrb[54].mxu1  ;;  %11918 = vmatprep.mubr.msk.bf16.mxu0 %vm13169_vm3, %v18290_v15  ;;  %v2934_v29 = vadd.f32 %v2893_v38, %v2599_v1  ;;  %v5101_v7 = vpack.c.bf16 %v5061_v14, %v5060_v47  ;;  %v5065_v38 = vld [vmem:[#allocation3 + $0x5f] sm:$0xff]  ;;  %v5080_v14 = vld [vmem:[#allocation3 + $0xd7] sm:$0xff] }
 0x3e4   : > { %12004 = vmatprep.mubr.msk.bf16.mxu1 %vm13169_vm3, %v18290_v15  ;;  %v15827_v34 = vadd.f32 %v4626_v52, %v4360_v37  ;;  %v11801_v13 = vpop.f32.mrb[55].mxu0  ;;  %v11887_v30 = vpop.f32.mrb[55].mxu1  ;;  %v1595_v48 = vadd.f32 %v1554_v33, %v1260_v36 }
 0x3e5   : > { %v3178_v8 = vpop.permute.xlu1 %3177  ;;  %v1843_v21 = vpop.permute.xlu0 %1842  ;;  %v5103_v30 = vpack.c.bf16 %v5065_v38, %v5064_v11 }
 0x3e6   : > { %v3228_v12 = vmul.f32 %v13726_v24, %v3178_v8  ;;  %v1889_v43 = vmul.f32 %v13665_v60, %v1843_v21  ;;  %v10836_v21 = vld [vmem:[%s18262_s2 + $0x14] sm:$0xf] }
 0x3e7   : > { %v5926_v1 = vsel %vm4215_vm2, %v10836_v21, 0  ;;  %v5086_v21 = vld [vmem:[#allocation3 + $0x107] sm:$0xff] }
 0x3e8   : > { %v3269_v44 = vadd.f32 %v3228_v12, %v2934_v29  ;;  %v1930_v60 = vadd.f32 %v1889_v43, %v1595_v48  ;;  %v5066_v29 = vld [vmem:[#allocation3 + $0x67] sm:$0xff]  ;;  %v5067_v43 = vld [vmem:[#allocation3 + $0x6f] sm:$0xff]  ;;  %v5068_v48 = vld [vmem:[#allocation3 + $0x77] sm:$0xff] }
 0x3e9   : > { %v3513_v27 = vpop.permute.xlu1 %3512  ;;  %v2178_v41 = vpop.permute.xlu0 %2177 }
 0x3ea   : > { %v3563_v26 = vmul.f32 %v13733_v9, %v3513_v27  ;;  %v2224_v62 = vmul.f32 %v13683_v5, %v2178_v41  ;;  %11919 = vmatmul.mubr.msk.bf16.vlgmr.msra.gmra.mrb[84].mxu0 %vm3982_vm4, %v4728_v17  ;;  %v5069_v27 = vld [vmem:[#allocation3 + $0x7f] sm:$0xff] }
 0x3eb   : > { %12005 = vmatmul.mubr.msk.bf16.vlgmr.msra.gmra.mrb[84].mxu1 %vm3982_vm4, %v5099_v54  ;;  %11922 = vmatprep.mubr.msk.bf16.mxu0 %vm13169_vm3, %v18290_v15  ;;  %v5105_v41 = vpack.c.bf16 %v5069_v27, %v5068_v48  ;;  %v5093_v27 = vld [vmem:[#allocation3 + $0x13f] sm:$0xff] }
 0x3ec   : > { %12008 = vmatprep.mubr.msk.bf16.mxu1 %vm13169_vm3, %v18290_v15  ;;  %v3604_v35 = vadd.f32 %v3563_v26, %v3269_v44  ;;  %12089 = vmatpush3.bf16.msra.mxu0 %v5555_v19  ;;  %v2265_v5 = vadd.f32 %v2224_v62, %v1930_v60  ;;  %v5070_v19 = vld [vmem:[#allocation3 + $0x87] sm:$0xff]  ;;  %v5071_v44 = vld [vmem:[#allocation3 + $0x8f] sm:$0xff]  ;;  %v5072_v62 = vld [vmem:[#allocation3 + $0x97] sm:$0xff] }
 0x3ed   : > { %v2848_v31 = vpop.permute.xlu1 %2847  ;;  %v2513_v61 = vpop.permute.xlu0 %2512  ;;  %12260 = vmatprep.subr.bf16.mxu0 %v18290_v15  ;;  %12175 = vmatpush3.bf16.msra.mxu1 %v5926_v1  ;;  %v5106_v26 = vpack.c.bf16 %v5071_v44, %v5070_v19  ;;  %v5073_v60 = vld [vmem:[#allocation3 + $0x9f] sm:$0xff] }
 0x3ee   : > { %v2559_v32 = vmul.f32 %v13697_v28, %v2513_v61  ;;  %v2894_v55 = vmul.f32 %v13715_v49, %v2848_v31  ;;  %v3652_v40 = vadd.f32 %v15449_v0, %v3604_v35  ;;  %12346 = vmatprep.subr.bf16.mxu1 %v18290_v15  ;;  %v5107_v35 = vpack.c.bf16 %v5073_v60, %v5072_v62  ;;  %v5074_v31 = vld [vmem:[#allocation3 + $0xa7] sm:$0xff]  ;;  %v5075_v61 = vld [vmem:[#allocation3 + $0xaf] sm:$0xff] }
 0x3ef   : > { %v5108_v16 = vpack.c.bf16 %v5075_v61, %v5074_v31 }
 0x3f0   : > { %v2600_v3 = vadd.f32 %v2559_v32, %v2265_v5  ;;  %v3693_v25 = vmax.f32 %v3652_v40, 0.0 }
 0x3f1   : > { %v3518_v6 = vpop.permute.xlu1 %3517  ;;  %v3183_v20 = vpop.permute.xlu0 %3182 }
 0x3f2   : > { %v2935_v53 = vadd.f32 %v2894_v55, %v2600_v3  ;;  %v3229_v50 = vmul.f32 %v13726_v24, %v3183_v20  ;;  %11923 = vmatmul.mubr.msk.bf16.gmra.mrb[88].mxu0 %vm3982_vm4, %v5099_v54  ;;  %v3564_v28 = vmul.f32 %v13733_v9, %v3518_v6  ;;  %v5104_v54 = vpack.c.bf16 %v5067_v43, %v5066_v29  ;;  %v5091_v43 = vld [vmem:[#allocation3 + $0x12f] sm:$0xff] }
 0x3f3   : > { %12009 = vmatmul.mubr.msk.bf16.gmra.mrb[88].mxu1 %vm3982_vm4, %v5100_v46  ;;  %11926 = vmatprep.mubr.msk.bf16.mxu0 %vm13169_vm3, %v18290_v15 }
 0x3f4   : > { %12012 = vmatprep.mubr.msk.bf16.mxu1 %vm13169_vm3, %v18290_v15  ;;  %v3270_v49 = vadd.f32 %v3229_v50, %v2935_v53  ;;  %v5076_v50 = vld [vmem:[#allocation3 + $0xb7] sm:$0xff] }
 0x3f5   : > { %v3934_v10 = vpop.permute.xlu0 %3933  ;;  %v3939_v52 = vpop.permute.xlu1 %3938 }
 0x3f6   : > { %v3605_v56 = vadd.f32 %v3564_v28, %v3270_v49  ;;  %v3980_v2 = vmul.f32 %v3934_v10, %v3693_v25  ;;  %v5077_v28 = vld [vmem:[#allocation3 + $0xbf] sm:$0xff]  ;;  %v5078_v25 = vld [vmem:[#allocation3 + $0xc7] sm:$0xff]  ;;  %v5079_v10 = vld [vmem:[#allocation3 + $0xcf] sm:$0xff] }
 0x3f7   : > { %v5109_v49 = vpack.c.bf16 %v5077_v28, %v5076_v50  ;;  %v5110_v47 = vpack.c.bf16 %v5079_v10, %v5078_v25  ;;  %v5427_v28 = vld [vmem:[#allocation3 + $0x18] sm:$0xff]  ;;  %v5799_v25 = vld [vmem:[#allocation3 + $0x21] sm:$0xff] }
 0x3f8   : > { %v3653_v24 = vadd.f32 %v15449_v0, %v3605_v56  ;;  %4022 = vst.msk [vmem:[#allocation3 + $0x150] sm:$0xff] %vm3982_vm4, %v3980_v2  ;;  %v5102_v0 = vpack.c.bf16 %v5063_v18, %v5062_v59  ;;  %v5081_v56 = vld [vmem:[#allocation3 + $0xdf] sm:$0xff] }
 0x3f9   : > { %v5111_v2 = vpack.c.bf16 %v5081_v56, %v5080_v14  ;;  %v10858_v10 = vld [vmem:[%s18262_s2 + $0x18] sm:$0xf] }
 0x3fa   : > { %v3694_v37 = vmax.f32 %v3653_v24, 0.0  ;;  %11927 = vmatmul.mubr.msk.bf16.gmra.mrb[92].mxu0 %vm3982_vm4, %v5100_v46  ;;  %v5082_v24 = vld [vmem:[#allocation3 + $0xe7] sm:$0xff] }
 0x3fb   : > { %12013 = vmatmul.mubr.msk.bf16.gmra.mrb[92].mxu1 %vm3982_vm4, %v5101_v7  ;;  %11930 = vmatprep.mubr.msk.bf16.mxu0 %vm13169_vm3, %v18290_v15 }
 0x3fc   : > { %12016 = vmatprep.mubr.msk.bf16.mxu1 %vm13169_vm3, %v18290_v15  ;;  %v3981_v9 = vmul.f32 %v3939_v52, %v3694_v37  ;;  %v5084_v52 = vld [vmem:[#allocation3 + $0xf7] sm:$0xff] }
 0x3fe   : > { %4024 = vst.msk [vmem:[#allocation3 + $0x158] sm:$0xf] %vm4023_vm6, %v3981_v9  ;;  %v5085_v9 = vld [vmem:[#allocation3 + $0xff] sm:$0xff] }
 0x3ff   : > { %v5113_v59 = vpack.c.bf16 %v5085_v9, %v5084_v52  ;;  %v5095_v44 = vld [vmem:[#allocation3 + $0x14f] sm:$0xff] }
 0x400   : > { %v5800_v52 = vld [vmem:[#allocation3 + $0x29] sm:$0xff] }
 0x402   : > { %11931 = vmatmul.mubr.msk.bf16.gmra.mrb[96].mxu0 %vm3982_vm4, %v5101_v7  ;;  %v5083_v7 = vld [vmem:[#allocation3 + $0xef] sm:$0xff] }
 0x403   : > { %12017 = vmatmul.mubr.msk.bf16.gmra.mrb[96].mxu1 %vm3982_vm4, %v5102_v0  ;;  %11934 = vmatprep.mubr.msk.bf16.mxu0 %vm13169_vm3, %v18290_v15  ;;  %v5112_v37 = vpack.c.bf16 %v5083_v7, %v5082_v24  ;;  %v5429_v24 = vld [vmem:[#allocation3 + $0x28] sm:$0xff]  ;;  %v5430_v7 = vld [vmem:[#allocation3 + $0x30] sm:$0xff] }
 0x404   : > { %12020 = vmatprep.mubr.msk.bf16.mxu1 %vm13169_vm3, %v18290_v15  ;;  %v5471_v9 = vpack.c.bf16 %v5430_v7, %v5429_v24 }
 0x408   : > { %v4365_v13 = vpop.f32.mrb[56].mxu0 }
 0x409   : > { %v4631_v45 = vpop.f32.mrb[56].mxu1  ;;  %v11804_v8 = vpop.f32.mrb[57].mxu0 }
 0x40a   : > { %v15872_v33 = vadd.f32 %v4631_v45, %v4365_v13  ;;  %11935 = vmatmul.mubr.msk.bf16.gmra.mrb[100].mxu0 %vm3982_vm4, %v5102_v0  ;;  %v11890_v22 = vpop.f32.mrb[57].mxu1  ;;  %v4368_v63 = vpop.f32.mrb[58].mxu0 }
 0x40b   : > { %12021 = vmatmul.mubr.msk.bf16.gmra.mrb[100].mxu1 %vm3982_vm4, %v5103_v30  ;;  %11938 = vmatprep.mubr.msk.bf16.mxu0 %vm13169_vm3, %v18290_v15  ;;  %v4634_v12 = vpop.f32.mrb[58].mxu1  ;;  %v11805_v17 = vpop.f32.mrb[59].mxu0  ;;  %v5087_v22 = vld [vmem:[#allocation3 + $0x10f] sm:$0xff] }
 0x40c   : > { %12024 = vmatprep.mubr.msk.bf16.mxu1 %vm13169_vm3, %v18290_v15  ;;  %v15884_v4 = vadd.f32 %v4634_v12, %v4368_v63  ;;  %v11891_v36 = vpop.f32.mrb[59].mxu1  ;;  %v5114_v12 = vpack.c.bf16 %v5087_v22, %v5086_v21  ;;  %v5088_v17 = vld [vmem:[#allocation3 + $0x117] sm:$0xff] }
 0x40d   : > { %v5089_v36 = vld [vmem:[#allocation3 + $0x11f] sm:$0xff] }
 0x40e   : > { %v5115_v29 = vpack.c.bf16 %v5089_v36, %v5088_v17 }
 0x412   : > { %11939 = vmatmul.mubr.msk.bf16.gmra.mrb[104].mxu0 %vm3982_vm4, %v5103_v30 }
 0x413   : > { %12025 = vmatmul.mubr.msk.bf16.gmra.mrb[104].mxu1 %vm3982_vm4, %v5104_v54  ;;  %11942 = vmatprep.mubr.msk.bf16.mxu0 %vm13169_vm3, %v18290_v15 }
 0x414   : > { %12028 = vmatprep.mubr.msk.bf16.mxu1 %vm13169_vm3, %v18290_v15 }
 0x41a   : > { %11943 = vmatmul.mubr.msk.bf16.gmra.mrb[108].mxu0 %vm3982_vm4, %v5104_v54  ;;  %v5090_v54 = vld [vmem:[#allocation3 + $0x127] sm:$0xff] }
 0x41b   : > { %12029 = vmatmul.mubr.msk.bf16.gmra.mrb[108].mxu1 %vm3982_vm4, %v5105_v41  ;;  %11946 = vmatprep.mubr.msk.bf16.mxu0 %vm13169_vm3, %v18290_v15  ;;  %v5116_v48 = vpack.c.bf16 %v5091_v43, %v5090_v54 }
 0x41c   : > { %12032 = vmatprep.mubr.msk.bf16.mxu1 %vm13169_vm3, %v18290_v15 }
 0x422   : > { %11947 = vmatmul.mubr.msk.bf16.gmra.mrb[112].mxu0 %vm3982_vm4, %v5105_v41  ;;  %v5092_v41 = vld [vmem:[#allocation3 + $0x137] sm:$0xff] }
 0x423   : > { %12033 = vmatmul.mubr.msk.bf16.gmra.mrb[112].mxu1 %vm3982_vm4, %v5106_v26  ;;  %11950 = vmatprep.mubr.msk.bf16.mxu0 %vm13169_vm3, %v18290_v15  ;;  %v5117_v19 = vpack.c.bf16 %v5093_v27, %v5092_v41  ;;  %v5434_v27 = vld [vmem:[#allocation3 + $0x50] sm:$0xff] }
 0x424   : > { %12036 = vmatprep.mubr.msk.bf16.mxu1 %vm13169_vm3, %v18290_v15  ;;  %v5805_v41 = vld [vmem:[#allocation3 + $0x51] sm:$0xff] }
 0x42a   : > { %11951 = vmatmul.mubr.msk.bf16.gmra.mrb[116].mxu0 %vm3982_vm4, %v5106_v26  ;;  %v5094_v26 = vld [vmem:[#allocation3 + $0x147] sm:$0xff] }
 0x42b   : > { %12037 = vmatmul.mubr.msk.bf16.gmra.mrb[116].mxu1 %vm3982_vm4, %v5107_v35  ;;  %11954 = vmatprep.mubr.msk.bf16.mxu0 %vm13169_vm3, %v18290_v15  ;;  %v5118_v62 = vpack.c.bf16 %v5095_v44, %v5094_v26 }
 0x42c   : > { %12040 = vmatprep.mubr.msk.bf16.mxu1 %vm13169_vm3, %v18290_v15 }
 0x431   : > { %v4373_v57 = vpop.f32.mrb[60].mxu0 }
 0x432   : > { %v4639_v5 = vpop.f32.mrb[60].mxu1  ;;  %11955 = vmatmul.mubr.msk.bf16.gmra.mrb[120].mxu0 %vm3982_vm4, %v5107_v35  ;;  %v11808_v55 = vpop.f32.mrb[61].mxu0 }
 0x433   : > { %12041 = vmatmul.mubr.msk.bf16.gmra.mrb[120].mxu1 %vm3982_vm4, %v5108_v16  ;;  %v15913_v32 = vadd.f32 %v4639_v5, %v4373_v57  ;;  %v11894_v3 = vpop.f32.mrb[61].mxu1  ;;  %11958 = vmatprep.mubr.msk.bf16.mxu0 %vm13169_vm3, %v18290_v15  ;;  %v4376_v46 = vpop.f32.mrb[62].mxu0 }
 0x434   : > { %12044 = vmatprep.mubr.msk.bf16.mxu1 %vm13169_vm3, %v18290_v15  ;;  %v4642_v40 = vpop.f32.mrb[62].mxu1  ;;  %v11809_v20 = vpop.f32.mrb[63].mxu0 }
 0x435   : > { %v15919_v6 = vadd.f32 %v4642_v40, %v4376_v46  ;;  %v11895_v53 = vpop.f32.mrb[63].mxu1  ;;  %v4725_v40 = vld [vmem:[#allocation3 + $0x147] sm:$0xf]  ;;  %v5096_v20 = vld [vmem:[#allocation3 + $0x157] sm:$0xf] }
 0x436   : > { %v4748_v53 = vpack.c.bf16 %v4725_v40, %v4725_v40  ;;  %v5119_v50 = vpack.c.bf16 %v5096_v20, %v5096_v20  ;;  %v5806_v20 = vld [vmem:[#allocation3 + $0x59] sm:$0xff] }
 0x43a   : > { %11959 = vmatmul.mubr.msk.bf16.gmra.mrb[124].mxu0 %vm3982_vm4, %v5108_v16 }
 0x43b   : > { %12045 = vmatmul.mubr.msk.bf16.gmra.mrb[124].mxu1 %vm3982_vm4, %v5109_v49  ;;  %11962 = vmatprep.mubr.msk.bf16.mxu0 %vm13169_vm3, %v18290_v15 }
 0x43c   : > { %12048 = vmatprep.mubr.msk.bf16.mxu1 %vm13169_vm3, %v18290_v15 }
 0x442   : > { %11963 = vmatmul.mubr.msk.bf16.gmra.mrb[128].mxu0 %vm3982_vm4, %v5109_v49  ;;  %v5428_v49 = vld [vmem:[#allocation3 + $0x20] sm:$0xff] }
 0x443   : > { %12049 = vmatmul.mubr.msk.bf16.gmra.mrb[128].mxu1 %vm3982_vm4, %v5110_v47  ;;  %11966 = vmatprep.mubr.msk.bf16.mxu0 %vm13169_vm3, %v18290_v15  ;;  %v5470_v14 = vpack.c.bf16 %v5428_v49, %v5427_v28 }
 0x444   : > { %12052 = vmatprep.mubr.msk.bf16.mxu1 %vm13169_vm3, %v18290_v15 }
 0x44a   : > { %11967 = vmatmul.mubr.msk.bf16.gmra.mrb[132].mxu0 %vm3982_vm4, %v5110_v47  ;;  %v5798_v47 = vld [vmem:[#allocation3 + $0x19] sm:$0xff] }
 0x44b   : > { %12053 = vmatmul.mubr.msk.bf16.gmra.mrb[132].mxu1 %vm3982_vm4, %v5111_v2  ;;  %11970 = vmatprep.mubr.msk.bf16.mxu0 %vm13169_vm3, %v18290_v15  ;;  %v5841_v56 = vpack.c.bf16 %v5799_v25, %v5798_v47 }
 0x44c   : > { %12056 = vmatprep.mubr.msk.bf16.mxu1 %vm13169_vm3, %v18290_v15 }
 0x452   : > { %11971 = vmatmul.mubr.msk.bf16.gmra.mrb[136].mxu0 %vm3982_vm4, %v5111_v2  ;;  %v6297_v2 = vsel %vm4215_vm2, %v10858_v10, 0 }
 0x453   : > { %12057 = vmatmul.mubr.msk.bf16.gmra.mrb[136].mxu1 %vm3982_vm4, %v5112_v37  ;;  %11974 = vmatprep.mubr.msk.bf16.mxu0 %vm13169_vm3, %v18290_v15 }
 0x454   : > { %12060 = vmatprep.mubr.msk.bf16.mxu1 %vm13169_vm3, %v18290_v15 }
 0x459   : > { %v4381_v18 = vpop.f32.mrb[64].mxu0 }
 0x45a   : > { %v4647_v0 = vpop.f32.mrb[64].mxu1  ;;  %11975 = vmatmul.mubr.msk.bf16.gmra.mrb[140].mxu0 %vm3982_vm4, %v5112_v37  ;;  %v11812_v38 = vpop.f32.mrb[65].mxu0  ;;  %v5801_v37 = vld [vmem:[#allocation3 + $0x31] sm:$0xff] }
 0x45b   : > { %12061 = vmatmul.mubr.msk.bf16.gmra.mrb[140].mxu1 %vm3982_vm4, %v5113_v59  ;;  %v15947_v11 = vadd.f32 %v4647_v0, %v4381_v18  ;;  %11978 = vmatprep.mubr.msk.bf16.mxu0 %vm13169_vm3, %v18290_v15  ;;  %v11898_v13 = vpop.f32.mrb[65].mxu1  ;;  %v4384_v30 = vpop.f32.mrb[66].mxu0  ;;  %v5431_v18 = vld [vmem:[#allocation3 + $0x38] sm:$0xff]  ;;  %v5432_v0 = vld [vmem:[#allocation3 + $0x40] sm:$0xff] }
 0x45c   : > { %12064 = vmatprep.mubr.msk.bf16.mxu1 %vm13169_vm3, %v18290_v15  ;;  %v4650_v45 = vpop.f32.mrb[66].mxu1  ;;  %v11813_v8 = vpop.f32.mrb[67].mxu0  ;;  %v5803_v38 = vld [vmem:[#allocation3 + $0x41] sm:$0xff]  ;;  %v5802_v13 = vld [vmem:[#allocation3 + $0x39] sm:$0xff] }
 0x45d   : > { %v15953_v63 = vadd.f32 %v4650_v45, %v4384_v30  ;;  %v11899_v1 = vpop.f32.mrb[67].mxu1  ;;  %v5472_v30 = vpack.c.bf16 %v5432_v0, %v5431_v18  ;;  %v16015_v45 = vpack.c.bf16 %v5803_v38, %v5802_v13  ;;  %v5808_v18 = vld [vmem:[#allocation3 + $0x69] sm:$0xff]  ;;  %v10880_v0 = vld [vmem:[%s18262_s2 + $0x1c] sm:$0xf] }
 0x462   : > { %11979 = vmatmul.mubr.msk.bf16.gmra.mrb[144].mxu0 %vm3982_vm4, %v5113_v59  ;;  %v16006_v59 = vpack.c.bf16 %v5801_v37, %v5800_v52 }
 0x463   : > { %12065 = vmatmul.mubr.msk.bf16.gmra.mrb[144].mxu1 %vm3982_vm4, %v5114_v12  ;;  %11982 = vmatprep.mubr.msk.bf16.mxu0 %vm13169_vm3, %v18290_v15 }
 0x464   : > { %12068 = vmatprep.mubr.msk.bf16.mxu1 %vm13169_vm3, %v18290_v15 }
 0x46a   : > { %11983 = vmatmul.mubr.msk.bf16.gmra.mrb[148].mxu0 %vm3982_vm4, %v5114_v12 }
 0x46b   : > { %12069 = vmatmul.mubr.msk.bf16.gmra.mrb[148].mxu1 %vm3982_vm4, %v5115_v29  ;;  %11986 = vmatprep.mubr.msk.bf16.mxu0 %vm13169_vm3, %v18290_v15 }
 0x46c   : > { %12072 = vmatprep.mubr.msk.bf16.mxu1 %vm13169_vm3, %v18290_v15 }
 0x472   : > { %11987 = vmatmul.mubr.msk.bf16.gmra.mrb[152].mxu0 %vm3982_vm4, %v5115_v29 }
 0x473   : > { %12073 = vmatmul.mubr.msk.bf16.gmra.mrb[152].mxu1 %vm3982_vm4, %v5116_v48  ;;  %11990 = vmatprep.mubr.msk.bf16.mxu0 %vm13169_vm3, %v18290_v15 }
 0x474   : > { %12076 = vmatprep.mubr.msk.bf16.mxu1 %vm13169_vm3, %v18290_v15 }
 0x47a   : > { %11991 = vmatmul.mubr.msk.bf16.gmra.mrb[156].mxu0 %vm3982_vm4, %v5116_v48  ;;  %v5433_v48 = vld [vmem:[#allocation3 + $0x48] sm:$0xff] }
 0x47b   : > { %12077 = vmatmul.mubr.msk.bf16.gmra.mrb[156].mxu1 %vm3982_vm4, %v5117_v19  ;;  %11994 = vmatprep.mubr.msk.bf16.mxu0 %vm13169_vm3, %v18290_v15  ;;  %v5473_v44 = vpack.c.bf16 %v5434_v27, %v5433_v48 }
 0x47c   : > { %12080 = vmatprep.mubr.msk.bf16.mxu1 %vm13169_vm3, %v18290_v15 }
 0x481   : > { %v4389_v60 = vpop.f32.mrb[68].mxu0 }
 0x482   : > { %v4655_v35 = vpop.f32.mrb[68].mxu1  ;;  %v11816_v31 = vpop.f32.mrb[69].mxu0  ;;  %11995 = vmatmul.mubr.msk.bf16.gmra.mrb[160].mxu0 %vm3982_vm4, %v5117_v19  ;;  %v5804_v19 = vld [vmem:[#allocation3 + $0x49] sm:$0xff] }
 0x483   : > { %12081 = vmatmul.mubr.msk.bf16.gmra.mrb[160].mxu1 %vm3982_vm4, %v5118_v62  ;;  %v15981_v61 = vadd.f32 %v4655_v35, %v4389_v60  ;;  %v11902_v16 = vpop.f32.mrb[69].mxu1  ;;  %v4392_v57 = vpop.f32.mrb[70].mxu0  ;;  %11998 = vmatprep.mubr.msk.bf16.mxu0 %vm13169_vm3, %v18290_v15  ;;  %v16028_v26 = vpack.c.bf16 %v5805_v41, %v5804_v19  ;;  %v5435_v35 = vld [vmem:[#allocation3 + $0x58] sm:$0xff]  ;;  %v5436_v31 = vld [vmem:[#allocation3 + $0x60] sm:$0xff] }
 0x484   : > { %12084 = vmatprep.mubr.msk.bf16.mxu1 %vm13169_vm3, %v18290_v15  ;;  %v4658_v5 = vpop.f32.mrb[70].mxu1  ;;  %v11817_v55 = vpop.f32.mrb[71].mxu0  ;;  %v5807_v16 = vld [vmem:[#allocation3 + $0x61] sm:$0xff]  ;;  %v5474_v49 = vpack.c.bf16 %v5436_v31, %v5435_v35 }
 0x485   : > { %v15987_v3 = vadd.f32 %v4658_v5, %v4392_v57  ;;  %v11903_v46 = vpop.f32.mrb[71].mxu1  ;;  %v16041_v25 = vpack.c.bf16 %v5807_v16, %v5806_v20  ;;  %v18310_v35 = vld [vmem:[#allocation8_spill] sm:$0xff] }
 0x48a   : > { %11999 = vmatmul.mubr.msk.bf16.gmra.mrb[164].mxu0 %vm3982_vm4, %v4748_v53 }
 0x48b   : > { %12085 = vmatmul.mubr.msk.bf16.gmra.mrb[164].mxu1 %vm3982_vm4, %v5119_v50  ;;  %12090 = vmatprep.mubr.msk.bf16.mxu0 %vm13169_vm3, %v18290_v15 }
 0x48c   : > { %12176 = vmatprep.mubr.msk.bf16.mxu1 %vm13169_vm3, %v18290_v15 }
 0x492   : > { %12091 = vmatmul.mubr.msk.bf16.vlgmr.msra.gmra.mrb[168].mxu0 %vm3982_vm4, %v5470_v14  ;;  %v5437_v14 = vld [vmem:[#allocation3 + $0x68] sm:$0xff] }
 0x493   : > { %12177 = vmatmul.mubr.msk.bf16.vlgmr.msra.gmra.mrb[168].mxu1 %vm3982_vm4, %v5841_v56  ;;  %12094 = vmatprep.mubr.msk.bf16.mxu0 %vm13169_vm3, %v18290_v15  ;;  %v5438_v56 = vld [vmem:[#allocation3 + $0x70] sm:$0xff] }
 0x494   : > { %12180 = vmatprep.mubr.msk.bf16.mxu1 %vm13169_vm3, %v18290_v15  ;;  %12261 = vmatpush3.bf16.msra.mxu0 %v6297_v2  ;;  %v5809_v2 = vld [vmem:[#allocation3 + $0x71] sm:$0xff] }
 0x495   : > { %12432 = vmatprep.subr.bf16.mxu0 %v18290_v15 }
 0x49a   : > { %12095 = vmatmul.mubr.msk.bf16.gmra.mrb[172].mxu0 %vm3982_vm4, %v5471_v9 }
 0x49b   : > { %12181 = vmatmul.mubr.msk.bf16.gmra.mrb[172].mxu1 %vm3982_vm4, %v16006_v59  ;;  %12098 = vmatprep.mubr.msk.bf16.mxu0 %vm13169_vm3, %v18290_v15 }
 0x49c   : > { %12184 = vmatprep.mubr.msk.bf16.mxu1 %vm13169_vm3, %v18290_v15 }
 0x4a1   : > { %v4397_v8 = vpop.f32.mrb[72].mxu0 }
 0x4a2   : > { %v4663_v21 = vpop.f32.mrb[72].mxu1  ;;  %v11820_v1 = vpop.f32.mrb[73].mxu0  ;;  %12099 = vmatmul.mubr.msk.bf16.gmra.mrb[176].mxu0 %vm3982_vm4, %v5472_v30  ;;  %v5475_v30 = vpack.c.bf16 %v5438_v56, %v5437_v14 }
 0x4a3   : > { %v16017_v22 = vadd.f32 %v4663_v21, %v4397_v8  ;;  %v11906_v12 = vpop.f32.mrb[73].mxu1  ;;  %12185 = vmatmul.mubr.msk.bf16.gmra.mrb[176].mxu1 %vm3982_vm4, %v16015_v45  ;;  %v4400_v17 = vpop.f32.mrb[74].mxu0  ;;  %12102 = vmatprep.mubr.msk.bf16.mxu0 %vm13169_vm3, %v18290_v15  ;;  %v16055_v8 = vpack.c.bf16 %v5809_v2, %v5808_v18  ;;  %v6668_v21 = vsel %vm4215_vm2, %v10880_v0, 0  ;;  %v18312_v18 = vld [vmem:[#allocation10_spill] sm:$0xff] }
 0x4a4   : > { %v4666_v36 = vpop.f32.mrb[74].mxu1  ;;  %12188 = vmatprep.mubr.msk.bf16.mxu1 %vm13169_vm3, %v18290_v15  ;;  %v11821_v43 = vpop.f32.mrb[75].mxu0  ;;  %12347 = vmatpush3.bf16.msra.mxu1 %v6668_v21 }
 0x4a5   : > { %v16026_v29 = vadd.f32 %v4666_v36, %v4400_v17  ;;  %v11907_v54 = vpop.f32.mrb[75].mxu1  ;;  %v5439_v17 = vld [vmem:[#allocation3 + $0x78] sm:$0xff]  ;;  %v5440_v36 = vld [vmem:[#allocation3 + $0x80] sm:$0xff] }
 0x4a6   : > { %v5811_v43 = vld [vmem:[#allocation3 + $0x81] sm:$0xff] }
 0x4a7   : > { %v18309_v54 = vld [vmem:[#allocation7_spill] sm:$0xff] }
 0x4aa   : > { %12103 = vmatmul.mubr.msk.bf16.gmra.mrb[180].mxu0 %vm3982_vm4, %v5473_v44 }
 0x4ab   : > { %12189 = vmatmul.mubr.msk.bf16.gmra.mrb[180].mxu1 %vm3982_vm4, %v16028_v26  ;;  %12106 = vmatprep.mubr.msk.bf16.mxu0 %vm13169_vm3, %v18290_v15 }
 0x4ac   : > { %12192 = vmatprep.mubr.msk.bf16.mxu1 %vm13169_vm3, %v18290_v15 }
 0x4ad   : > { %v4405_v62 = vpop.f32.mrb[76].mxu0 }
 0x4ae   : > { %v4671_v60 = vpop.f32.mrb[76].mxu1  ;;  %v11824_v5 = vpop.f32.mrb[77].mxu0 }
 0x4af   : > { %v16037_v57 = vadd.f32 %v4671_v60, %v4405_v62  ;;  %v11910_v55 = vpop.f32.mrb[77].mxu1  ;;  %v4408_v46 = vpop.f32.mrb[78].mxu0  ;;  %v5810_v62 = vld [vmem:[#allocation3 + $0x79] sm:$0xff] }
 0x4b0   : > { %v4674_v40 = vpop.f32.mrb[78].mxu1  ;;  %v11825_v50 = vpop.f32.mrb[79].mxu0  ;;  %v5476_v55 = vpack.c.bf16 %v5440_v36, %v5439_v17  ;;  %v5443_v36 = vld [vmem:[#allocation3 + $0x98] sm:$0xff] }
 0x4b1   : > { %v16039_v53 = vadd.f32 %v4674_v40, %v4408_v46  ;;  %v11911_v28 = vpop.f32.mrb[79].mxu1  ;;  %v16069_v46 = vpack.c.bf16 %v5811_v43, %v5810_v62  ;;  %v5444_v43 = vld [vmem:[#allocation3 + $0xa0] sm:$0xff] }
 0x4b2   : > { %12107 = vmatmul.mubr.msk.bf16.gmra.mrb[184].mxu0 %vm3982_vm4, %v5474_v49  ;;  %v5441_v28 = vld [vmem:[#allocation3 + $0x88] sm:$0xff]  ;;  %v5442_v49 = vld [vmem:[#allocation3 + $0x90] sm:$0xff] }
 0x4b3   : > { %12193 = vmatmul.mubr.msk.bf16.gmra.mrb[184].mxu1 %vm3982_vm4, %v16041_v25  ;;  %12110 = vmatprep.mubr.msk.bf16.mxu0 %vm13169_vm3, %v18290_v15 }
 0x4b4   : > { %12196 = vmatprep.mubr.msk.bf16.mxu1 %vm13169_vm3, %v18290_v15 }
 0x4b5   : > { %v4413_v10 = vpop.f32.mrb[80].mxu0 }
 0x4b6   : > { %v4679_v47 = vpop.f32.mrb[80].mxu1  ;;  %v11828_v7 = vpop.f32.mrb[81].mxu0 }
 0x4b7   : > { %v16050_v24 = vadd.f32 %v4679_v47, %v4413_v10  ;;  %v11914_v37 = vpop.f32.mrb[81].mxu1  ;;  %v4416_v52 = vpop.f32.mrb[82].mxu0  ;;  %v5813_v10 = vld [vmem:[#allocation3 + $0x91] sm:$0xff] }
 0x4b8   : > { %v4682_v9 = vpop.f32.mrb[82].mxu1  ;;  %v11829_v38 = vpop.f32.mrb[83].mxu0  ;;  %v18311_v47 = vld [vmem:[#allocation9_spill] sm:$0xff] }
 0x4b9   : > { %v11915_v13 = vpop.f32.mrb[83].mxu1  ;;  %v5812_v52 = vld [vmem:[#allocation3 + $0x89] sm:$0xff] }
 0x4ba   : > { %12111 = vmatmul.mubr.msk.bf16.gmra.mrb[188].mxu0 %vm3982_vm4, %v5475_v30  ;;  %v5477_v30 = vpack.c.bf16 %v5442_v49, %v5441_v28  ;;  %v16084_v21 = vpack.c.bf16 %v5813_v10, %v5812_v52 }
 0x4bb   : > { %12197 = vmatmul.mubr.msk.bf16.gmra.mrb[188].mxu1 %vm3982_vm4, %v16055_v8  ;;  %12114 = vmatprep.mubr.msk.bf16.mxu0 %vm13169_vm3, %v18290_v15 }
 0x4bc   : > { %12200 = vmatprep.mubr.msk.bf16.mxu1 %vm13169_vm3, %v18290_v15 }
 0x4bd   : > { %v4849_v1 = vpop.f32.mrb[84].mxu0 }
 0x4be   : > { %v5220_v12 = vpop.f32.mrb[84].mxu1  ;;  %v5015_v48 = vadd.f32 %v4849_v1, %v18309_v54  ;;  %v11920_v27 = vpop.f32.mrb[85].mxu0  ;;  %v5815_v54 = vld [vmem:[#allocation3 + $0xa1] sm:$0xff] }
 0x4bf   : > { %v12006_v41 = vpop.f32.mrb[85].mxu1  ;;  %v4852_v19 = vpop.f32.mrb[86].mxu0 }
 0x4c0   : > { %v5223_v44 = vpop.f32.mrb[86].mxu1  ;;  %v16066_v60 = vadd.f32 %v5220_v12, %v5015_v48  ;;  %v5016_v31 = vadd.f32 %v4852_v19, %v18310_v35  ;;  %v11921_v16 = vpop.f32.mrb[87].mxu0  ;;  %v18313_v48 = vld [vmem:[#allocation11_spill] sm:$0xff] }
 0x4c1   : > { %v12007_v5 = vpop.f32.mrb[87].mxu1  ;;  %v5814_v35 = vld [vmem:[#allocation3 + $0x99] sm:$0xff]  ;;  %v18314_v16 = vld [vmem:[#allocation12_spill] sm:$0xff] }
 0x4c2   : > { %v16071_v40 = vadd.f32 %v5223_v44, %v5016_v31  ;;  %12115 = vmatmul.mubr.msk.bf16.gmra.mrb[192].mxu0 %vm3982_vm4, %v5476_v55  ;;  %v16099_v28 = vpack.c.bf16 %v5815_v54, %v5814_v35  ;;  %v5819_v35 = vld [vmem:[#allocation3 + $0xc1] sm:$0xff] }
 0x4c3   : > { %12201 = vmatmul.mubr.msk.bf16.gmra.mrb[192].mxu1 %vm3982_vm4, %v16069_v46  ;;  %12118 = vmatprep.mubr.msk.bf16.mxu0 %vm13169_vm3, %v18290_v15 }
 0x4c4   : > { %12204 = vmatprep.mubr.msk.bf16.mxu1 %vm13169_vm3, %v18290_v15 }
 0x4c5   : > { %v4857_v20 = vpop.f32.mrb[88].mxu0 }
 0x4c6   : > { %v5228_v50 = vpop.f32.mrb[88].mxu1  ;;  %v5017_v14 = vadd.f32 %v4857_v20, %v18311_v47  ;;  %v11924_v56 = vpop.f32.mrb[89].mxu0 }
 0x4c7   : > { %v12010_v2 = vpop.f32.mrb[89].mxu1  ;;  %v4860_v7 = vpop.f32.mrb[90].mxu0  ;;  %v5446_v56 = vld [vmem:[#allocation3 + $0xb0] sm:$0xff] }
 0x4c8   : > { %v5231_v37 = vpop.f32.mrb[90].mxu1  ;;  %v16081_v9 = vadd.f32 %v5228_v50, %v5017_v14  ;;  %v5018_v0 = vadd.f32 %v4860_v7, %v18312_v18  ;;  %v11925_v38 = vpop.f32.mrb[91].mxu0  ;;  %v5478_v50 = vpack.c.bf16 %v5444_v43, %v5443_v36  ;;  %v5445_v14 = vld [vmem:[#allocation3 + $0xa8] sm:$0xff]  ;;  %v5817_v2 = vld [vmem:[#allocation3 + $0xb1] sm:$0xff] }
 0x4c9   : > { %v12011_v13 = vpop.f32.mrb[91].mxu1  ;;  %v18315_v7 = vld [vmem:[#allocation13_spill] sm:$0xff]  ;;  %v5479_v54 = vpack.c.bf16 %v5446_v56, %v5445_v14  ;;  %v18318_v56 = vld [vmem:[#allocation16_spill] sm:$0xff] }
 0x4ca   : > { %v16086_v1 = vadd.f32 %v5231_v37, %v5018_v0  ;;  %12119 = vmatmul.mubr.msk.bf16.gmra.mrb[196].mxu0 %vm3982_vm4, %v5477_v30  ;;  %v5816_v13 = vld [vmem:[#allocation3 + $0xa9] sm:$0xff] }
 0x4cb   : > { %12205 = vmatmul.mubr.msk.bf16.gmra.mrb[196].mxu1 %vm3982_vm4, %v16084_v21  ;;  %12122 = vmatprep.mubr.msk.bf16.mxu0 %vm13169_vm3, %v18290_v15 }
 0x4cc   : > { %12208 = vmatprep.mubr.msk.bf16.mxu1 %vm13169_vm3, %v18290_v15 }
 0x4cd   : > { %v4865_v12 = vpop.f32.mrb[92].mxu0 }
 0x4ce   : > { %v5236_v17 = vpop.f32.mrb[92].mxu1  ;;  %v5019_v27 = vadd.f32 %v4865_v12, %v18313_v48  ;;  %v11928_v41 = vpop.f32.mrb[93].mxu0  ;;  %v18316_v12 = vld [vmem:[#allocation14_spill] sm:$0xff]  ;;  %v16114_v48 = vpack.c.bf16 %v5817_v2, %v5816_v13 }
 0x4cf   : > { %v12014_v19 = vpop.f32.mrb[93].mxu1  ;;  %v4868_v44 = vpop.f32.mrb[94].mxu0 }
 0x4d0   : > { %v5239_v62 = vpop.f32.mrb[94].mxu1  ;;  %v16096_v31 = vadd.f32 %v5236_v17, %v5019_v27  ;;  %v5020_v5 = vadd.f32 %v4868_v44, %v18314_v16  ;;  %v11929_v55 = vpop.f32.mrb[95].mxu0  ;;  %v5447_v44 = vld [vmem:[#allocation3 + $0xb8] sm:$0xff] }
 0x4d1   : > { %v12015_v20 = vpop.f32.mrb[95].mxu1  ;;  %v18317_v16 = vld [vmem:[#allocation15_spill] sm:$0xff] }
 0x4d2   : > { %v16101_v49 = vadd.f32 %v5239_v62, %v5020_v5  ;;  %12123 = vmatmul.mubr.msk.bf16.gmra.mrb[200].mxu0 %vm3982_vm4, %v5478_v50  ;;  %v5448_v62 = vld [vmem:[#allocation3 + $0xc0] sm:$0xff] }
 0x4d3   : > { %12209 = vmatmul.mubr.msk.bf16.gmra.mrb[200].mxu1 %vm3982_vm4, %v16099_v28  ;;  %12126 = vmatprep.mubr.msk.bf16.mxu0 %vm13169_vm3, %v18290_v15 }
 0x4d4   : > { %12212 = vmatprep.mubr.msk.bf16.mxu1 %vm13169_vm3, %v18290_v15 }
 0x4d5   : > { %v4873_v10 = vpop.f32.mrb[96].mxu0 }
 0x4d6   : > { %v5244_v47 = vpop.f32.mrb[96].mxu1  ;;  %v5021_v37 = vadd.f32 %v4873_v10, %v18315_v7  ;;  %v11932_v52 = vpop.f32.mrb[97].mxu0 }
 0x4d7   : > { %v12018_v18 = vpop.f32.mrb[97].mxu1  ;;  %v4876_v0 = vpop.f32.mrb[98].mxu0  ;;  %v5480_v52 = vpack.c.bf16 %v5448_v62, %v5447_v44 }
 0x4d8   : > { %v5247_v38 = vpop.f32.mrb[98].mxu1  ;;  %v16111_v30 = vadd.f32 %v5244_v47, %v5021_v37  ;;  %v5022_v17 = vadd.f32 %v4876_v0, %v18316_v12  ;;  %v11933_v36 = vpop.f32.mrb[99].mxu0  ;;  %v5818_v47 = vld [vmem:[#allocation3 + $0xb9] sm:$0xff]  ;;  %v5449_v12 = vld [vmem:[#allocation3 + $0xc8] sm:$0xff] }
 0x4d9   : > { %v12019_v43 = vpop.f32.mrb[99].mxu1  ;;  %v16129_v18 = vpack.c.bf16 %v5819_v35, %v5818_v47  ;;  %v5821_v36 = vld [vmem:[#allocation3 + $0xd1] sm:$0xff]  ;;  %v5820_v35 = vld [vmem:[#allocation3 + $0xc9] sm:$0xff] }
 0x4da   : > { %v16116_v27 = vadd.f32 %v5247_v38, %v5022_v17  ;;  %12127 = vmatmul.mubr.msk.bf16.gmra.mrb[204].mxu0 %vm3982_vm4, %v5479_v54  ;;  %v5450_v17 = vld [vmem:[#allocation3 + $0xd0] sm:$0xff]  ;;  %v16144_v47 = vpack.c.bf16 %v5821_v36, %v5820_v35 }
 0x4db   : > { %12213 = vmatmul.mubr.msk.bf16.gmra.mrb[204].mxu1 %vm3982_vm4, %v16114_v48  ;;  %12130 = vmatprep.mubr.msk.bf16.mxu0 %vm13169_vm3, %v18290_v15  ;;  %v18319_v43 = vld [vmem:[#allocation17_spill] sm:$0xff] }
 0x4dc   : > { %12216 = vmatprep.mubr.msk.bf16.mxu1 %vm13169_vm3, %v18290_v15 }
 0x4dd   : > { %v4881_v41 = vpop.f32.mrb[100].mxu0 }
 0x4de   : > { %v5252_v19 = vpop.f32.mrb[100].mxu1  ;;  %v5023_v5 = vadd.f32 %v4881_v41, %v18317_v16  ;;  %v11936_v55 = vpop.f32.mrb[101].mxu0 }
 0x4df   : > { %v12022_v20 = vpop.f32.mrb[101].mxu1  ;;  %v4884_v50 = vpop.f32.mrb[102].mxu0 }
 0x4e0   : > { %v5255_v10 = vpop.f32.mrb[102].mxu1  ;;  %v16126_v14 = vadd.f32 %v5252_v19, %v5023_v5  ;;  %v5024_v2 = vadd.f32 %v4884_v50, %v18318_v56  ;;  %v11937_v7 = vpop.f32.mrb[103].mxu0  ;;  %v18320_v5 = vld [vmem:[#allocation18_spill] sm:$0xff] }
 0x4e1   : > { %v12023_v37 = vpop.f32.mrb[103].mxu1 }
 0x4e2   : > { %v16131_v0 = vadd.f32 %v5255_v10, %v5024_v2  ;;  %12131 = vmatmul.mubr.msk.bf16.gmra.mrb[208].mxu0 %vm3982_vm4, %v5480_v52  ;;  %v5481_v10 = vpack.c.bf16 %v5450_v17, %v5449_v12  ;;  %v5451_v37 = vld [vmem:[#allocation3 + $0xd8] sm:$0xff]  ;;  %v5452_v52 = vld [vmem:[#allocation3 + $0xe0] sm:$0xff] }
 0x4e3   : > { %12217 = vmatmul.mubr.msk.bf16.gmra.mrb[208].mxu1 %vm3982_vm4, %v16129_v18  ;;  %12134 = vmatprep.mubr.msk.bf16.mxu0 %vm13169_vm3, %v18290_v15 }
 0x4e4   : > { %12220 = vmatprep.mubr.msk.bf16.mxu1 %vm13169_vm3, %v18290_v15 }
 0x4e5   : > { %v4889_v38 = vpop.f32.mrb[104].mxu0 }
 0x4e6   : > { %v5260_v13 = vpop.f32.mrb[104].mxu1  ;;  %v5025_v54 = vadd.f32 %v4889_v38, %v18319_v43  ;;  %v11940_v41 = vpop.f32.mrb[105].mxu0  ;;  %v5823_v38 = vld [vmem:[#allocation3 + $0xe1] sm:$0xff] }
 0x4e7   : > { %v12026_v19 = vpop.f32.mrb[105].mxu1  ;;  %v4892_v44 = vpop.f32.mrb[106].mxu0  ;;  %v5822_v41 = vld [vmem:[#allocation3 + $0xd9] sm:$0xff] }
 0x4e8   : > { %v5263_v62 = vpop.f32.mrb[106].mxu1  ;;  %v16141_v16 = vadd.f32 %v5260_v13, %v5025_v54  ;;  %v5026_v55 = vadd.f32 %v4892_v44, %v18320_v5  ;;  %v11941_v20 = vpop.f32.mrb[107].mxu0  ;;  %v18321_v13 = vld [vmem:[#allocation19_spill] sm:$0xff]  ;;  %v18323_v44 = vld [vmem:[#allocation20_spill] sm:$0xff] }
 0x4e9   : > { %v12027_v50 = vpop.f32.mrb[107].mxu1  ;;  %v16159_v20 = vpack.c.bf16 %v5823_v38, %v5822_v41 }
 0x4ea   : > { %v16146_v56 = vadd.f32 %v5263_v62, %v5026_v55  ;;  %12135 = vmatmul.mubr.msk.bf16.gmra.mrb[212].mxu0 %vm3982_vm4, %v5481_v10  ;;  %v5482_v55 = vpack.c.bf16 %v5452_v52, %v5451_v37  ;;  %v5825_v37 = vld [vmem:[#allocation3 + $0xf1] sm:$0xff] }
 0x4eb   : > { %12221 = vmatmul.mubr.msk.bf16.gmra.mrb[212].mxu1 %vm3982_vm4, %v16144_v47  ;;  %12138 = vmatprep.mubr.msk.bf16.mxu0 %vm13169_vm3, %v18290_v15  ;;  %v18325_v52 = vld [vmem:[#allocation21_spill] sm:$0xff] }
 0x4ec   : > { %12224 = vmatprep.mubr.msk.bf16.mxu1 %vm13169_vm3, %v18290_v15 }
 0x4ed   : > { %v4897_v2 = vpop.f32.mrb[108].mxu0 }
 0x4ee   : > { %v5268_v7 = vpop.f32.mrb[108].mxu1  ;;  %v5027_v12 = vadd.f32 %v4897_v2, %v18321_v13  ;;  %v11944_v17 = vpop.f32.mrb[109].mxu0  ;;  %v5454_v13 = vld [vmem:[#allocation3 + $0xf0] sm:$0xff] }
 0x4ef   : > { %v12030_v36 = vpop.f32.mrb[109].mxu1  ;;  %v4900_v43 = vpop.f32.mrb[110].mxu0 }
 0x4f0   : > { %v5271_v54 = vpop.f32.mrb[110].mxu1  ;;  %v16156_v19 = vadd.f32 %v5268_v7, %v5027_v12  ;;  %v5028_v62 = vadd.f32 %v4900_v43, %v18323_v44  ;;  %v11945_v35 = vpop.f32.mrb[111].mxu0  ;;  %v5453_v7 = vld [vmem:[#allocation3 + $0xe8] sm:$0xff]  ;;  %v18327_v44 = vld [vmem:[#allocation22_spill] sm:$0xff] }
 0x4f1   : > { %v12031_v5 = vpop.f32.mrb[111].mxu1 }
 0x4f2   : > { %18322 = vst [vmem:[#allocation27_spill] sm:$0xff] %v16156_v19  ;;  %v16161_v50 = vadd.f32 %v5271_v54, %v5028_v62  ;;  %12139 = vmatmul.mubr.msk.bf16.gmra.mrb[216].mxu0 %vm3982_vm4, %v5482_v55  ;;  %v5824_v54 = vld [vmem:[#allocation3 + $0xe9] sm:$0xff]  ;;  %v5483_v55 = vpack.c.bf16 %v5454_v13, %v5453_v7  ;;  %v5827_v7 = vld [vmem:[#allocation3 + $0x101] sm:$0xff] }
 0x4f3   : > { %12225 = vmatmul.mubr.msk.bf16.gmra.mrb[216].mxu1 %vm3982_vm4, %v16159_v20  ;;  %12142 = vmatprep.mubr.msk.bf16.mxu0 %vm13169_vm3, %v18290_v15  ;;  %v18330_v13 = vld [vmem:[#allocation23_spill] sm:$0xff] }
 0x4f4   : > { %18324 = vst [vmem:[#allocation7_spill] sm:$0xff] %v16161_v50  ;;  %12228 = vmatprep.mubr.msk.bf16.mxu1 %vm13169_vm3, %v18290_v15  ;;  %v16174_v50 = vpack.c.bf16 %v5825_v37, %v5824_v54  ;;  %v5826_v54 = vld [vmem:[#allocation3 + $0xf9] sm:$0xff] }
 0x4f5   : > { %v4905_v10 = vpop.f32.mrb[112].mxu0 }
 0x4f6   : > { %v5276_v2 = vpop.f32.mrb[112].mxu1  ;;  %v5029_v38 = vadd.f32 %v4905_v10, %v18325_v52  ;;  %v11948_v12 = vpop.f32.mrb[113].mxu0  ;;  %18328 = vst [vmem:[#allocation9_spill] sm:$0xff] %v16174_v50  ;;  %v5455_v52 = vld [vmem:[#allocation3 + $0xf8] sm:$0xff] }
 0x4f7   : > { %v12034_v17 = vpop.f32.mrb[113].mxu1  ;;  %v4908_v36 = vpop.f32.mrb[114].mxu0 }
 0x4f8   : > { %v5279_v43 = vpop.f32.mrb[114].mxu1  ;;  %v16171_v41 = vadd.f32 %v5276_v2, %v5029_v38  ;;  %v5030_v62 = vadd.f32 %v4908_v36, %v18327_v44  ;;  %v11949_v35 = vpop.f32.mrb[115].mxu0  ;;  %v5456_v38 = vld [vmem:[#allocation3 + $0x100] sm:$0xff] }
 0x4f9   : > { %v12035_v5 = vpop.f32.mrb[115].mxu1 }
 0x4fa   : > { %18326 = vst [vmem:[#allocation8_spill] sm:$0xff] %v16171_v41  ;;  %v16176_v19 = vadd.f32 %v5279_v43, %v5030_v62  ;;  %12143 = vmatmul.mubr.msk.bf16.gmra.mrb[220].mxu0 %vm3982_vm4, %v5483_v55  ;;  %v18332_v62 = vld [vmem:[#allocation24_spill] sm:$0xff]  ;;  %v16189_v41 = vpack.c.bf16 %v5827_v7, %v5826_v54 }
 0x4fb   : > { %12229 = vmatmul.mubr.msk.bf16.gmra.mrb[220].mxu1 %vm3982_vm4, %v16174_v50  ;;  %12146 = vmatprep.mubr.msk.bf16.mxu0 %vm13169_vm3, %v18290_v15 }
 0x4fc   : > { %18329 = vst [vmem:[#allocation10_spill] sm:$0xff] %v16176_v19  ;;  %12232 = vmatprep.mubr.msk.bf16.mxu1 %vm13169_vm3, %v18290_v15  ;;  %v5484_v19 = vpack.c.bf16 %v5456_v38, %v5455_v52  ;;  %18333 = vst [vmem:[#allocation12_spill] sm:$0xff] %v16189_v41  ;;  %v5829_v52 = vld [vmem:[#allocation3 + $0x111] sm:$0xff] }
 0x4fd   : > { %v4913_v10 = vpop.f32.mrb[116].mxu0  ;;  %v18335_v38 = vld [vmem:[#allocation25_spill] sm:$0xff] }
 0x4fe   : > { %v5284_v2 = vpop.f32.mrb[116].mxu1  ;;  %v5031_v37 = vadd.f32 %v4913_v10, %v18330_v13  ;;  %v11952_v12 = vpop.f32.mrb[117].mxu0  ;;  %v5457_v13 = vld [vmem:[#allocation3 + $0x108] sm:$0xff] }
 0x4ff   : > { %v12038_v17 = vpop.f32.mrb[117].mxu1  ;;  %v4916_v36 = vpop.f32.mrb[118].mxu0 }
 0x500   : > { %v5287_v43 = vpop.f32.mrb[118].mxu1  ;;  %v16186_v44 = vadd.f32 %v5284_v2, %v5031_v37  ;;  %v5032_v35 = vadd.f32 %v4916_v36, %v18332_v62  ;;  %v11953_v5 = vpop.f32.mrb[119].mxu0  ;;  %v5458_v37 = vld [vmem:[#allocation3 + $0x110] sm:$0xff] }
 0x501   : > { %v12039_v55 = vpop.f32.mrb[119].mxu1  ;;  %v18337_v62 = vld [vmem:[#allocation26_spill] sm:$0xff] }
 0x502   : > { %18331 = vst [vmem:[#allocation11_spill] sm:$0xff] %v16186_v44  ;;  %v16191_v50 = vadd.f32 %v5287_v43, %v5032_v35  ;;  %12147 = vmatmul.mubr.msk.bf16.gmra.mrb[224].mxu0 %vm3982_vm4, %v5484_v19  ;;  %v5828_v43 = vld [vmem:[#allocation3 + $0x109] sm:$0xff] }
 0x503   : > { %12233 = vmatmul.mubr.msk.bf16.gmra.mrb[224].mxu1 %vm3982_vm4, %v16189_v41  ;;  %12150 = vmatprep.mubr.msk.bf16.mxu0 %vm13169_vm3, %v18290_v15  ;;  %v16204_v44 = vpack.c.bf16 %v5829_v52, %v5828_v43 }
 0x504   : > { %18334 = vst [vmem:[#allocation13_spill] sm:$0xff] %v16191_v50  ;;  %12236 = vmatprep.mubr.msk.bf16.mxu1 %vm13169_vm3, %v18290_v15  ;;  %v5485_v50 = vpack.c.bf16 %v5458_v37, %v5457_v13  ;;  %v5831_v13 = vld [vmem:[#allocation3 + $0x121] sm:$0xff] }
 0x505   : > { %v4921_v10 = vpop.f32.mrb[120].mxu0  ;;  %18338 = vst [vmem:[#allocation15_spill] sm:$0xff] %v16204_v44  ;;  %v18340_v37 = vld [vmem:[#allocation28_spill] sm:$0xff] }
 0x506   : > { %v5292_v2 = vpop.f32.mrb[120].mxu1  ;;  %v5033_v7 = vadd.f32 %v4921_v10, %v18335_v38  ;;  %v11956_v12 = vpop.f32.mrb[121].mxu0  ;;  %v5459_v38 = vld [vmem:[#allocation3 + $0x118] sm:$0xff] }
 0x507   : > { %v12042_v17 = vpop.f32.mrb[121].mxu1  ;;  %v4924_v36 = vpop.f32.mrb[122].mxu0 }
 0x508   : > { %v5295_v19 = vpop.f32.mrb[122].mxu1  ;;  %v16201_v54 = vadd.f32 %v5292_v2, %v5033_v7  ;;  %v5034_v35 = vadd.f32 %v4924_v36, %v18337_v62  ;;  %v11957_v5 = vpop.f32.mrb[123].mxu0  ;;  %v5460_v7 = vld [vmem:[#allocation3 + $0x120] sm:$0xff]  ;;  %v18341_v62 = vld [vmem:[#allocation29_spill] sm:$0xff] }
 0x509   : > { %v12043_v55 = vpop.f32.mrb[123].mxu1 }
 0x50a   : > { %18336 = vst [vmem:[#allocation14_spill] sm:$0xff] %v16201_v54  ;;  %v16206_v41 = vadd.f32 %v5295_v19, %v5034_v35  ;;  %12151 = vmatmul.mubr.msk.bf16.gmra.mrb[228].mxu0 %vm3982_vm4, %v5485_v50  ;;  %v5830_v19 = vld [vmem:[#allocation3 + $0x119] sm:$0xff] }
 0x50b   : > { %12237 = vmatmul.mubr.msk.bf16.gmra.mrb[228].mxu1 %vm3982_vm4, %v16204_v44  ;;  %12154 = vmatprep.mubr.msk.bf16.mxu0 %vm13169_vm3, %v18290_v15  ;;  %v16219_v54 = vpack.c.bf16 %v5831_v13, %v5830_v19 }
 0x50c   : > { %18339 = vst [vmem:[#allocation16_spill] sm:$0xff] %v16206_v41  ;;  %12240 = vmatprep.mubr.msk.bf16.mxu1 %vm13169_vm3, %v18290_v15  ;;  %v5486_v41 = vpack.c.bf16 %v5460_v7, %v5459_v38 }
 0x50d   : > { %v4929_v10 = vpop.f32.mrb[124].mxu0 }
 0x50e   : > { %v5300_v2 = vpop.f32.mrb[124].mxu1  ;;  %v5035_v52 = vadd.f32 %v4929_v10, %v18340_v37  ;;  %v11960_v12 = vpop.f32.mrb[125].mxu0  ;;  %v5462_v37 = vld [vmem:[#allocation3 + $0x130] sm:$0xff] }
 0x50f   : > { %v12046_v17 = vpop.f32.mrb[125].mxu1  ;;  %v4932_v36 = vpop.f32.mrb[126].mxu0 }
 0x510   : > { %v5303_v50 = vpop.f32.mrb[126].mxu1  ;;  %v16216_v43 = vadd.f32 %v5300_v2, %v5035_v52  ;;  %v5036_v35 = vadd.f32 %v4932_v36, %v18341_v62  ;;  %v11961_v5 = vpop.f32.mrb[127].mxu0  ;;  %v5833_v52 = vld [vmem:[#allocation3 + $0x131] sm:$0xff]  ;;  %v5832_v36 = vld [vmem:[#allocation3 + $0x129] sm:$0xff] }
 0x511   : > { %v12047_v55 = vpop.f32.mrb[127].mxu1 }
 0x512   : > { %v16221_v44 = vadd.f32 %v5303_v50, %v5036_v35  ;;  %12155 = vmatmul.mubr.msk.bf16.gmra.mrb[232].mxu0 %vm3982_vm4, %v5486_v41  ;;  %v5461_v41 = vld [vmem:[#allocation3 + $0x128] sm:$0xff]  ;;  %v16234_v55 = vpack.c.bf16 %v5833_v52, %v5832_v36 }
 0x513   : > { %12241 = vmatmul.mubr.msk.bf16.gmra.mrb[232].mxu1 %vm3982_vm4, %v16219_v54  ;;  %12158 = vmatprep.mubr.msk.bf16.mxu0 %vm13169_vm3, %v18290_v15  ;;  %v5487_v5 = vpack.c.bf16 %v5462_v37, %v5461_v41 }
 0x514   : > { %18342 = vst [vmem:[#allocation17_spill] sm:$0xff] %v16221_v44  ;;  %12244 = vmatprep.mubr.msk.bf16.mxu1 %vm13169_vm3, %v18290_v15 }
 0x515   : > { %v4937_v10 = vpop.f32.mrb[128].mxu0 }
 0x516   : > { %v5308_v2 = vpop.f32.mrb[128].mxu1  ;;  %v5037_v38 = vadd.f32 %v4937_v10, %v15565_v42  ;;  %v11964_v7 = vpop.f32.mrb[129].mxu0  ;;  %v5464_v10 = vld [vmem:[#allocation3 + $0x140] sm:$0xff] }
 0x517   : > { %v12050_v13 = vpop.f32.mrb[129].mxu1  ;;  %v4940_v12 = vpop.f32.mrb[130].mxu0 }
 0x518   : > { %v5311_v17 = vpop.f32.mrb[130].mxu1  ;;  %v16231_v50 = vadd.f32 %v5308_v2, %v5037_v38  ;;  %v5038_v19 = vadd.f32 %v4940_v12, %v15578_v39  ;;  %v11965_v62 = vpop.f32.mrb[131].mxu0  ;;  %v5835_v2 = vld [vmem:[#allocation3 + $0x141] sm:$0xff]  ;;  %v5463_v12 = vld [vmem:[#allocation3 + $0x138] sm:$0xff] }
 0x519   : > { %v12051_v35 = vpop.f32.mrb[131].mxu1 }
 0x51a   : > { %v16236_v44 = vadd.f32 %v5311_v17, %v5038_v19  ;;  %12159 = vmatmul.mubr.msk.bf16.gmra.mrb[236].mxu0 %vm3982_vm4, %v5487_v5  ;;  %v5834_v17 = vld [vmem:[#allocation3 + $0x139] sm:$0xff]  ;;  %v5488_v35 = vpack.c.bf16 %v5464_v10, %v5463_v12 }
 0x51b   : > { %12245 = vmatmul.mubr.msk.bf16.gmra.mrb[236].mxu1 %vm3982_vm4, %v16234_v55  ;;  %12162 = vmatprep.mubr.msk.bf16.mxu0 %vm13169_vm3, %v18290_v15  ;;  %v16249_v5 = vpack.c.bf16 %v5835_v2, %v5834_v17 }
 0x51c   : > { %18343 = vst [vmem:[#allocation18_spill] sm:$0xff] %v16236_v44  ;;  %12248 = vmatprep.mubr.msk.bf16.mxu1 %vm13169_vm3, %v18290_v15 }
 0x51d   : > { %v4945_v42 = vpop.f32.mrb[132].mxu0 }
 0x51e   : > { %v5316_v39 = vpop.f32.mrb[132].mxu1  ;;  %v5039_v37 = vadd.f32 %v4945_v42, %v15719_v23  ;;  %v11968_v52 = vpop.f32.mrb[133].mxu0  ;;  %v5466_v42 = vld [vmem:[#allocation3 + $0x150] sm:$0xff] }
 0x51f   : > { %v12054_v38 = vpop.f32.mrb[133].mxu1  ;;  %v4948_v7 = vpop.f32.mrb[134].mxu0 }
 0x520   : > { %v5319_v13 = vpop.f32.mrb[134].mxu1  ;;  %v16246_v41 = vadd.f32 %v5316_v39, %v5039_v37  ;;  %v5040_v36 = vadd.f32 %v4948_v7, %v15734_v51  ;;  %v11969_v19 = vpop.f32.mrb[135].mxu0  ;;  %v5837_v39 = vld [vmem:[#allocation3 + $0x151] sm:$0xff]  ;;  %v5465_v7 = vld [vmem:[#allocation3 + $0x148] sm:$0xff] }
 0x521   : > { %v12055_v62 = vpop.f32.mrb[135].mxu1 }
 0x522   : > { %v16251_v44 = vadd.f32 %v5319_v13, %v5040_v36  ;;  %12163 = vmatmul.mubr.msk.bf16.gmra.mrb[240].mxu0 %vm3982_vm4, %v5488_v35  ;;  %v5836_v13 = vld [vmem:[#allocation3 + $0x149] sm:$0xff]  ;;  %v5489_v62 = vpack.c.bf16 %v5466_v42, %v5465_v7 }
 0x523   : > { %12249 = vmatmul.mubr.msk.bf16.gmra.mrb[240].mxu1 %vm3982_vm4, %v16249_v5  ;;  %12166 = vmatprep.mubr.msk.bf16.mxu0 %vm13169_vm3, %v18290_v15  ;;  %v16264_v35 = vpack.c.bf16 %v5837_v39, %v5836_v13 }
 0x524   : > { %18344 = vst [vmem:[#allocation19_spill] sm:$0xff] %v16251_v44  ;;  %12252 = vmatprep.mubr.msk.bf16.mxu1 %vm13169_vm3, %v18290_v15 }
 0x525   : > { %v4953_v23 = vpop.f32.mrb[136].mxu0 }
 0x526   : > { %v5324_v51 = vpop.f32.mrb[136].mxu1  ;;  %v5041_v10 = vadd.f32 %v4953_v23, %v15817_v58  ;;  %v11972_v2 = vpop.f32.mrb[137].mxu0  ;;  %v5467_v23 = vld [vmem:[#allocation3 + $0x158] sm:$0xf] }
 0x527   : > { %v12058_v37 = vpop.f32.mrb[137].mxu1  ;;  %v4956_v52 = vpop.f32.mrb[138].mxu0 }
 0x528   : > { %v5327_v38 = vpop.f32.mrb[138].mxu1  ;;  %v16261_v12 = vadd.f32 %v5324_v51, %v5041_v10  ;;  %v5042_v17 = vadd.f32 %v4956_v52, %v15827_v34  ;;  %v11973_v36 = vpop.f32.mrb[139].mxu0  ;;  %v5838_v51 = vld [vmem:[#allocation3 + $0x159] sm:$0xf] }
 0x529   : > { %v12059_v19 = vpop.f32.mrb[139].mxu1  ;;  %v5861_v36 = vpack.c.bf16 %v5838_v51, %v5838_v51  ;;  %v10902_v51 = vld [vmem:[%s18262_s2 + $0x20] sm:$0xf] }
 0x52a   : > { %v16266_v44 = vadd.f32 %v5327_v38, %v5042_v17  ;;  %12167 = vmatmul.mubr.msk.bf16.gmra.mrb[244].mxu0 %vm3982_vm4, %v5489_v62  ;;  %v5490_v17 = vpack.c.bf16 %v5467_v23, %v5467_v23 }
 0x52b   : > { %12253 = vmatmul.mubr.msk.bf16.gmra.mrb[244].mxu1 %vm3982_vm4, %v16264_v35  ;;  %12170 = vmatprep.mubr.msk.bf16.mxu0 %vm13169_vm3, %v18290_v15 }
 0x52c   : > { %12256 = vmatprep.mubr.msk.bf16.mxu1 %vm13169_vm3, %v18290_v15 }
 0x52d   : > { %v4961_v58 = vpop.f32.mrb[140].mxu0 }
 0x52e   : > { %v5332_v34 = vpop.f32.mrb[140].mxu1  ;;  %v5043_v42 = vadd.f32 %v4961_v58, %v15872_v33  ;;  %v11976_v39 = vpop.f32.mrb[141].mxu0  ;;  %v6541_v58 = vld [vmem:[#allocation3 + $0x32] sm:$0xff] }
 0x52f   : > { %v12062_v10 = vpop.f32.mrb[141].mxu1  ;;  %v4964_v2 = vpop.f32.mrb[142].mxu0 }
 0x530   : > { %v5335_v37 = vpop.f32.mrb[142].mxu1  ;;  %v16276_v52 = vadd.f32 %v5332_v34, %v5043_v42  ;;  %v5044_v38 = vadd.f32 %v4964_v2, %v15884_v4  ;;  %v11977_v7 = vpop.f32.mrb[143].mxu0  ;;  %v6540_v10 = vld [vmem:[#allocation3 + $0x2a] sm:$0xff] }
 0x531   : > { %v12063_v13 = vpop.f32.mrb[143].mxu1 }
 0x532   : > { %v16279_v19 = vadd.f32 %v5335_v37, %v5044_v38  ;;  %12171 = vmatmul.mubr.msk.bf16.gmra.mrb[248].mxu0 %vm3982_vm4, %v5490_v17  ;;  %v6583_v13 = vpack.c.bf16 %v6541_v58, %v6540_v10  ;;  %v7039_v17 = vsel %vm4215_vm2, %v10902_v51, 0 }
 0x533   : > { %12257 = vmatmul.mubr.msk.bf16.gmra.mrb[248].mxu1 %vm3982_vm4, %v5861_v36  ;;  %12262 = vmatprep.mubr.msk.bf16.mxu0 %vm13169_vm3, %v18290_v15 }
 0x534   : > { %12348 = vmatprep.mubr.msk.bf16.mxu1 %vm13169_vm3, %v18290_v15 }
 0x535   : > { %v4969_v33 = vpop.f32.mrb[144].mxu0 }
 0x536   : > { %v5340_v62 = vpop.f32.mrb[144].mxu1  ;;  %v5045_v4 = vadd.f32 %v4969_v33, %v15913_v32  ;;  %v11980_v34 = vpop.f32.mrb[145].mxu0  ;;  %v6543_v33 = vld [vmem:[#allocation3 + $0x42] sm:$0xff] }
 0x537   : > { %v12066_v23 = vpop.f32.mrb[145].mxu1  ;;  %v4972_v42 = vpop.f32.mrb[146].mxu0 }
 0x538   : > { %v5343_v39 = vpop.f32.mrb[146].mxu1  ;;  %v16291_v2 = vadd.f32 %v5340_v62, %v5045_v4  ;;  %v5046_v37 = vadd.f32 %v4972_v42, %v15919_v6  ;;  %v11981_v38 = vpop.f32.mrb[147].mxu0  ;;  %v6542_v23 = vld [vmem:[#allocation3 + $0x3a] sm:$0xff] }
 0x539   : > { %v12067_v7 = vpop.f32.mrb[147].mxu1 }
 0x53a   : > { %v16295_v36 = vadd.f32 %v5343_v39, %v5046_v37  ;;  %12263 = vmatmul.mubr.msk.bf16.vlgmr.msra.gmra.mrb[252].mxu0 %vm3982_vm4, %v16006_v59  ;;  %v6584_v37 = vpack.c.bf16 %v6543_v33, %v6542_v23 }
 0x53b   : > { %12349 = vmatmul.mubr.msk.bf16.vlgmr.msra.gmra.mrb[252].mxu1 %vm3982_vm4, %v6583_v13  ;;  %12266 = vmatprep.mubr.msk.bf16.mxu0 %vm13169_vm3, %v18290_v15  ;;  %v6545_v13 = vld [vmem:[#allocation3 + $0x52] sm:$0xff] }
 0x53c   : > { %12352 = vmatprep.mubr.msk.bf16.mxu1 %vm13169_vm3, %v18290_v15  ;;  %12433 = vmatpush3.bf16.msra.mxu0 %v7039_v17 }
 0x53d   : > { %v4977_v32 = vpop.f32.mrb[148].mxu0  ;;  %12556 = vmatprep.subr.bf16.mxu0 %v18290_v15 }
 0x53e   : > { %v5348_v6 = vpop.f32.mrb[148].mxu1  ;;  %v5047_v62 = vadd.f32 %v4977_v32, %v15947_v11  ;;  %v11984_v58 = vpop.f32.mrb[149].mxu0 }
 0x53f   : > { %v12070_v4 = vpop.f32.mrb[149].mxu1  ;;  %v4980_v34 = vpop.f32.mrb[150].mxu0 }
 0x540   : > { %v5351_v59 = vpop.f32.mrb[150].mxu1  ;;  %v16306_v51 = vadd.f32 %v5348_v6, %v5047_v62  ;;  %v5048_v42 = vadd.f32 %v4980_v34, %v15953_v63  ;;  %v11985_v39 = vpop.f32.mrb[151].mxu0  ;;  %v6544_v62 = vld [vmem:[#allocation3 + $0x4a] sm:$0xff] }
 0x541   : > { %v12071_v10 = vpop.f32.mrb[151].mxu1  ;;  %v6547_v39 = vld [vmem:[#allocation3 + $0x62] sm:$0xff] }
 0x542   : > { %v16309_v38 = vadd.f32 %v5351_v59, %v5048_v42  ;;  %12267 = vmatmul.mubr.msk.bf16.gmra.mrb[0].mxu0 %vm3982_vm4, %v16015_v45  ;;  %v6585_v59 = vpack.c.bf16 %v6545_v13, %v6544_v62  ;;  %v6546_v13 = vld [vmem:[#allocation3 + $0x5a] sm:$0xff] }
 0x543   : > { %12353 = vmatmul.mubr.msk.bf16.gmra.mrb[0].mxu1 %vm3982_vm4, %v6584_v37  ;;  %12270 = vmatprep.mubr.msk.bf16.mxu0 %vm13169_vm3, %v18290_v15 }
 0x544   : > { %12356 = vmatprep.mubr.msk.bf16.mxu1 %vm13169_vm3, %v18290_v15 }
 0x545   : > { %v4985_v11 = vpop.f32.mrb[152].mxu0 }
 0x546   : > { %v5356_v7 = vpop.f32.mrb[152].mxu1  ;;  %v5049_v63 = vadd.f32 %v4985_v11, %v15981_v61  ;;  %v11988_v17 = vpop.f32.mrb[153].mxu0 }
 0x547   : > { %v12074_v32 = vpop.f32.mrb[153].mxu1  ;;  %v4988_v6 = vpop.f32.mrb[154].mxu0 }
 0x548   : > { %v5359_v33 = vpop.f32.mrb[154].mxu1  ;;  %v16319_v58 = vadd.f32 %v5356_v7, %v5049_v63  ;;  %v5050_v45 = vadd.f32 %v4988_v6, %v15987_v3  ;;  %v11989_v4 = vpop.f32.mrb[155].mxu0  ;;  %v6586_v6 = vpack.c.bf16 %v6547_v39, %v6546_v13  ;;  %v6551_v13 = vld [vmem:[#allocation3 + $0x82] sm:$0xff] }
 0x549   : > { %v12075_v34 = vpop.f32.mrb[155].mxu1 }
 0x54a   : > { %v16322_v23 = vadd.f32 %v5359_v33, %v5050_v45  ;;  %12271 = vmatmul.mubr.msk.bf16.gmra.mrb[4].mxu0 %vm3982_vm4, %v16028_v26  ;;  %v6549_v45 = vld [vmem:[#allocation3 + $0x72] sm:$0xff] }
 0x54b   : > { %12357 = vmatmul.mubr.msk.bf16.gmra.mrb[4].mxu1 %vm3982_vm4, %v6585_v59  ;;  %12274 = vmatprep.mubr.msk.bf16.mxu0 %vm13169_vm3, %v18290_v15 }
 0x54c   : > { %12360 = vmatprep.mubr.msk.bf16.mxu1 %vm13169_vm3, %v18290_v15 }
 0x54d   : > { %v4993_v61 = vpop.f32.mrb[156].mxu0 }
 0x54e   : > { %v5364_v42 = vpop.f32.mrb[156].mxu1  ;;  %v5051_v3 = vadd.f32 %v4993_v61, %v16017_v22  ;;  %v11992_v10 = vpop.f32.mrb[157].mxu0 }
 0x54f   : > { %v12078_v37 = vpop.f32.mrb[157].mxu1  ;;  %v4996_v11 = vpop.f32.mrb[158].mxu0 }
 0x550   : > { %v5367_v7 = vpop.f32.mrb[158].mxu1  ;;  %v16332_v63 = vadd.f32 %v5364_v42, %v5051_v3  ;;  %v5052_v26 = vadd.f32 %v4996_v11, %v16026_v29  ;;  %v11993_v17 = vpop.f32.mrb[159].mxu0  ;;  %v6548_v42 = vld [vmem:[#allocation3 + $0x6a] sm:$0xff] }
 0x551   : > { %v12079_v32 = vpop.f32.mrb[159].mxu1  ;;  %v6587_v37 = vpack.c.bf16 %v6549_v45, %v6548_v42 }
 0x552   : > { %v16335_v33 = vadd.f32 %v5367_v7, %v5052_v26  ;;  %12275 = vmatmul.mubr.msk.bf16.gmra.mrb[8].mxu0 %vm3982_vm4, %v16041_v25 }
 0x553   : > { %12361 = vmatmul.mubr.msk.bf16.gmra.mrb[8].mxu1 %vm3982_vm4, %v6586_v6  ;;  %12278 = vmatprep.mubr.msk.bf16.mxu0 %vm13169_vm3, %v18290_v15 }
 0x554   : > { %12364 = vmatprep.mubr.msk.bf16.mxu1 %vm13169_vm3, %v18290_v15 }
 0x555   : > { %v5001_v22 = vpop.f32.mrb[160].mxu0 }
 0x556   : > { %v5372_v62 = vpop.f32.mrb[160].mxu1  ;;  %v5053_v29 = vadd.f32 %v5001_v22, %v16037_v57  ;;  %v11996_v4 = vpop.f32.mrb[161].mxu0  ;;  %v6550_v22 = vld [vmem:[#allocation3 + $0x7a] sm:$0xff] }
 0x557   : > { %v12082_v34 = vpop.f32.mrb[161].mxu1  ;;  %v5004_v59 = vpop.f32.mrb[162].mxu0 }
 0x558   : > { %v5375_v61 = vpop.f32.mrb[162].mxu1  ;;  %v16345_v39 = vadd.f32 %v5372_v62, %v5053_v29  ;;  %v5054_v25 = vadd.f32 %v5004_v59, %v16039_v53  ;;  %v11997_v3 = vpop.f32.mrb[163].mxu0  ;;  %v6588_v29 = vpack.c.bf16 %v6551_v13, %v6550_v22  ;;  %v6553_v34 = vld [vmem:[#allocation3 + $0x92] sm:$0xff] }
 0x559   : > { %v12083_v10 = vpop.f32.mrb[163].mxu1 }
 0x55a   : > { %v16348_v11 = vadd.f32 %v5375_v61, %v5054_v25  ;;  %12279 = vmatmul.mubr.msk.bf16.gmra.mrb[12].mxu0 %vm3982_vm4, %v16055_v8  ;;  %v6552_v10 = vld [vmem:[#allocation3 + $0x8a] sm:$0xff] }
 0x55b   : > { %12365 = vmatmul.mubr.msk.bf16.gmra.mrb[12].mxu1 %vm3982_vm4, %v6587_v37  ;;  %12282 = vmatprep.mubr.msk.bf16.mxu0 %vm13169_vm3, %v18290_v15  ;;  %v6589_v13 = vpack.c.bf16 %v6553_v34, %v6552_v10 }
 0x55c   : > { %12368 = vmatprep.mubr.msk.bf16.mxu1 %vm13169_vm3, %v18290_v15 }
 0x55d   : > { %v5009_v57 = vpop.f32.mrb[164].mxu0 }
 0x55e   : > { %v5380_v7 = vpop.f32.mrb[164].mxu1  ;;  %v5055_v53 = vadd.f32 %v5009_v57, %v16050_v24  ;;  %v12000_v26 = vpop.f32.mrb[165].mxu0 }
 0x55f   : > { %v12086_v17 = vpop.f32.mrb[165].mxu1  ;;  %v5012_v32 = vpop.f32.mrb[166].mxu0 }
 0x560   : > { %v5383_v6 = vpop.f32.mrb[166].mxu1  ;;  %v16358_v62 = vadd.f32 %v5380_v7, %v5055_v53  ;;  %v12001_v8 = vpop.f32.mrb[167].mxu0  ;;  %v6555_v17 = vld [vmem:[#allocation3 + $0xa2] sm:$0xff] }
 0x561   : > { %v12087_v45 = vpop.f32.mrb[167].mxu1 }
 0x562   : > { %12283 = vmatmul.mubr.msk.bf16.gmra.mrb[16].mxu0 %vm3982_vm4, %v16069_v46  ;;  %v6554_v45 = vld [vmem:[#allocation3 + $0x9a] sm:$0xff] }
 0x563   : > { %12369 = vmatmul.mubr.msk.bf16.gmra.mrb[16].mxu1 %vm3982_vm4, %v6588_v29  ;;  %12286 = vmatprep.mubr.msk.bf16.mxu0 %vm13169_vm3, %v18290_v15  ;;  %v6590_v34 = vpack.c.bf16 %v6555_v17, %v6554_v45 }
 0x564   : > { %12372 = vmatprep.mubr.msk.bf16.mxu1 %vm13169_vm3, %v18290_v15 }
 0x565   : > { %v5591_v24 = vpop.f32.mrb[168].mxu0 }
 0x566   : > { %v5962_v4 = vpop.f32.mrb[168].mxu1  ;;  %v5757_v59 = vadd.f32 %v5591_v24, %v16066_v60  ;;  %v12092_v61 = vpop.f32.mrb[169].mxu0 }
 0x567   : > { %v12178_v42 = vpop.f32.mrb[169].mxu1  ;;  %v5594_v25 = vpop.f32.mrb[170].mxu0 }
 0x568   : > { %v5965_v3 = vpop.f32.mrb[170].mxu1  ;;  %v16368_v37 = vadd.f32 %v5962_v4, %v5757_v59  ;;  %v5758_v46 = vadd.f32 %v5594_v25, %v16071_v40  ;;  %v12093_v57 = vpop.f32.mrb[171].mxu0  ;;  %v6557_v42 = vld [vmem:[#allocation3 + $0xb2] sm:$0xff] }
 0x569   : > { %v12179_v7 = vpop.f32.mrb[171].mxu1  ;;  %v6556_v57 = vld [vmem:[#allocation3 + $0xaa] sm:$0xff] }
 0x56a   : > { %v16371_v53 = vadd.f32 %v5965_v3, %v5758_v46  ;;  %12287 = vmatmul.mubr.msk.bf16.gmra.mrb[20].mxu0 %vm3982_vm4, %v16084_v21 }
 0x56b   : > { %12373 = vmatmul.mubr.msk.bf16.gmra.mrb[20].mxu1 %vm3982_vm4, %v6589_v13  ;;  %12290 = vmatprep.mubr.msk.bf16.mxu0 %vm13169_vm3, %v18290_v15 }
 0x56c   : > { %12376 = vmatprep.mubr.msk.bf16.mxu1 %vm13169_vm3, %v18290_v15 }
 0x56d   : > { %v5599_v60 = vpop.f32.mrb[172].mxu0 }
 0x56e   : > { %v5970_v26 = vpop.f32.mrb[172].mxu1  ;;  %v5759_v40 = vadd.f32 %v5599_v60, %v16081_v9  ;;  %v12096_v32 = vpop.f32.mrb[173].mxu0 }
 0x56f   : > { %v12182_v6 = vpop.f32.mrb[173].mxu1  ;;  %v5602_v22 = vpop.f32.mrb[174].mxu0  ;;  %v6559_v32 = vld [vmem:[#allocation3 + $0xc2] sm:$0xff] }
 0x570   : > { %v5973_v8 = vpop.f32.mrb[174].mxu1  ;;  %v16381_v29 = vadd.f32 %v5970_v26, %v5759_v40  ;;  %v5760_v21 = vadd.f32 %v5602_v22, %v16086_v1  ;;  %v12097_v24 = vpop.f32.mrb[175].mxu0  ;;  %v6591_v26 = vpack.c.bf16 %v6557_v42, %v6556_v57  ;;  %v6560_v57 = vld [vmem:[#allocation3 + $0xca] sm:$0xff] }
 0x571   : > { %v12183_v4 = vpop.f32.mrb[175].mxu1 }
 0x572   : > { %v16384_v59 = vadd.f32 %v5973_v8, %v5760_v21  ;;  %12291 = vmatmul.mubr.msk.bf16.gmra.mrb[24].mxu0 %vm3982_vm4, %v16099_v28  ;;  %v6558_v21 = vld [vmem:[#allocation3 + $0xba] sm:$0xff] }
 0x573   : > { %12377 = vmatmul.mubr.msk.bf16.gmra.mrb[24].mxu1 %vm3982_vm4, %v6590_v34  ;;  %12294 = vmatprep.mubr.msk.bf16.mxu0 %vm13169_vm3, %v18290_v15 }
 0x574   : > { %12380 = vmatprep.mubr.msk.bf16.mxu1 %vm13169_vm3, %v18290_v15 }
 0x575   : > { %v5607_v9 = vpop.f32.mrb[176].mxu0 }
 0x576   : > { %v5978_v61 = vpop.f32.mrb[176].mxu1  ;;  %v5761_v1 = vadd.f32 %v5607_v9, %v16096_v31  ;;  %v12100_v25 = vpop.f32.mrb[177].mxu0  ;;  %v6592_v9 = vpack.c.bf16 %v6559_v32, %v6558_v21  ;;  %v6563_v32 = vld [vmem:[#allocation3 + $0xe2] sm:$0xff] }
 0x577   : > { %v12186_v3 = vpop.f32.mrb[177].mxu1  ;;  %v5610_v10 = vpop.f32.mrb[178].mxu0 }
 0x578   : > { %v5981_v46 = vpop.f32.mrb[178].mxu1  ;;  %v16394_v7 = vadd.f32 %v5978_v61, %v5761_v1  ;;  %v5762_v28 = vadd.f32 %v5610_v10, %v16101_v49  ;;  %v12101_v13 = vpop.f32.mrb[179].mxu0  ;;  %v6561_v1 = vld [vmem:[#allocation3 + $0xd2] sm:$0xff] }
 0x579   : > { %v12187_v60 = vpop.f32.mrb[179].mxu1 }
 0x57a   : > { %v16397_v17 = vadd.f32 %v5981_v46, %v5762_v28  ;;  %12295 = vmatmul.mubr.msk.bf16.gmra.mrb[28].mxu0 %vm3982_vm4, %v16114_v48 }
 0x57b   : > { %12381 = vmatmul.mubr.msk.bf16.gmra.mrb[28].mxu1 %vm3982_vm4, %v6591_v26  ;;  %12298 = vmatprep.mubr.msk.bf16.mxu0 %vm13169_vm3, %v18290_v15  ;;  %v6593_v26 = vpack.c.bf16 %v6561_v1, %v6560_v57 }
 0x57c   : > { %12384 = vmatprep.mubr.msk.bf16.mxu1 %vm13169_vm3, %v18290_v15 }
 0x57d   : > { %v5615_v31 = vpop.f32.mrb[180].mxu0 }
 0x57e   : > { %v5986_v40 = vpop.f32.mrb[180].mxu1  ;;  %v5763_v49 = vadd.f32 %v5615_v31, %v16111_v30  ;;  %v12104_v6 = vpop.f32.mrb[181].mxu0 }
 0x57f   : > { %v12190_v22 = vpop.f32.mrb[181].mxu1  ;;  %v5618_v8 = vpop.f32.mrb[182].mxu0 }
 0x580   : > { %v5989_v45 = vpop.f32.mrb[182].mxu1  ;;  %v16407_v24 = vadd.f32 %v5986_v40, %v5763_v49  ;;  %v5764_v48 = vadd.f32 %v5618_v8, %v16116_v27  ;;  %v12105_v4 = vpop.f32.mrb[183].mxu0 }
 0x581   : > { %v12191_v34 = vpop.f32.mrb[183].mxu1 }
 0x582   : > { %v16410_v61 = vadd.f32 %v5989_v45, %v5764_v48  ;;  %12299 = vmatmul.mubr.msk.bf16.gmra.mrb[32].mxu0 %vm3982_vm4, %v16129_v18  ;;  %v6562_v45 = vld [vmem:[#allocation3 + $0xda] sm:$0xff] }
 0x583   : > { %12385 = vmatmul.mubr.msk.bf16.gmra.mrb[32].mxu1 %vm3982_vm4, %v6592_v9  ;;  %12302 = vmatprep.mubr.msk.bf16.mxu0 %vm13169_vm3, %v18290_v15  ;;  %v6594_v34 = vpack.c.bf16 %v6563_v32, %v6562_v45 }
 0x584   : > { %12388 = vmatprep.mubr.msk.bf16.mxu1 %vm13169_vm3, %v18290_v15 }
 0x585   : > { %v5623_v30 = vpop.f32.mrb[184].mxu0 }
 0x586   : > { %v5994_v42 = vpop.f32.mrb[184].mxu1  ;;  %v5765_v27 = vadd.f32 %v5623_v30, %v16126_v14  ;;  %v12108_v25 = vpop.f32.mrb[185].mxu0 }
 0x587   : > { %v12194_v3 = vpop.f32.mrb[185].mxu1  ;;  %v5626_v10 = vpop.f32.mrb[186].mxu0 }
 0x588   : > { %v5997_v46 = vpop.f32.mrb[186].mxu1  ;;  %v16420_v28 = vadd.f32 %v5994_v42, %v5765_v27  ;;  %v5766_v18 = vadd.f32 %v5626_v10, %v16131_v0  ;;  %v12109_v13 = vpop.f32.mrb[187].mxu0  ;;  %v6565_v42 = vld [vmem:[#allocation3 + $0xf2] sm:$0xff] }
 0x589   : > { %v12195_v60 = vpop.f32.mrb[187].mxu1 }
 0x58a   : > { %v16423_v31 = vadd.f32 %v5997_v46, %v5766_v18  ;;  %12303 = vmatmul.mubr.msk.bf16.gmra.mrb[36].mxu0 %vm3982_vm4, %v16144_v47  ;;  %v6564_v46 = vld [vmem:[#allocation3 + $0xea] sm:$0xff] }
 0x58b   : > { %12389 = vmatmul.mubr.msk.bf16.gmra.mrb[36].mxu1 %vm3982_vm4, %v6593_v26  ;;  %12306 = vmatprep.mubr.msk.bf16.mxu0 %vm13169_vm3, %v18290_v15  ;;  %v6595_v26 = vpack.c.bf16 %v6565_v42, %v6564_v46  ;;  %v6569_v46 = vld [vmem:[#allocation3 + $0x112] sm:$0xff] }
 0x58c   : > { %12392 = vmatprep.mubr.msk.bf16.mxu1 %vm13169_vm3, %v18290_v15 }
 0x58d   : > { %v5631_v14 = vpop.f32.mrb[188].mxu0 }
 0x58e   : > { %v6002_v40 = vpop.f32.mrb[188].mxu1  ;;  %v5767_v0 = vadd.f32 %v5631_v14, %v16141_v16  ;;  %v12112_v49 = vpop.f32.mrb[189].mxu0 }
 0x58f   : > { %v12198_v6 = vpop.f32.mrb[189].mxu1  ;;  %v5634_v22 = vpop.f32.mrb[190].mxu0  ;;  %v6567_v49 = vld [vmem:[#allocation3 + $0x102] sm:$0xff] }
 0x590   : > { %v6005_v8 = vpop.f32.mrb[190].mxu1  ;;  %v16433_v21 = vadd.f32 %v6002_v40, %v5767_v0  ;;  %v5768_v47 = vadd.f32 %v5634_v22, %v16146_v56  ;;  %v12113_v48 = vpop.f32.mrb[191].mxu0  ;;  %v18345_v56 = vld [vmem:[#allocation27_spill] sm:$0xff]  ;;  %v18347_v40 = vld [vmem:[#allocation9_spill] sm:$0xff]  ;;  %v18348_v6 = vld [vmem:[#allocation8_spill] sm:$0xff] }
 0x591   : > { %v12199_v4 = vpop.f32.mrb[191].mxu1 }
 0x592   : > { %v16436_v9 = vadd.f32 %v6005_v8, %v5768_v47  ;;  %12307 = vmatmul.mubr.msk.bf16.gmra.mrb[40].mxu0 %vm3982_vm4, %v16159_v20  ;;  %v18346_v20 = vld [vmem:[#allocation7_spill] sm:$0xff] }
 0x593   : > { %12393 = vmatmul.mubr.msk.bf16.gmra.mrb[40].mxu1 %vm3982_vm4, %v6594_v34  ;;  %12310 = vmatprep.mubr.msk.bf16.mxu0 %vm13169_vm3, %v18290_v15  ;;  %v6566_v4 = vld [vmem:[#allocation3 + $0xfa] sm:$0xff] }
 0x594   : > { %12396 = vmatprep.mubr.msk.bf16.mxu1 %vm13169_vm3, %v18290_v15 }
 0x595   : > { %v5639_v16 = vpop.f32.mrb[192].mxu0 }
 0x596   : > { %v6010_v30 = vpop.f32.mrb[192].mxu1  ;;  %v5769_v1 = vadd.f32 %v5639_v16, %v18345_v56  ;;  %v12116_v27 = vpop.f32.mrb[193].mxu0  ;;  %v18349_v16 = vld [vmem:[#allocation10_spill] sm:$0xff] }
 0x597   : > { %v12202_v25 = vpop.f32.mrb[193].mxu1  ;;  %v5642_v3 = vpop.f32.mrb[194].mxu0 }
 0x598   : > { %v6013_v10 = vpop.f32.mrb[194].mxu1  ;;  %v16446_v57 = vadd.f32 %v6010_v30, %v5769_v1  ;;  %v5770_v18 = vadd.f32 %v5642_v3, %v18346_v20  ;;  %v12117_v13 = vpop.f32.mrb[195].mxu0  ;;  %v6596_v1 = vpack.c.bf16 %v6567_v49, %v6566_v4  ;;  %v18350_v25 = vld [vmem:[#allocation12_spill] sm:$0xff]  ;;  %v18351_v20 = vld [vmem:[#allocation11_spill] sm:$0xff]  ;;  %v18352_v49 = vld [vmem:[#allocation13_spill] sm:$0xff] }
 0x599   : > { %v12203_v60 = vpop.f32.mrb[195].mxu1 }
 0x59a   : > { %v16449_v14 = vadd.f32 %v6013_v10, %v5770_v18  ;;  %12311 = vmatmul.mubr.msk.bf16.gmra.mrb[44].mxu0 %vm3982_vm4, %v18347_v40 }
 0x59b   : > { %12397 = vmatmul.mubr.msk.bf16.gmra.mrb[44].mxu1 %vm3982_vm4, %v6595_v26  ;;  %12314 = vmatprep.mubr.msk.bf16.mxu0 %vm13169_vm3, %v18290_v15 }
 0x59c   : > { %12400 = vmatprep.mubr.msk.bf16.mxu1 %vm13169_vm3, %v18290_v15 }
 0x59d   : > { %v5647_v32 = vpop.f32.mrb[196].mxu0 }
 0x59e   : > { %v6018_v0 = vpop.f32.mrb[196].mxu1  ;;  %v5771_v22 = vadd.f32 %v5647_v32, %v18348_v6  ;;  %v12120_v8 = vpop.f32.mrb[197].mxu0  ;;  %v6568_v32 = vld [vmem:[#allocation3 + $0x10a] sm:$0xff] }
 0x59f   : > { %v12206_v45 = vpop.f32.mrb[197].mxu1  ;;  %v5650_v47 = vpop.f32.mrb[198].mxu0 }
 0x5a0   : > { %v6021_v48 = vpop.f32.mrb[198].mxu1  ;;  %v16459_v34 = vadd.f32 %v6018_v0, %v5771_v22  ;;  %v5772_v30 = vadd.f32 %v5650_v47, %v18349_v16  ;;  %v12121_v42 = vpop.f32.mrb[199].mxu0  ;;  %v6597_v45 = vpack.c.bf16 %v6569_v46, %v6568_v32  ;;  %v6570_v46 = vld [vmem:[#allocation3 + $0x11a] sm:$0xff] }
 0x5a1   : > { %v12207_v56 = vpop.f32.mrb[199].mxu1  ;;  %v18354_v42 = vld [vmem:[#allocation14_spill] sm:$0xff] }
 0x5a2   : > { %v16462_v27 = vadd.f32 %v6021_v48, %v5772_v30  ;;  %12315 = vmatmul.mubr.msk.bf16.gmra.mrb[48].mxu0 %vm3982_vm4, %v18350_v25  ;;  %v18353_v48 = vld [vmem:[#allocation15_spill] sm:$0xff]  ;;  %v6571_v30 = vld [vmem:[#allocation3 + $0x122] sm:$0xff] }
 0x5a3   : > { %12401 = vmatmul.mubr.msk.bf16.gmra.mrb[48].mxu1 %vm3982_vm4, %v6596_v1  ;;  %12318 = vmatprep.mubr.msk.bf16.mxu0 %vm13169_vm3, %v18290_v15 }
 0x5a4   : > { %12404 = vmatprep.mubr.msk.bf16.mxu1 %vm13169_vm3, %v18290_v15 }
 0x5a5   : > { %v5655_v3 = vpop.f32.mrb[200].mxu0 }
 0x5a6   : > { %v6026_v10 = vpop.f32.mrb[200].mxu1  ;;  %v5773_v18 = vadd.f32 %v5655_v3, %v18351_v20  ;;  %v12124_v13 = vpop.f32.mrb[201].mxu0 }
 0x5a7   : > { %v12210_v60 = vpop.f32.mrb[201].mxu1  ;;  %v5658_v26 = vpop.f32.mrb[202].mxu0 }
 0x5a8   : > { %v6029_v40 = vpop.f32.mrb[202].mxu1  ;;  %v16472_v0 = vadd.f32 %v6026_v10, %v5773_v18  ;;  %v5774_v6 = vadd.f32 %v5658_v26, %v18352_v49  ;;  %v12125_v22 = vpop.f32.mrb[203].mxu0  ;;  %v18355_v18 = vld [vmem:[#allocation16_spill] sm:$0xff] }
 0x5a9   : > { %v12211_v8 = vpop.f32.mrb[203].mxu1  ;;  %v6573_v22 = vld [vmem:[#allocation3 + $0x132] sm:$0xff] }
 0x5aa   : > { %v16475_v47 = vadd.f32 %v6029_v40, %v5774_v6  ;;  %12319 = vmatmul.mubr.msk.bf16.gmra.mrb[52].mxu0 %vm3982_vm4, %v18353_v48  ;;  %v6598_v40 = vpack.c.bf16 %v6571_v30, %v6570_v46  ;;  %v6572_v30 = vld [vmem:[#allocation3 + $0x12a] sm:$0xff] }
 0x5ab   : > { %12405 = vmatmul.mubr.msk.bf16.gmra.mrb[52].mxu1 %vm3982_vm4, %v6597_v45  ;;  %12322 = vmatprep.mubr.msk.bf16.mxu0 %vm13169_vm3, %v18290_v15 }
 0x5ac   : > { %12408 = vmatprep.mubr.msk.bf16.mxu1 %vm13169_vm3, %v18290_v15 }
 0x5ad   : > { %v5663_v4 = vpop.f32.mrb[204].mxu0 }
 0x5ae   : > { %v6034_v16 = vpop.f32.mrb[204].mxu1  ;;  %v5775_v56 = vadd.f32 %v5663_v4, %v18354_v42  ;;  %v12128_v1 = vpop.f32.mrb[205].mxu0 }
 0x5af   : > { %v12214_v25 = vpop.f32.mrb[205].mxu1  ;;  %v5666_v3 = vpop.f32.mrb[206].mxu0 }
 0x5b0   : > { %v6037_v10 = vpop.f32.mrb[206].mxu1  ;;  %v16485_v20 = vadd.f32 %v6034_v16, %v5775_v56  ;;  %v5776_v13 = vadd.f32 %v5666_v3, %v18355_v18  ;;  %v12129_v60 = vpop.f32.mrb[207].mxu0  ;;  %v6599_v3 = vpack.c.bf16 %v6573_v22, %v6572_v30  ;;  %v6575_v18 = vld [vmem:[#allocation3 + $0x142] sm:$0xff] }
 0x5b1   : > { %v12215_v26 = vpop.f32.mrb[207].mxu1 }
 0x5b2   : > { %v16488_v32 = vadd.f32 %v6037_v10, %v5776_v13  ;;  %12323 = vmatmul.mubr.msk.bf16.gmra.mrb[56].mxu0 %vm3982_vm4, %v16219_v54  ;;  %v18356_v54 = vld [vmem:[#allocation17_spill] sm:$0xff] }
 0x5b3   : > { %12409 = vmatmul.mubr.msk.bf16.gmra.mrb[56].mxu1 %vm3982_vm4, %v6598_v40  ;;  %12326 = vmatprep.mubr.msk.bf16.mxu0 %vm13169_vm3, %v18290_v15 }
 0x5b4   : > { %12412 = vmatprep.mubr.msk.bf16.mxu1 %vm13169_vm3, %v18290_v15 }
 0x5b5   : > { %v5671_v49 = vpop.f32.mrb[208].mxu0 }
 0x5b6   : > { %v6042_v6 = vpop.f32.mrb[208].mxu1  ;;  %v5777_v8 = vadd.f32 %v5671_v49, %v16216_v43  ;;  %v12132_v45 = vpop.f32.mrb[209].mxu0 }
 0x5b7   : > { %v12218_v48 = vpop.f32.mrb[209].mxu1  ;;  %v5674_v4 = vpop.f32.mrb[210].mxu0 }
 0x5b8   : > { %v6045_v16 = vpop.f32.mrb[210].mxu1  ;;  %v16498_v42 = vadd.f32 %v6042_v6, %v5777_v8  ;;  %v5778_v56 = vadd.f32 %v5674_v4, %v18356_v54  ;;  %v12133_v1 = vpop.f32.mrb[211].mxu0  ;;  %v6574_v6 = vld [vmem:[#allocation3 + $0x13a] sm:$0xff]  ;;  %v6577_v54 = vld [vmem:[#allocation3 + $0x152] sm:$0xff] }
 0x5b9   : > { %v12219_v25 = vpop.f32.mrb[211].mxu1  ;;  %v6600_v4 = vpack.c.bf16 %v6575_v18, %v6574_v6 }
 0x5ba   : > { %v16501_v10 = vadd.f32 %v6045_v16, %v5778_v56  ;;  %12327 = vmatmul.mubr.msk.bf16.gmra.mrb[60].mxu0 %vm3982_vm4, %v16234_v55  ;;  %v18357_v55 = vld [vmem:[#allocation18_spill] sm:$0xff] }
 0x5bb   : > { %12413 = vmatmul.mubr.msk.bf16.gmra.mrb[60].mxu1 %vm3982_vm4, %v6599_v3  ;;  %12330 = vmatprep.mubr.msk.bf16.mxu0 %vm13169_vm3, %v18290_v15 }
 0x5bc   : > { %12416 = vmatprep.mubr.msk.bf16.mxu1 %vm13169_vm3, %v18290_v15 }
 0x5bd   : > { %v5679_v43 = vpop.f32.mrb[212].mxu0 }
 0x5be   : > { %v6050_v46 = vpop.f32.mrb[212].mxu1  ;;  %v5779_v13 = vadd.f32 %v5679_v43, %v16231_v50  ;;  %v12136_v60 = vpop.f32.mrb[213].mxu0 }
 0x5bf   : > { %v12222_v26 = vpop.f32.mrb[213].mxu1  ;;  %v5682_v40 = vpop.f32.mrb[214].mxu0 }
 0x5c0   : > { %v6053_v49 = vpop.f32.mrb[214].mxu1  ;;  %v16511_v22 = vadd.f32 %v6050_v46, %v5779_v13  ;;  %v5780_v8 = vadd.f32 %v5682_v40, %v18357_v55  ;;  %v12137_v45 = vpop.f32.mrb[215].mxu0  ;;  %v6576_v46 = vld [vmem:[#allocation3 + $0x14a] sm:$0xff] }
 0x5c1   : > { %v12223_v48 = vpop.f32.mrb[215].mxu1  ;;  %v6601_v40 = vpack.c.bf16 %v6577_v54, %v6576_v46  ;;  %v6578_v45 = vld [vmem:[#allocation3 + $0x15a] sm:$0xff] }
 0x5c2   : > { %v16514_v16 = vadd.f32 %v6053_v49, %v5780_v8  ;;  %12331 = vmatmul.mubr.msk.bf16.gmra.mrb[64].mxu0 %vm3982_vm4, %v16249_v5  ;;  %v18358_v5 = vld [vmem:[#allocation19_spill] sm:$0xff]  ;;  %v6579_v48 = vld [vmem:[#allocation3 + $0x162] sm:$0xff] }
 0x5c3   : > { %12417 = vmatmul.mubr.msk.bf16.gmra.mrb[64].mxu1 %vm3982_vm4, %v6600_v4  ;;  %12334 = vmatprep.mubr.msk.bf16.mxu0 %vm13169_vm3, %v18290_v15  ;;  %v6207_v8 = vld [vmem:[#allocation3 + $0x159] sm:$0xff]  ;;  %v6602_v46 = vpack.c.bf16 %v6579_v48, %v6578_v45 }
 0x5c4   : > { %12420 = vmatprep.mubr.msk.bf16.mxu1 %vm13169_vm3, %v18290_v15 }
 0x5c5   : > { %v5687_v50 = vpop.f32.mrb[216].mxu0 }
 0x5c6   : > { %v6058_v30 = vpop.f32.mrb[216].mxu1  ;;  %v5781_v56 = vadd.f32 %v5687_v50, %v16246_v41  ;;  %v12140_v1 = vpop.f32.mrb[217].mxu0  ;;  %v6208_v41 = vld [vmem:[#allocation3 + $0x161] sm:$0xff] }
 0x5c7   : > { %v12226_v25 = vpop.f32.mrb[217].mxu1  ;;  %v5690_v3 = vpop.f32.mrb[218].mxu0 }
 0x5c8   : > { %v6061_v43 = vpop.f32.mrb[218].mxu1  ;;  %v16524_v18 = vadd.f32 %v6058_v30, %v5781_v56  ;;  %v5782_v13 = vadd.f32 %v5690_v3, %v18358_v5  ;;  %v12141_v60 = vpop.f32.mrb[219].mxu0 }
 0x5c9   : > { %v12227_v26 = vpop.f32.mrb[219].mxu1 }
 0x5ca   : > { %v16527_v49 = vadd.f32 %v6061_v43, %v5782_v13  ;;  %12335 = vmatmul.mubr.msk.bf16.gmra.mrb[68].mxu0 %vm3982_vm4, %v16264_v35  ;;  %v6231_v43 = vpack.c.bf16 %v6208_v41, %v6207_v8  ;;  %v6580_v13 = vld [vmem:[#allocation3 + $0x16a] sm:$0xf] }
 0x5cb   : > { %12421 = vmatmul.mubr.msk.bf16.gmra.mrb[68].mxu1 %vm3982_vm4, %v6601_v40  ;;  %12338 = vmatprep.mubr.msk.bf16.mxu0 %vm13169_vm3, %v18290_v15 }
 0x5cc   : > { %12424 = vmatprep.mubr.msk.bf16.mxu1 %vm13169_vm3, %v18290_v15 }
 0x5cd   : > { %v5695_v6 = vpop.f32.mrb[220].mxu0 }
 0x5ce   : > { %v6066_v55 = vpop.f32.mrb[220].mxu1  ;;  %v5783_v4 = vadd.f32 %v5695_v6, %v16261_v12  ;;  %v12144_v50 = vpop.f32.mrb[221].mxu0  ;;  %v6209_v12 = vld [vmem:[#allocation3 + $0x169] sm:$0xf] }
 0x5cf   : > { %v12230_v30 = vpop.f32.mrb[221].mxu1  ;;  %v5698_v54 = vpop.f32.mrb[222].mxu0  ;;  %v6232_v6 = vpack.c.bf16 %v6209_v12, %v6209_v12 }
 0x5d0   : > { %v6069_v35 = vpop.f32.mrb[222].mxu1  ;;  %v16537_v56 = vadd.f32 %v6066_v55, %v5783_v4  ;;  %v5784_v1 = vadd.f32 %v5698_v54, %v16266_v44  ;;  %v12145_v25 = vpop.f32.mrb[223].mxu0  ;;  %v6603_v55 = vpack.c.bf16 %v6580_v13, %v6580_v13 }
 0x5d1   : > { %v12231_v3 = vpop.f32.mrb[223].mxu1 }
 0x5d2   : > { %v16540_v5 = vadd.f32 %v6069_v35, %v5784_v1  ;;  %12339 = vmatmul.mubr.msk.bf16.gmra.mrb[72].mxu0 %vm3982_vm4, %v6231_v43 }
 0x5d3   : > { %12425 = vmatmul.mubr.msk.bf16.gmra.mrb[72].mxu1 %vm3982_vm4, %v6602_v46  ;;  %12342 = vmatprep.mubr.msk.bf16.mxu0 %vm13169_vm3, %v18290_v15  ;;  %v6911_v46 = vld [vmem:[#allocation3 + $0x2b] sm:$0xff] }
 0x5d4   : > { %12428 = vmatprep.mubr.msk.bf16.mxu1 %vm13169_vm3, %v18290_v15 }
 0x5d5   : > { %v5703_v60 = vpop.f32.mrb[224].mxu0 }
 0x5d6   : > { %v6074_v44 = vpop.f32.mrb[224].mxu1  ;;  %v5785_v26 = vadd.f32 %v5703_v60, %v16276_v52  ;;  %v12148_v40 = vpop.f32.mrb[225].mxu0  ;;  %v6912_v52 = vld [vmem:[#allocation3 + $0x33] sm:$0xff] }
 0x5d7   : > { %v12234_v41 = vpop.f32.mrb[225].mxu1  ;;  %v5706_v8 = vpop.f32.mrb[226].mxu0  ;;  %v6954_v13 = vpack.c.bf16 %v6912_v52, %v6911_v46  ;;  %v6913_v52 = vld [vmem:[#allocation3 + $0x3b] sm:$0xff] }
 0x5d8   : > { %v6077_v45 = vpop.f32.mrb[226].mxu1  ;;  %v16549_v48 = vadd.f32 %v6074_v44, %v5785_v26  ;;  %v5786_v4 = vadd.f32 %v5706_v8, %v16279_v19  ;;  %v12149_v50 = vpop.f32.mrb[227].mxu0 }
 0x5d9   : > { %v12235_v30 = vpop.f32.mrb[227].mxu1 }
 0x5da   : > { %v16552_v54 = vadd.f32 %v6077_v45, %v5786_v4  ;;  %12343 = vmatmul.mubr.msk.bf16.gmra.mrb[76].mxu0 %vm3982_vm4, %v6232_v6 }
 0x5db   : > { %12429 = vmatmul.mubr.msk.bf16.gmra.mrb[76].mxu1 %vm3982_vm4, %v6603_v55  ;;  %12434 = vmatprep.mubr.msk.bf16.mxu0 %vm13169_vm3, %v18290_v15  ;;  %v6914_v55 = vld [vmem:[#allocation3 + $0x43] sm:$0xff] }
 0x5dd   : > { %v5711_v35 = vpop.f32.mrb[228].mxu0 }
 0x5de   : > { %v6082_v1 = vpop.f32.mrb[228].mxu1  ;;  %v5787_v25 = vadd.f32 %v5711_v35, %v16291_v2  ;;  %v12152_v3 = vpop.f32.mrb[229].mxu0 }
 0x5df   : > { %v12238_v43 = vpop.f32.mrb[229].mxu1  ;;  %v5714_v19 = vpop.f32.mrb[230].mxu0  ;;  %v6955_v3 = vpack.c.bf16 %v6914_v55, %v6913_v52 }
 0x5e0   : > { %v6085_v12 = vpop.f32.mrb[230].mxu1  ;;  %v16559_v60 = vadd.f32 %v6082_v1, %v5787_v25  ;;  %v5788_v44 = vadd.f32 %v5714_v19, %v16295_v36  ;;  %v12153_v26 = vpop.f32.mrb[231].mxu0  ;;  %v6916_v19 = vld [vmem:[#allocation3 + $0x53] sm:$0xff] }
 0x5e1   : > { %v12239_v40 = vpop.f32.mrb[231].mxu1 }
 0x5e2   : > { %v16562_v41 = vadd.f32 %v6085_v12, %v5788_v44  ;;  %12435 = vmatmul.mubr.msk.bf16.vlgmr.msra.gmra.mrb[80].mxu0 %vm3982_vm4, %v6954_v13 }
 0x5e3   : > { %12438 = vmatprep.mubr.msk.bf16.mxu0 %vm13169_vm3, %v18290_v15 }
 0x5e5   : > { %v5719_v2 = vpop.f32.mrb[232].mxu0 }
 0x5e6   : > { %v6090_v6 = vpop.f32.mrb[232].mxu1  ;;  %v5789_v8 = vadd.f32 %v5719_v2, %v16306_v51  ;;  %v12156_v45 = vpop.f32.mrb[233].mxu0 }
 0x5e7   : > { %v12242_v4 = vpop.f32.mrb[233].mxu1  ;;  %v5722_v50 = vpop.f32.mrb[234].mxu0 }
 0x5e8   : > { %v6093_v30 = vpop.f32.mrb[234].mxu1  ;;  %v16568_v36 = vadd.f32 %v6090_v6, %v5789_v8  ;;  %v5790_v35 = vadd.f32 %v5722_v50, %v16309_v38  ;;  %v12157_v1 = vpop.f32.mrb[235].mxu0  ;;  %v6915_v38 = vld [vmem:[#allocation3 + $0x4b] sm:$0xff] }
 0x5e9   : > { %v12243_v25 = vpop.f32.mrb[235].mxu1  ;;  %v6956_v45 = vpack.c.bf16 %v6916_v19, %v6915_v38 }
 0x5ea   : > { %v16571_v43 = vadd.f32 %v6093_v30, %v5790_v35  ;;  %12439 = vmatmul.mubr.msk.bf16.gmra.mrb[84].mxu0 %vm3982_vm4, %v6955_v3  ;;  %v6918_v30 = vld [vmem:[#allocation3 + $0x63] sm:$0xff] }
 0x5eb   : > { %12442 = vmatprep.mubr.msk.bf16.mxu0 %vm13169_vm3, %v18290_v15 }
 0x5ed   : > { %v5727_v51 = vpop.f32.mrb[236].mxu0 }
 0x5ee   : > { %v6098_v46 = vpop.f32.mrb[236].mxu1  ;;  %v5791_v12 = vadd.f32 %v5727_v51, %v16319_v58  ;;  %v12160_v13 = vpop.f32.mrb[237].mxu0 }
 0x5ef   : > { %v12246_v44 = vpop.f32.mrb[237].mxu1  ;;  %v5730_v26 = vpop.f32.mrb[238].mxu0 }
 0x5f0   : > { %v6101_v40 = vpop.f32.mrb[238].mxu1  ;;  %v16577_v2 = vadd.f32 %v6098_v46, %v5791_v12  ;;  %v5792_v6 = vadd.f32 %v5730_v26, %v16322_v23  ;;  %v12161_v55 = vpop.f32.mrb[239].mxu0  ;;  %v6917_v23 = vld [vmem:[#allocation3 + $0x5b] sm:$0xff] }
 0x5f1   : > { %v12247_v8 = vpop.f32.mrb[239].mxu1  ;;  %v6957_v13 = vpack.c.bf16 %v6918_v30, %v6917_v23 }
 0x5f2   : > { %v16580_v4 = vadd.f32 %v6101_v40, %v5792_v6  ;;  %12443 = vmatmul.mubr.msk.bf16.gmra.mrb[88].mxu0 %vm3982_vm4, %v6956_v45  ;;  %v6920_v40 = vld [vmem:[#allocation3 + $0x73] sm:$0xff] }
 0x5f3   : > { %12446 = vmatprep.mubr.msk.bf16.mxu0 %vm13169_vm3, %v18290_v15 }
 0x5f5   : > { %v5735_v58 = vpop.f32.mrb[240].mxu0 }
 0x5f6   : > { %v6106_v50 = vpop.f32.mrb[240].mxu1  ;;  %v5793_v52 = vadd.f32 %v5735_v58, %v16332_v63  ;;  %v12164_v35 = vpop.f32.mrb[241].mxu0 }
 0x5f7   : > { %v12250_v1 = vpop.f32.mrb[241].mxu1  ;;  %v5738_v25 = vpop.f32.mrb[242].mxu0 }
 0x5f8   : > { %v6109_v3 = vpop.f32.mrb[242].mxu1  ;;  %v16586_v51 = vadd.f32 %v6106_v50, %v5793_v52  ;;  %v5794_v46 = vadd.f32 %v5738_v25, %v16335_v33  ;;  %v12165_v19 = vpop.f32.mrb[243].mxu0  ;;  %v6919_v33 = vld [vmem:[#allocation3 + $0x6b] sm:$0xff] }
 0x5f9   : > { %v12251_v12 = vpop.f32.mrb[243].mxu1  ;;  %v6958_v35 = vpack.c.bf16 %v6920_v40, %v6919_v33 }
 0x5fa   : > { %v16589_v44 = vadd.f32 %v6109_v3, %v5794_v46  ;;  %12447 = vmatmul.mubr.msk.bf16.gmra.mrb[92].mxu0 %vm3982_vm4, %v6957_v13  ;;  %v6922_v3 = vld [vmem:[#allocation3 + $0x83] sm:$0xff] }
 0x5fb   : > { %12450 = vmatprep.mubr.msk.bf16.mxu0 %vm13169_vm3, %v18290_v15 }
 0x5fd   : > { %v5743_v63 = vpop.f32.mrb[244].mxu0 }
 0x5fe   : > { %v6114_v26 = vpop.f32.mrb[244].mxu1  ;;  %v5795_v38 = vadd.f32 %v5743_v63, %v16345_v39  ;;  %v12168_v6 = vpop.f32.mrb[245].mxu0 }
 0x5ff   : > { %v12254_v55 = vpop.f32.mrb[245].mxu1  ;;  %v5746_v8 = vpop.f32.mrb[246].mxu0 }
 0x600   : > { %v6117_v45 = vpop.f32.mrb[246].mxu1  ;;  %v16595_v58 = vadd.f32 %v6114_v26, %v5795_v38  ;;  %v5796_v50 = vadd.f32 %v5746_v8, %v16348_v11  ;;  %v12169_v30 = vpop.f32.mrb[247].mxu0  ;;  %v6921_v11 = vld [vmem:[#allocation3 + $0x7b] sm:$0xff]  ;;  %v6924_v8 = vld [vmem:[#allocation3 + $0x93] sm:$0xff] }
 0x601   : > { %v12255_v52 = vpop.f32.mrb[247].mxu1  ;;  %v6959_v38 = vpack.c.bf16 %v6922_v3, %v6921_v11 }
 0x602   : > { %v16598_v1 = vadd.f32 %v6117_v45, %v5796_v50  ;;  %12451 = vmatmul.mubr.msk.bf16.gmra.mrb[96].mxu0 %vm3982_vm4, %v6958_v35  ;;  %v6923_v52 = vld [vmem:[#allocation3 + $0x8b] sm:$0xff] }
 0x603   : > { %12454 = vmatprep.mubr.msk.bf16.mxu0 %vm13169_vm3, %v18290_v15 }
 0x605   : > { %v5751_v39 = vpop.f32.mrb[248].mxu0 }
 0x606   : > { %v6122_v25 = vpop.f32.mrb[248].mxu1  ;;  %v5797_v23 = vadd.f32 %v5751_v39, %v16358_v62  ;;  %v12172_v46 = vpop.f32.mrb[249].mxu0 }
 0x607   : > { %v12258_v19 = vpop.f32.mrb[249].mxu1  ;;  %v5754_v12 = vpop.f32.mrb[250].mxu0 }
 0x608   : > { %v6125_v13 = vpop.f32.mrb[250].mxu1  ;;  %v16604_v63 = vadd.f32 %v6122_v25, %v5797_v23  ;;  %v12173_v26 = vpop.f32.mrb[251].mxu0  ;;  %v6960_v23 = vpack.c.bf16 %v6924_v8, %v6923_v52  ;;  %v6926_v12 = vld [vmem:[#allocation3 + $0xa3] sm:$0xff] }
 0x609   : > { %v12259_v40 = vpop.f32.mrb[251].mxu1 }
 0x60a   : > { %12455 = vmatmul.mubr.msk.bf16.gmra.mrb[100].mxu0 %vm3982_vm4, %v6959_v38 }
 0x60b   : > { %12458 = vmatprep.mubr.msk.bf16.mxu0 %vm13169_vm3, %v18290_v15 }
 0x60d   : > { %v6333_v6 = vpop.f32.mrb[252].mxu0 }
 0x60e   : > { %v6704_v55 = vpop.f32.mrb[252].mxu1  ;;  %v6499_v62 = vadd.f32 %v6333_v6, %v16368_v37  ;;  %v12264_v45 = vpop.f32.mrb[253].mxu0 }
 0x60f   : > { %v12350_v33 = vpop.f32.mrb[253].mxu1  ;;  %v6336_v50 = vpop.f32.mrb[254].mxu0 }
 0x610   : > { %v6707_v30 = vpop.f32.mrb[254].mxu1  ;;  %v16610_v35 = vadd.f32 %v6704_v55, %v6499_v62  ;;  %v6500_v39 = vadd.f32 %v6336_v50, %v16371_v53  ;;  %v12265_v25 = vpop.f32.mrb[255].mxu0  ;;  %v6925_v53 = vld [vmem:[#allocation3 + $0x9b] sm:$0xff] }
 0x611   : > { %v12351_v3 = vpop.f32.mrb[255].mxu1  ;;  %v6961_v45 = vpack.c.bf16 %v6926_v12, %v6925_v53 }
 0x612   : > { %v16613_v46 = vadd.f32 %v6707_v30, %v6500_v39  ;;  %12459 = vmatmul.mubr.msk.bf16.gmra.mrb[104].mxu0 %vm3982_vm4, %v6960_v23  ;;  %v6928_v30 = vld [vmem:[#allocation3 + $0xb3] sm:$0xff] }
 0x613   : > { %12462 = vmatprep.mubr.msk.bf16.mxu0 %vm13169_vm3, %v18290_v15 }
 0x615   : > { %v6341_v37 = vpop.f32.mrb[0].mxu0 }
 0x616   : > { %v6712_v19 = vpop.f32.mrb[0].mxu1  ;;  %v6501_v13 = vadd.f32 %v6341_v37, %v16381_v29  ;;  %v12268_v11 = vpop.f32.mrb[1].mxu0 }
 0x617   : > { %v12354_v26 = vpop.f32.mrb[1].mxu1  ;;  %v6344_v40 = vpop.f32.mrb[2].mxu0 }
 0x618   : > { %v6715_v38 = vpop.f32.mrb[2].mxu1  ;;  %v16619_v6 = vadd.f32 %v6712_v19, %v6501_v13  ;;  %v6502_v55 = vadd.f32 %v6344_v40, %v16384_v59  ;;  %v12269_v8 = vpop.f32.mrb[3].mxu0  ;;  %v6927_v59 = vld [vmem:[#allocation3 + $0xab] sm:$0xff] }
 0x619   : > { %v12355_v62 = vpop.f32.mrb[3].mxu1  ;;  %v6962_v11 = vpack.c.bf16 %v6928_v30, %v6927_v59 }
 0x61a   : > { %v16622_v33 = vadd.f32 %v6715_v38, %v6502_v55  ;;  %12463 = vmatmul.mubr.msk.bf16.gmra.mrb[108].mxu0 %vm3982_vm4, %v6961_v45  ;;  %v6930_v38 = vld [vmem:[#allocation3 + $0xc3] sm:$0xff] }
 0x61b   : > { %12466 = vmatprep.mubr.msk.bf16.mxu0 %vm13169_vm3, %v18290_v15 }
 0x61d   : > { %v6349_v29 = vpop.f32.mrb[4].mxu0 }
 0x61e   : > { %v6720_v50 = vpop.f32.mrb[4].mxu1  ;;  %v6503_v52 = vadd.f32 %v6349_v29, %v16394_v7  ;;  %v12272_v39 = vpop.f32.mrb[5].mxu0 }
 0x61f   : > { %v12358_v25 = vpop.f32.mrb[5].mxu1  ;;  %v6352_v3 = vpop.f32.mrb[6].mxu0 }
 0x620   : > { %v6723_v23 = vpop.f32.mrb[6].mxu1  ;;  %v16628_v37 = vadd.f32 %v6720_v50, %v6503_v52  ;;  %v6504_v19 = vadd.f32 %v6352_v3, %v16397_v17  ;;  %v12273_v12 = vpop.f32.mrb[7].mxu0  ;;  %v6929_v17 = vld [vmem:[#allocation3 + $0xbb] sm:$0xff] }
 0x621   : > { %v12359_v13 = vpop.f32.mrb[7].mxu1  ;;  %v6963_v39 = vpack.c.bf16 %v6930_v38, %v6929_v17 }
 0x622   : > { %v16631_v26 = vadd.f32 %v6723_v23, %v6504_v19  ;;  %12467 = vmatmul.mubr.msk.bf16.gmra.mrb[112].mxu0 %vm3982_vm4, %v6962_v11  ;;  %v6932_v23 = vld [vmem:[#allocation3 + $0xd3] sm:$0xff] }
 0x623   : > { %12470 = vmatprep.mubr.msk.bf16.mxu0 %vm13169_vm3, %v18290_v15 }
 0x625   : > { %v6357_v7 = vpop.f32.mrb[8].mxu0 }
 0x626   : > { %v6728_v40 = vpop.f32.mrb[8].mxu1  ;;  %v6505_v53 = vadd.f32 %v6357_v7, %v16407_v24  ;;  %v12276_v55 = vpop.f32.mrb[9].mxu0 }
 0x627   : > { %v12362_v8 = vpop.f32.mrb[9].mxu1  ;;  %v6360_v62 = vpop.f32.mrb[10].mxu0 }
 0x628   : > { %v6731_v45 = vpop.f32.mrb[10].mxu1  ;;  %v16637_v29 = vadd.f32 %v6728_v40, %v6505_v53  ;;  %v6506_v50 = vadd.f32 %v6360_v62, %v16410_v61  ;;  %v12277_v30 = vpop.f32.mrb[11].mxu0  ;;  %v6931_v61 = vld [vmem:[#allocation3 + $0xcb] sm:$0xff] }
 0x629   : > { %v12363_v52 = vpop.f32.mrb[11].mxu1  ;;  %v6964_v55 = vpack.c.bf16 %v6932_v23, %v6931_v61 }
 0x62a   : > { %v16640_v25 = vadd.f32 %v6731_v45, %v6506_v50  ;;  %12471 = vmatmul.mubr.msk.bf16.gmra.mrb[116].mxu0 %vm3982_vm4, %v6963_v39  ;;  %v6934_v45 = vld [vmem:[#allocation3 + $0xe3] sm:$0xff] }
 0x62b   : > { %12474 = vmatprep.mubr.msk.bf16.mxu0 %vm13169_vm3, %v18290_v15 }
 0x62d   : > { %v6365_v24 = vpop.f32.mrb[12].mxu0 }
 0x62e   : > { %v6736_v3 = vpop.f32.mrb[12].mxu1  ;;  %v6507_v59 = vadd.f32 %v6365_v24, %v16420_v28  ;;  %v12280_v19 = vpop.f32.mrb[13].mxu0 }
 0x62f   : > { %v12366_v12 = vpop.f32.mrb[13].mxu1  ;;  %v6368_v13 = vpop.f32.mrb[14].mxu0 }
 0x630   : > { %v6739_v11 = vpop.f32.mrb[14].mxu1  ;;  %v16646_v7 = vadd.f32 %v6736_v3, %v6507_v59  ;;  %v6508_v40 = vadd.f32 %v6368_v13, %v16423_v31  ;;  %v12281_v38 = vpop.f32.mrb[15].mxu0  ;;  %v6933_v31 = vld [vmem:[#allocation3 + $0xdb] sm:$0xff] }
 0x631   : > { %v12367_v53 = vpop.f32.mrb[15].mxu1  ;;  %v6965_v19 = vpack.c.bf16 %v6934_v45, %v6933_v31 }
 0x632   : > { %v16649_v8 = vadd.f32 %v6739_v11, %v6508_v40  ;;  %12475 = vmatmul.mubr.msk.bf16.gmra.mrb[120].mxu0 %vm3982_vm4, %v6964_v55  ;;  %v6936_v11 = vld [vmem:[#allocation3 + $0xf3] sm:$0xff] }
 0x633   : > { %12478 = vmatprep.mubr.msk.bf16.mxu0 %vm13169_vm3, %v18290_v15 }
 0x635   : > { %v6373_v28 = vpop.f32.mrb[16].mxu0 }
 0x636   : > { %v6744_v62 = vpop.f32.mrb[16].mxu1  ;;  %v6509_v17 = vadd.f32 %v6373_v28, %v16433_v21  ;;  %v12284_v50 = vpop.f32.mrb[17].mxu0 }
 0x637   : > { %v12370_v30 = vpop.f32.mrb[17].mxu1  ;;  %v6376_v52 = vpop.f32.mrb[18].mxu0 }
 0x638   : > { %v6747_v39 = vpop.f32.mrb[18].mxu1  ;;  %v16655_v24 = vadd.f32 %v6744_v62, %v6509_v17  ;;  %v6510_v3 = vadd.f32 %v6376_v52, %v16436_v9  ;;  %v12285_v23 = vpop.f32.mrb[19].mxu0  ;;  %v6935_v9 = vld [vmem:[#allocation3 + $0xeb] sm:$0xff] }
 0x639   : > { %v12371_v59 = vpop.f32.mrb[19].mxu1  ;;  %v6966_v50 = vpack.c.bf16 %v6936_v11, %v6935_v9 }
 0x63a   : > { %v16658_v12 = vadd.f32 %v6747_v39, %v6510_v3  ;;  %12479 = vmatmul.mubr.msk.bf16.gmra.mrb[124].mxu0 %vm3982_vm4, %v6965_v19  ;;  %v6938_v39 = vld [vmem:[#allocation3 + $0x103] sm:$0xff] }
 0x63b   : > { %12482 = vmatprep.mubr.msk.bf16.mxu0 %vm13169_vm3, %v18290_v15 }
 0x63d   : > { %v6381_v21 = vpop.f32.mrb[20].mxu0 }
 0x63e   : > { %v6752_v13 = vpop.f32.mrb[20].mxu1  ;;  %v6511_v61 = vadd.f32 %v6381_v21, %v16446_v57  ;;  %v12288_v40 = vpop.f32.mrb[21].mxu0 }
 0x63f   : > { %v12374_v38 = vpop.f32.mrb[21].mxu1  ;;  %v6384_v53 = vpop.f32.mrb[22].mxu0 }
 0x640   : > { %v6755_v55 = vpop.f32.mrb[22].mxu1  ;;  %v16664_v28 = vadd.f32 %v6752_v13, %v6511_v61  ;;  %v6512_v62 = vadd.f32 %v6384_v53, %v16449_v14  ;;  %v12289_v45 = vpop.f32.mrb[23].mxu0  ;;  %v6937_v14 = vld [vmem:[#allocation3 + $0xfb] sm:$0xff] }
 0x641   : > { %v12375_v17 = vpop.f32.mrb[23].mxu1  ;;  %v6967_v61 = vpack.c.bf16 %v6938_v39, %v6937_v14 }
 0x642   : > { %v16667_v30 = vadd.f32 %v6755_v55, %v6512_v62  ;;  %12483 = vmatmul.mubr.msk.bf16.gmra.mrb[128].mxu0 %vm3982_vm4, %v6966_v50  ;;  %v6940_v55 = vld [vmem:[#allocation3 + $0x113] sm:$0xff]  ;;  %v6939_v50 = vld [vmem:[#allocation3 + $0x10b] sm:$0xff] }
 0x643   : > { %12486 = vmatprep.mubr.msk.bf16.mxu0 %vm13169_vm3, %v18290_v15 }
 0x645   : > { %v6389_v57 = vpop.f32.mrb[24].mxu0 }
 0x646   : > { %v6760_v52 = vpop.f32.mrb[24].mxu1  ;;  %v6513_v31 = vadd.f32 %v6389_v57, %v16459_v34  ;;  %v12292_v3 = vpop.f32.mrb[25].mxu0 }
 0x647   : > { %v12378_v23 = vpop.f32.mrb[25].mxu1  ;;  %v6392_v59 = vpop.f32.mrb[26].mxu0 }
 0x648   : > { %v6763_v19 = vpop.f32.mrb[26].mxu1  ;;  %v6514_v21 = vadd.f32 %v6392_v59, %v16462_v27  ;;  %v12293_v13 = vpop.f32.mrb[27].mxu0  ;;  %v16674_v40 = vadd.f32 %v6760_v52, %v6513_v31  ;;  %v6968_v31 = vpack.c.bf16 %v6940_v55, %v6939_v50 }
 0x649   : > { %v12379_v11 = vpop.f32.mrb[27].mxu1 }
 0x64a   : > { %12487 = vmatmul.mubr.msk.bf16.gmra.mrb[132].mxu0 %vm3982_vm4, %v6967_v61  ;;  %v16677_v38 = vadd.f32 %v6763_v19, %v6514_v21  ;;  %v6942_v19 = vld [vmem:[#allocation3 + $0x123] sm:$0xff]  ;;  %v6941_v61 = vld [vmem:[#allocation3 + $0x11b] sm:$0xff] }
 0x64b   : > { %12490 = vmatprep.mubr.msk.bf16.mxu0 %vm13169_vm3, %v18290_v15 }
 0x64d   : > { %v6397_v34 = vpop.f32.mrb[28].mxu0 }
 0x64e   : > { %v6768_v53 = vpop.f32.mrb[28].mxu1  ;;  %v6515_v9 = vadd.f32 %v6397_v34, %v16472_v0  ;;  %v12296_v62 = vpop.f32.mrb[29].mxu0 }
 0x64f   : > { %v12382_v45 = vpop.f32.mrb[29].mxu1  ;;  %v6400_v27 = vpop.f32.mrb[30].mxu0 }
 0x650   : > { %v6771_v17 = vpop.f32.mrb[30].mxu1  ;;  %v6516_v57 = vadd.f32 %v6400_v27, %v16475_v47  ;;  %v12297_v52 = vpop.f32.mrb[31].mxu0  ;;  %v16683_v3 = vadd.f32 %v6768_v53, %v6515_v9  ;;  %v6969_v9 = vpack.c.bf16 %v6942_v19, %v6941_v61 }
 0x651   : > { %v12383_v39 = vpop.f32.mrb[31].mxu1 }
 0x652   : > { %12491 = vmatmul.mubr.msk.bf16.gmra.mrb[136].mxu0 %vm3982_vm4, %v6968_v31  ;;  %v16686_v23 = vadd.f32 %v6771_v17, %v6516_v57  ;;  %v6944_v17 = vld [vmem:[#allocation3 + $0x133] sm:$0xff]  ;;  %v6943_v31 = vld [vmem:[#allocation3 + $0x12b] sm:$0xff] }
 0x653   : > { %12494 = vmatprep.mubr.msk.bf16.mxu0 %vm13169_vm3, %v18290_v15 }
 0x655   : > { %v6405_v0 = vpop.f32.mrb[32].mxu0 }
 0x656   : > { %v6776_v59 = vpop.f32.mrb[32].mxu1  ;;  %v6517_v14 = vadd.f32 %v6405_v0, %v16485_v20  ;;  %v12300_v21 = vpop.f32.mrb[33].mxu0 }
 0x657   : > { %v12386_v13 = vpop.f32.mrb[33].mxu1  ;;  %v6408_v47 = vpop.f32.mrb[34].mxu0 }
 0x658   : > { %v6779_v11 = vpop.f32.mrb[34].mxu1  ;;  %v6518_v34 = vadd.f32 %v6408_v47, %v16488_v32  ;;  %v12301_v53 = vpop.f32.mrb[35].mxu0  ;;  %v16692_v62 = vadd.f32 %v6776_v59, %v6517_v14  ;;  %v6970_v14 = vpack.c.bf16 %v6944_v17, %v6943_v31 }
 0x659   : > { %v12387_v55 = vpop.f32.mrb[35].mxu1 }
 0x65a   : > { %12495 = vmatmul.mubr.msk.bf16.gmra.mrb[140].mxu0 %vm3982_vm4, %v6969_v9  ;;  %v16695_v45 = vadd.f32 %v6779_v11, %v6518_v34  ;;  %v6946_v11 = vld [vmem:[#allocation3 + $0x143] sm:$0xff]  ;;  %v6945_v9 = vld [vmem:[#allocation3 + $0x13b] sm:$0xff] }
 0x65b   : > { %12498 = vmatprep.mubr.msk.bf16.mxu0 %vm13169_vm3, %v18290_v15 }
 0x65d   : > { %v6413_v20 = vpop.f32.mrb[36].mxu0 }
 0x65e   : > { %v6784_v27 = vpop.f32.mrb[36].mxu1  ;;  %v6519_v50 = vadd.f32 %v6413_v20, %v16498_v42  ;;  %v12304_v57 = vpop.f32.mrb[37].mxu0 }
 0x65f   : > { %v12390_v52 = vpop.f32.mrb[37].mxu1  ;;  %v6416_v32 = vpop.f32.mrb[38].mxu0 }
 0x660   : > { %v6787_v39 = vpop.f32.mrb[38].mxu1  ;;  %v6520_v0 = vadd.f32 %v6416_v32, %v16501_v10  ;;  %v12305_v59 = vpop.f32.mrb[39].mxu0  ;;  %v16701_v21 = vadd.f32 %v6784_v27, %v6519_v50  ;;  %v6971_v50 = vpack.c.bf16 %v6946_v11, %v6945_v9  ;;  %v6950_v9 = vld [vmem:[#allocation3 + $0x163] sm:$0xff] }
 0x661   : > { %v12391_v19 = vpop.f32.mrb[39].mxu1 }
 0x662   : > { %12499 = vmatmul.mubr.msk.bf16.gmra.mrb[144].mxu0 %vm3982_vm4, %v6970_v14  ;;  %v16704_v13 = vadd.f32 %v6787_v39, %v6520_v0  ;;  %v6948_v39 = vld [vmem:[#allocation3 + $0x153] sm:$0xff]  ;;  %v6947_v14 = vld [vmem:[#allocation3 + $0x14b] sm:$0xff] }
 0x663   : > { %12502 = vmatprep.mubr.msk.bf16.mxu0 %vm13169_vm3, %v18290_v15 }
 0x665   : > { %v6421_v42 = vpop.f32.mrb[40].mxu0 }
 0x666   : > { %v6792_v47 = vpop.f32.mrb[40].mxu1  ;;  %v6521_v61 = vadd.f32 %v6421_v42, %v16511_v22  ;;  %v12308_v34 = vpop.f32.mrb[41].mxu0 }
 0x667   : > { %v12394_v53 = vpop.f32.mrb[41].mxu1  ;;  %v6424_v10 = vpop.f32.mrb[42].mxu0 }
 0x668   : > { %v6795_v55 = vpop.f32.mrb[42].mxu1  ;;  %v6522_v20 = vadd.f32 %v6424_v10, %v16514_v16  ;;  %v12309_v27 = vpop.f32.mrb[43].mxu0  ;;  %v16710_v57 = vadd.f32 %v6792_v47, %v6521_v61  ;;  %v6972_v61 = vpack.c.bf16 %v6948_v39, %v6947_v14 }
 0x669   : > { %v12395_v17 = vpop.f32.mrb[43].mxu1 }
 0x66a   : > { %12503 = vmatmul.mubr.msk.bf16.gmra.mrb[148].mxu0 %vm3982_vm4, %v6971_v50  ;;  %v16713_v52 = vadd.f32 %v6795_v55, %v6522_v20  ;;  %v6949_v55 = vld [vmem:[#allocation3 + $0x15b] sm:$0xff] }
 0x66b   : > { %12506 = vmatprep.mubr.msk.bf16.mxu0 %vm13169_vm3, %v18290_v15 }
 0x66d   : > { %v6429_v22 = vpop.f32.mrb[44].mxu0 }
 0x66e   : > { %v6800_v32 = vpop.f32.mrb[44].mxu1  ;;  %v6523_v31 = vadd.f32 %v6429_v22, %v16524_v18  ;;  %v12312_v0 = vpop.f32.mrb[45].mxu0 }
 0x66f   : > { %v12398_v59 = vpop.f32.mrb[45].mxu1  ;;  %v6432_v16 = vpop.f32.mrb[46].mxu0 }
 0x670   : > { %v6803_v19 = vpop.f32.mrb[46].mxu1  ;;  %v6524_v42 = vadd.f32 %v6432_v16, %v16527_v49  ;;  %v12313_v47 = vpop.f32.mrb[47].mxu0  ;;  %v16719_v34 = vadd.f32 %v6800_v32, %v6523_v31  ;;  %v6973_v31 = vpack.c.bf16 %v6950_v9, %v6949_v55  ;;  %v6951_v16 = vld [vmem:[#allocation3 + $0x16b] sm:$0xf] }
 0x671   : > { %v12399_v11 = vpop.f32.mrb[47].mxu1 }
 0x672   : > { %12507 = vmatmul.mubr.msk.bf16.gmra.mrb[152].mxu0 %vm3982_vm4, %v6972_v61  ;;  %v16722_v53 = vadd.f32 %v6803_v19, %v6524_v42 }
 0x673   : > { %12510 = vmatprep.mubr.msk.bf16.mxu0 %vm13169_vm3, %v18290_v15 }
 0x675   : > { %v6437_v18 = vpop.f32.mrb[48].mxu0 }
 0x676   : > { %v6808_v10 = vpop.f32.mrb[48].mxu1  ;;  %v6525_v20 = vadd.f32 %v6437_v18, %v16537_v56  ;;  %v12316_v27 = vpop.f32.mrb[49].mxu0 }
 0x677   : > { %v12402_v49 = vpop.f32.mrb[49].mxu1  ;;  %v6440_v17 = vpop.f32.mrb[50].mxu0 }
 0x678   : > { %v6811_v50 = vpop.f32.mrb[50].mxu1  ;;  %v6526_v22 = vadd.f32 %v6440_v17, %v16540_v5  ;;  %v12317_v32 = vpop.f32.mrb[51].mxu0  ;;  %v16728_v0 = vadd.f32 %v6808_v10, %v6525_v20  ;;  %v6974_v5 = vpack.c.bf16 %v6951_v16, %v6951_v16 }
 0x679   : > { %v12403_v39 = vpop.f32.mrb[51].mxu1 }
 0x67a   : > { %12511 = vmatmul.mubr.msk.bf16.gmra.mrb[156].mxu0 %vm3982_vm4, %v6973_v31  ;;  %v16731_v59 = vadd.f32 %v6811_v50, %v6526_v22 }
 0x67b   : > { %12514 = vmatprep.mubr.msk.bf16.mxu0 %vm13169_vm3, %v18290_v15 }
 0x67d   : > { %v6445_v56 = vpop.f32.mrb[52].mxu0 }
 0x67e   : > { %v6816_v19 = vpop.f32.mrb[52].mxu1  ;;  %v6527_v14 = vadd.f32 %v6445_v56, %v16549_v48  ;;  %v12320_v42 = vpop.f32.mrb[53].mxu0 }
 0x67f   : > { %v12406_v47 = vpop.f32.mrb[53].mxu1  ;;  %v6448_v11 = vpop.f32.mrb[54].mxu0 }
 0x680   : > { %v6819_v61 = vpop.f32.mrb[54].mxu1  ;;  %v6528_v18 = vadd.f32 %v6448_v11, %v16552_v54  ;;  %v12321_v10 = vpop.f32.mrb[55].mxu0  ;;  %v16737_v9 = vadd.f32 %v6816_v19, %v6527_v14 }
 0x681   : > { %v12407_v55 = vpop.f32.mrb[55].mxu1 }
 0x682   : > { %12515 = vmatmul.mubr.msk.bf16.gmra.mrb[160].mxu0 %vm3982_vm4, %v6974_v5  ;;  %v16740_v20 = vadd.f32 %v6819_v61, %v6528_v18 }
 0x683   : > { %12566 = vmatprep.mubr.msk.bf16.mxu0 %vm13169_vm3, %v18290_v15 }
 0x685   : > { %v6453_v27 = vpop.f32.mrb[56].mxu0 }
 0x686   : > { %v6824_v48 = vpop.f32.mrb[56].mxu1  ;;  %v6529_v49 = vadd.f32 %v6453_v27, %v16559_v60  ;;  %v12324_v17 = vpop.f32.mrb[57].mxu0 }
 0x687   : > { %v12410_v50 = vpop.f32.mrb[57].mxu1  ;;  %v6456_v22 = vpop.f32.mrb[58].mxu0 }
 0x688   : > { %v6827_v32 = vpop.f32.mrb[58].mxu1  ;;  %v6530_v54 = vadd.f32 %v6456_v22, %v16562_v41  ;;  %v12325_v39 = vpop.f32.mrb[59].mxu0  ;;  %v16746_v16 = vadd.f32 %v6824_v48, %v6529_v49 }
 0x689   : > { %v12411_v31 = vpop.f32.mrb[59].mxu1  ;;  %v16756_v27 = vpop.permute.xlu1 %7499 }
 0x68a   : > { %v16748_v56 = vadd.f32 %v6827_v32, %v6530_v54  ;;  %v16758_v48 = vpop.permute.xlu0 %7494 }
 0x68d   : > { %v6461_v19 = vpop.f32.mrb[60].mxu0 }
 0x68e   : > { %v6832_v14 = vpop.f32.mrb[60].mxu1  ;;  %v6531_v42 = vadd.f32 %v6461_v19, %v16568_v36  ;;  %v12328_v47 = vpop.f32.mrb[61].mxu0 }
 0x68f   : > { %v12414_v5 = vpop.f32.mrb[61].mxu1  ;;  %v6464_v11 = vpop.f32.mrb[62].mxu0 }
 0x690   : > { %v6835_v60 = vpop.f32.mrb[62].mxu1  ;;  %v6532_v61 = vadd.f32 %v6464_v11, %v16571_v43  ;;  %v12329_v18 = vpop.f32.mrb[63].mxu0  ;;  %v16752_v55 = vadd.f32 %v6832_v14, %v6531_v42 }
 0x691   : > { %v12415_v10 = vpop.f32.mrb[63].mxu1  ;;  %v7420_v42 = vpop.permute.xlu1 %7419 }
 0x692   : > { %v16754_v41 = vadd.f32 %v6835_v60, %v6532_v61  ;;  %v7415_v47 = vpop.permute.xlu0 %7414 }
 0x695   : > { %v6469_v49 = vpop.f32.mrb[64].mxu0 }
 0x696   : > { %v6840_v17 = vpop.f32.mrb[64].mxu1  ;;  %v6533_v36 = vadd.f32 %v6469_v49, %v16577_v2  ;;  %v12332_v50 = vpop.f32.mrb[65].mxu0 }
 0x697   : > { %v12418_v22 = vpop.f32.mrb[65].mxu1  ;;  %v6472_v32 = vpop.f32.mrb[66].mxu0 }
 0x698   : > { %v6843_v54 = vpop.f32.mrb[66].mxu1  ;;  %v6534_v43 = vadd.f32 %v6472_v32, %v16580_v4  ;;  %v12333_v39 = vpop.f32.mrb[67].mxu0  ;;  %v16762_v19 = vadd.f32 %v6840_v17, %v6533_v36 }
 0x699   : > { %v12419_v31 = vpop.f32.mrb[67].mxu1  ;;  %v16772_v36 = vpop.permute.xlu1 %7509 }
 0x69a   : > { %v16764_v14 = vadd.f32 %v6843_v54, %v6534_v43  ;;  %v16774_v32 = vpop.permute.xlu0 %7504 }
 0x69d   : > { %v6477_v5 = vpop.f32.mrb[68].mxu0 }
 0x69e   : > { %v6848_v11 = vpop.f32.mrb[68].mxu1  ;;  %v6535_v60 = vadd.f32 %v6477_v5, %v16586_v51  ;;  %v12336_v61 = vpop.f32.mrb[69].mxu0 }
 0x69f   : > { %v12422_v2 = vpop.f32.mrb[69].mxu1  ;;  %v6480_v18 = vpop.f32.mrb[70].mxu0 }
 0x6a0   : > { %v6851_v10 = vpop.f32.mrb[70].mxu1  ;;  %v6536_v49 = vadd.f32 %v6480_v18, %v16589_v44  ;;  %v12337_v50 = vpop.f32.mrb[71].mxu0  ;;  %v16768_v22 = vadd.f32 %v6848_v11, %v6535_v60 }
 0x6a1   : > { %v12423_v4 = vpop.f32.mrb[71].mxu1 }
 0x6a2   : > { %18359 = vst [vmem:[#allocation20_spill] sm:$0xff] %v16768_v22  ;;  %v16770_v17 = vadd.f32 %v6851_v10, %v6536_v49  ;;  %v7425_v10 = vpop.permute.xlu0 %7424  ;;  %v7430_v49 = vpop.permute.xlu1 %7429 }
 0x6a4   : > { %18360 = vst [vmem:[#allocation21_spill] sm:$0xff] %v16770_v17 }
 0x6a5   : > { %v6485_v54 = vpop.f32.mrb[72].mxu0 }
 0x6a6   : > { %v6856_v43 = vpop.f32.mrb[72].mxu1  ;;  %v6537_v51 = vadd.f32 %v6485_v54, %v16595_v58  ;;  %v12340_v39 = vpop.f32.mrb[73].mxu0 }
 0x6a7   : > { %v12426_v31 = vpop.f32.mrb[73].mxu1  ;;  %v6488_v5 = vpop.f32.mrb[74].mxu0 }
 0x6a8   : > { %v6859_v61 = vpop.f32.mrb[74].mxu1  ;;  %v6538_v44 = vadd.f32 %v6488_v5, %v16598_v1  ;;  %v12341_v2 = vpop.f32.mrb[75].mxu0  ;;  %v16778_v11 = vadd.f32 %v6856_v43, %v6537_v51 }
 0x6a9   : > { %v12427_v18 = vpop.f32.mrb[75].mxu1  ;;  %v16785_v5 = vpop.permute.xlu0 %7514 }
 0x6aa   : > { %v16780_v60 = vadd.f32 %v6859_v61, %v6538_v44  ;;  %v16787_v43 = vpop.permute.xlu1 %7519  ;;  %v16792_v61 = vld [vmem:[%s18265_s5] ss:$0 sm:$0xff] }
 0x6ac   : > { %18361 = vst [vmem:[#allocation22_spill] sm:$0xff] %v16780_v60 }
 0x6ad   : > { %v6493_v50 = vpop.f32.mrb[76].mxu0  ;;  %v7435_v44 = vpop.permute.xlu0 %7434 }
 0x6ae   : > { %v6864_v4 = vpop.f32.mrb[76].mxu1  ;;  %v6539_v17 = vadd.f32 %v6493_v50, %v16604_v63  ;;  %v12344_v22 = vpop.f32.mrb[77].mxu0 }
 0x6af   : > { %v12430_v58 = vpop.f32.mrb[77].mxu1  ;;  %v6496_v54 = vpop.f32.mrb[78].mxu0 }
 0x6b0   : > { %v6867_v39 = vpop.f32.mrb[78].mxu1  ;;  %v12345_v31 = vpop.f32.mrb[79].mxu0  ;;  %v16783_v15 = vadd.f32 %v6864_v4, %v6539_v17 }
 0x6b1   : > { %v12431_v1 = vpop.f32.mrb[79].mxu1  ;;  %v7440_v4 = vpop.permute.xlu1 %7439 }
 0x6b2   : > { %18362 = vst [vmem:[#allocation23_spill] sm:$0xff] %v16783_v15  ;;  %v16798_v1 = vpop.permute.xlu0 %7524 }
 0x6b5   : > { %v7075_v51 = vpop.f32.mrb[80].mxu0  ;;  %v16802_v60 = vpop.permute.xlu1 %7529 }
 0x6b6   : > { %v7241_v63 = vadd.f32 %v7075_v51, %v16610_v35  ;;  %v12436_v22 = vpop.f32.mrb[81].mxu0 }
 0x6b7   : > { %v7078_v2 = vpop.f32.mrb[82].mxu0 }
 0x6b8   : > { %v7289_v18 = vadd.f32 %v16792_v61, %v7241_v63  ;;  %v7242_v17 = vadd.f32 %v7078_v2, %v16613_v46  ;;  %v12437_v50 = vpop.f32.mrb[83].mxu0 }
 0x6b9   : > { %v7445_v50 = vpop.permute.xlu0 %7444 }
 0x6ba   : > { %v7330_v58 = vmax.f32 %v7289_v18, 0.0  ;;  %v7290_v54 = vadd.f32 %v16792_v61, %v7242_v17 }
 0x6bc   : > { %v7617_v39 = vmul.f32 %v7415_v47, %v7330_v58  ;;  %v7331_v31 = vmax.f32 %v7290_v54, 0.0 }
 0x6bd   : > { %v7083_v15 = vpop.f32.mrb[84].mxu0 }
 0x6be   : > { %7658 = vst.msk [vmem:[#allocation2 + $0x18] sm:$0xff] %vm3982_vm4, %v7617_v39  ;;  %v7618_v35 = vmul.f32 %v7420_v42, %v7331_v31  ;;  %v7243_v51 = vadd.f32 %v7083_v15, %v16619_v6  ;;  %v12440_v22 = vpop.f32.mrb[85].mxu0  ;;  %v7450_v42 = vpop.permute.xlu1 %7449 }
 0x6bf   : > { %v7086_v63 = vpop.f32.mrb[86].mxu0 }
 0x6c0   : > { %7659 = vst.msk [vmem:[#allocation2 + $0x20] sm:$0xff] %vm3982_vm4, %v7618_v35  ;;  %v7291_v46 = vadd.f32 %v16792_v61, %v7243_v51  ;;  %v7244_v2 = vadd.f32 %v7086_v63, %v16622_v33  ;;  %v12441_v47 = vpop.f32.mrb[87].mxu0  ;;  %v12993_v33 = vld [vmem:[%s18267_s7 + $0x4] ss:$12 sps:$4 sm:$0xff]   ;;  %v16816_v63 = vpop.permute.xlu0 %7534 }
 0x6c1   : > { %7945 = vmatprep.mubr.bf16.mxu1 %v12993_v33 }
 0x6c2   : > { %v7332_v18 = vmax.f32 %v7291_v46, 0.0  ;;  %v7292_v17 = vadd.f32 %v16792_v61, %v7244_v2 }
 0x6c4   : > { %v7619_v58 = vmul.f32 %v7425_v10, %v7332_v18  ;;  %v7333_v54 = vmax.f32 %v7292_v17, 0.0 }
 0x6c5   : > { %v7091_v39 = vpop.f32.mrb[88].mxu0 }
 0x6c6   : > { %7660 = vst.msk [vmem:[#allocation2 + $0x28] sm:$0xff] %vm3982_vm4, %v7619_v58  ;;  %v7620_v15 = vmul.f32 %v7430_v49, %v7333_v54  ;;  %v7245_v6 = vadd.f32 %v7091_v39, %v16628_v37  ;;  %v12444_v31 = vpop.f32.mrb[89].mxu0  ;;  %v16819_v37 = vpop.permute.xlu1 %7539 }
 0x6c7   : > { %v7094_v35 = vpop.f32.mrb[90].mxu0  ;;  %v7455_v39 = vpop.permute.xlu0 %7454 }
 0x6c8   : > { %7661 = vst.msk [vmem:[#allocation2 + $0x30] sm:$0xff] %vm3982_vm4, %v7620_v15  ;;  %v7293_v51 = vadd.f32 %v16792_v61, %v7245_v6  ;;  %v7246_v10 = vadd.f32 %v7094_v35, %v16631_v26  ;;  %v12445_v22 = vpop.f32.mrb[91].mxu0 }
 0x6ca   : > { %v7334_v46 = vmax.f32 %v7293_v51, 0.0  ;;  %v7294_v49 = vadd.f32 %v16792_v61, %v7246_v10  ;;  %v7460_v35 = vpop.permute.xlu1 %7459 }
 0x6cb   : > { %v16827_v22 = vpop.permute.xlu0 %7544 }
 0x6cc   : > { %v7621_v2 = vmul.f32 %v7435_v44, %v7334_v46  ;;  %v7335_v47 = vmax.f32 %v7294_v49, 0.0 }
 0x6cd   : > { %v7099_v18 = vpop.f32.mrb[92].mxu0 }
 0x6ce   : > { %7662 = vst.msk [vmem:[#allocation2 + $0x38] sm:$0xff] %vm3982_vm4, %v7621_v2  ;;  %v7622_v17 = vmul.f32 %v7440_v4, %v7335_v47  ;;  %v7247_v58 = vadd.f32 %v7099_v18, %v16637_v29  ;;  %v12448_v54 = vpop.f32.mrb[93].mxu0  ;;  %v16831_v2 = vpop.permute.xlu1 %7549 }
 0x6cf   : > { %v7102_v26 = vpop.f32.mrb[94].mxu0  ;;  %v7465_v54 = vpop.permute.xlu0 %7464 }
 0x6d0   : > { %7663 = vst.msk [vmem:[#allocation2 + $0x40] sm:$0xff] %vm3982_vm4, %v7622_v17  ;;  %v7295_v15 = vadd.f32 %v16792_v61, %v7247_v58  ;;  %v7248_v6 = vadd.f32 %v7102_v26, %v16640_v25  ;;  %v12449_v31 = vpop.f32.mrb[95].mxu0 }
 0x6d2   : > { %v7336_v33 = vmax.f32 %v7295_v15, 0.0  ;;  %v7296_v44 = vadd.f32 %v16792_v61, %v7248_v6 }
 0x6d4   : > { %v7623_v51 = vmul.f32 %v7445_v50, %v7336_v33  ;;  %v7337_v10 = vmax.f32 %v7296_v44, 0.0 }
 0x6d5   : > { %v7107_v4 = vpop.f32.mrb[96].mxu0 }
 0x6d6   : > { %7664 = vst.msk [vmem:[#allocation2 + $0x48] sm:$0xff] %vm3982_vm4, %v7623_v51  ;;  %v7624_v29 = vmul.f32 %v7450_v42, %v7337_v10  ;;  %v7249_v46 = vadd.f32 %v7107_v4, %v16646_v7  ;;  %v12452_v49 = vpop.f32.mrb[97].mxu0  ;;  %v7470_v42 = vpop.permute.xlu1 %7469 }
 0x6d7   : > { %v7110_v47 = vpop.f32.mrb[98].mxu0  ;;  %v16842_v4 = vpop.permute.xlu0 %7554 }
 0x6d8   : > { %7665 = vst.msk [vmem:[#allocation2 + $0x50] sm:$0xff] %vm3982_vm4, %v7624_v29  ;;  %v7297_v25 = vadd.f32 %v16792_v61, %v7249_v46  ;;  %v7250_v18 = vadd.f32 %v7110_v47, %v16649_v8  ;;  %v12453_v50 = vpop.f32.mrb[99].mxu0 }
 0x6da   : > { %v7338_v17 = vmax.f32 %v7297_v25, 0.0  ;;  %v7298_v58 = vadd.f32 %v16792_v61, %v7250_v18  ;;  %v16845_v46 = vpop.permute.xlu1 %7559 }
 0x6db   : > { %v7475_v50 = vpop.permute.xlu0 %7474 }
 0x6dc   : > { %v7625_v26 = vmul.f32 %v7455_v39, %v7338_v17  ;;  %v7339_v15 = vmax.f32 %v7298_v58, 0.0 }
 0x6dd   : > { %v7115_v6 = vpop.f32.mrb[100].mxu0 }
 0x6de   : > { %7666 = vst.msk [vmem:[#allocation2 + $0x58] sm:$0xff] %vm3982_vm4, %v7625_v26  ;;  %v7626_v7 = vmul.f32 %v7460_v35, %v7339_v15  ;;  %v7251_v31 = vadd.f32 %v7115_v6, %v16655_v24  ;;  %v12456_v33 = vpop.f32.mrb[101].mxu0  ;;  %v7480_v15 = vpop.permute.xlu1 %7479 }
 0x6df   : > { %v7118_v44 = vpop.f32.mrb[102].mxu0  ;;  %v16853_v33 = vpop.permute.xlu0 %7564 }
 0x6e0   : > { %7667 = vst.msk [vmem:[#allocation2 + $0x60] sm:$0xff] %vm3982_vm4, %v7626_v7  ;;  %v7299_v8 = vadd.f32 %v16792_v61, %v7251_v31  ;;  %v7252_v51 = vadd.f32 %v7118_v44, %v16658_v12  ;;  %v12457_v10 = vpop.f32.mrb[103].mxu0 }
 0x6e2   : > { %v7340_v39 = vmax.f32 %v7299_v8, 0.0  ;;  %v7300_v29 = vadd.f32 %v16792_v61, %v7252_v51  ;;  %v16857_v51 = vpop.permute.xlu1 %7569 }
 0x6e4   : > { %v7627_v49 = vmul.f32 %v7465_v54, %v7340_v39  ;;  %v7341_v35 = vmax.f32 %v7300_v29, 0.0 }
 0x6e5   : > { %v7123_v47 = vpop.f32.mrb[104].mxu0 }
 0x6e6   : > { %7668 = vst.msk [vmem:[#allocation2 + $0x68] sm:$0xff] %vm3982_vm4, %v7627_v49  ;;  %v7628_v24 = vmul.f32 %v7470_v42, %v7341_v35  ;;  %v7253_v25 = vadd.f32 %v7123_v47, %v16664_v28  ;;  %v12460_v18 = vpop.f32.mrb[105].mxu0  ;;  %v7485_v47 = vpop.permute.xlu0 %7484 }
 0x6e7   : > { %v7126_v17 = vpop.f32.mrb[106].mxu0  ;;  %v7490_v18 = vpop.permute.xlu1 %7489 }
 0x6e8   : > { %7669 = vst.msk [vmem:[#allocation2 + $0x70] sm:$0xff] %vm3982_vm4, %v7628_v24  ;;  %v7301_v12 = vadd.f32 %v16792_v61, %v7253_v25  ;;  %v7254_v58 = vadd.f32 %v7126_v17, %v16667_v30  ;;  %v12461_v26 = vpop.f32.mrb[107].mxu0 }
 0x6ea   : > { %v7342_v6 = vmax.f32 %v7301_v12, 0.0  ;;  %v7302_v54 = vadd.f32 %v16792_v61, %v7254_v58 }
 0x6ec   : > { %v7629_v7 = vmul.f32 %v7475_v50, %v7342_v6  ;;  %v7343_v31 = vmax.f32 %v7302_v54, 0.0 }
 0x6ed   : > { %v7131_v42 = vpop.f32.mrb[108].mxu0 }
 0x6ee   : > { %7670 = vst.msk [vmem:[#allocation2 + $0x78] sm:$0xff] %vm3982_vm4, %v7629_v7  ;;  %v7630_v28 = vmul.f32 %v7480_v15, %v7343_v31  ;;  %v7255_v44 = vadd.f32 %v7131_v42, %v16674_v40  ;;  %v12464_v8 = vpop.f32.mrb[109].mxu0 }
 0x6ef   : > { %v7134_v10 = vpop.f32.mrb[110].mxu0 }
 0x6f0   : > { %7671 = vst.msk [vmem:[#allocation2 + $0x80] sm:$0xff] %vm3982_vm4, %v7630_v28  ;;  %v7303_v30 = vadd.f32 %v16792_v61, %v7255_v44  ;;  %v7256_v39 = vadd.f32 %v7134_v10, %v16677_v38  ;;  %v12465_v29 = vpop.f32.mrb[111].mxu0 }
 0x6f2   : > { %v7344_v49 = vmax.f32 %v7303_v30, 0.0  ;;  %v7304_v35 = vadd.f32 %v16792_v61, %v7256_v39 }
 0x6f4   : > { %v7631_v24 = vmul.f32 %v7485_v47, %v7344_v49  ;;  %v7345_v25 = vmax.f32 %v7304_v35, 0.0 }
 0x6f5   : > { %v7139_v50 = vpop.f32.mrb[112].mxu0 }
 0x6f6   : > { %7672 = vst.msk [vmem:[#allocation2 + $0x88] sm:$0xff] %vm3982_vm4, %v7631_v24  ;;  %v7632_v40 = vmul.f32 %v7490_v18, %v7345_v25  ;;  %v7257_v17 = vadd.f32 %v7139_v50, %v16683_v3  ;;  %v12468_v12 = vpop.f32.mrb[113].mxu0  ;;  %v7700_v24 = vld [vmem:[#allocation2 + $0x20] sm:$0xff] }
 0x6f7   : > { %v7142_v58 = vpop.f32.mrb[114].mxu0  ;;  %v7699_v12 = vld [vmem:[#allocation2 + $0x18] sm:$0xff] }
 0x6f8   : > { %7673 = vst.msk [vmem:[#allocation2 + $0x90] sm:$0xff] %vm3982_vm4, %v7632_v40  ;;  %v7305_v38 = vadd.f32 %v16792_v61, %v7257_v17  ;;  %v7258_v26 = vadd.f32 %v7142_v58, %v16686_v23  ;;  %v12469_v15 = vpop.f32.mrb[115].mxu0  ;;  %v16886_v58 = vpack.c.bf16 %v7700_v24, %v7699_v12 }
 0x6fa   : > { %v7346_v6 = vmax.f32 %v7305_v38, 0.0  ;;  %v7306_v54 = vadd.f32 %v16792_v61, %v7258_v26 }
 0x6fc   : > { %v7633_v7 = vmul.f32 %v16758_v48, %v7346_v6  ;;  %v7347_v31 = vmax.f32 %v7306_v54, 0.0 }
 0x6fd   : > { %v7147_v42 = vpop.f32.mrb[116].mxu0 }
 0x6fe   : > { %7674 = vst.msk [vmem:[#allocation2 + $0x98] sm:$0xff] %vm3982_vm4, %v7633_v7  ;;  %v7634_v3 = vmul.f32 %v16756_v27, %v7347_v31  ;;  %v7259_v28 = vadd.f32 %v7147_v42, %v16692_v62  ;;  %v12472_v44 = vpop.f32.mrb[117].mxu0  ;;  %v7702_v7 = vld [vmem:[#allocation2 + $0x30] sm:$0xff] }
 0x6ff   : > { %v7150_v8 = vpop.f32.mrb[118].mxu0 }
 0x700   : > { %7675 = vst.msk [vmem:[#allocation2 + $0xa0] sm:$0xff] %vm3982_vm4, %v7634_v3  ;;  %v7307_v23 = vadd.f32 %v16792_v61, %v7259_v28  ;;  %v7260_v10 = vadd.f32 %v7150_v8, %v16695_v45  ;;  %v12473_v30 = vpop.f32.mrb[119].mxu0 }
 0x702   : > { %v7348_v39 = vmax.f32 %v7307_v23, 0.0  ;;  %v7308_v48 = vadd.f32 %v16792_v61, %v7260_v10  ;;  %v7701_v23 = vld [vmem:[#allocation2 + $0x28] sm:$0xff] }
 0x703   : > { %v16900_v10 = vpack.c.bf16 %v7702_v7, %v7701_v23 }
 0x704   : > { %v7635_v29 = vmul.f32 %v16774_v32, %v7348_v39  ;;  %v7349_v49 = vmax.f32 %v7308_v48, 0.0 }
 0x705   : > { %v7155_v35 = vpop.f32.mrb[120].mxu0  ;;  %v7715_v18 = vld [vmem:[#allocation2 + $0x98] sm:$0xff] }
 0x706   : > { %7676 = vst.msk [vmem:[#allocation2 + $0xa8] sm:$0xff] %vm3982_vm4, %v7635_v29  ;;  %v7636_v62 = vmul.f32 %v16772_v36, %v7349_v49  ;;  %v7261_v27 = vadd.f32 %v7155_v35, %v16701_v21  ;;  %v12476_v47 = vpop.f32.mrb[121].mxu0  ;;  %v7704_v35 = vld [vmem:[#allocation2 + $0x40] sm:$0xff] }
 0x707   : > { %v7158_v25 = vpop.f32.mrb[122].mxu0  ;;  %v7716_v50 = vld [vmem:[#allocation2 + $0xa0] sm:$0xff] }
 0x708   : > { %7677 = vst.msk [vmem:[#allocation2 + $0xb0] sm:$0xff] %vm3982_vm4, %v7636_v62  ;;  %v7309_v45 = vadd.f32 %v16792_v61, %v7261_v27  ;;  %v7262_v40 = vadd.f32 %v7158_v25, %v16704_v13  ;;  %v12477_v32 = vpop.f32.mrb[123].mxu0  ;;  %v16884_v17 = vpack.c.bf16 %v7716_v50, %v7715_v18  ;;  %v7703_v50 = vld [vmem:[#allocation2 + $0x38] sm:$0xff] }
 0x70a   : > { %v7350_v36 = vmax.f32 %v7309_v45, 0.0  ;;  %v7310_v21 = vadd.f32 %v16792_v61, %v7262_v40  ;;  %11390 = vmatprep.subr.bf16.mxu1 %v16884_v17  ;;  %v16914_v45 = vpack.c.bf16 %v7704_v35, %v7703_v50 }
 0x70b   : > { %11391 = vmatpush3.bf16.msra.mxu1 %v16886_v58 }
 0x70c   : > { %v7637_v38 = vmul.f32 %v16785_v5, %v7350_v36  ;;  %v7351_v26 = vmax.f32 %v7310_v21, 0.0 }
 0x70d   : > { %v7163_v15 = vpop.f32.mrb[124].mxu0  ;;  %v7717_v42 = vld [vmem:[#allocation2 + $0xa8] sm:$0xff] }
 0x70e   : > { %7678 = vst.msk [vmem:[#allocation2 + $0xb8] sm:$0xff] %vm3982_vm4, %v7637_v38  ;;  %v7638_v13 = vmul.f32 %v16787_v43, %v7351_v26  ;;  %v7263_v6 = vadd.f32 %v7163_v15, %v16710_v57  ;;  %v12480_v54 = vpop.f32.mrb[125].mxu0  ;;  %v7706_v38 = vld [vmem:[#allocation2 + $0x50] sm:$0xff] }
 0x70f   : > { %v7166_v31 = vpop.f32.mrb[126].mxu0  ;;  %v7718_v3 = vld [vmem:[#allocation2 + $0xb0] sm:$0xff] }
 0x710   : > { %7679 = vst.msk [vmem:[#allocation2 + $0xc0] sm:$0xff] %vm3982_vm4, %v7638_v13  ;;  %v7311_v28 = vadd.f32 %v16792_v61, %v7263_v6  ;;  %v7264_v44 = vadd.f32 %v7166_v31, %v16713_v52  ;;  %v12481_v5 = vpop.f32.mrb[127].mxu0  ;;  %v16898_v8 = vpack.c.bf16 %v7718_v3, %v7717_v42  ;;  %v7705_v31 = vld [vmem:[#allocation2 + $0x48] sm:$0xff] }
 0x711   : > { %v16928_v42 = vpack.c.bf16 %v7706_v38, %v7705_v31 }
 0x712   : > { %v7352_v43 = vmax.f32 %v7311_v28, 0.0  ;;  %v7312_v57 = vadd.f32 %v16792_v61, %v7264_v44  ;;  %11392 = vmatprep.subr.bf16.mxu1 %v16898_v8 }
 0x713   : > { %11393 = vmatpush3.bf16.msra.mxu1 %v16900_v10 }
 0x714   : > { %v7639_v30 = vmul.f32 %v16798_v1, %v7352_v43  ;;  %v7353_v39 = vmax.f32 %v7312_v57, 0.0  ;;  %v7708_v43 = vld [vmem:[#allocation2 + $0x60] sm:$0xff] }
 0x715   : > { %v7171_v48 = vpop.f32.mrb[128].mxu0  ;;  %v7719_v27 = vld [vmem:[#allocation2 + $0xb8] sm:$0xff] }
 0x716   : > { %7680 = vst.msk [vmem:[#allocation2 + $0xc8] sm:$0xff] %vm3982_vm4, %v7639_v30  ;;  %v7640_v52 = vmul.f32 %v16802_v60, %v7353_v39  ;;  %v7265_v29 = vadd.f32 %v7171_v48, %v16719_v34  ;;  %v12484_v49 = vpop.f32.mrb[129].mxu0 }
 0x717   : > { %v7174_v62 = vpop.f32.mrb[130].mxu0  ;;  %v7720_v47 = vld [vmem:[#allocation2 + $0xc0] sm:$0xff]  ;;  %v7707_v49 = vld [vmem:[#allocation2 + $0x58] sm:$0xff] }
 0x718   : > { %7681 = vst.msk [vmem:[#allocation2 + $0xd0] sm:$0xff] %vm3982_vm4, %v7640_v52  ;;  %v7313_v24 = vadd.f32 %v16792_v61, %v7265_v29  ;;  %v7266_v25 = vadd.f32 %v7174_v62, %v16722_v53  ;;  %v12485_v1 = vpop.f32.mrb[131].mxu0  ;;  %v16912_v18 = vpack.c.bf16 %v7720_v47, %v7719_v27  ;;  %v16942_v35 = vpack.c.bf16 %v7708_v43, %v7707_v49  ;;  %v7580_v43 = vpop.permute.xlu1 %7579 }
 0x719   : > { %v7710_v1 = vld [vmem:[#allocation2 + $0x70] sm:$0xff] }
 0x71a   : > { %v7354_v60 = vmax.f32 %v7313_v24, 0.0  ;;  %v7314_v34 = vadd.f32 %v16792_v61, %v7266_v25  ;;  %11394 = vmatprep.subr.bf16.mxu1 %v16912_v18 }
 0x71b   : > { %11395 = vmatpush3.bf16.msra.mxu1 %v16914_v45 }
 0x71c   : > { %v7641_v40 = vmul.f32 %v16816_v63, %v7354_v60  ;;  %v7355_v32 = vmax.f32 %v7314_v34, 0.0 }
 0x71d   : > { %v7179_v12 = vpop.f32.mrb[132].mxu0  ;;  %v7721_v15 = vld [vmem:[#allocation2 + $0xc8] sm:$0xff] }
 0x71e   : > { %7682 = vst.msk [vmem:[#allocation2 + $0xd8] sm:$0xff] %vm3982_vm4, %v7641_v40  ;;  %v7642_v53 = vmul.f32 %v16819_v37, %v7355_v32  ;;  %v7267_v36 = vadd.f32 %v7179_v12, %v16728_v0  ;;  %v12488_v21 = vpop.f32.mrb[133].mxu0 }
 0x71f   : > { %v7182_v26 = vpop.f32.mrb[134].mxu0  ;;  %v7722_v13 = vld [vmem:[#allocation2 + $0xd0] sm:$0xff] }
 0x720   : > { %7683 = vst.msk [vmem:[#allocation2 + $0xe0] sm:$0xff] %vm3982_vm4, %v7642_v53  ;;  %v7315_v6 = vadd.f32 %v16792_v61, %v7267_v36  ;;  %v7268_v54 = vadd.f32 %v7182_v26, %v16731_v59  ;;  %v12489_v63 = vpop.f32.mrb[135].mxu0  ;;  %v16926_v7 = vpack.c.bf16 %v7722_v13, %v7721_v15  ;;  %v7709_v53 = vld [vmem:[#allocation2 + $0x68] sm:$0xff] }
 0x721   : > { %v16956_v36 = vpack.c.bf16 %v7710_v1, %v7709_v53  ;;  %v18364_v53 = vld [vmem:[#allocation20_spill] sm:$0xff] }
 0x722   : > { %v7356_v37 = vmax.f32 %v7315_v6, 0.0  ;;  %v7316_v0 = vadd.f32 %v16792_v61, %v7268_v54  ;;  %11396 = vmatprep.subr.bf16.mxu1 %v16926_v7  ;;  %v7712_v6 = vld [vmem:[#allocation2 + $0x80] sm:$0xff] }
 0x723   : > { %11397 = vmatpush3.bf16.msra.mxu1 %v16928_v42 }
 0x724   : > { %v7643_v3 = vmul.f32 %v16827_v22, %v7356_v37  ;;  %v7357_v28 = vmax.f32 %v7316_v0, 0.0 }
 0x725   : > { %v7187_v44 = vpop.f32.mrb[136].mxu0  ;;  %v7723_v30 = vld [vmem:[#allocation2 + $0xd8] sm:$0xff] }
 0x726   : > { %7684 = vst.msk [vmem:[#allocation2 + $0xe8] sm:$0xff] %vm3982_vm4, %v7643_v3  ;;  %v7644_v59 = vmul.f32 %v16831_v2, %v7357_v28  ;;  %v7269_v5 = vadd.f32 %v7187_v44, %v16737_v9  ;;  %v12492_v23 = vpop.f32.mrb[137].mxu0  ;;  %v7711_v28 = vld [vmem:[#allocation2 + $0x78] sm:$0xff] }
 0x727   : > { %v7190_v57 = vpop.f32.mrb[138].mxu0  ;;  %v7724_v39 = vld [vmem:[#allocation2 + $0xe0] sm:$0xff]  ;;  %v16970_v44 = vpack.c.bf16 %v7712_v6, %v7711_v28 }
 0x728   : > { %7685 = vst.msk [vmem:[#allocation2 + $0xf0] sm:$0xff] %vm3982_vm4, %v7644_v59  ;;  %v7317_v48 = vadd.f32 %v16792_v61, %v7269_v5  ;;  %v7270_v52 = vadd.f32 %v7190_v57, %v16740_v20  ;;  %v12493_v22 = vpop.f32.mrb[139].mxu0  ;;  %v16940_v29 = vpack.c.bf16 %v7724_v39, %v7723_v30  ;;  %v7575_v59 = vpop.permute.xlu0 %7574 }
 0x72a   : > { %v7358_v2 = vmax.f32 %v7317_v48, 0.0  ;;  %v7318_v9 = vadd.f32 %v16792_v61, %v7270_v52  ;;  %11398 = vmatprep.subr.bf16.mxu1 %v16940_v29  ;;  %v7714_v48 = vld [vmem:[#allocation2 + $0x90] sm:$0xff] }
 0x72b   : > { %11399 = vmatpush3.bf16.msra.mxu1 %v16942_v35 }
 0x72c   : > { %v7645_v62 = vmul.f32 %v16842_v4, %v7358_v2  ;;  %v7359_v27 = vmax.f32 %v7318_v9, 0.0  ;;  %v7585_v1 = vpop.permute.xlu0 %7584 }
 0x72d   : > { %v7195_v47 = vpop.f32.mrb[140].mxu0  ;;  %v7725_v60 = vld [vmem:[#allocation2 + $0xe8] sm:$0xff] }
 0x72e   : > { %7686 = vst.msk [vmem:[#allocation2 + $0xf8] sm:$0xff] %vm3982_vm4, %v7645_v62  ;;  %v7646_v20 = vmul.f32 %v16845_v46, %v7359_v27  ;;  %v7271_v24 = vadd.f32 %v7195_v47, %v16746_v16  ;;  %v12496_v25 = vpop.f32.mrb[141].mxu0  ;;  %v7713_v47 = vld [vmem:[#allocation2 + $0x88] sm:$0xff] }
 0x72f   : > { %v7198_v50 = vpop.f32.mrb[142].mxu0  ;;  %v7726_v34 = vld [vmem:[#allocation2 + $0xf0] sm:$0xff]  ;;  %v12991_v25 = vld [vmem:[%s18267_s7] ss:$12 sps:$4 sm:$0xff]  }
 0x730   : > { %7687 = vst.msk [vmem:[#allocation2 + $0x100] sm:$0xff] %vm3982_vm4, %v7646_v20  ;;  %v7319_v40 = vadd.f32 %v16792_v61, %v7271_v24  ;;  %v7272_v32 = vadd.f32 %v7198_v50, %v16748_v56  ;;  %v12497_v4 = vpop.f32.mrb[143].mxu0  ;;  %v16954_v12 = vpack.c.bf16 %v7726_v34, %v7725_v60  ;;  %v16982_v20 = vpack.c.bf16 %v7714_v48, %v7713_v47  ;;  %v18366_v48 = vld [vmem:[#allocation22_spill] sm:$0xff] }
 0x731   : > { %v18363_v34 = vmov 0.0   ;;  %v13002_v47 = vld [vmem:[%s18267_s7 + $0x4c] ss:$12 sps:$4 sm:$0xff]  }
 0x732   : > { %v7360_v46 = vmax.f32 %v7319_v40, 0.0  ;;  %v7320_v16 = vadd.f32 %v16792_v61, %v7272_v32  ;;  %11400 = vmatprep.subr.bf16.mxu1 %v16954_v12  ;;  %v7590_v40 = vpop.permute.xlu1 %7589 }
 0x733   : > { %11401 = vmatpush3.bf16.msra.mxu1 %v16956_v36 }
 0x734   : > { %v7647_v21 = vmul.f32 %v16853_v33, %v7360_v46  ;;  %v7361_v38 = vmax.f32 %v7320_v16, 0.0 }
 0x735   : > { %v7203_v26 = vpop.f32.mrb[144].mxu0  ;;  %v7727_v63 = vld [vmem:[#allocation2 + $0xf8] sm:$0xff] }
 0x736   : > { %7688 = vst.msk [vmem:[#allocation2 + $0x108] sm:$0xff] %vm3982_vm4, %v7647_v21  ;;  %v7648_v56 = vmul.f32 %v16857_v51, %v7361_v38  ;;  %v7273_v15 = vadd.f32 %v7203_v26, %v16752_v55  ;;  %v12500_v13 = vpop.f32.mrb[145].mxu0 }
 0x737   : > { %v7206_v54 = vpop.f32.mrb[146].mxu0  ;;  %v7728_v31 = vld [vmem:[#allocation2 + $0x100] sm:$0xff] }
 0x738   : > { %7689 = vst.msk [vmem:[#allocation2 + $0x110] sm:$0xff] %vm3982_vm4, %v7648_v56  ;;  %v7321_v37 = vadd.f32 %v16792_v61, %v7273_v15  ;;  %v7274_v0 = vadd.f32 %v7206_v54, %v16754_v41  ;;  %v12501_v33 = vpop.f32.mrb[147].mxu0  ;;  %v16968_v3 = vpack.c.bf16 %v7728_v31, %v7727_v63  ;;  %v18365_v15 = vld [vmem:[#allocation21_spill] sm:$0xff] }
 0x739   : > { %v12999_v33 = vld [vmem:[%s18267_s7 + $0x34] ss:$12 sps:$4 sm:$0xff]  }
 0x73a   : > { %v7362_v51 = vmax.f32 %v7321_v37, 0.0  ;;  %v7322_v55 = vadd.f32 %v16792_v61, %v7274_v0  ;;  %11402 = vmatprep.subr.bf16.mxu1 %v16968_v3  ;;  %v12994_v37 = vld [vmem:[%s18267_s7 + $0x18] ss:$12 sps:$4 sm:$0xff]   ;;  %v7595_v0 = vpop.permute.xlu0 %7594 }
 0x73b   : > { %11403 = vmatpush3.bf16.msra.mxu1 %v16970_v44 }
 0x73c   : > { %v7649_v5 = vmul.f32 %v7575_v59, %v7362_v51  ;;  %v7363_v23 = vmax.f32 %v7322_v55, 0.0  ;;  %v7600_v55 = vpop.permute.xlu1 %7599 }
 0x73d   : > { %v7211_v57 = vpop.f32.mrb[148].mxu0  ;;  %v7729_v22 = vld [vmem:[#allocation2 + $0x108] sm:$0xff] }
 0x73e   : > { %7690 = vst.msk [vmem:[#allocation2 + $0x118] sm:$0xff] %vm3982_vm4, %v7649_v5  ;;  %v7650_v41 = vmul.f32 %v7580_v43, %v7363_v23  ;;  %v7275_v30 = vadd.f32 %v7211_v57, %v16762_v19  ;;  %v12504_v39 = vpop.f32.mrb[149].mxu0 }
 0x73f   : > { %v7214_v52 = vpop.f32.mrb[150].mxu0  ;;  %v7730_v49 = vld [vmem:[#allocation2 + $0x110] sm:$0xff] }
 0x740   : > { %7691 = vst.msk [vmem:[#allocation2 + $0x120] sm:$0xff] %vm3982_vm4, %v7650_v41  ;;  %v7323_v2 = vadd.f32 %v16792_v61, %v7275_v30  ;;  %v7276_v9 = vadd.f32 %v7214_v52, %v16764_v14  ;;  %v12505_v62 = vpop.f32.mrb[151].mxu0  ;;  %v16980_v27 = vpack.c.bf16 %v7730_v49, %v7729_v22  ;;  %v12996_v14 = vld [vmem:[%s18267_s7 + $0x1c] ss:$12 sps:$4 sm:$0xff]  }
 0x741   : > { %v7605_v62 = vpop.permute.xlu0 %7604 }
 0x742   : > { %v7364_v24 = vmax.f32 %v7323_v2, 0.0  ;;  %v7324_v19 = vadd.f32 %v16792_v61, %v7276_v9  ;;  %11404 = vmatprep.subr.bf16.mxu1 %v16980_v27 }
 0x743   : > { %11405 = vmatpush3.bf16.msra.mxu1 %v16982_v20 }
 0x744   : > { %v7651_v50 = vmul.f32 %v7585_v1, %v7364_v24  ;;  %v7365_v60 = vmax.f32 %v7324_v19, 0.0  ;;  %12518 = vmatprep.subr.bf16.mxu1 %v18363_v34 }
 0x745   : > { %v7219_v32 = vpop.f32.mrb[152].mxu0  ;;  %v7731_v38 = vld [vmem:[#allocation2 + $0x118] sm:$0xff] }
 0x746   : > { %7692 = vst.msk [vmem:[#allocation2 + $0x128] sm:$0xff] %vm3982_vm4, %v7651_v50  ;;  %v7652_v4 = vmul.f32 %v7590_v40, %v7365_v60  ;;  %v7277_v46 = vadd.f32 %v7219_v32, %v18364_v53  ;;  %v12508_v16 = vpop.f32.mrb[153].mxu0  ;;  %7946 = vmatmul.mubr.bf16.vlgmr.msra.gmra.mrb[80].mxu1 %v12991_v25  ;;  %v7610_v25 = vpop.permute.xlu1 %7609  ;;  %v18367_v50 = vld [vmem:[#allocation23_spill] sm:$0xff] }
 0x747   : > { %v7222_v21 = vpop.f32.mrb[154].mxu0  ;;  %v7732_v26 = vld [vmem:[#allocation2 + $0x120] sm:$0xff]  ;;  %7953 = vmatprep.mubr.bf16.mxu1 %v12996_v14 }
 0x748   : > { %7693 = vst.msk [vmem:[#allocation2 + $0x130] sm:$0xff] %vm3982_vm4, %v7652_v4  ;;  %v7325_v56 = vadd.f32 %v16792_v61, %v7277_v46  ;;  %v7278_v13 = vadd.f32 %v7222_v21, %v18365_v15  ;;  %v12509_v6 = vpop.f32.mrb[155].mxu0  ;;  %v16999_v54 = vpack.c.bf16 %v7732_v26, %v7731_v38  ;;  %v13000_v26 = vld [vmem:[%s18267_s7 + $0x48] ss:$12 sps:$4 sm:$0xff]  }
 0x74a   : > { %v7366_v63 = vmax.f32 %v7325_v56, 0.0  ;;  %v7326_v31 = vadd.f32 %v16792_v61, %v7278_v13  ;;  %12519 = vmatpush3.bf16.msra.mxu1 %v16999_v54  ;;  %12557 = vmatpush3.bf16.msra.mxu0 %v16999_v54  ;;  %v7615_v56 = vpop.permute.xlu0 %7614 }
 0x74b   : > { %12520 = vmatprep.subr.bf16.mxu1 %v18363_v34  ;;  %12558 = vmatprep.subr.bf16.mxu0 %v18363_v34 }
 0x74c   : > { %v7653_v28 = vmul.f32 %v7595_v0, %v7366_v63  ;;  %v7367_v51 = vmax.f32 %v7326_v31, 0.0  ;;  %v13003_v31 = vld [vmem:[%s18267_s7 + $0x60] ss:$12 sps:$4 sm:$0xff]  }
 0x74d   : > { %v7227_v59 = vpop.f32.mrb[156].mxu0  ;;  %v7733_v41 = vld [vmem:[#allocation2 + $0x128] sm:$0xff] }
 0x74e   : > { %7694 = vst.msk [vmem:[#allocation2 + $0x138] sm:$0xff] %vm3982_vm4, %v7653_v28  ;;  %v7654_v5 = vmul.f32 %v7600_v55, %v7367_v51  ;;  %v7279_v23 = vadd.f32 %v7227_v59, %v16778_v11  ;;  %v12512_v43 = vpop.f32.mrb[157].mxu0  ;;  %7954 = vmatmul.mubr.bf16.gmra.mrb[84].mxu1 %v12994_v37  ;;  %v12997_v11 = vld [vmem:[%s18267_s7 + $0x30] ss:$12 sps:$4 sm:$0xff]   ;;  %v13007_v59 = vld [vmem:[%s18267_s7 + $0x78] ss:$12 sps:$4 sm:$0xff]  }
 0x74f   : > { %v7230_v57 = vpop.f32.mrb[158].mxu0  ;;  %v7734_v30 = vld [vmem:[#allocation2 + $0x130] sm:$0xff]  ;;  %7961 = vmatprep.mubr.bf16.mxu1 %v12999_v33  ;;  %v13009_v37 = vld [vmem:[%s18267_s7 + $0x7c] ss:$12 sps:$4 sm:$0xff]  }
 0x750   : > { %7695 = vst.msk [vmem:[#allocation2 + $0x140] sm:$0xff] %vm3982_vm4, %v7654_v5  ;;  %v7327_v39 = vadd.f32 %v16792_v61, %v7279_v23  ;;  %v7280_v52 = vadd.f32 %v7230_v57, %v18366_v48  ;;  %v12513_v22 = vpop.f32.mrb[159].mxu0  ;;  %v17017_v49 = vpack.c.bf16 %v7734_v30, %v7733_v41  ;;  %v13006_v51 = vld [vmem:[%s18267_s7 + $0xa4] ss:$12 sps:$4 sm:$0xff]   ;;  %v13010_v23 = vld [vmem:[%s18267_s7 + $0xbc] ss:$12 sps:$4 sm:$0xff]  }
 0x751   : > { %v7785_v55 = vld [vmem:[%s18267_s7 + $0x90] sm:$0x33]  ;;  %v13015_v30 = vld [vmem:[%s18267_s7 + $0xec] ss:$12 sps:$4 sm:$0xff]   ;;  %v13019_v22 = vld [vmem:[%s18267_s7 + $0x11c] ss:$12 sps:$4 sm:$0xff]  }
 0x752   : > { %v7368_v2 = vmax.f32 %v7327_v39, 0.0  ;;  %v7328_v9 = vadd.f32 %v16792_v61, %v7280_v52  ;;  %12521 = vmatpush3.bf16.msra.mxu1 %v17017_v49  ;;  %12559 = vmatpush3.bf16.msra.mxu0 %v17017_v49  ;;  %v10944_v5 = vcombine.high %v7785_v55, %v7785_v55  ;;  %v10943_v43 = vcombine.low %v7785_v55, %v7785_v55  ;;  %v13013_v57 = vld [vmem:[%s18267_s7 + $0xd4] ss:$12 sps:$4 sm:$0xff]   ;;  %v13017_v48 = vld [vmem:[%s18267_s7 + $0x104] ss:$12 sps:$4 sm:$0xff]  }
 0x753   : > { %12522 = vmatprep.subr.bf16.mxu1 %v18363_v34  ;;  %12560 = vmatprep.subr.bf16.mxu0 %v18363_v34  ;;  %v13014_v41 = vld [vmem:[%s18267_s7 + $0x8] ss:$12 sps:$4 sm:$0xff]   ;;  %v13016_v39 = vld [vmem:[%s18267_s7 + $0x20] ss:$12 sps:$4 sm:$0xff]   ;;  %v13018_v52 = vld [vmem:[%s18267_s7 + $0x38] ss:$12 sps:$4 sm:$0xff]  }
 0x754   : > { %v7655_v24 = vmul.f32 %v7605_v62, %v7368_v2  ;;  %v7369_v19 = vmax.f32 %v7328_v9, 0.0  ;;  %v13020_v2 = vld [vmem:[%s18267_s7 + $0x50] ss:$12 sps:$4 sm:$0xff]   ;;  %v13021_v9 = vld [vmem:[%s18267_s7 + $0x134] ss:$0 sps:$4 sm:$0x33]  }
 0x755   : > { %v7235_v1 = vpop.f32.mrb[160].mxu0  ;;  %v7735_v32 = vld [vmem:[#allocation2 + $0x138] sm:$0xff]  ;;  %v13023_v62 = vld [vmem:[%s18267_s7 + $0x140] ss:$12 sps:$4 sm:$0xff]  }
 0x756   : > { %7696 = vst.msk [vmem:[#allocation2 + $0x148] sm:$0xff] %vm3982_vm4, %v7655_v24  ;;  %v7656_v14 = vmul.f32 %v7610_v25, %v7369_v19  ;;  %v7281_v60 = vadd.f32 %v7235_v1, %v18367_v50  ;;  %7962 = vmatmul.mubr.bf16.gmra.mrb[88].mxu1 %v12997_v11  ;;  %v12516_v40 = vpop.f32.mrb[161].mxu0  ;;  %v13022_v11 = vld [vmem:[%s18267_s7 + $0x68] ss:$12 sps:$4 sm:$0xff]   ;;  %v13052_v24 = vld [vmem:[%s18267_s7 + $0x158] ss:$12 sps:$4 sm:$0xff]  }
 0x757   : > { %v7736_v4 = vld [vmem:[#allocation2 + $0x140] sm:$0xff]  ;;  %7969 = vmatprep.mubr.bf16.mxu1 %v13002_v47  ;;  %v7238_v53 = vpop.f32.mrb[162].mxu0  ;;  %v13026_v25 = vld [vmem:[%s18267_s7 + $0x9c] ss:$12 sps:$4 sm:$0xff]  }
 0x758   : > { %7697 = vst.msk [vmem:[#allocation2 + $0x150] sm:$0xff] %vm3982_vm4, %v7656_v14  ;;  %v7329_v46 = vadd.f32 %v16792_v61, %v7281_v60  ;;  %v17034_v16 = vpack.c.bf16 %v7736_v4, %v7735_v32  ;;  %v12517_v21 = vpop.f32.mrb[163].mxu0  ;;  %v13005_v61 = vld [vmem:[%s18267_s7 + $0x64] ss:$12 sps:$4 sm:$0xff]   ;;  %v13024_v47 = vld [vmem:[%s18267_s7 + $0x80] ss:$12 sps:$4 sm:$0xff]  }
 0x759   : > { %v13028_v19 = vld [vmem:[%s18267_s7 + $0xa0] ss:$12 sps:$4 sm:$0xff]   ;;  %v13031_v1 = vld [vmem:[%s18267_s7 + $0xb8] ss:$12 sps:$4 sm:$0xff]   ;;  %v13060_v14 = vld [vmem:[%s18267_s7 + $0x188] ss:$12 sps:$4 sm:$0xff]  }
 0x75a   : > { %v7370_v38 = vmax.f32 %v7329_v46, 0.0  ;;  %12523 = vmatpush3.bf16.msra.mxu1 %v17034_v16  ;;  %12561 = vmatpush3.bf16.msra.mxu0 %v17034_v16  ;;  %v13029_v50 = vld [vmem:[%s18267_s7 + $0xb4] ss:$12 sps:$4 sm:$0xff]   ;;  %v13034_v60 = vld [vmem:[%s18267_s7 + $0xd0] ss:$12 sps:$4 sm:$0xff]  }
 0x75b   : > { %12524 = vmatprep.subr.bf16.mxu1 %v18363_v34  ;;  %12562 = vmatprep.subr.bf16.mxu0 %v18363_v34  ;;  %v13064_v40 = vld [vmem:[%s18267_s7 + $0x1a0] ss:$12 sps:$4 sm:$0xff]   ;;  %v13037_v4 = vld [vmem:[%s18267_s7 + $0xe8] ss:$12 sps:$4 sm:$0xff]   ;;  %v13068_v53 = vld [vmem:[%s18267_s7 + $0x1b8] ss:$12 sps:$4 sm:$0xff]  }
 0x75c   : > { %v7657_v15 = vmul.f32 %v7615_v56, %v7370_v38  ;;  %v13032_v32 = vld [vmem:[%s18267_s7 + $0xcc] ss:$12 sps:$4 sm:$0xff]   ;;  %v13035_v46 = vld [vmem:[%s18267_s7 + $0xe4] ss:$12 sps:$4 sm:$0xff]   ;;  %v13038_v38 = vld [vmem:[%s18267_s7 + $0xfc] ss:$12 sps:$4 sm:$0xff]  }
 0x75d   : > { %v7737_v13 = vld [vmem:[#allocation2 + $0x148] sm:$0xff]  ;;  %v13071_v21 = vld [vmem:[%s18267_s7 + $0x1d0] ss:$0 sps:$4 sm:$0x33]   ;;  %v13074_v55 = vld [vmem:[%s18267_s7 + $0x1d8] ss:$12 sps:$4 sm:$0xff]  }
 0x75e   : > { %7698 = vst.msk [vmem:[#allocation2 + $0x158] sm:$0xf] %vm4023_vm6, %v7657_v15  ;;  %7970 = vmatmul.mubr.bf16.gmra.mrb[92].mxu1 %v13000_v26  ;;  %v13043_v26 = vld [vmem:[%s18267_s7 + $0x118] ss:$12 sps:$4 sm:$0xff]   ;;  %v10977_v56 = vld [vmem:[%s18267_s7 + $0x12c] sm:$0x33] }
 0x75f   : > { %v7738_v6 = vld [vmem:[#allocation2 + $0x150] sm:$0xff]  ;;  %7977 = vmatprep.mubr.bf16.mxu1 %v13005_v61  ;;  %v13075_v61 = vld [vmem:[%s18267_s7 + $0x1dc] ss:$12 sps:$4 sm:$0xff]  }
 0x760   : > { %v17047_v63 = vpack.c.bf16 %v7738_v6, %v7737_v13  ;;  %v13041_v15 = vld [vmem:[%s18267_s7 + $0x114] ss:$12 sps:$4 sm:$0xff]   ;;  %v10997_v6 = vcombine.low %v10977_v56, %v10977_v56 }
 0x761   : > { %v13079_v13 = vld [vmem:[%s18267_s7 + $0x1f4] ss:$12 sps:$4 sm:$0xff]  }
 0x762   : > { %12525 = vmatpush3.bf16.msra.mxu1 %v17047_v63  ;;  %12563 = vmatpush3.bf16.msra.mxu0 %v17047_v63 }
 0x763   : > { %12526 = vmatprep.subr.bf16.mxu1 %v18363_v34  ;;  %12564 = vmatprep.subr.bf16.mxu0 %v18363_v34 }
 0x765   : > { %v7739_v0 = vld [vmem:[#allocation2 + $0x158] sm:$0xf] }
 0x766   : > { %7978 = vmatmul.mubr.bf16.gmra.mrb[96].mxu1 %v13003_v31  ;;  %v7760_v33 = vpack.c.bf16 %v7739_v0, %v7739_v0  ;;  %v13083_v31 = vld [vmem:[%s18267_s7 + $0x20c] ss:$12 sps:$4 sm:$0xff]   ;;  %v13051_v0 = vld [vmem:[%s18267_s7 + $0x154] ss:$12 sps:$4 sm:$0xff]  }
 0x767   : > { %7985 = vmatprep.mubr.bf16.mxu1 %v13009_v37  ;;  %v13046_v37 = vld [vmem:[%s18267_s7 + $0x138] ss:$12 sps:$4 sm:$0xff]  }
 0x768   : > { %v17059_v28 = vsel %vm7909_vm7, %v7760_v33, 0  ;;  %v13087_v33 = vld [vmem:[%s18267_s7 + $0x224] ss:$12 sps:$4 sm:$0xff]  }
 0x769   : > { %12527 = vmatpush3.bf16.msra.mxu1 %v17059_v28  ;;  %12565 = vmatpush3.bf16.msra.mxu0 %v17059_v28 }
 0x76a   : > { %11460 = vmatprep.subr.bf16.mxu1 %v16884_v17  ;;  %12594 = vmatprep.subr.bf16.mxu0 %v18363_v34 }
 0x76c   : > { %12567 = vmatmul.mubr.msk.bf16.vlgmr.msra.gmra.mrb[164].mxu0 %vm7887_vm8, %v13006_v51  ;;  %v13055_v51 = vld [vmem:[%s18267_s7 + $0x16c] ss:$12 sps:$4 sm:$0xff]  }
 0x76d   : > { %12595 = vmatpush3.bf16.msra.mxu0 %v16999_v54  ;;  %12570 = vmatprep.mubr.msk.bf16.mxu0 %vm13169_vm3, %v18363_v34 }
 0x76e   : > { %7986 = vmatmul.mubr.bf16.gmra.mrb[100].mxu1 %v13007_v59  ;;  %12596 = vmatprep.subr.bf16.mxu0 %v18363_v34 }
 0x76f   : > { %7993 = vmatprep.mubr.bf16.mxu1 %v10944_v5 }
 0x771   : > { %12597 = vmatpush3.bf16.msra.mxu0 %v17017_v49 }
 0x772   : > { %12598 = vmatprep.subr.bf16.mxu0 %v18363_v34 }
 0x774   : > { %12571 = vmatmul.mubr.msk.bf16.gmra.mrb[168].mxu0 %vm7887_vm8, %v13010_v23 }
 0x775   : > { %12599 = vmatpush3.bf16.msra.mxu0 %v17034_v16  ;;  %12574 = vmatprep.mubr.msk.bf16.mxu0 %vm13169_vm3, %v18363_v34 }
 0x776   : > { %7994 = vmatmul.mubr.bf16.gmra.mrb[104].mxu1 %v10943_v43  ;;  %12600 = vmatprep.subr.bf16.mxu0 %v18363_v34 }
 0x777   : > { %12528 = vmatprep.mubr.msk.bf16.mxu1 %vm13169_vm3, %v18363_v34 }
 0x779   : > { %12601 = vmatpush3.bf16.msra.mxu0 %v17047_v63 }
 0x77a   : > { %12602 = vmatprep.subr.bf16.mxu0 %v18363_v34 }
 0x77c   : > { %12575 = vmatmul.mubr.msk.bf16.gmra.mrb[172].mxu0 %vm7887_vm8, %v13013_v57 }
 0x77d   : > { %12603 = vmatpush3.bf16.msra.mxu0 %v17059_v28  ;;  %12578 = vmatprep.mubr.msk.bf16.mxu0 %vm13169_vm3, %v18363_v34 }
 0x77e   : > { %12529 = vmatmul.mubr.msk.bf16.vlgmr.msra.gmra.mrb[108].mxu1 %vm7887_vm8, %v13014_v41  ;;  %12632 = vmatprep.subr.bf16.mxu0 %v18363_v34  ;;  %v13072_v41 = vld [vmem:[%s18267_s7 + $0x1d4] ss:$12 sps:$4 sm:$0xff]  }
 0x77f   : > { %11461 = vmatpush3.bf16.msra.mxu1 %v16886_v58  ;;  %12532 = vmatprep.mubr.msk.bf16.mxu1 %vm13169_vm3, %v18363_v34 }
 0x780   : > { %11462 = vmatprep.subr.bf16.mxu1 %v16898_v8 }
 0x783   : > { %11463 = vmatpush3.bf16.msra.mxu1 %v16900_v10 }
 0x784   : > { %11464 = vmatprep.subr.bf16.mxu1 %v16912_v18  ;;  %12579 = vmatmul.mubr.msk.bf16.gmra.mrb[176].mxu0 %vm7887_vm8, %v13015_v30 }
 0x785   : > { %12582 = vmatprep.mubr.msk.bf16.mxu0 %vm13169_vm3, %v18363_v34 }
 0x786   : > { %12533 = vmatmul.mubr.msk.bf16.gmra.mrb[112].mxu1 %vm7887_vm8, %v13016_v39  ;;  %v13078_v39 = vld [vmem:[%s18267_s7 + $0x1f0] ss:$12 sps:$4 sm:$0xff]  }
 0x787   : > { %11465 = vmatpush3.bf16.msra.mxu1 %v16914_v45  ;;  %12536 = vmatprep.mubr.msk.bf16.mxu1 %vm13169_vm3, %v18363_v34 }
 0x788   : > { %11466 = vmatprep.subr.bf16.mxu1 %v16926_v7 }
 0x78b   : > { %11467 = vmatpush3.bf16.msra.mxu1 %v16928_v42 }
 0x78c   : > { %11468 = vmatprep.subr.bf16.mxu1 %v16940_v29  ;;  %12583 = vmatmul.mubr.msk.bf16.gmra.mrb[180].mxu0 %vm7887_vm8, %v13017_v48 }
 0x78d   : > { %12586 = vmatprep.mubr.msk.bf16.mxu0 %vm13169_vm3, %v18363_v34 }
 0x78e   : > { %12537 = vmatmul.mubr.msk.bf16.gmra.mrb[116].mxu1 %vm7887_vm8, %v13018_v52 }
 0x78f   : > { %11469 = vmatpush3.bf16.msra.mxu1 %v16942_v35  ;;  %12540 = vmatprep.mubr.msk.bf16.mxu1 %vm13169_vm3, %v18363_v34 }
 0x790   : > { %11470 = vmatprep.subr.bf16.mxu1 %v16954_v12 }
 0x793   : > { %11471 = vmatpush3.bf16.msra.mxu1 %v16956_v36 }
 0x794   : > { %11472 = vmatprep.subr.bf16.mxu1 %v16968_v3  ;;  %12587 = vmatmul.mubr.msk.bf16.gmra.mrb[184].mxu0 %vm7887_vm8, %v13019_v22 }
 0x795   : > { %12590 = vmatprep.mubr.msk.bf16.mxu0 %vm13169_vm3, %v18363_v34 }
 0x796   : > { %12541 = vmatmul.mubr.msk.bf16.gmra.mrb[120].mxu1 %vm7887_vm8, %v13020_v2 }
 0x797   : > { %11473 = vmatpush3.bf16.msra.mxu1 %v16970_v44  ;;  %12544 = vmatprep.mubr.msk.bf16.mxu1 %vm13169_vm3, %v18363_v34 }
 0x798   : > { %11474 = vmatprep.subr.bf16.mxu1 %v16980_v27 }
 0x79b   : > { %11475 = vmatpush3.bf16.msra.mxu1 %v16982_v20 }
 0x79c   : > { %11530 = vmatprep.subr.bf16.mxu1 %v16884_v17  ;;  %12591 = vmatmul.mubr.msk.bf16.gmra.mrb[188].mxu0 %vm7887_vm8, %v13021_v9 }
 0x79d   : > { %12604 = vmatprep.mubr.msk.bf16.mxu0 %vm13169_vm3, %v18363_v34 }
 0x79e   : > { %12545 = vmatmul.mubr.msk.bf16.gmra.mrb[124].mxu1 %vm7887_vm8, %v13022_v11  ;;  %v13076_v11 = vld [vmem:[%s18267_s7 + $0x1ec] ss:$12 sps:$4 sm:$0xff]  }
 0x79f   : > { %12548 = vmatprep.mubr.msk.bf16.mxu1 %vm13169_vm3, %v18363_v34 }
 0x7a4   : > { %12605 = vmatmul.mubr.msk.bf16.vlgmr.msra.gmra.mrb[192].mxu0 %vm7887_vm8, %v13023_v62 }
 0x7a5   : > { %12633 = vmatpush3.bf16.msra.mxu0 %v16999_v54  ;;  %12608 = vmatprep.mubr.msk.bf16.mxu0 %vm13169_vm3, %v18363_v34  ;;  %v13025_v54 = vld [vmem:[%s18267_s7 + $0x98] ss:$0 sps:$4 sm:$0x33]  }
 0x7a6   : > { %12549 = vmatmul.mubr.msk.bf16.gmra.mrb[128].mxu1 %vm7887_vm8, %v13024_v47  ;;  %12634 = vmatprep.subr.bf16.mxu0 %v18363_v34  ;;  %v13082_v47 = vld [vmem:[%s18267_s7 + $0x208] ss:$12 sps:$4 sm:$0xff]  }
 0x7a7   : > { %12552 = vmatprep.mubr.msk.bf16.mxu1 %vm13169_vm3, %v18363_v34 }
 0x7a9   : > { %12635 = vmatpush3.bf16.msra.mxu0 %v17017_v49  ;;  %v13056_v49 = vld [vmem:[%s18267_s7 + $0x170] ss:$12 sps:$4 sm:$0xff]  }
 0x7aa   : > { %12636 = vmatprep.subr.bf16.mxu0 %v18363_v34 }
 0x7ac   : > { %12609 = vmatmul.mubr.msk.bf16.gmra.mrb[196].mxu0 %vm7887_vm8, %v13052_v24 }
 0x7ad   : > { %12637 = vmatpush3.bf16.msra.mxu0 %v17034_v16  ;;  %12612 = vmatprep.mubr.msk.bf16.mxu0 %vm13169_vm3, %v18363_v34  ;;  %v13040_v16 = vld [vmem:[%s18267_s7 + $0x100] ss:$12 sps:$4 sm:$0xff]  }
 0x7ae   : > { %12553 = vmatmul.mubr.msk.bf16.gmra.mrb[132].mxu1 %vm7887_vm8, %v13025_v54  ;;  %12638 = vmatprep.subr.bf16.mxu0 %v18363_v34 }
 0x7af   : > { %8269 = vmatprep.mubr.bf16.mxu1 %v13028_v19 }
 0x7b1   : > { %12639 = vmatpush3.bf16.msra.mxu0 %v17047_v63  ;;  %v13048_v63 = vld [vmem:[%s18267_s7 + $0x13c] ss:$12 sps:$4 sm:$0xff]  }
 0x7b2   : > { %12640 = vmatprep.subr.bf16.mxu0 %v18363_v34 }
 0x7b4   : > { %12613 = vmatmul.mubr.msk.bf16.gmra.mrb[200].mxu0 %vm7887_vm8, %v13056_v49 }
 0x7b5   : > { %12641 = vmatpush3.bf16.msra.mxu0 %v17059_v28  ;;  %12616 = vmatprep.mubr.msk.bf16.mxu0 %vm13169_vm3, %v18363_v34  ;;  %v13049_v28 = vld [vmem:[%s18267_s7 + $0x150] ss:$12 sps:$4 sm:$0xff]  }
 0x7b6   : > { %8270 = vmatmul.mubr.bf16.vlgmr.msra.gmra.mrb[136].mxu1 %v13026_v25  ;;  %12700 = vmatprep.subr.bf16.mxu0 %v18363_v34 }
 0x7b7   : > { %11531 = vmatpush3.bf16.msra.mxu1 %v16886_v58  ;;  %8277 = vmatprep.mubr.bf16.mxu1 %v13031_v1  ;;  %v13080_v1 = vld [vmem:[%s18267_s7 + $0x204] ss:$12 sps:$4 sm:$0xff]  }
 0x7b8   : > { %11532 = vmatprep.subr.bf16.mxu1 %v16898_v8 }
 0x7bb   : > { %11533 = vmatpush3.bf16.msra.mxu1 %v16900_v10 }
 0x7bc   : > { %11534 = vmatprep.subr.bf16.mxu1 %v16912_v18  ;;  %12617 = vmatmul.mubr.msk.bf16.gmra.mrb[204].mxu0 %vm7887_vm8, %v13060_v14 }
 0x7bd   : > { %12620 = vmatprep.mubr.msk.bf16.mxu0 %vm13169_vm3, %v18363_v34 }
 0x7be   : > { %8278 = vmatmul.mubr.bf16.gmra.mrb[140].mxu1 %v13029_v50  ;;  %v13086_v50 = vld [vmem:[%s18267_s7 + $0x220] ss:$12 sps:$4 sm:$0xff]  }
 0x7bf   : > { %11535 = vmatpush3.bf16.msra.mxu1 %v16914_v45  ;;  %8285 = vmatprep.mubr.bf16.mxu1 %v13034_v60 }
 0x7c0   : > { %11536 = vmatprep.subr.bf16.mxu1 %v16926_v7 }
 0x7c3   : > { %11537 = vmatpush3.bf16.msra.mxu1 %v16928_v42 }
 0x7c4   : > { %11538 = vmatprep.subr.bf16.mxu1 %v16940_v29  ;;  %12621 = vmatmul.mubr.msk.bf16.gmra.mrb[208].mxu0 %vm7887_vm8, %v13064_v40 }
 0x7c5   : > { %12624 = vmatprep.mubr.msk.bf16.mxu0 %vm13169_vm3, %v18363_v34 }
 0x7c6   : > { %8286 = vmatmul.mubr.bf16.gmra.mrb[144].mxu1 %v13032_v32 }
 0x7c7   : > { %11539 = vmatpush3.bf16.msra.mxu1 %v16942_v35  ;;  %8293 = vmatprep.mubr.bf16.mxu1 %v13037_v4 }
 0x7c8   : > { %11540 = vmatprep.subr.bf16.mxu1 %v16954_v12 }
 0x7cb   : > { %11541 = vmatpush3.bf16.msra.mxu1 %v16956_v36 }
 0x7cc   : > { %11542 = vmatprep.subr.bf16.mxu1 %v16968_v3  ;;  %12625 = vmatmul.mubr.msk.bf16.gmra.mrb[212].mxu0 %vm7887_vm8, %v13068_v53 }
 0x7cd   : > { %12628 = vmatprep.mubr.msk.bf16.mxu0 %vm13169_vm3, %v18363_v34 }
 0x7ce   : > { %8294 = vmatmul.mubr.bf16.gmra.mrb[148].mxu1 %v13035_v46  ;;  %v13084_v46 = vld [vmem:[%s18267_s7 + $0x21c] ss:$12 sps:$4 sm:$0xff]  }
 0x7cf   : > { %11543 = vmatpush3.bf16.msra.mxu1 %v16970_v44  ;;  %8301 = vmatprep.mubr.bf16.mxu1 %v13040_v16 }
 0x7d0   : > { %11544 = vmatprep.subr.bf16.mxu1 %v16980_v27 }
 0x7d3   : > { %11545 = vmatpush3.bf16.msra.mxu1 %v16982_v20 }
 0x7d4   : > { %11600 = vmatprep.subr.bf16.mxu1 %v16884_v17  ;;  %12629 = vmatmul.mubr.msk.bf16.gmra.mrb[216].mxu0 %vm7887_vm8, %v13071_v21  ;;  %v10998_v17 = vcombine.high %v10977_v56, %v10977_v56  ;;  %v13090_v21 = vld [vmem:[%s18267_s7 + $0x238] ss:$12 sps:$4 sm:$0xff]  }
 0x7d5   : > { %12642 = vmatprep.mubr.msk.bf16.mxu0 %vm13169_vm3, %v18363_v34 }
 0x7d6   : > { %8302 = vmatmul.mubr.bf16.gmra.mrb[152].mxu1 %v13038_v38 }
 0x7d7   : > { %8309 = vmatprep.mubr.bf16.mxu1 %v13043_v26 }
 0x7dc   : > { %12643 = vmatmul.mubr.msk.bf16.vlgmr.msra.gmra.mrb[220].mxu0 %vm7887_vm8, %v13075_v61 }
 0x7dd   : > { %12646 = vmatprep.mubr.msk.bf16.mxu0 %vm13169_vm3, %v18363_v34 }
 0x7de   : > { %8310 = vmatmul.mubr.bf16.gmra.mrb[156].mxu1 %v13041_v15 }
 0x7df   : > { %8317 = vmatprep.mubr.bf16.mxu1 %v10998_v17 }
 0x7e4   : > { %12647 = vmatmul.mubr.msk.bf16.gmra.mrb[224].mxu0 %vm7887_vm8, %v13079_v13 }
 0x7e5   : > { %12650 = vmatprep.mubr.msk.bf16.mxu0 %vm13169_vm3, %v18363_v34 }
 0x7e6   : > { %8318 = vmatmul.mubr.bf16.gmra.mrb[160].mxu1 %v10997_v6 }
 0x7e7   : > { %8606 = vmatprep.mubr.bf16.mxu1 %v13048_v63  ;;  %v13088_v63 = vld [vmem:[%s18267_s7 + $0x234] ss:$12 sps:$4 sm:$0xff]  }
 0x7ec   : > { %12651 = vmatmul.mubr.msk.bf16.gmra.mrb[228].mxu0 %vm7887_vm8, %v13083_v31 }
 0x7ed   : > { %12654 = vmatprep.mubr.msk.bf16.mxu0 %vm13169_vm3, %v18363_v34 }
 0x7ee   : > { %8607 = vmatmul.mubr.bf16.vlgmr.msra.gmra.mrb[164].mxu1 %v13046_v37 }
 0x7ef   : > { %11601 = vmatpush3.bf16.msra.mxu1 %v16886_v58  ;;  %8614 = vmatprep.mubr.bf16.mxu1 %v13051_v0  ;;  %v13091_v58 = vld [vmem:[%s18267_s7 + $0x23c] ss:$12 sps:$4 sm:$0xff]  }
 0x7f0   : > { %11602 = vmatprep.subr.bf16.mxu1 %v16898_v8  ;;  %v13053_v8 = vld [vmem:[%s18267_s7 + $0x168] ss:$12 sps:$4 sm:$0xff]   ;;  %v13094_v0 = vld [vmem:[%s18267_s7 + $0x250] ss:$12 sps:$4 sm:$0xff]  }
 0x7f3   : > { %11603 = vmatpush3.bf16.msra.mxu1 %v16900_v10  ;;  %v13059_v10 = vld [vmem:[%s18267_s7 + $0x184] ss:$12 sps:$4 sm:$0xff]  }
 0x7f4   : > { %11604 = vmatprep.subr.bf16.mxu1 %v16912_v18  ;;  %12655 = vmatmul.mubr.msk.bf16.gmra.mrb[232].mxu0 %vm7887_vm8, %v13087_v33  ;;  %v13095_v18 = vld [vmem:[%s18267_s7 + $0x254] ss:$12 sps:$4 sm:$0xff]  }
 0x7f5   : > { %12658 = vmatprep.mubr.msk.bf16.mxu0 %vm13169_vm3, %v18363_v34 }
 0x7f6   : > { %8615 = vmatmul.mubr.bf16.gmra.mrb[168].mxu1 %v13049_v28 }
 0x7f7   : > { %11605 = vmatpush3.bf16.msra.mxu1 %v16914_v45  ;;  %8622 = vmatprep.mubr.bf16.mxu1 %v13055_v51  ;;  %v13057_v45 = vld [vmem:[%s18267_s7 + $0x180] ss:$12 sps:$4 sm:$0xff]  }
 0x7f8   : > { %11606 = vmatprep.subr.bf16.mxu1 %v16926_v7  ;;  %v13063_v7 = vld [vmem:[%s18267_s7 + $0x19c] ss:$12 sps:$4 sm:$0xff]  }
 0x7fb   : > { %11607 = vmatpush3.bf16.msra.mxu1 %v16928_v42  ;;  %v13098_v42 = vld [vmem:[%s18267_s7 + $0x26c] ss:$0 sps:$4 sm:$0x33]  }
 0x7fc   : > { %11608 = vmatprep.subr.bf16.mxu1 %v16940_v29  ;;  %12659 = vmatmul.mubr.msk.bf16.gmra.mrb[236].mxu0 %vm7887_vm8, %v13091_v58  ;;  %v13061_v29 = vld [vmem:[%s18267_s7 + $0x198] ss:$12 sps:$4 sm:$0xff]  }
 0x7fd   : > { %12662 = vmatprep.mubr.msk.bf16.mxu0 %vm13169_vm3, %v18363_v34 }
 0x7fe   : > { %8623 = vmatmul.mubr.bf16.gmra.mrb[172].mxu1 %v13053_v8 }
 0x7ff   : > { %11609 = vmatpush3.bf16.msra.mxu1 %v16942_v35  ;;  %8630 = vmatprep.mubr.bf16.mxu1 %v13059_v10  ;;  %v13067_v35 = vld [vmem:[%s18267_s7 + $0x1b4] ss:$12 sps:$4 sm:$0xff]   ;;  %v11085_v10 = vld [vmem:[%s18267_s7 + $0x264] sm:$0x33] }
 0x800   : > { %11610 = vmatprep.subr.bf16.mxu1 %v16954_v12  ;;  %v11031_v12 = vld [vmem:[%s18267_s7 + $0x1c8] sm:$0x33] }
 0x803   : > { %11611 = vmatpush3.bf16.msra.mxu1 %v16956_v36  ;;  %v13065_v36 = vld [vmem:[%s18267_s7 + $0x1b0] ss:$12 sps:$4 sm:$0xff]  }
 0x804   : > { %11612 = vmatprep.subr.bf16.mxu1 %v16968_v3  ;;  %12663 = vmatmul.mubr.msk.bf16.gmra.mrb[240].mxu0 %vm7887_vm8, %v13095_v18  ;;  %v11052_v3 = vcombine.high %v11031_v12, %v11031_v12 }
 0x805   : > { %12666 = vmatprep.mubr.msk.bf16.mxu0 %vm13169_vm3, %v18363_v34 }
 0x806   : > { %8631 = vmatmul.mubr.bf16.gmra.mrb[176].mxu1 %v13057_v45 }
 0x807   : > { %11613 = vmatpush3.bf16.msra.mxu1 %v16970_v44  ;;  %8638 = vmatprep.mubr.bf16.mxu1 %v13063_v7 }
 0x808   : > { %11614 = vmatprep.subr.bf16.mxu1 %v16980_v27  ;;  %v11051_v27 = vcombine.low %v11031_v12, %v11031_v12  ;;  %v11106_v12 = vcombine.high %v11085_v10, %v11085_v10 }
 0x80b   : > { %11615 = vmatpush3.bf16.msra.mxu1 %v16982_v20 }
 0x80c   : > { %12667 = vmatmul.mubr.msk.bf16.gmra.mrb[244].mxu0 %vm7887_vm8, %v13098_v42  ;;  %12670 = vmatprep.subr.bf16.mxu1 %v18363_v34  ;;  %v13092_v42 = vld [vmem:[%s18267_s7 + $0x24c] ss:$12 sps:$4 sm:$0xff]  }
 0x80d   : > { %12702 = vmatprep.mubr.msk.bf16.mxu0 %vm13169_vm3, %v18363_v34 }
 0x80e   : > { %8639 = vmatmul.mubr.bf16.gmra.mrb[180].mxu1 %v13061_v29 }
 0x80f   : > { %8646 = vmatprep.mubr.bf16.mxu1 %v13067_v35 }
 0x816   : > { %8647 = vmatmul.mubr.bf16.gmra.mrb[184].mxu1 %v13065_v36 }
 0x817   : > { %8654 = vmatprep.mubr.bf16.mxu1 %v11052_v3 }
 0x819   : > { %v11406_v44 = vpop.f32.mrb[80].mxu1 }
 0x81a   : > { %v11407_v20 = vpop.f32.mrb[81].mxu1 }
 0x81b   : > { %v11409_v59 = vpop.f32.mrb[82].mxu1  ;;  %v17388_v5 = vadd.f32 %v11407_v20, %v11406_v44 }
 0x81c   : > { %v11410_v23 = vpop.f32.mrb[83].mxu1 }
 0x81d   : > { %v17390_v43 = vadd.f32 %v11410_v23, %v11409_v59  ;;  %v11105_v23 = vcombine.low %v11085_v10, %v11085_v10 }
 0x81e   : > { %8655 = vmatmul.mubr.bf16.gmra.mrb[188].mxu1 %v11051_v27 }
 0x81f   : > { %8943 = vmatprep.mubr.bf16.mxu1 %v13074_v55 }
 0x821   : > { %v11412_v57 = vpop.f32.mrb[84].mxu1 }
 0x822   : > { %v11413_v30 = vpop.f32.mrb[85].mxu1 }
 0x823   : > { %v11415_v48 = vpop.f32.mrb[86].mxu1  ;;  %v17398_v52 = vadd.f32 %v11413_v30, %v11412_v57 }
 0x824   : > { %v11416_v22 = vpop.f32.mrb[87].mxu1 }
 0x825   : > { %v17400_v2 = vadd.f32 %v11416_v22, %v11415_v48 }
 0x826   : > { %8944 = vmatmul.mubr.bf16.vlgmr.msra.gmra.mrb[192].mxu1 %v13072_v41 }
 0x827   : > { %8951 = vmatprep.mubr.bf16.mxu1 %v13078_v39 }
 0x829   : > { %v11418_v9 = vpop.f32.mrb[88].mxu1 }
 0x82a   : > { %v11419_v62 = vpop.f32.mrb[89].mxu1 }
 0x82b   : > { %v11421_v24 = vpop.f32.mrb[90].mxu1  ;;  %v17408_v54 = vadd.f32 %v11419_v62, %v11418_v9 }
 0x82c   : > { %v11422_v19 = vpop.f32.mrb[91].mxu1 }
 0x82d   : > { %v17410_v49 = vadd.f32 %v11422_v19, %v11421_v24 }
 0x82e   : > { %8952 = vmatmul.mubr.bf16.gmra.mrb[196].mxu1 %v13076_v11 }
 0x82f   : > { %8959 = vmatprep.mubr.bf16.mxu1 %v13082_v47 }
 0x831   : > { %v11424_v25 = vpop.f32.mrb[92].mxu1 }
 0x832   : > { %v11425_v14 = vpop.f32.mrb[93].mxu1 }
 0x833   : > { %v11427_v60 = vpop.f32.mrb[94].mxu1  ;;  %v17418_v40 = vadd.f32 %v11425_v14, %v11424_v25 }
 0x834   : > { %v11428_v32 = vpop.f32.mrb[95].mxu1 }
 0x835   : > { %v17420_v4 = vadd.f32 %v11428_v32, %v11427_v60 }
 0x836   : > { %8960 = vmatmul.mubr.bf16.gmra.mrb[200].mxu1 %v13080_v1 }
 0x837   : > { %8967 = vmatprep.mubr.bf16.mxu1 %v13086_v50 }
 0x839   : > { %v11430_v53 = vpop.f32.mrb[96].mxu1 }
 0x83a   : > { %v11431_v16 = vpop.f32.mrb[97].mxu1 }
 0x83b   : > { %v11433_v38 = vpop.f32.mrb[98].mxu1  ;;  %v17428_v26 = vadd.f32 %v11431_v16, %v11430_v53 }
 0x83c   : > { %v11434_v56 = vpop.f32.mrb[99].mxu1 }
 0x83d   : > { %v17430_v61 = vadd.f32 %v11434_v56, %v11433_v38 }
 0x83e   : > { %8968 = vmatmul.mubr.bf16.gmra.mrb[204].mxu1 %v13084_v46 }
 0x83f   : > { %8975 = vmatprep.mubr.bf16.mxu1 %v13090_v21  ;;  %v17432_v15 = vpop.f32.mrb[164].mxu0 }
 0x840   : > { %v12568_v17 = vpop.f32.mrb[165].mxu0 }
 0x841   : > { %v11436_v13 = vpop.f32.mrb[100].mxu1  ;;  %v17434_v6 = vpop.f32.mrb[166].mxu0 }
 0x842   : > { %v11437_v31 = vpop.f32.mrb[101].mxu1  ;;  %v12569_v37 = vpop.f32.mrb[167].mxu0 }
 0x843   : > { %v11439_v33 = vpop.f32.mrb[102].mxu1  ;;  %v17442_v28 = vadd.f32 %v11437_v31, %v11436_v13 }
 0x844   : > { %v11440_v51 = vpop.f32.mrb[103].mxu1 }
 0x845   : > { %v17444_v58 = vadd.f32 %v11440_v51, %v11439_v33 }
 0x846   : > { %8976 = vmatmul.mubr.bf16.gmra.mrb[208].mxu1 %v13088_v63 }
 0x847   : > { %8983 = vmatprep.mubr.bf16.mxu1 %v13094_v0  ;;  %v17446_v8 = vpop.f32.mrb[168].mxu0 }
 0x848   : > { %v12572_v18 = vpop.f32.mrb[169].mxu0 }
 0x849   : > { %v11442_v45 = vpop.f32.mrb[104].mxu1  ;;  %v17451_v7 = vpop.f32.mrb[170].mxu0 }
 0x84a   : > { %v11443_v29 = vpop.f32.mrb[105].mxu1  ;;  %v12573_v35 = vpop.f32.mrb[171].mxu0 }
 0x84b   : > { %v17456_v36 = vadd.f32 %v11443_v29, %v11442_v45  ;;  %v11445_v3 = vpop.f32.mrb[106].mxu1 }
 0x84c   : > { %v11446_v44 = vpop.f32.mrb[107].mxu1 }
 0x84e   : > { %8984 = vmatmul.mubr.bf16.gmra.mrb[212].mxu1 %v13092_v42 }
 0x84f   : > { %8991 = vmatprep.mubr.bf16.mxu1 %v11106_v12  ;;  %v17458_v27 = vpop.f32.mrb[172].mxu0 }
 0x850   : > { %v12576_v20 = vpop.f32.mrb[173].mxu0 }
 0x851   : > { %v8035_v55 = vpop.f32.mrb[108].mxu1  ;;  %v17460_v59 = vpop.f32.mrb[174].mxu0 }
 0x852   : > { %v17463_v57 = vadd.f32 %v17388_v5, %v8035_v55  ;;  %v12530_v41 = vpop.f32.mrb[109].mxu1  ;;  %v12577_v30 = vpop.f32.mrb[175].mxu0 }
 0x853   : > { %v8038_v39 = vpop.f32.mrb[110].mxu1 }
 0x854   : > { %v17466_v48 = vadd.f32 %v17390_v43, %v8038_v39  ;;  %v12531_v22 = vpop.f32.mrb[111].mxu1 }
 0x856   : > { %8992 = vmatmul.mubr.bf16.gmra.mrb[216].mxu1 %v11105_v23 }
 0x857   : > { %v17468_v9 = vpop.f32.mrb[176].mxu0  ;;  %12672 = vmatprep.mubr.msk.bf16.mxu1 %vm13169_vm3, %v18363_v34 }
 0x858   : > { %v12580_v11 = vpop.f32.mrb[177].mxu0 }
 0x859   : > { %v8043_v62 = vpop.f32.mrb[112].mxu1  ;;  %v17472_v47 = vpop.f32.mrb[178].mxu0 }
 0x85a   : > { %v17475_v5 = vadd.f32 %v17398_v52, %v8043_v62  ;;  %v12534_v24 = vpop.f32.mrb[113].mxu1  ;;  %v12581_v19 = vpop.f32.mrb[179].mxu0 }
 0x85b   : > { %v8046_v25 = vpop.f32.mrb[114].mxu1 }
 0x85c   : > { %v17478_v43 = vadd.f32 %v17400_v2, %v8046_v25  ;;  %v12535_v1 = vpop.f32.mrb[115].mxu1 }
 0x85f   : > { %v17480_v14 = vpop.f32.mrb[180].mxu0 }
 0x860   : > { %v12584_v50 = vpop.f32.mrb[181].mxu0 }
 0x861   : > { %v8051_v60 = vpop.f32.mrb[116].mxu1  ;;  %v17482_v32 = vpop.f32.mrb[182].mxu0 }
 0x862   : > { %v17485_v53 = vadd.f32 %v17408_v54, %v8051_v60  ;;  %v12538_v46 = vpop.f32.mrb[117].mxu1  ;;  %v12585_v16 = vpop.f32.mrb[183].mxu0 }
 0x863   : > { %v8054_v52 = vpop.f32.mrb[118].mxu1 }
 0x864   : > { %v17488_v21 = vadd.f32 %v17410_v49, %v8054_v52  ;;  %v12539_v38 = vpop.f32.mrb[119].mxu1 }
 0x865   : > { %v11115_v38 = vld [vmem:[%s18263_s3 + $0x4] sm:$0xf] }
 0x867   : > { %v17490_v56 = vpop.f32.mrb[184].mxu0 }
 0x868   : > { %v12588_v2 = vpop.f32.mrb[185].mxu0 }
 0x869   : > { %v8059_v17 = vpop.f32.mrb[120].mxu1  ;;  %v17492_v13 = vpop.f32.mrb[186].mxu0 }
 0x86a   : > { %v17495_v63 = vadd.f32 %v17418_v40, %v8059_v17  ;;  %v12542_v31 = vpop.f32.mrb[121].mxu1  ;;  %v12589_v37 = vpop.f32.mrb[187].mxu0 }
 0x86b   : > { %v8062_v54 = vpop.f32.mrb[122].mxu1  ;;  %v9178_v31 = vsel %vm4215_vm2, %v11115_v38, 0 }
 0x86c   : > { %v17498_v0 = vadd.f32 %v17420_v4, %v8062_v54  ;;  %v12543_v33 = vpop.f32.mrb[123].mxu1  ;;  %12671 = vmatpush3.bf16.msra.mxu1 %v9178_v31 }
 0x86d   : > { %12730 = vmatprep.subr.bf16.mxu1 %v18363_v34 }
 0x86f   : > { %v17500_v51 = vpop.f32.mrb[188].mxu0 }
 0x870   : > { %v12592_v49 = vpop.f32.mrb[189].mxu0 }
 0x871   : > { %v8067_v10 = vpop.f32.mrb[124].mxu1  ;;  %v8410_v18 = vpop.f32.mrb[190].mxu0 }
 0x872   : > { %v17503_v45 = vadd.f32 %v17428_v26, %v8067_v10  ;;  %v12546_v42 = vpop.f32.mrb[125].mxu1  ;;  %v12593_v29 = vpop.f32.mrb[191].mxu0 }
 0x873   : > { %v8070_v35 = vpop.f32.mrb[126].mxu1 }
 0x874   : > { %v17506_v40 = vadd.f32 %v17430_v61, %v8070_v35  ;;  %v12547_v12 = vpop.f32.mrb[127].mxu1 }
 0x877   : > { %v17508_v3 = vpop.f32.mrb[192].mxu0 }
 0x878   : > { %v12606_v4 = vpop.f32.mrb[193].mxu0 }
 0x879   : > { %v8075_v44 = vpop.f32.mrb[128].mxu1  ;;  %v17510_v20 = vpop.f32.mrb[194].mxu0 }
 0x87a   : > { %v17513_v55 = vadd.f32 %v17442_v28, %v8075_v44  ;;  %v12550_v23 = vpop.f32.mrb[129].mxu1  ;;  %v12607_v41 = vpop.f32.mrb[195].mxu0 }
 0x87b   : > { %v8078_v26 = vpop.f32.mrb[130].mxu1 }
 0x87c   : > { %v17516_v30 = vadd.f32 %v17444_v58, %v8078_v26  ;;  %v12551_v39 = vpop.f32.mrb[131].mxu1 }
 0x87f   : > { %v17518_v22 = vpop.f32.mrb[196].mxu0 }
 0x880   : > { %v12610_v61 = vpop.f32.mrb[197].mxu0 }
 0x881   : > { %v8083_v11 = vpop.f32.mrb[132].mxu1  ;;  %v17520_v62 = vpop.f32.mrb[198].mxu0 }
 0x882   : > { %v17523_v24 = vadd.f32 %v17456_v36, %v8083_v11  ;;  %v12554_v19 = vpop.f32.mrb[133].mxu1  ;;  %v12611_v25 = vpop.f32.mrb[199].mxu0  ;;  %v9126_v36 = vld [vmem:[%s18263_s3] sm:$0xf] }
 0x883   : > { %v8086_v28 = vpop.f32.mrb[134].mxu1  ;;  %v9290_v37 = vsel %vm4215_vm2, %v9126_v36, 0 }
 0x884   : > { %v12555_v1 = vpop.f32.mrb[135].mxu1  ;;  %12701 = vmatpush3.bf16.msra.mxu0 %v9290_v37 }
 0x885   : > { %12760 = vmatprep.subr.bf16.mxu0 %v18363_v34 }
 0x887   : > { %v17525_v50 = vpop.f32.mrb[200].mxu0 }
 0x888   : > { %v12614_v60 = vpop.f32.mrb[201].mxu0 }
 0x889   : > { %v11476_v46 = vpop.f32.mrb[136].mxu1  ;;  %v17527_v58 = vpop.f32.mrb[202].mxu0 }
 0x88a   : > { %v11477_v16 = vpop.f32.mrb[137].mxu1  ;;  %v12615_v52 = vpop.f32.mrb[203].mxu0 }
 0x88b   : > { %v11478_v2 = vadd.f32 %v11477_v16, %v11476_v46  ;;  %v11479_v17 = vpop.f32.mrb[138].mxu1 }
 0x88c   : > { %v11480_v54 = vpop.f32.mrb[139].mxu1 }
 0x88d   : > { %v11481_v33 = vadd.f32 %v11480_v54, %v11479_v17  ;;  %v17538_v49 = vadd.f32 %v11478_v2, %v17432_v15 }
 0x88f   : > { %v8413_v10 = vmax.f32 %v17463_v57, %v17538_v49  ;;  %v17545_v18 = vadd.f32 %v11481_v33, %v17434_v6  ;;  %v17547_v42 = vpop.f32.mrb[204].mxu0 }
 0x890   : > { %v12618_v29 = vpop.f32.mrb[205].mxu0 }
 0x891   : > { %v8414_v35 = vmax.f32 %v17466_v48, %v17545_v18  ;;  %v11482_v12 = vpop.f32.mrb[140].mxu1  ;;  %v17551_v4 = vpop.f32.mrb[206].mxu0 }
 0x892   : > { %v11483_v15 = vpop.f32.mrb[141].mxu1  ;;  %v12619_v44 = vpop.f32.mrb[207].mxu0 }
 0x893   : > { %v11484_v23 = vadd.f32 %v11483_v15, %v11482_v12  ;;  %v11485_v41 = vpop.f32.mrb[142].mxu1 }
 0x894   : > { %v11486_v26 = vpop.f32.mrb[143].mxu1 }
 0x895   : > { %v11487_v39 = vadd.f32 %v11486_v26, %v11485_v41  ;;  %v17554_v61 = vadd.f32 %v11484_v23, %v17446_v8 }
 0x897   : > { %v8415_v6 = vmax.f32 %v17475_v5, %v17554_v61  ;;  %v17559_v11 = vadd.f32 %v11487_v39, %v17451_v7  ;;  %v17561_v19 = vpop.f32.mrb[208].mxu0 }
 0x898   : > { %v12622_v25 = vpop.f32.mrb[209].mxu0 }
 0x899   : > { %v8416_v28 = vmax.f32 %v17478_v43, %v17559_v11  ;;  %v11488_v1 = vpop.f32.mrb[144].mxu1  ;;  %v17565_v60 = vpop.f32.mrb[210].mxu0 }
 0x89a   : > { %v11489_v46 = vpop.f32.mrb[145].mxu1  ;;  %v12623_v16 = vpop.f32.mrb[211].mxu0 }
 0x89b   : > { %v11490_v52 = vadd.f32 %v11489_v46, %v11488_v1  ;;  %v11491_v8 = vpop.f32.mrb[146].mxu1 }
 0x89c   : > { %v11492_v38 = vpop.f32.mrb[147].mxu1 }
 0x89d   : > { %v11493_v36 = vadd.f32 %v11492_v38, %v11491_v8  ;;  %v17568_v2 = vadd.f32 %v11490_v52, %v17458_v27 }
 0x89f   : > { %v17573_v17 = vadd.f32 %v11493_v36, %v17460_v59  ;;  %v17575_v31 = vpop.f32.mrb[212].mxu0 }
 0x8a0   : > { %v12626_v37 = vpop.f32.mrb[213].mxu0 }
 0x8a1   : > { %v11494_v33 = vpop.f32.mrb[148].mxu1  ;;  %v17579_v29 = vpop.f32.mrb[214].mxu0 }
 0x8a2   : > { %v11495_v12 = vpop.f32.mrb[149].mxu1  ;;  %v12627_v15 = vpop.f32.mrb[215].mxu0 }
 0x8a3   : > { %v11496_v44 = vadd.f32 %v11495_v12, %v11494_v33  ;;  %v11497_v27 = vpop.f32.mrb[150].mxu1 }
 0x8a4   : > { %v11498_v23 = vpop.f32.mrb[151].mxu1 }
 0x8a5   : > { %v11499_v41 = vadd.f32 %v11498_v23, %v11497_v27  ;;  %v17582_v26 = vadd.f32 %v11496_v44, %v17468_v9 }
 0x8a7   : > { %v17587_v39 = vadd.f32 %v11499_v41, %v17472_v47  ;;  %v17589_v25 = vpop.f32.mrb[216].mxu0 }
 0x8a8   : > { %v12630_v1 = vpop.f32.mrb[217].mxu0 }
 0x8a9   : > { %v11500_v16 = vpop.f32.mrb[152].mxu1  ;;  %v8747_v52 = vpop.f32.mrb[218].mxu0 }
 0x8aa   : > { %v11501_v8 = vpop.f32.mrb[153].mxu1  ;;  %v12631_v38 = vpop.f32.mrb[219].mxu0 }
 0x8ab   : > { %v11502_v36 = vadd.f32 %v11501_v8, %v11500_v16  ;;  %v11503_v37 = vpop.f32.mrb[154].mxu1 }
 0x8ac   : > { %v11504_v9 = vpop.f32.mrb[155].mxu1 }
 0x8ad   : > { %v11505_v33 = vadd.f32 %v11504_v9, %v11503_v37  ;;  %v17594_v12 = vadd.f32 %v11502_v36, %v17480_v14 }
 0x8af   : > { %v17599_v15 = vadd.f32 %v11505_v33, %v17482_v32  ;;  %v17601_v44 = vpop.f32.mrb[220].mxu0 }
 0x8b0   : > { %v12644_v27 = vpop.f32.mrb[221].mxu0 }
 0x8b1   : > { %v11506_v41 = vpop.f32.mrb[156].mxu1  ;;  %v17605_v1 = vpop.f32.mrb[222].mxu0 }
 0x8b2   : > { %v11507_v16 = vpop.f32.mrb[157].mxu1  ;;  %v12645_v52 = vpop.f32.mrb[223].mxu0 }
 0x8b3   : > { %v11508_v8 = vadd.f32 %v11507_v16, %v11506_v41  ;;  %v11509_v14 = vpop.f32.mrb[158].mxu1 }
 0x8b4   : > { %v11510_v38 = vpop.f32.mrb[159].mxu1 }
 0x8b5   : > { %v11511_v36 = vadd.f32 %v11510_v38, %v11509_v14  ;;  %v17608_v37 = vadd.f32 %v11508_v8, %v17490_v56 }
 0x8b7   : > { %v17613_v9 = vadd.f32 %v11511_v36, %v17492_v13  ;;  %v17615_v33 = vpop.f32.mrb[224].mxu0 }
 0x8b8   : > { %v12648_v27 = vpop.f32.mrb[225].mxu0 }
 0x8b9   : > { %v11512_v52 = vpop.f32.mrb[160].mxu1  ;;  %v17619_v41 = vpop.f32.mrb[226].mxu0 }
 0x8ba   : > { %v11513_v16 = vpop.f32.mrb[161].mxu1  ;;  %v12649_v14 = vpop.f32.mrb[227].mxu0 }
 0x8bb   : > { %v11514_v38 = vadd.f32 %v11513_v16, %v11512_v52  ;;  %v11515_v56 = vpop.f32.mrb[162].mxu1 }
 0x8bc   : > { %v11516_v8 = vpop.f32.mrb[163].mxu1 }
 0x8bd   : > { %v17622_v47 = vadd.f32 %v11514_v38, %v17500_v51 }
 0x8bf   : > { %v8425_v13 = vmax.f32 %v17523_v24, %v17622_v47  ;;  %v17626_v36 = vpop.f32.mrb[228].mxu0 }
 0x8c0   : > { %v12652_v27 = vpop.f32.mrb[229].mxu0 }
 0x8c1   : > { %v11546_v32 = vpop.f32.mrb[164].mxu1  ;;  %v17628_v46 = vpop.f32.mrb[230].mxu0 }
 0x8c2   : > { %v11547_v23 = vpop.f32.mrb[165].mxu1  ;;  %v12653_v59 = vpop.f32.mrb[231].mxu0 }
 0x8c3   : > { %v11548_v54 = vadd.f32 %v11547_v23, %v11546_v32  ;;  %v11549_v7 = vpop.f32.mrb[166].mxu1 }
 0x8c4   : > { %v11550_v14 = vpop.f32.mrb[167].mxu1 }
 0x8c5   : > { %v11551_v52 = vadd.f32 %v11550_v14, %v11549_v7  ;;  %v8697_v16 = vadd.f32 %v11548_v54, %v17508_v3 }
 0x8c7   : > { %v17634_v51 = vmax.f32 %v8413_v10, %v8697_v16  ;;  %v8700_v38 = vadd.f32 %v11551_v52, %v17510_v20  ;;  %v17637_v56 = vpop.f32.mrb[232].mxu0 }
 0x8c8   : > { %v12656_v8 = vpop.f32.mrb[233].mxu0 }
 0x8c9   : > { %v17642_v59 = vmax.f32 %v8414_v35, %v8700_v38  ;;  %v11552_v23 = vpop.f32.mrb[168].mxu1  ;;  %v17644_v32 = vpop.f32.mrb[234].mxu0 }
 0x8ca   : > { %v11553_v7 = vpop.f32.mrb[169].mxu1  ;;  %v12657_v3 = vpop.f32.mrb[235].mxu0 }
 0x8cb   : > { %v11554_v54 = vadd.f32 %v11553_v7, %v11552_v23  ;;  %v11555_v27 = vpop.f32.mrb[170].mxu1  ;;  %v18369_v3 = vmax.f32 %v17488_v21, %v17573_v17 }
 0x8cc   : > { %v11556_v57 = vpop.f32.mrb[171].mxu1 }
 0x8cd   : > { %v11557_v49 = vadd.f32 %v11556_v57, %v11555_v27  ;;  %v8705_v10 = vadd.f32 %v11554_v54, %v17518_v22 }
 0x8cf   : > { %v17650_v20 = vmax.f32 %v8415_v6, %v8705_v10  ;;  %v8708_v48 = vadd.f32 %v11557_v49, %v17520_v62  ;;  %v17653_v18 = vpop.f32.mrb[236].mxu0  ;;  %v18368_v62 = vmax.f32 %v17485_v53, %v17568_v2 }
 0x8d0   : > { %v12660_v35 = vpop.f32.mrb[237].mxu0 }
 0x8d1   : > { %v17658_v14 = vmax.f32 %v8416_v28, %v8708_v48  ;;  %v11558_v52 = vpop.f32.mrb[172].mxu1  ;;  %v17660_v16 = vpop.f32.mrb[238].mxu0 }
 0x8d2   : > { %v11559_v38 = vpop.f32.mrb[173].mxu1  ;;  %v12661_v22 = vpop.f32.mrb[239].mxu0 }
 0x8d3   : > { %v11560_v8 = vadd.f32 %v11559_v38, %v11558_v52  ;;  %v11561_v23 = vpop.f32.mrb[174].mxu1  ;;  %v18371_v22 = vmax.f32 %v17498_v0, %v17587_v39  ;;  %v18373_v0 = vmax.f32 %v17506_v40, %v17599_v15  ;;  %v18375_v40 = vmax.f32 %v17516_v30, %v17613_v9 }
 0x8d4   : > { %v11562_v5 = vpop.f32.mrb[175].mxu1 }
 0x8d5   : > { %v11563_v61 = vadd.f32 %v11562_v5, %v11561_v23  ;;  %v8713_v6 = vadd.f32 %v11560_v8, %v17525_v50 }
 0x8d7   : > { %v17666_v7 = vmax.f32 %v18368_v62, %v8713_v6  ;;  %v8716_v43 = vadd.f32 %v11563_v61, %v17527_v58  ;;  %v17669_v11 = vpop.f32.mrb[240].mxu0  ;;  %v18370_v58 = vmax.f32 %v17495_v63, %v17582_v26 }
 0x8d8   : > { %v12664_v28 = vpop.f32.mrb[241].mxu0 }
 0x8d9   : > { %v17674_v54 = vmax.f32 %v18369_v3, %v8716_v43  ;;  %v11564_v27 = vpop.f32.mrb[176].mxu1  ;;  %v17676_v57 = vpop.f32.mrb[242].mxu0 }
 0x8da   : > { %v11565_v49 = vpop.f32.mrb[177].mxu1  ;;  %v12665_v50 = vpop.f32.mrb[243].mxu0 }
 0x8db   : > { %v11566_v10 = vadd.f32 %v11565_v49, %v11564_v27  ;;  %v11567_v48 = vpop.f32.mrb[178].mxu1 }
 0x8dc   : > { %v11568_v53 = vpop.f32.mrb[179].mxu1 }
 0x8dd   : > { %v11569_v2 = vadd.f32 %v11568_v53, %v11567_v48  ;;  %v8721_v35 = vadd.f32 %v11566_v10, %v17547_v42 }
 0x8df   : > { %v17682_v52 = vmax.f32 %v18370_v58, %v8721_v35  ;;  %v8724_v21 = vadd.f32 %v11569_v2, %v17551_v4  ;;  %v17685_v17 = vpop.f32.mrb[244].mxu0  ;;  %v18372_v4 = vmax.f32 %v17503_v45, %v17594_v12  ;;  %v18374_v45 = vmax.f32 %v17513_v55, %v17608_v37 }
 0x8e0   : > { %v12668_v38 = vpop.f32.mrb[245].mxu0 }
 0x8e1   : > { %v17690_v8 = vmax.f32 %v18371_v22, %v8724_v21  ;;  %v11570_v23 = vpop.f32.mrb[180].mxu1  ;;  %v9084_v5 = vpop.f32.mrb[246].mxu0 }
 0x8e2   : > { %v11571_v61 = vpop.f32.mrb[181].mxu1  ;;  %v12669_v6 = vpop.f32.mrb[247].mxu0 }
 0x8e3   : > { %v11572_v42 = vadd.f32 %v11571_v61, %v11570_v23  ;;  %v11573_v62 = vpop.f32.mrb[182].mxu1 }
 0x8e4   : > { %v11574_v43 = vpop.f32.mrb[183].mxu1 }
 0x8e5   : > { %v11575_v63 = vadd.f32 %v11574_v43, %v11573_v62  ;;  %v8729_v26 = vadd.f32 %v11572_v42, %v17561_v19 }
 0x8e7   : > { %v17696_v28 = vmax.f32 %v18372_v4, %v8729_v26  ;;  %v8732_v3 = vadd.f32 %v11575_v63, %v17565_v60  ;;  %v9134_v26 = vld [vmem:[#allocation3 + $0xe] sm:$0xff] }
 0x8e8   : > { %v11138_v4 = vld [vmem:[%s18263_s3 + $0xc] sm:$0xf] }
 0x8e9   : > { %v17702_v39 = vmax.f32 %v18373_v0, %v8732_v3  ;;  %v11576_v27 = vpop.f32.mrb[184].mxu1 }
 0x8ea   : > { %v11577_v49 = vpop.f32.mrb[185].mxu1 }
 0x8eb   : > { %v11578_v50 = vadd.f32 %v11577_v49, %v11576_v27  ;;  %v11579_v10 = vpop.f32.mrb[186].mxu1 }
 0x8ec   : > { %v11580_v48 = vpop.f32.mrb[187].mxu1 }
 0x8ed   : > { %v11581_v53 = vadd.f32 %v11580_v48, %v11579_v10  ;;  %v8737_v19 = vadd.f32 %v11578_v50, %v17575_v31  ;;  %v9571_v10 = vsel %vm4215_vm2, %v11138_v4, 0 }
 0x8ef   : > { %v17708_v12 = vmax.f32 %v18374_v45, %v8737_v19  ;;  %v8740_v60 = vadd.f32 %v11581_v53, %v17579_v29 }
 0x8f1   : > { %v17714_v15 = vmax.f32 %v18375_v40, %v8740_v60  ;;  %v11582_v2 = vpop.f32.mrb[188].mxu1 }
 0x8f2   : > { %v11583_v35 = vpop.f32.mrb[189].mxu1 }
 0x8f3   : > { %v11584_v58 = vadd.f32 %v11583_v35, %v11582_v2  ;;  %v11585_v21 = vpop.f32.mrb[190].mxu1 }
 0x8f4   : > { %v11586_v38 = vpop.f32.mrb[191].mxu1 }
 0x8f5   : > { %v8745_v22 = vadd.f32 %v11584_v58, %v17589_v25 }
 0x8f7   : > { %v17720_v55 = vmax.f32 %v8425_v13, %v8745_v22 }
 0x8f9   : > { %v11616_v31 = vpop.f32.mrb[192].mxu1 }
 0x8fa   : > { %v11617_v37 = vpop.f32.mrb[193].mxu1 }
 0x8fb   : > { %v11618_v29 = vadd.f32 %v11617_v37, %v11616_v31  ;;  %v11619_v23 = vpop.f32.mrb[194].mxu1 }
 0x8fc   : > { %v11620_v5 = vpop.f32.mrb[195].mxu1 }
 0x8fd   : > { %v11621_v30 = vadd.f32 %v11620_v5, %v11619_v23  ;;  %v9034_v9 = vadd.f32 %v11618_v29, %v17601_v44  ;;  %v9113_v44 = vld [vmem:[#allocation3 + $0xd] sm:$0xff] }
 0x8ff   : > { %v9087_v61 = vmax.f32 %v17634_v51, %v9034_v9  ;;  %v9037_v6 = vadd.f32 %v11621_v30, %v17605_v1 }
 0x901   : > { %9100 = vst.msk [vmem:[#allocation3 + $0x18] sm:$0xff] %vm3982_vm4, %v9087_v61  ;;  %v9088_v25 = vmax.f32 %v17642_v59, %v9037_v6  ;;  %v11622_v42 = vpop.f32.mrb[196].mxu1  ;;  %v11130_v59 = vld [vmem:[%s18263_s3 + $0x8] sm:$0xf] }
 0x902   : > { %v11623_v24 = vpop.f32.mrb[197].mxu1 }
 0x903   : > { %9101 = vst.msk [vmem:[#allocation3 + $0x20] sm:$0xff] %vm3982_vm4, %v9088_v25  ;;  %v11624_v47 = vadd.f32 %v11623_v24, %v11622_v42  ;;  %v11625_v13 = vpop.f32.mrb[198].mxu1 }
 0x904   : > { %v11626_v62 = vpop.f32.mrb[199].mxu1 }
 0x905   : > { %v11627_v43 = vadd.f32 %v11626_v62, %v11625_v13  ;;  %v9042_v63 = vadd.f32 %v11624_v47, %v17615_v33 }
 0x907   : > { %v9089_v51 = vmax.f32 %v17650_v20, %v9042_v63  ;;  %v9045_v1 = vadd.f32 %v11627_v43, %v17619_v41  ;;  %v9424_v41 = vsel %vm4215_vm2, %v11130_v59, 0 }
 0x908   : > { %v9135_v3 = vld [vmem:[#allocation3 + $0x16] sm:$0xff] }
 0x909   : > { %v9114_v0 = vld [vmem:[#allocation3 + $0x15] sm:$0xff]  ;;  %9102 = vst.msk [vmem:[#allocation3 + $0x28] sm:$0xff] %vm3982_vm4, %v9089_v51  ;;  %v9090_v33 = vmax.f32 %v17658_v14, %v9045_v1  ;;  %v11628_v27 = vpop.f32.mrb[200].mxu1  ;;  %v9149_v49 = vpack.c.bf16 %v9135_v3, %v9134_v26 }
 0x90a   : > { %v9127_v50 = vpack.c.bf16 %v9114_v0, %v9113_v44  ;;  %v11629_v20 = vpop.f32.mrb[201].mxu1  ;;  %v9136_v2 = vld [vmem:[#allocation3 + $0x1e] sm:$0xff] }
 0x90b   : > { %9103 = vst.msk [vmem:[#allocation3 + $0x30] sm:$0xff] %vm3982_vm4, %v9090_v33  ;;  %v11630_v48 = vadd.f32 %v11629_v20, %v11628_v27  ;;  %v11631_v53 = vpop.f32.mrb[202].mxu1  ;;  %12673 = vmatmul.mubr.msk.bf16.vlgmr.msra.gmra.mrb[220].mxu1 %vm3982_vm4, %v9149_v49  ;;  %v9115_v58 = vld [vmem:[#allocation3 + $0x1d] sm:$0xff] }
 0x90c   : > { %12703 = vmatmul.mubr.msk.bf16.vlgmr.msra.gmra.mrb[248].mxu0 %vm3982_vm4, %v9127_v50  ;;  %v11632_v19 = vpop.f32.mrb[203].mxu1  ;;  %12676 = vmatprep.mubr.msk.bf16.mxu1 %vm13169_vm3, %v18363_v34 }
 0x90d   : > { %12706 = vmatprep.mubr.msk.bf16.mxu0 %vm13169_vm3, %v18363_v34  ;;  %v11633_v14 = vadd.f32 %v11632_v19, %v11631_v53  ;;  %v9050_v45 = vadd.f32 %v11630_v48, %v17626_v36  ;;  %12731 = vmatpush3.bf16.msra.mxu1 %v9424_v41 }
 0x90e   : > { %12761 = vmatpush3.bf16.msra.mxu0 %v9571_v10  ;;  %12790 = vmatprep.subr.bf16.mxu1 %v18363_v34 }
 0x90f   : > { %12820 = vmatprep.subr.bf16.mxu0 %v18363_v34  ;;  %v9091_v60 = vmax.f32 %v17666_v7, %v9050_v45  ;;  %v9053_v40 = vadd.f32 %v11633_v14, %v17628_v46 }
 0x910   : > { %v9137_v35 = vld [vmem:[#allocation3 + $0x26] sm:$0xff] }
 0x911   : > { %v9116_v21 = vld [vmem:[#allocation3 + $0x25] sm:$0xff]  ;;  %9104 = vst.msk [vmem:[#allocation3 + $0x38] sm:$0xff] %vm3982_vm4, %v9091_v60  ;;  %v9092_v38 = vmax.f32 %v17674_v54, %v9053_v40  ;;  %v11634_v22 = vpop.f32.mrb[204].mxu1  ;;  %v9150_v36 = vpack.c.bf16 %v9137_v35, %v9136_v2 }
 0x912   : > { %v9128_v31 = vpack.c.bf16 %v9116_v21, %v9115_v58  ;;  %v11635_v37 = vpop.f32.mrb[205].mxu1  ;;  %v9138_v9 = vld [vmem:[#allocation3 + $0x2e] sm:$0xff] }
 0x913   : > { %9105 = vst.msk [vmem:[#allocation3 + $0x40] sm:$0xff] %vm3982_vm4, %v9092_v38  ;;  %v11636_v29 = vadd.f32 %v11635_v37, %v11634_v22  ;;  %v11637_v23 = vpop.f32.mrb[206].mxu1  ;;  %12677 = vmatmul.mubr.msk.bf16.gmra.mrb[224].mxu1 %vm3982_vm4, %v9150_v36  ;;  %v9117_v6 = vld [vmem:[#allocation3 + $0x2d] sm:$0xff] }
 0x914   : > { %12707 = vmatmul.mubr.msk.bf16.gmra.mrb[252].mxu0 %vm3982_vm4, %v9128_v31  ;;  %v11638_v46 = vpop.f32.mrb[207].mxu1  ;;  %12680 = vmatprep.mubr.msk.bf16.mxu1 %vm13169_vm3, %v18363_v34 }
 0x915   : > { %12710 = vmatprep.mubr.msk.bf16.mxu0 %vm13169_vm3, %v18363_v34  ;;  %v11639_v7 = vadd.f32 %v11638_v46, %v11637_v23  ;;  %v9058_v54 = vadd.f32 %v11636_v29, %v17637_v56  ;;  %v9380_v29 = vld [vmem:[#allocation3 + $0xf] sm:$0xff]  ;;  %v9381_v23 = vld [vmem:[#allocation3 + $0x17] sm:$0xff]  ;;  %v9528_v46 = vld [vmem:[#allocation3 + $0x1f] sm:$0xff] }
 0x917   : > { %v9093_v5 = vmax.f32 %v17682_v52, %v9058_v54  ;;  %v9061_v30 = vadd.f32 %v11639_v7, %v17644_v32  ;;  %v11146_v7 = vld [vmem:[%s18263_s3 + $0x10] sm:$0xf]  ;;  %v11154_v54 = vld [vmem:[%s18263_s3 + $0x14] sm:$0xf] }
 0x918   : > { %v9139_v61 = vld [vmem:[#allocation3 + $0x36] sm:$0xff] }
 0x919   : > { %v9118_v25 = vld [vmem:[#allocation3 + $0x35] sm:$0xff]  ;;  %9106 = vst.msk [vmem:[#allocation3 + $0x48] sm:$0xff] %vm3982_vm4, %v9093_v5  ;;  %v9094_v42 = vmax.f32 %v17690_v8, %v9061_v30  ;;  %v11640_v24 = vpop.f32.mrb[208].mxu1  ;;  %v9151_v47 = vpack.c.bf16 %v9139_v61, %v9138_v9  ;;  %v9395_v5 = vpack.c.bf16 %v9381_v23, %v9380_v29  ;;  %v9542_v30 = vpack.c.bf16 %v9528_v46, %v9381_v23 }
 0x91a   : > { %v9129_v13 = vpack.c.bf16 %v9118_v25, %v9117_v6  ;;  %v11641_v62 = vpop.f32.mrb[209].mxu1  ;;  %v9140_v44 = vld [vmem:[#allocation3 + $0x3e] sm:$0xff]  ;;  %v9718_v9 = vsel %vm4215_vm2, %v11146_v7, 0  ;;  %v9865_v61 = vsel %vm4215_vm2, %v11154_v54, 0  ;;  %v9383_v6 = vld [vmem:[#allocation3 + $0x27] sm:$0xff]  ;;  %v9530_v25 = vld [vmem:[#allocation3 + $0x2f] sm:$0xff] }
 0x91b   : > { %9107 = vst.msk [vmem:[#allocation3 + $0x50] sm:$0xff] %vm3982_vm4, %v9094_v42  ;;  %v11642_v43 = vadd.f32 %v11641_v62, %v11640_v24  ;;  %v11643_v56 = vpop.f32.mrb[210].mxu1  ;;  %12681 = vmatmul.mubr.msk.bf16.gmra.mrb[228].mxu1 %vm3982_vm4, %v9151_v47  ;;  %v9119_v1 = vld [vmem:[#allocation3 + $0x3d] sm:$0xff]  ;;  %v9396_v42 = vpack.c.bf16 %v9383_v6, %v9528_v46  ;;  %v9543_v24 = vpack.c.bf16 %v9530_v25, %v9383_v6 }
 0x91c   : > { %12711 = vmatmul.mubr.msk.bf16.gmra.mrb[0].mxu0 %vm3982_vm4, %v9129_v13  ;;  %v11644_v32 = vpop.f32.mrb[211].mxu1  ;;  %12684 = vmatprep.mubr.msk.bf16.mxu1 %vm13169_vm3, %v18363_v34  ;;  %v9385_v47 = vld [vmem:[#allocation3 + $0x37] sm:$0xff]  ;;  %v9532_v13 = vld [vmem:[#allocation3 + $0x3f] sm:$0xff] }
 0x91d   : > { %12714 = vmatprep.mubr.msk.bf16.mxu0 %vm13169_vm3, %v18363_v34  ;;  %v11645_v52 = vadd.f32 %v11644_v32, %v11643_v56  ;;  %v9066_v8 = vadd.f32 %v11642_v43, %v17653_v18  ;;  %v9397_v62 = vpack.c.bf16 %v9385_v47, %v9530_v25  ;;  %v9544_v43 = vpack.c.bf16 %v9532_v13, %v9385_v47 }
 0x91f   : > { %v9095_v63 = vmax.f32 %v17696_v28, %v9066_v8  ;;  %v9069_v26 = vadd.f32 %v11645_v52, %v17660_v16 }
 0x920   : > { %v9141_v51 = vld [vmem:[#allocation3 + $0x46] sm:$0xff] }
 0x921   : > { %v9120_v59 = vld [vmem:[#allocation3 + $0x45] sm:$0xff]  ;;  %9108 = vst.msk [vmem:[#allocation3 + $0x58] sm:$0xff] %vm3982_vm4, %v9095_v63  ;;  %v9096_v4 = vmax.f32 %v17702_v39, %v9069_v26  ;;  %v11646_v3 = vpop.f32.mrb[212].mxu1  ;;  %v9152_v0 = vpack.c.bf16 %v9141_v51, %v9140_v44 }
 0x922   : > { %v9130_v33 = vpack.c.bf16 %v9120_v59, %v9119_v1  ;;  %v11647_v27 = vpop.f32.mrb[213].mxu1  ;;  %v9142_v41 = vld [vmem:[#allocation3 + $0x4e] sm:$0xff] }
 0x923   : > { %9109 = vst.msk [vmem:[#allocation3 + $0x60] sm:$0xff] %vm3982_vm4, %v9096_v4  ;;  %v11648_v49 = vadd.f32 %v11647_v27, %v11646_v3  ;;  %v11649_v18 = vpop.f32.mrb[214].mxu1  ;;  %12685 = vmatmul.mubr.msk.bf16.gmra.mrb[232].mxu1 %vm3982_vm4, %v9152_v0  ;;  %v9121_v48 = vld [vmem:[#allocation3 + $0x4d] sm:$0xff] }
 0x924   : > { %12715 = vmatmul.mubr.msk.bf16.gmra.mrb[4].mxu0 %vm3982_vm4, %v9130_v33  ;;  %v11650_v16 = vpop.f32.mrb[215].mxu1  ;;  %12688 = vmatprep.mubr.msk.bf16.mxu1 %vm13169_vm3, %v18363_v34  ;;  %v9387_v56 = vld [vmem:[#allocation3 + $0x47] sm:$0xff]  ;;  %v9534_v32 = vld [vmem:[#allocation3 + $0x4f] sm:$0xff] }
 0x925   : > { %12718 = vmatprep.mubr.msk.bf16.mxu0 %vm13169_vm3, %v18363_v34  ;;  %v11651_v28 = vadd.f32 %v11650_v16, %v11649_v18  ;;  %v9074_v39 = vadd.f32 %v11648_v49, %v17669_v11  ;;  %v9398_v52 = vpack.c.bf16 %v9387_v56, %v9532_v13  ;;  %v9545_v8 = vpack.c.bf16 %v9534_v32, %v9387_v56  ;;  %v9675_v18 = vld [vmem:[#allocation3 + $0x20] sm:$0xff]  ;;  %v10116_v13 = vld [vmem:[#allocation3 + $0x2a] sm:$0xff] }
 0x926   : > { %v17865_v16 = vld [vmem:[#allocation3 + $0x21] sm:$0xff] }
 0x927   : > { %v9097_v50 = vmax.f32 %v17708_v12, %v9074_v39  ;;  %v9077_v20 = vadd.f32 %v11651_v28, %v17676_v57  ;;  %v11162_v28 = vld [vmem:[%s18263_s3 + $0x18] sm:$0xf]  ;;  %v11170_v39 = vld [vmem:[%s18263_s3 + $0x1c] sm:$0xf] }
 0x928   : > { %v9143_v10 = vld [vmem:[#allocation3 + $0x56] sm:$0xff] }
 0x929   : > { %v9122_v53 = vld [vmem:[#allocation3 + $0x55] sm:$0xff]  ;;  %9110 = vst.msk [vmem:[#allocation3 + $0x68] sm:$0xff] %vm3982_vm4, %v9097_v50  ;;  %v9098_v19 = vmax.f32 %v17714_v15, %v9077_v20  ;;  %v11652_v14 = vpop.f32.mrb[216].mxu1  ;;  %v9153_v45 = vpack.c.bf16 %v9143_v10, %v9142_v41 }
 0x92a   : > { %v9131_v60 = vpack.c.bf16 %v9122_v53, %v9121_v48  ;;  %v11653_v40 = vpop.f32.mrb[217].mxu1  ;;  %v9144_v35 = vld [vmem:[#allocation3 + $0x5e] sm:$0xff]  ;;  %v10012_v48 = vsel %vm4215_vm2, %v11162_v28, 0  ;;  %v10159_v53 = vsel %vm4215_vm2, %v11170_v39, 0 }
 0x92b   : > { %9111 = vst.msk [vmem:[#allocation3 + $0x70] sm:$0xff] %vm3982_vm4, %v9098_v19  ;;  %v11654_v2 = vadd.f32 %v11653_v40, %v11652_v14  ;;  %12689 = vmatmul.mubr.msk.bf16.gmra.mrb[236].mxu1 %vm3982_vm4, %v9153_v45  ;;  %v11655_v11 = vpop.f32.mrb[218].mxu1  ;;  %v9123_v21 = vld [vmem:[#allocation3 + $0x5d] sm:$0xff]  ;;  %v9677_v19 = vld [vmem:[#allocation3 + $0x30] sm:$0xff]  ;;  %v9676_v45 = vld [vmem:[#allocation3 + $0x28] sm:$0xff] }
 0x92c   : > { %12719 = vmatmul.mubr.msk.bf16.gmra.mrb[8].mxu0 %vm3982_vm4, %v9131_v60  ;;  %12692 = vmatprep.mubr.msk.bf16.mxu1 %vm13169_vm3, %v18363_v34  ;;  %v11656_v57 = vpop.f32.mrb[219].mxu1  ;;  %v9389_v63 = vld [vmem:[#allocation3 + $0x57] sm:$0xff]  ;;  %v9536_v26 = vld [vmem:[#allocation3 + $0x5f] sm:$0xff]  ;;  %v9823_v60 = vld [vmem:[#allocation3 + $0x29] sm:$0xff]  ;;  %v9690_v40 = vpack.c.bf16 %v9677_v19, %v9676_v45 }
 0x92d   : > { %12722 = vmatprep.mubr.msk.bf16.mxu0 %vm13169_vm3, %v18363_v34  ;;  %v9082_v12 = vadd.f32 %v11654_v2, %v17685_v17  ;;  %v9399_v44 = vpack.c.bf16 %v9389_v63, %v9534_v32  ;;  %v9546_v51 = vpack.c.bf16 %v9536_v26, %v9389_v63  ;;  %v9674_v50 = vld [vmem:[#allocation3 + $0x18] sm:$0xff]  ;;  %v9679_v11 = vld [vmem:[#allocation3 + $0x40] sm:$0xff]  ;;  %v9983_v56 = vpack.c.bf16 %v9823_v60, %v17865_v16 }
 0x92e   : > { %v9821_v20 = vld [vmem:[#allocation3 + $0x19] sm:$0xff]  ;;  %v9689_v41 = vpack.c.bf16 %v9675_v18, %v9674_v50  ;;  %v17882_v14 = vld [vmem:[#allocation3 + $0x31] sm:$0xff]  ;;  %v17893_v57 = vld [vmem:[#allocation3 + $0x41] sm:$0xff] }
 0x92f   : > { %v9099_v15 = vmax.f32 %v17720_v55, %v9082_v12  ;;  %v9836_v10 = vpack.c.bf16 %v17865_v16, %v9821_v20  ;;  %v9837_v2 = vpack.c.bf16 %v17882_v14, %v9823_v60  ;;  %v9678_v12 = vld [vmem:[#allocation3 + $0x38] sm:$0xff]  ;;  %v9980_v19 = vld [vmem:[#allocation3 + $0x81] sm:$0xf] }
 0x930   : > { %v9145_v58 = vld [vmem:[#allocation3 + $0x66] sm:$0xff]  ;;  %v9682_v29 = vld [vmem:[#allocation3 + $0x58] sm:$0xff] }
 0x931   : > { %v9124_v38 = vld [vmem:[#allocation3 + $0x65] sm:$0xff]  ;;  %9112 = vst.msk [vmem:[#allocation3 + $0x78] sm:$0xf] %vm4023_vm6, %v9099_v15  ;;  %v9154_v22 = vpack.c.bf16 %v9145_v58, %v9144_v35  ;;  %v9825_v15 = vld [vmem:[#allocation3 + $0x39] sm:$0xff]  ;;  %v9691_v35 = vpack.c.bf16 %v9679_v11, %v9678_v12 }
 0x932   : > { %v9132_v36 = vpack.c.bf16 %v9124_v38, %v9123_v21  ;;  %v9146_v17 = vld [vmem:[#allocation3 + $0x6e] sm:$0xf]  ;;  %v9838_v58 = vpack.c.bf16 %v17893_v57, %v9825_v15  ;;  %v9829_v23 = vld [vmem:[#allocation3 + $0x59] sm:$0xff]  ;;  %v10123_v18 = vld [vmem:[#allocation3 + $0x62] sm:$0xff] }
 0x933   : > { %12693 = vmatmul.mubr.msk.bf16.gmra.mrb[240].mxu1 %vm3982_vm4, %v9154_v22  ;;  %v9125_v55 = vld [vmem:[#allocation3 + $0x6d] sm:$0xf]  ;;  %v9155_v31 = vpack.c.bf16 %v9146_v17, %v9146_v17  ;;  %v17902_v38 = vld [vmem:[#allocation3 + $0x51] sm:$0xff] }
 0x934   : > { %12723 = vmatmul.mubr.msk.bf16.gmra.mrb[12].mxu0 %vm3982_vm4, %v9132_v36  ;;  %12696 = vmatprep.mubr.msk.bf16.mxu1 %vm13169_vm3, %v18363_v34  ;;  %v9133_v37 = vpack.c.bf16 %v9125_v55, %v9125_v55  ;;  %v9391_v1 = vld [vmem:[#allocation3 + $0x67] sm:$0xff]  ;;  %v9538_v59 = vld [vmem:[#allocation3 + $0x6f] sm:$0xff] }
 0x935   : > { %12726 = vmatprep.mubr.msk.bf16.mxu0 %vm13169_vm3, %v18363_v34  ;;  %v9400_v4 = vpack.c.bf16 %v9391_v1, %v9536_v26  ;;  %v9547_v3 = vpack.c.bf16 %v9538_v59, %v9391_v1  ;;  %v9392_v0 = vld [vmem:[#allocation3 + $0x6f] sm:$0xf]  ;;  %v9984_v26 = vpack.c.bf16 %v9825_v15, %v17882_v14  ;;  %v10119_v1 = vld [vmem:[#allocation3 + $0x42] sm:$0xff] }
 0x936   : > { %v9401_v27 = vpack.c.bf16 %v9392_v0, %v9392_v0  ;;  %v9681_v21 = vld [vmem:[#allocation3 + $0x50] sm:$0xff]  ;;  %v9680_v22 = vld [vmem:[#allocation3 + $0x48] sm:$0xff]  ;;  %v10127_v14 = vld [vmem:[#allocation3 + $0x82] sm:$0xf] }
 0x937   : > { %v9827_v36 = vld [vmem:[#allocation3 + $0x49] sm:$0xff]  ;;  %v9692_v17 = vpack.c.bf16 %v9681_v21, %v9680_v22  ;;  %v10117_v63 = vld [vmem:[#allocation3 + $0x32] sm:$0xff] }
 0x938   : > { %v9539_v33 = vld [vmem:[#allocation3 + $0x77] sm:$0xf]  ;;  %v9839_v55 = vpack.c.bf16 %v17902_v38, %v9827_v36  ;;  %v9985_v59 = vpack.c.bf16 %v9827_v36, %v17893_v57  ;;  %v10263_v22 = vld [vmem:[#allocation3 + $0x2b] sm:$0xff] }
 0x939   : > { %v9548_v49 = vpack.c.bf16 %v9539_v33, %v9539_v33  ;;  %v9685_v54 = vld [vmem:[#allocation3 + $0x70] sm:$0xff]  ;;  %v9686_v25 = vld [vmem:[#allocation3 + $0x78] sm:$0xf]  ;;  %v9986_v33 = vpack.c.bf16 %v9829_v23, %v17902_v38 }
 0x93a   : > { %v10121_v0 = vld [vmem:[#allocation3 + $0x52] sm:$0xff]  ;;  %v10126_v20 = vld [vmem:[#allocation3 + $0x7a] sm:$0xff] }
 0x93b   : > { %12697 = vmatmul.mubr.msk.bf16.gmra.mrb[244].mxu1 %vm3982_vm4, %v9155_v31  ;;  %v9683_v31 = vld [vmem:[#allocation3 + $0x60] sm:$0xff]  ;;  %v10125_v50 = vld [vmem:[#allocation3 + $0x72] sm:$0xff] }
 0x93c   : > { %12727 = vmatmul.mubr.msk.bf16.gmra.mrb[16].mxu0 %vm3982_vm4, %v9133_v37  ;;  %12732 = vmatprep.mubr.msk.bf16.mxu1 %vm13169_vm3, %v18363_v34  ;;  %v17911_v37 = vld [vmem:[#allocation3 + $0x61] sm:$0xff]  ;;  %v9693_v46 = vpack.c.bf16 %v9683_v31, %v9682_v29  ;;  %v9979_v39 = vld [vmem:[#allocation3 + $0x79] sm:$0xff] }
 0x93d   : > { %12762 = vmatprep.mubr.msk.bf16.mxu0 %vm13169_vm3, %v18363_v34  ;;  %v9840_v7 = vpack.c.bf16 %v17911_v37, %v9829_v23  ;;  %v10262_v29 = vld [vmem:[#allocation3 + $0x23] sm:$0xff] }
 0x943   : > { %12733 = vmatmul.mubr.msk.bf16.vlgmr.msra.gmra.mrb[248].mxu1 %vm3982_vm4, %v9395_v5  ;;  %v17920_v5 = vld [vmem:[#allocation3 + $0x71] sm:$0xff] }
 0x944   : > { %12763 = vmatmul.mubr.msk.bf16.vlgmr.msra.gmra.mrb[20].mxu0 %vm3982_vm4, %v9542_v30  ;;  %12736 = vmatprep.mubr.msk.bf16.mxu1 %vm13169_vm3, %v18363_v34  ;;  %v9684_v30 = vld [vmem:[#allocation3 + $0x68] sm:$0xff] }
 0x945   : > { %12766 = vmatprep.mubr.msk.bf16.mxu0 %vm13169_vm3, %v18363_v34  ;;  %12791 = vmatpush3.bf16.msra.mxu1 %v9718_v9  ;;  %v9831_v9 = vld [vmem:[#allocation3 + $0x69] sm:$0xff] }
 0x946   : > { %12821 = vmatpush3.bf16.msra.mxu0 %v9865_v61  ;;  %12850 = vmatprep.subr.bf16.mxu1 %v18363_v34  ;;  %v9694_v61 = vpack.c.bf16 %v9685_v54, %v9684_v30  ;;  %v9841_v6 = vpack.c.bf16 %v17920_v5, %v9831_v9  ;;  %v9987_v16 = vpack.c.bf16 %v9831_v9, %v17911_v37  ;;  %v10265_v9 = vld [vmem:[#allocation3 + $0x3b] sm:$0xff] }
 0x947   : > { %12880 = vmatprep.subr.bf16.mxu0 %v18363_v34  ;;  %v10277_v54 = vpack.c.bf16 %v10263_v22, %v10262_v29  ;;  %v10273_v29 = vld [vmem:[#allocation3 + $0x7b] sm:$0xff] }
 0x94b   : > { %12737 = vmatmul.mubr.msk.bf16.gmra.mrb[252].mxu1 %vm3982_vm4, %v9396_v42  ;;  %v9833_v42 = vld [vmem:[#allocation3 + $0x79] sm:$0xf] }
 0x94c   : > { %12767 = vmatmul.mubr.msk.bf16.gmra.mrb[24].mxu0 %vm3982_vm4, %v9543_v24  ;;  %12740 = vmatprep.mubr.msk.bf16.mxu1 %vm13169_vm3, %v18363_v34  ;;  %v9695_v24 = vpack.c.bf16 %v9686_v25, %v9686_v25  ;;  %v9842_v47 = vpack.c.bf16 %v9833_v42, %v9833_v42 }
 0x94d   : > { %12770 = vmatprep.mubr.msk.bf16.mxu0 %vm13169_vm3, %v18363_v34 }
 0x953   : > { %12741 = vmatmul.mubr.msk.bf16.gmra.mrb[0].mxu1 %vm3982_vm4, %v9397_v62  ;;  %v11178_v62 = vld [vmem:[%s18263_s3 + $0x20] sm:$0xf] }
 0x954   : > { %12771 = vmatmul.mubr.msk.bf16.gmra.mrb[28].mxu0 %vm3982_vm4, %v9544_v43  ;;  %12744 = vmatprep.mubr.msk.bf16.mxu1 %vm13169_vm3, %v18363_v34  ;;  %v10115_v43 = vld [vmem:[#allocation3 + $0x22] sm:$0xff] }
 0x955   : > { %12774 = vmatprep.mubr.msk.bf16.mxu0 %vm13169_vm3, %v18363_v34  ;;  %v10130_v32 = vpack.c.bf16 %v10116_v13, %v10115_v43 }
 0x95b   : > { %12745 = vmatmul.mubr.msk.bf16.gmra.mrb[4].mxu1 %vm3982_vm4, %v9398_v52  ;;  %v10306_v52 = vsel %vm4215_vm2, %v11178_v62, 0 }
 0x95c   : > { %12775 = vmatmul.mubr.msk.bf16.gmra.mrb[32].mxu0 %vm3982_vm4, %v9545_v8  ;;  %12748 = vmatprep.mubr.msk.bf16.mxu1 %vm13169_vm3, %v18363_v34  ;;  %v10118_v8 = vld [vmem:[#allocation3 + $0x3a] sm:$0xff] }
 0x95d   : > { %12778 = vmatprep.mubr.msk.bf16.mxu0 %vm13169_vm3, %v18363_v34 }
 0x963   : > { %12749 = vmatmul.mubr.msk.bf16.gmra.mrb[8].mxu1 %vm3982_vm4, %v9399_v44  ;;  %v10131_v44 = vpack.c.bf16 %v10118_v8, %v10117_v63  ;;  %v10267_v8 = vld [vmem:[#allocation3 + $0x4b] sm:$0xff] }
 0x964   : > { %12779 = vmatmul.mubr.msk.bf16.gmra.mrb[36].mxu0 %vm3982_vm4, %v9546_v51  ;;  %12752 = vmatprep.mubr.msk.bf16.mxu1 %vm13169_vm3, %v18363_v34  ;;  %v10120_v51 = vld [vmem:[#allocation3 + $0x4a] sm:$0xff] }
 0x965   : > { %12782 = vmatprep.mubr.msk.bf16.mxu0 %vm13169_vm3, %v18363_v34 }
 0x96b   : > { %12753 = vmatmul.mubr.msk.bf16.gmra.mrb[12].mxu1 %vm3982_vm4, %v9400_v4  ;;  %v10132_v4 = vpack.c.bf16 %v10120_v51, %v10119_v1 }
 0x96c   : > { %12783 = vmatmul.mubr.msk.bf16.gmra.mrb[40].mxu0 %vm3982_vm4, %v9547_v3  ;;  %12756 = vmatprep.mubr.msk.bf16.mxu1 %vm13169_vm3, %v18363_v34  ;;  %v10122_v3 = vld [vmem:[#allocation3 + $0x5a] sm:$0xff] }
 0x96d   : > { %12786 = vmatprep.mubr.msk.bf16.mxu0 %vm13169_vm3, %v18363_v34 }
 0x973   : > { %12757 = vmatmul.mubr.msk.bf16.gmra.mrb[16].mxu1 %vm3982_vm4, %v9401_v27  ;;  %v10133_v27 = vpack.c.bf16 %v10122_v3, %v10121_v0 }
 0x974   : > { %12787 = vmatmul.mubr.msk.bf16.gmra.mrb[44].mxu0 %vm3982_vm4, %v9548_v49  ;;  %12792 = vmatprep.mubr.msk.bf16.mxu1 %vm13169_vm3, %v18363_v34  ;;  %v10124_v49 = vld [vmem:[#allocation3 + $0x6a] sm:$0xff] }
 0x975   : > { %12822 = vmatprep.mubr.msk.bf16.mxu0 %vm13169_vm3, %v18363_v34  ;;  %v10134_v28 = vpack.c.bf16 %v10124_v49, %v10123_v18  ;;  %v10269_v18 = vld [vmem:[#allocation3 + $0x5b] sm:$0xff] }
 0x97b   : > { %12793 = vmatmul.mubr.msk.bf16.vlgmr.msra.gmra.mrb[20].mxu1 %vm3982_vm4, %v9689_v41  ;;  %v9988_v41 = vpack.c.bf16 %v9979_v39, %v17920_v5 }
 0x97c   : > { %12823 = vmatmul.mubr.msk.bf16.vlgmr.msra.gmra.mrb[48].mxu0 %vm3982_vm4, %v9836_v10  ;;  %12796 = vmatprep.mubr.msk.bf16.mxu1 %vm13169_vm3, %v18363_v34  ;;  %v10135_v10 = vpack.c.bf16 %v10126_v20, %v10125_v50 }
 0x97d   : > { %12826 = vmatprep.mubr.msk.bf16.mxu0 %vm13169_vm3, %v18363_v34  ;;  %12851 = vmatpush3.bf16.msra.mxu1 %v10012_v48 }
 0x97e   : > { %12881 = vmatpush3.bf16.msra.mxu0 %v10159_v53  ;;  %12910 = vmatprep.subr.bf16.mxu1 %v18363_v34 }
 0x97f   : > { %12940 = vmatprep.subr.bf16.mxu0 %v18363_v34 }
 0x983   : > { %12797 = vmatmul.mubr.msk.bf16.gmra.mrb[24].mxu1 %vm3982_vm4, %v9690_v40 }
 0x984   : > { %12827 = vmatmul.mubr.msk.bf16.gmra.mrb[52].mxu0 %vm3982_vm4, %v9837_v2  ;;  %12800 = vmatprep.mubr.msk.bf16.mxu1 %vm13169_vm3, %v18363_v34 }
 0x985   : > { %12830 = vmatprep.mubr.msk.bf16.mxu0 %vm13169_vm3, %v18363_v34 }
 0x98b   : > { %12801 = vmatmul.mubr.msk.bf16.gmra.mrb[28].mxu1 %vm3982_vm4, %v9691_v35  ;;  %v9989_v35 = vpack.c.bf16 %v9980_v19, %v9980_v19 }
 0x98c   : > { %12831 = vmatmul.mubr.msk.bf16.gmra.mrb[56].mxu0 %vm3982_vm4, %v9838_v58  ;;  %12804 = vmatprep.mubr.msk.bf16.mxu1 %vm13169_vm3, %v18363_v34  ;;  %v10136_v58 = vpack.c.bf16 %v10127_v14, %v10127_v14 }
 0x98d   : > { %12834 = vmatprep.mubr.msk.bf16.mxu0 %vm13169_vm3, %v18363_v34 }
 0x993   : > { %12805 = vmatmul.mubr.msk.bf16.gmra.mrb[32].mxu1 %vm3982_vm4, %v9692_v17 }
 0x994   : > { %12835 = vmatmul.mubr.msk.bf16.gmra.mrb[60].mxu0 %vm3982_vm4, %v9839_v55  ;;  %12808 = vmatprep.mubr.msk.bf16.mxu1 %vm13169_vm3, %v18363_v34 }
 0x995   : > { %12838 = vmatprep.mubr.msk.bf16.mxu0 %vm13169_vm3, %v18363_v34 }
 0x99b   : > { %12809 = vmatmul.mubr.msk.bf16.gmra.mrb[36].mxu1 %vm3982_vm4, %v9693_v46 }
 0x99c   : > { %12839 = vmatmul.mubr.msk.bf16.gmra.mrb[64].mxu0 %vm3982_vm4, %v9840_v7  ;;  %12812 = vmatprep.mubr.msk.bf16.mxu1 %vm13169_vm3, %v18363_v34 }
 0x99d   : > { %12842 = vmatprep.mubr.msk.bf16.mxu0 %vm13169_vm3, %v18363_v34 }
 0x9a3   : > { %12813 = vmatmul.mubr.msk.bf16.gmra.mrb[40].mxu1 %vm3982_vm4, %v9694_v61 }
 0x9a4   : > { %12843 = vmatmul.mubr.msk.bf16.gmra.mrb[68].mxu0 %vm3982_vm4, %v9841_v6  ;;  %12816 = vmatprep.mubr.msk.bf16.mxu1 %vm13169_vm3, %v18363_v34 }
 0x9a5   : > { %12846 = vmatprep.mubr.msk.bf16.mxu0 %vm13169_vm3, %v18363_v34 }
 0x9ab   : > { %12817 = vmatmul.mubr.msk.bf16.gmra.mrb[44].mxu1 %vm3982_vm4, %v9695_v24 }
 0x9ac   : > { %12847 = vmatmul.mubr.msk.bf16.gmra.mrb[72].mxu0 %vm3982_vm4, %v9842_v47  ;;  %12852 = vmatprep.mubr.msk.bf16.mxu1 %vm13169_vm3, %v18363_v34  ;;  %v10264_v47 = vld [vmem:[#allocation3 + $0x33] sm:$0xff] }
 0x9ad   : > { %12882 = vmatprep.mubr.msk.bf16.mxu0 %vm13169_vm3, %v18363_v34 }
 0x9b3   : > { %12853 = vmatmul.mubr.msk.bf16.vlgmr.msra.gmra.mrb[48].mxu1 %vm3982_vm4, %v9983_v56  ;;  %v10278_v56 = vpack.c.bf16 %v10265_v9, %v10264_v47  ;;  %v10274_v47 = vld [vmem:[#allocation3 + $0x83] sm:$0xf] }
 0x9b4   : > { %12883 = vmatmul.mubr.msk.bf16.vlgmr.msra.gmra.mrb[76].mxu0 %vm3982_vm4, %v10130_v32  ;;  %12856 = vmatprep.mubr.msk.bf16.mxu1 %vm13169_vm3, %v18363_v34 }
 0x9b5   : > { %12886 = vmatprep.mubr.msk.bf16.mxu0 %vm13169_vm3, %v18363_v34  ;;  %12911 = vmatpush3.bf16.msra.mxu1 %v10306_v52 }
 0x9bb   : > { %12857 = vmatmul.mubr.msk.bf16.gmra.mrb[52].mxu1 %vm3982_vm4, %v9984_v26 }
 0x9bc   : > { %12887 = vmatmul.mubr.msk.bf16.gmra.mrb[80].mxu0 %vm3982_vm4, %v10131_v44  ;;  %12860 = vmatprep.mubr.msk.bf16.mxu1 %vm13169_vm3, %v18363_v34 }
 0x9bd   : > { %12890 = vmatprep.mubr.msk.bf16.mxu0 %vm13169_vm3, %v18363_v34 }
 0x9c3   : > { %12861 = vmatmul.mubr.msk.bf16.gmra.mrb[56].mxu1 %vm3982_vm4, %v9985_v59  ;;  %v10266_v59 = vld [vmem:[#allocation3 + $0x43] sm:$0xff] }
 0x9c4   : > { %12891 = vmatmul.mubr.msk.bf16.gmra.mrb[84].mxu0 %vm3982_vm4, %v10132_v4  ;;  %12864 = vmatprep.mubr.msk.bf16.mxu1 %vm13169_vm3, %v18363_v34 }
 0x9c5   : > { %12894 = vmatprep.mubr.msk.bf16.mxu0 %vm13169_vm3, %v18363_v34 }
 0x9cb   : > { %12865 = vmatmul.mubr.msk.bf16.gmra.mrb[60].mxu1 %vm3982_vm4, %v9986_v33  ;;  %v10279_v33 = vpack.c.bf16 %v10267_v8, %v10266_v59 }
 0x9cc   : > { %12895 = vmatmul.mubr.msk.bf16.gmra.mrb[88].mxu0 %vm3982_vm4, %v10133_v27  ;;  %12868 = vmatprep.mubr.msk.bf16.mxu1 %vm13169_vm3, %v18363_v34 }
 0x9cd   : > { %12898 = vmatprep.mubr.msk.bf16.mxu0 %vm13169_vm3, %v18363_v34 }
 0x9d3   : > { %12869 = vmatmul.mubr.msk.bf16.gmra.mrb[64].mxu1 %vm3982_vm4, %v9987_v16 }
 0x9d4   : > { %12899 = vmatmul.mubr.msk.bf16.gmra.mrb[92].mxu0 %vm3982_vm4, %v10134_v28  ;;  %12872 = vmatprep.mubr.msk.bf16.mxu1 %vm13169_vm3, %v18363_v34 }
 0x9d5   : > { %12902 = vmatprep.mubr.msk.bf16.mxu0 %vm13169_vm3, %v18363_v34 }
 0x9db   : > { %12873 = vmatmul.mubr.msk.bf16.gmra.mrb[68].mxu1 %vm3982_vm4, %v9988_v41  ;;  %v10268_v41 = vld [vmem:[#allocation3 + $0x53] sm:$0xff] }
 0x9dc   : > { %12903 = vmatmul.mubr.msk.bf16.gmra.mrb[96].mxu0 %vm3982_vm4, %v10135_v10  ;;  %12876 = vmatprep.mubr.msk.bf16.mxu1 %vm13169_vm3, %v18363_v34  ;;  %v10280_v19 = vpack.c.bf16 %v10269_v18, %v10268_v41 }
 0x9dd   : > { %12906 = vmatprep.mubr.msk.bf16.mxu0 %vm13169_vm3, %v18363_v34 }
 0x9de   : > { %v9214_v48 = vpop.f32.mrb[220].mxu1 }
 0x9df   : > { %v9326_v53 = vpop.f32.mrb[248].mxu0  ;;  %v12674_v60 = vpop.f32.mrb[221].mxu1 }
 0x9e0   : > { %v17981_v45 = vadd.f32 %v9326_v53, %v9214_v48  ;;  %v12704_v40 = vpop.f32.mrb[249].mxu0  ;;  %v9217_v2 = vpop.f32.mrb[222].mxu1 }
 0x9e1   : > { %v9329_v11 = vpop.f32.mrb[250].mxu0  ;;  %v12675_v12 = vpop.f32.mrb[223].mxu1  ;;  %v10271_v40 = vld [vmem:[#allocation3 + $0x6b] sm:$0xff] }
 0x9e2   : > { %v17983_v57 = vadd.f32 %v9329_v11, %v9217_v2  ;;  %v12705_v15 = vpop.f32.mrb[251].mxu0 }
 0x9e3   : > { %12877 = vmatmul.mubr.msk.bf16.gmra.mrb[72].mxu1 %vm3982_vm4, %v9989_v35 }
 0x9e4   : > { %12907 = vmatmul.mubr.msk.bf16.gmra.mrb[100].mxu0 %vm3982_vm4, %v10136_v58  ;;  %12912 = vmatprep.mubr.msk.bf16.mxu1 %vm13169_vm3, %v18363_v34  ;;  %v10270_v58 = vld [vmem:[#allocation3 + $0x63] sm:$0xff] }
 0x9e5   : > { %12942 = vmatprep.mubr.msk.bf16.mxu0 %vm13169_vm3, %v18363_v34 }
 0x9e6   : > { %v9222_v21 = vpop.f32.mrb[224].mxu1 }
 0x9e7   : > { %v9334_v38 = vpop.f32.mrb[252].mxu0  ;;  %v12678_v17 = vpop.f32.mrb[225].mxu1 }
 0x9e8   : > { %v17991_v36 = vadd.f32 %v9334_v38, %v9222_v21  ;;  %v12708_v55 = vpop.f32.mrb[253].mxu0  ;;  %v9225_v31 = vpop.f32.mrb[226].mxu1  ;;  %v10281_v17 = vpack.c.bf16 %v10271_v40, %v10270_v58 }
 0x9e9   : > { %v9337_v37 = vpop.f32.mrb[254].mxu0  ;;  %v12679_v46 = vpop.f32.mrb[227].mxu1 }
 0x9ea   : > { %v17993_v23 = vadd.f32 %v9337_v37, %v9225_v31  ;;  %v12709_v7 = vpop.f32.mrb[255].mxu0  ;;  %v10272_v37 = vld [vmem:[#allocation3 + $0x73] sm:$0xff] }
 0x9eb   : > { %12913 = vmatmul.mubr.msk.bf16.vlgmr.msra.gmra.mrb[76].mxu1 %vm3982_vm4, %v10277_v54 }
 0x9ec   : > { %12916 = vmatprep.mubr.msk.bf16.mxu1 %vm13169_vm3, %v18363_v34 }
 0x9ee   : > { %v9230_v5 = vpop.f32.mrb[228].mxu1 }
 0x9ef   : > { %v9342_v30 = vpop.f32.mrb[0].mxu0  ;;  %v12682_v6 = vpop.f32.mrb[229].mxu1 }
 0x9f0   : > { %v17998_v61 = vadd.f32 %v9342_v30, %v9230_v5  ;;  %v12712_v25 = vpop.f32.mrb[1].mxu0  ;;  %v9233_v42 = vpop.f32.mrb[230].mxu1 }
 0x9f1   : > { %v9345_v24 = vpop.f32.mrb[2].mxu0  ;;  %v12683_v62 = vpop.f32.mrb[231].mxu1  ;;  %v10282_v25 = vpack.c.bf16 %v10273_v29, %v10272_v37 }
 0x9f2   : > { %v18000_v13 = vadd.f32 %v9345_v24, %v9233_v42  ;;  %v12713_v43 = vpop.f32.mrb[3].mxu0 }
 0x9f3   : > { %12917 = vmatmul.mubr.msk.bf16.gmra.mrb[80].mxu1 %vm3982_vm4, %v10278_v56 }
 0x9f4   : > { %12920 = vmatprep.mubr.msk.bf16.mxu1 %vm13169_vm3, %v18363_v34 }
 0x9f6   : > { %v9238_v32 = vpop.f32.mrb[232].mxu1 }
 0x9f7   : > { %v9350_v52 = vpop.f32.mrb[4].mxu0  ;;  %v12686_v26 = vpop.f32.mrb[233].mxu1 }
 0x9f8   : > { %v18005_v63 = vadd.f32 %v9350_v52, %v9238_v32  ;;  %v12716_v44 = vpop.f32.mrb[5].mxu0  ;;  %v9241_v51 = vpop.f32.mrb[234].mxu1 }
 0x9f9   : > { %v9353_v1 = vpop.f32.mrb[6].mxu0  ;;  %v12687_v3 = vpop.f32.mrb[235].mxu1 }
 0x9fa   : > { %v18007_v4 = vadd.f32 %v9353_v1, %v9241_v51  ;;  %v12717_v0 = vpop.f32.mrb[7].mxu0  ;;  %v10283_v1 = vpack.c.bf16 %v10274_v47, %v10274_v47 }
 0x9fb   : > { %12921 = vmatmul.mubr.msk.bf16.gmra.mrb[84].mxu1 %vm3982_vm4, %v10279_v33 }
 0x9fc   : > { %12924 = vmatprep.mubr.msk.bf16.mxu1 %vm13169_vm3, %v18363_v34 }
 0x9fe   : > { %v9246_v27 = vpop.f32.mrb[236].mxu1 }
 0x9ff   : > { %v9358_v49 = vpop.f32.mrb[8].mxu0  ;;  %v12690_v28 = vpop.f32.mrb[237].mxu1 }
 0xa00   : > { %v18012_v16 = vadd.f32 %v9358_v49, %v9246_v27  ;;  %v12720_v39 = vpop.f32.mrb[9].mxu0  ;;  %v9249_v50 = vpop.f32.mrb[238].mxu1 }
 0xa01   : > { %v9361_v20 = vpop.f32.mrb[10].mxu0  ;;  %v12691_v48 = vpop.f32.mrb[239].mxu1 }
 0xa02   : > { %v18014_v10 = vadd.f32 %v9361_v20, %v9249_v50  ;;  %v12721_v53 = vpop.f32.mrb[11].mxu0 }
 0xa03   : > { %12925 = vmatmul.mubr.msk.bf16.gmra.mrb[88].mxu1 %vm3982_vm4, %v10280_v19 }
 0xa04   : > { %12928 = vmatprep.mubr.msk.bf16.mxu1 %vm13169_vm3, %v18363_v34 }
 0xa06   : > { %v9254_v14 = vpop.f32.mrb[240].mxu1 }
 0xa07   : > { %v9366_v60 = vpop.f32.mrb[12].mxu0  ;;  %v12694_v11 = vpop.f32.mrb[241].mxu1 }
 0xa08   : > { %v18019_v2 = vadd.f32 %v9366_v60, %v9254_v14  ;;  %v12724_v12 = vpop.f32.mrb[13].mxu0  ;;  %v9257_v15 = vpop.f32.mrb[242].mxu1 }
 0xa09   : > { %v9369_v35 = vpop.f32.mrb[14].mxu0  ;;  %v12695_v38 = vpop.f32.mrb[243].mxu1 }
 0xa0a   : > { %v18021_v21 = vadd.f32 %v9369_v35, %v9257_v15  ;;  %v12725_v22 = vpop.f32.mrb[15].mxu0 }
 0xa0b   : > { %12929 = vmatmul.mubr.msk.bf16.gmra.mrb[92].mxu1 %vm3982_vm4, %v10281_v17 }
 0xa0c   : > { %12932 = vmatprep.mubr.msk.bf16.mxu1 %vm13169_vm3, %v18363_v34 }
 0xa0e   : > { %v9262_v55 = vpop.f32.mrb[244].mxu1 }
 0xa0f   : > { %v9374_v31 = vpop.f32.mrb[16].mxu0  ;;  %v12698_v7 = vpop.f32.mrb[245].mxu1 }
 0xa10   : > { %v18026_v46 = vadd.f32 %v9374_v31, %v9262_v55  ;;  %v12728_v54 = vpop.f32.mrb[17].mxu0  ;;  %v9265_v5 = vpop.f32.mrb[246].mxu1 }
 0xa11   : > { %v9377_v30 = vpop.f32.mrb[18].mxu0  ;;  %v12699_v9 = vpop.f32.mrb[247].mxu1 }
 0xa12   : > { %v12729_v6 = vpop.f32.mrb[19].mxu0 }
 0xa13   : > { %12933 = vmatmul.mubr.msk.bf16.gmra.mrb[96].mxu1 %vm3982_vm4, %v10282_v25 }
 0xa14   : > { %12936 = vmatprep.mubr.msk.bf16.mxu1 %vm13169_vm3, %v18363_v34 }
 0xa16   : > { %v9460_v42 = vpop.f32.mrb[248].mxu1 }
 0xa17   : > { %v9607_v24 = vpop.f32.mrb[20].mxu0  ;;  %v9514_v62 = vadd.f32 %v9460_v42, %v17981_v45  ;;  %v12734_v43 = vpop.f32.mrb[249].mxu1 }
 0xa18   : > { %v12764_v56 = vpop.f32.mrb[21].mxu0  ;;  %v9463_v32 = vpop.f32.mrb[250].mxu1 }
 0xa19   : > { %v9610_v52 = vpop.f32.mrb[22].mxu0  ;;  %v18032_v8 = vadd.f32 %v9607_v24, %v9514_v62  ;;  %v9515_v26 = vadd.f32 %v9463_v32, %v17983_v57  ;;  %v12735_v44 = vpop.f32.mrb[251].mxu1 }
 0xa1a   : > { %v12765_v51 = vpop.f32.mrb[23].mxu0 }
 0xa1b   : > { %v18035_v59 = vadd.f32 %v9610_v52, %v9515_v26  ;;  %12937 = vmatmul.mubr.msk.bf16.gmra.mrb[100].mxu1 %vm3982_vm4, %v10283_v1 }
 0xa1e   : > { %v9468_v34 = vpop.f32.mrb[252].mxu1 }
 0xa1f   : > { %v9615_v3 = vpop.f32.mrb[24].mxu0  ;;  %v9516_v0 = vadd.f32 %v9468_v34, %v17991_v36  ;;  %v12738_v45 = vpop.f32.mrb[253].mxu1 }
 0xa20   : > { %v12768_v33 = vpop.f32.mrb[25].mxu0  ;;  %v9471_v27 = vpop.f32.mrb[254].mxu1 }
 0xa21   : > { %v9618_v49 = vpop.f32.mrb[26].mxu0  ;;  %v18039_v18 = vadd.f32 %v9615_v3, %v9516_v0  ;;  %v9517_v28 = vadd.f32 %v9471_v27, %v17993_v23  ;;  %v12739_v57 = vpop.f32.mrb[255].mxu1 }
 0xa22   : > { %v12769_v39 = vpop.f32.mrb[27].mxu0 }
 0xa23   : > { %v18042_v50 = vadd.f32 %v9618_v49, %v9517_v28 }
 0xa26   : > { %v9476_v20 = vpop.f32.mrb[0].mxu1 }
 0xa27   : > { %v9623_v41 = vpop.f32.mrb[28].mxu0  ;;  %v9518_v48 = vadd.f32 %v9476_v20, %v17998_v61  ;;  %v12742_v53 = vpop.f32.mrb[1].mxu1 }
 0xa28   : > { %v12772_v19 = vpop.f32.mrb[29].mxu0  ;;  %v9479_v14 = vpop.f32.mrb[2].mxu1 }
 0xa29   : > { %v9626_v36 = vpop.f32.mrb[30].mxu0  ;;  %v18045_v60 = vadd.f32 %v9623_v41, %v9518_v48  ;;  %v9519_v40 = vadd.f32 %v9479_v14, %v18000_v13  ;;  %v12743_v11 = vpop.f32.mrb[3].mxu1 }
 0xa2a   : > { %v12773_v12 = vpop.f32.mrb[31].mxu0 }
 0xa2b   : > { %v18048_v15 = vadd.f32 %v9626_v36, %v9519_v40 }
 0xa2e   : > { %v9484_v23 = vpop.f32.mrb[4].mxu1 }
 0xa2f   : > { %v9631_v35 = vpop.f32.mrb[32].mxu0  ;;  %v9520_v58 = vadd.f32 %v9484_v23, %v18005_v63  ;;  %v12746_v38 = vpop.f32.mrb[5].mxu1 }
 0xa30   : > { %v12776_v22 = vpop.f32.mrb[33].mxu0  ;;  %v9487_v17 = vpop.f32.mrb[6].mxu1 }
 0xa31   : > { %v9634_v61 = vpop.f32.mrb[34].mxu0  ;;  %v18051_v55 = vadd.f32 %v9631_v35, %v9520_v58  ;;  %v9521_v31 = vadd.f32 %v9487_v17, %v18007_v4  ;;  %v12747_v37 = vpop.f32.mrb[7].mxu1 }
 0xa32   : > { %v12777_v29 = vpop.f32.mrb[35].mxu0 }
 0xa33   : > { %v18054_v7 = vadd.f32 %v9634_v61, %v9521_v31 }
 0xa36   : > { %v9492_v13 = vpop.f32.mrb[8].mxu1 }
 0xa37   : > { %v9639_v54 = vpop.f32.mrb[36].mxu0  ;;  %v9522_v5 = vadd.f32 %v9492_v13, %v18012_v16  ;;  %v12750_v30 = vpop.f32.mrb[9].mxu1 }
 0xa38   : > { %v12780_v9 = vpop.f32.mrb[37].mxu0  ;;  %v9495_v6 = vpop.f32.mrb[10].mxu1 }
 0xa39   : > { %v9642_v63 = vpop.f32.mrb[38].mxu0  ;;  %v18057_v25 = vadd.f32 %v9639_v54, %v9522_v5  ;;  %v9523_v42 = vadd.f32 %v9495_v6, %v18014_v10  ;;  %v12751_v24 = vpop.f32.mrb[11].mxu1 }
 0xa3a   : > { %v12781_v47 = vpop.f32.mrb[39].mxu0 }
 0xa3b   : > { %v18060_v62 = vadd.f32 %v9642_v63, %v9523_v42 }
 0xa3e   : > { %v9500_v4 = vpop.f32.mrb[12].mxu1 }
 0xa3f   : > { %v9647_v43 = vpop.f32.mrb[40].mxu0  ;;  %v9524_v56 = vadd.f32 %v9500_v4, %v18019_v2  ;;  %v12754_v32 = vpop.f32.mrb[13].mxu1 }
 0xa40   : > { %v12784_v52 = vpop.f32.mrb[41].mxu0  ;;  %v9503_v26 = vpop.f32.mrb[14].mxu1 }
 0xa41   : > { %v9650_v16 = vpop.f32.mrb[42].mxu0  ;;  %v18063_v44 = vadd.f32 %v9647_v43, %v9524_v56  ;;  %v9525_v51 = vadd.f32 %v9503_v26, %v18021_v21  ;;  %v12755_v1 = vpop.f32.mrb[15].mxu1 }
 0xa42   : > { %v12785_v34 = vpop.f32.mrb[43].mxu0 }
 0xa43   : > { %v18066_v3 = vadd.f32 %v9650_v16, %v9525_v51 }
 0xa46   : > { %v9508_v10 = vpop.f32.mrb[16].mxu1 }
 0xa47   : > { %v9655_v0 = vpop.f32.mrb[44].mxu0  ;;  %v9526_v45 = vadd.f32 %v9508_v10, %v18026_v46  ;;  %v12758_v33 = vpop.f32.mrb[17].mxu1 }
 0xa48   : > { %v12788_v27 = vpop.f32.mrb[45].mxu0  ;;  %v9511_v49 = vpop.f32.mrb[18].mxu1 }
 0xa49   : > { %v9658_v2 = vpop.f32.mrb[46].mxu0  ;;  %v18069_v28 = vadd.f32 %v9655_v0, %v9526_v45  ;;  %v12759_v57 = vpop.f32.mrb[19].mxu1 }
 0xa4a   : > { %v12789_v39 = vpop.f32.mrb[47].mxu0 }
 0xa4e   : > { %v9754_v20 = vpop.f32.mrb[20].mxu1 }
 0xa4f   : > { %v9901_v41 = vpop.f32.mrb[48].mxu0  ;;  %v9808_v21 = vadd.f32 %v9754_v20, %v18032_v8  ;;  %v12794_v48 = vpop.f32.mrb[21].mxu1 }
 0xa50   : > { %v12824_v53 = vpop.f32.mrb[49].mxu0  ;;  %v9757_v19 = vpop.f32.mrb[22].mxu1 }
 0xa51   : > { %v9904_v14 = vpop.f32.mrb[50].mxu0  ;;  %v18072_v36 = vadd.f32 %v9901_v41, %v9808_v21  ;;  %v9809_v46 = vadd.f32 %v9757_v19, %v18035_v59  ;;  %v12795_v40 = vpop.f32.mrb[23].mxu1 }
 0xa52   : > { %v12825_v11 = vpop.f32.mrb[51].mxu0 }
 0xa53   : > { %v18075_v12 = vadd.f32 %v9904_v14, %v9809_v46 }
 0xa56   : > { %v9762_v23 = vpop.f32.mrb[24].mxu1 }
 0xa57   : > { %v9909_v35 = vpop.f32.mrb[52].mxu0  ;;  %v9810_v58 = vadd.f32 %v9762_v23, %v18039_v18  ;;  %v12798_v38 = vpop.f32.mrb[25].mxu1 }
 0xa58   : > { %v12828_v22 = vpop.f32.mrb[53].mxu0  ;;  %v9765_v17 = vpop.f32.mrb[26].mxu1 }
 0xa59   : > { %v9912_v8 = vpop.f32.mrb[54].mxu0  ;;  %v18078_v61 = vadd.f32 %v9909_v35, %v9810_v58  ;;  %v9811_v31 = vadd.f32 %v9765_v17, %v18042_v50  ;;  %v12799_v37 = vpop.f32.mrb[27].mxu1 }
 0xa5a   : > { %v12829_v29 = vpop.f32.mrb[55].mxu0 }
 0xa5b   : > { %v18081_v13 = vadd.f32 %v9912_v8, %v9811_v31 }
 0xa5e   : > { %v9770_v59 = vpop.f32.mrb[28].mxu1 }
 0xa5f   : > { %v9917_v54 = vpop.f32.mrb[56].mxu0  ;;  %v9812_v5 = vadd.f32 %v9770_v59, %v18045_v60  ;;  %v12802_v30 = vpop.f32.mrb[29].mxu1 }
 0xa60   : > { %v12832_v9 = vpop.f32.mrb[57].mxu0  ;;  %v9773_v6 = vpop.f32.mrb[30].mxu1 }
 0xa61   : > { %v9920_v18 = vpop.f32.mrb[58].mxu0  ;;  %v18084_v63 = vadd.f32 %v9917_v54, %v9812_v5  ;;  %v9813_v42 = vadd.f32 %v9773_v6, %v18048_v15  ;;  %v12803_v24 = vpop.f32.mrb[31].mxu1 }
 0xa62   : > { %v12833_v47 = vpop.f32.mrb[59].mxu0 }
 0xa63   : > { %v18087_v4 = vadd.f32 %v9920_v18, %v9813_v42 }
 0xa66   : > { %v9778_v50 = vpop.f32.mrb[32].mxu1 }
 0xa67   : > { %v9925_v43 = vpop.f32.mrb[60].mxu0  ;;  %v9814_v56 = vadd.f32 %v9778_v50, %v18051_v55  ;;  %v12806_v32 = vpop.f32.mrb[33].mxu1 }
 0xa68   : > { %v12836_v52 = vpop.f32.mrb[61].mxu0  ;;  %v9781_v26 = vpop.f32.mrb[34].mxu1 }
 0xa69   : > { %v9928_v60 = vpop.f32.mrb[62].mxu0  ;;  %v18090_v16 = vadd.f32 %v9925_v43, %v9814_v56  ;;  %v9815_v51 = vadd.f32 %v9781_v26, %v18054_v7  ;;  %v12807_v1 = vpop.f32.mrb[35].mxu1  ;;  %v13099_v7 = vld [vmem:[%s18270_s10] sm:$0xff]  }
 0xa6a   : > { %v12837_v34 = vpop.f32.mrb[63].mxu0  ;;  %12941 = vmatpush3.bf16.msra.mxu0 %v13099_v7 }
 0xa6b   : > { %v18093_v10 = vadd.f32 %v9928_v60, %v9815_v51 }
 0xa6e   : > { %v9786_v15 = vpop.f32.mrb[36].mxu1 }
 0xa6f   : > { %v9933_v0 = vpop.f32.mrb[64].mxu0  ;;  %v9816_v45 = vadd.f32 %v9786_v15, %v18057_v25  ;;  %v12810_v33 = vpop.f32.mrb[37].mxu1 }
 0xa70   : > { %v12840_v27 = vpop.f32.mrb[65].mxu0  ;;  %v9789_v49 = vpop.f32.mrb[38].mxu1 }
 0xa71   : > { %v9936_v55 = vpop.f32.mrb[66].mxu0  ;;  %v18096_v2 = vadd.f32 %v9933_v0, %v9816_v45  ;;  %v9817_v57 = vadd.f32 %v9789_v49, %v18060_v62  ;;  %v12811_v39 = vpop.f32.mrb[39].mxu1 }
 0xa72   : > { %v12841_v20 = vpop.f32.mrb[67].mxu0 }
 0xa73   : > { %v18099_v41 = vadd.f32 %v9936_v55, %v9817_v57 }
 0xa76   : > { %v9794_v21 = vpop.f32.mrb[40].mxu1 }
 0xa77   : > { %v9941_v48 = vpop.f32.mrb[68].mxu0  ;;  %v9818_v25 = vadd.f32 %v9794_v21, %v18063_v44  ;;  %v12814_v53 = vpop.f32.mrb[41].mxu1 }
 0xa78   : > { %v12844_v19 = vpop.f32.mrb[69].mxu0  ;;  %v9797_v14 = vpop.f32.mrb[42].mxu1 }
 0xa79   : > { %v9944_v46 = vpop.f32.mrb[70].mxu0  ;;  %v18105_v40 = vadd.f32 %v9941_v48, %v9818_v25  ;;  %v9819_v62 = vadd.f32 %v9797_v14, %v18066_v3  ;;  %v12815_v11 = vpop.f32.mrb[43].mxu1 }
 0xa7a   : > { %v12845_v23 = vpop.f32.mrb[71].mxu0 }
 0xa7b   : > { %v18108_v35 = vadd.f32 %v9944_v46, %v9819_v62 }
 0xa7e   : > { %v9802_v58 = vpop.f32.mrb[44].mxu1 }
 0xa7f   : > { %v9949_v38 = vpop.f32.mrb[72].mxu0  ;;  %v9820_v22 = vadd.f32 %v9802_v58, %v18069_v28  ;;  %v12818_v17 = vpop.f32.mrb[45].mxu1 }
 0xa80   : > { %v12848_v8 = vpop.f32.mrb[73].mxu0  ;;  %v9805_v44 = vpop.f32.mrb[46].mxu1 }
 0xa81   : > { %v9952_v31 = vpop.f32.mrb[74].mxu0  ;;  %v18111_v37 = vadd.f32 %v9949_v38, %v9820_v22  ;;  %v12819_v29 = vpop.f32.mrb[47].mxu1 }
 0xa82   : > { %v12849_v59 = vpop.f32.mrb[75].mxu0 }
 0xa86   : > { %v10048_v54 = vpop.f32.mrb[48].mxu1 }
 0xa87   : > { %v10195_v5 = vpop.f32.mrb[76].mxu0  ;;  %v10102_v3 = vadd.f32 %v10048_v54, %v18072_v36  ;;  %v12854_v30 = vpop.f32.mrb[49].mxu1 }
 0xa88   : > { %v12884_v9 = vpop.f32.mrb[77].mxu0  ;;  %v10051_v6 = vpop.f32.mrb[50].mxu1 }
 0xa89   : > { %v10198_v18 = vpop.f32.mrb[78].mxu0  ;;  %v18114_v42 = vadd.f32 %v10195_v5, %v10102_v3  ;;  %v10103_v28 = vadd.f32 %v10051_v6, %v18075_v12  ;;  %v12855_v24 = vpop.f32.mrb[51].mxu1 }
 0xa8a   : > { %v12885_v47 = vpop.f32.mrb[79].mxu0 }
 0xa8b   : > { %v18117_v50 = vadd.f32 %v10198_v18, %v10103_v28 }
 0xa8e   : > { %v10056_v43 = vpop.f32.mrb[52].mxu1 }
 0xa8f   : > { %v10203_v56 = vpop.f32.mrb[80].mxu0  ;;  %v10104_v32 = vadd.f32 %v10056_v43, %v18078_v61  ;;  %v12858_v52 = vpop.f32.mrb[53].mxu1 }
 0xa90   : > { %v12888_v26 = vpop.f32.mrb[81].mxu0  ;;  %v10059_v60 = vpop.f32.mrb[54].mxu1 }
 0xa91   : > { %v10206_v36 = vpop.f32.mrb[82].mxu0  ;;  %v18120_v51 = vadd.f32 %v10203_v56, %v10104_v32  ;;  %v10105_v1 = vadd.f32 %v10059_v60, %v18081_v13  ;;  %v12859_v34 = vpop.f32.mrb[55].mxu1 }
 0xa92   : > { %v12889_v15 = vpop.f32.mrb[83].mxu0 }
 0xa93   : > { %v18123_v0 = vadd.f32 %v10206_v36, %v10105_v1 }
 0xa96   : > { %v10064_v12 = vpop.f32.mrb[56].mxu1 }
 0xa97   : > { %v10211_v45 = vpop.f32.mrb[84].mxu0  ;;  %v10106_v33 = vadd.f32 %v10064_v12, %v18084_v63  ;;  %v12862_v27 = vpop.f32.mrb[57].mxu1 }
 0xa98   : > { %v12892_v49 = vpop.f32.mrb[85].mxu0  ;;  %v10067_v55 = vpop.f32.mrb[58].mxu1 }
 0xa99   : > { %v10214_v61 = vpop.f32.mrb[86].mxu0  ;;  %v18126_v57 = vadd.f32 %v10211_v45, %v10106_v33  ;;  %v10107_v39 = vadd.f32 %v10067_v55, %v18087_v4  ;;  %v12863_v20 = vpop.f32.mrb[59].mxu1 }
 0xa9a   : > { %v12893_v7 = vpop.f32.mrb[87].mxu0  ;;  %v10458_v20 = vpop.permute.xlu1 %10457 }
 0xa9b   : > { %v18129_v21 = vadd.f32 %v10214_v61, %v10107_v39 }
 0xa9e   : > { %v10072_v13 = vpop.f32.mrb[60].mxu1 }
 0xa9f   : > { %v10219_v48 = vpop.f32.mrb[88].mxu0  ;;  %v10108_v25 = vadd.f32 %v10072_v13, %v18090_v16  ;;  %v12866_v53 = vpop.f32.mrb[61].mxu1 }
 0xaa0   : > { %v12896_v19 = vpop.f32.mrb[89].mxu0  ;;  %v10075_v14 = vpop.f32.mrb[62].mxu1 }
 0xaa1   : > { %v10222_v63 = vpop.f32.mrb[90].mxu0  ;;  %v18132_v46 = vadd.f32 %v10219_v48, %v10108_v25  ;;  %v10109_v62 = vadd.f32 %v10075_v14, %v18093_v10  ;;  %v12867_v11 = vpop.f32.mrb[63].mxu1 }
 0xaa2   : > { %v12897_v23 = vpop.f32.mrb[91].mxu0  ;;  %v10463_v48 = vpop.permute.xlu0 %10462 }
 0xaa3   : > { %v18135_v58 = vadd.f32 %v10222_v63, %v10109_v62 }
 0xaa6   : > { %v10080_v4 = vpop.f32.mrb[64].mxu1 }
 0xaa7   : > { %v10227_v38 = vpop.f32.mrb[92].mxu0  ;;  %v10110_v22 = vadd.f32 %v10080_v4, %v18096_v2  ;;  %v12870_v17 = vpop.f32.mrb[65].mxu1 }
 0xaa8   : > { %v12900_v8 = vpop.f32.mrb[93].mxu0  ;;  %v10083_v44 = vpop.f32.mrb[66].mxu1 }
 0xaa9   : > { %v10230_v16 = vpop.f32.mrb[94].mxu0  ;;  %v18138_v31 = vadd.f32 %v10227_v38, %v10110_v22  ;;  %v10111_v29 = vadd.f32 %v10083_v44, %v18099_v41  ;;  %v12871_v59 = vpop.f32.mrb[67].mxu1 }
 0xaaa   : > { %v12901_v54 = vpop.f32.mrb[95].mxu0  ;;  %v10468_v4 = vpop.permute.xlu1 %10467 }
 0xaab   : > { %v18141_v5 = vadd.f32 %v10230_v16, %v10111_v29  ;;  %v10473_v17 = vpop.permute.xlu0 %10472 }
 0xaae   : > { %v10088_v10 = vpop.f32.mrb[68].mxu1 }
 0xaaf   : > { %v10235_v3 = vpop.f32.mrb[96].mxu0  ;;  %v10112_v30 = vadd.f32 %v10088_v10, %v18105_v40  ;;  %v12874_v9 = vpop.f32.mrb[69].mxu1 }
 0xab0   : > { %v12904_v6 = vpop.f32.mrb[97].mxu0  ;;  %v10091_v18 = vpop.f32.mrb[70].mxu1 }
 0xab1   : > { %v10238_v2 = vpop.f32.mrb[98].mxu0  ;;  %v18144_v28 = vadd.f32 %v10235_v3, %v10112_v30  ;;  %v10113_v24 = vadd.f32 %v10091_v18, %v18108_v35  ;;  %v12875_v47 = vpop.f32.mrb[71].mxu1  ;;  %v18155_v35 = vld [vmem:[%s18266_s6] ss:$0 sm:$0xff] }
 0xab2   : > { %v12905_v43 = vpop.f32.mrb[99].mxu0  ;;  %v10478_v30 = vpop.permute.xlu1 %10477 }
 0xab3   : > { %v18147_v56 = vadd.f32 %v10238_v2, %v10113_v24  ;;  %v10483_v18 = vpop.permute.xlu0 %10482 }
 0xab6   : > { %v10096_v41 = vpop.f32.mrb[72].mxu1 }
 0xab7   : > { %v10243_v32 = vpop.f32.mrb[100].mxu0  ;;  %v10114_v52 = vadd.f32 %v10096_v41, %v18111_v37  ;;  %v12878_v26 = vpop.f32.mrb[73].mxu1 }
 0xab8   : > { %v12908_v60 = vpop.f32.mrb[101].mxu0  ;;  %v10099_v36 = vpop.f32.mrb[74].mxu1 }
 0xab9   : > { %v10246_v40 = vpop.f32.mrb[102].mxu0  ;;  %v18150_v1 = vadd.f32 %v10243_v32, %v10114_v52  ;;  %v12879_v34 = vpop.f32.mrb[75].mxu1 }
 0xaba   : > { %v12909_v15 = vpop.f32.mrb[103].mxu0  ;;  %v10488_v36 = vpop.permute.xlu1 %10487 }
 0xabe   : > { %v10342_v12 = vpop.f32.mrb[76].mxu1 }
 0xabf   : > { %v10396_v45 = vadd.f32 %v10342_v12, %v18114_v42  ;;  %v12914_v33 = vpop.f32.mrb[77].mxu1 }
 0xac0   : > { %v10345_v27 = vpop.f32.mrb[78].mxu1 }
 0xac1   : > { %v10416_v37 = vadd.f32 %v18155_v35, %v10396_v45  ;;  %v10397_v49 = vadd.f32 %v10345_v27, %v18117_v50  ;;  %v12915_v55 = vpop.f32.mrb[79].mxu1  ;;  %v10493_v45 = vpop.permute.xlu0 %10492 }
 0xac3   : > { %v10429_v61 = vmax.f32 %v10416_v37, 0.0  ;;  %v10417_v39 = vadd.f32 %v18155_v35, %v10397_v49 }
 0xac5   : > { %v10520_v7 = vmul.f32 %v10458_v20, %v10429_v61  ;;  %v10430_v13 = vmax.f32 %v10417_v39, 0.0 }
 0xac6   : > { %v10350_v25 = vpop.f32.mrb[80].mxu1 }
 0xac7   : > { %10533 = vst.msk [vmem:[#allocation2 + $0x18] sm:$0xff] %vm412_vm0, %v10520_v7  ;;  %v10521_v53 = vmul.f32 %v10463_v48, %v10430_v13  ;;  %v10398_v42 = vadd.f32 %v10350_v25, %v18120_v51  ;;  %v12918_v19 = vpop.f32.mrb[81].mxu1 }
 0xac8   : > { %v10353_v14 = vpop.f32.mrb[82].mxu1 }
 0xac9   : > { %10534 = vst.msk [vmem:[#allocation2 + $0x20] sm:$0xff] %vm412_vm0, %v10521_v53  ;;  %v10418_v50 = vadd.f32 %v18155_v35, %v10398_v42  ;;  %v10399_v63 = vadd.f32 %v10353_v14, %v18123_v0  ;;  %v12919_v62 = vpop.f32.mrb[83].mxu1  ;;  %v10498_v14 = vpop.permute.xlu1 %10497 }
 0xacb   : > { %v10431_v11 = vmax.f32 %v10418_v50, 0.0  ;;  %v10419_v23 = vadd.f32 %v18155_v35, %v10399_v63 }
 0xacd   : > { %v10522_v38 = vmul.f32 %v10468_v4, %v10431_v11  ;;  %v10432_v22 = vmax.f32 %v10419_v23, 0.0  ;;  %v10503_v11 = vpop.permute.xlu0 %10502 }
 0xace   : > { %v10358_v8 = vpop.f32.mrb[84].mxu1  ;;  %v10546_v40 = vld [vmem:[#allocation2 + $0x18] sm:$0xff] }
 0xacf   : > { %10535 = vst.msk [vmem:[#allocation2 + $0x28] sm:$0xff] %vm412_vm0, %v10522_v38  ;;  %v10523_v51 = vmul.f32 %v10473_v17, %v10432_v22  ;;  %v10400_v44 = vadd.f32 %v10358_v8, %v18126_v57  ;;  %v12922_v16 = vpop.f32.mrb[85].mxu1  ;;  %v10559_v49 = vsel %vm412_vm0, %v10546_v40, 0.0 }
 0xad0   : > { %v10361_v29 = vpop.f32.mrb[86].mxu1  ;;  %v10547_v52 = vld [vmem:[#allocation2 + $0x20] sm:$0xff] }
 0xad1   : > { %10536 = vst.msk [vmem:[#allocation2 + $0x30] sm:$0xff] %vm412_vm0, %v10523_v51  ;;  %v10420_v0 = vadd.f32 %v18155_v35, %v10400_v44  ;;  %v10401_v59 = vadd.f32 %v10361_v29, %v18129_v21  ;;  %v12923_v54 = vpop.f32.mrb[87].mxu1 }
 0xad3   : > { %v10433_v10 = vmax.f32 %v10420_v0, 0.0  ;;  %v10421_v3 = vadd.f32 %v18155_v35, %v10401_v59 }
 0xad5   : > { %v10524_v9 = vmul.f32 %v10478_v30, %v10433_v10  ;;  %v10434_v6 = vmax.f32 %v10421_v3, 0.0  ;;  %v10508_v30 = vpop.permute.xlu1 %10507 }
 0xad6   : > { %v10366_v2 = vpop.f32.mrb[88].mxu1  ;;  %v10548_v34 = vld [vmem:[#allocation2 + $0x28] sm:$0xff] }
 0xad7   : > { %10537 = vst.msk [vmem:[#allocation2 + $0x38] sm:$0xff] %vm412_vm0, %v10524_v9  ;;  %v10525_v57 = vmul.f32 %v10483_v18, %v10434_v6  ;;  %v10402_v24 = vadd.f32 %v10366_v2, %v18132_v46  ;;  %v12926_v47 = vpop.f32.mrb[89].mxu1  ;;  %v10560_v46 = vsel %vm412_vm0, %v10547_v52, 0.0  ;;  %v10562_v55 = vsel %vm412_vm0, %v10548_v34, 0.0  ;;  %v10513_v2 = vpop.permute.xlu0 %10512 }
 0xad8   : > { %v10369_v43 = vpop.f32.mrb[90].mxu1  ;;  %v10549_v39 = vld [vmem:[#allocation2 + $0x30] sm:$0xff]  ;;  %v10561_v20 = vadd.f32 %v10560_v46, %v10559_v49 }
 0xad9   : > { %10538 = vst.msk [vmem:[#allocation2 + $0x40] sm:$0xff] %vm412_vm0, %v10525_v57  ;;  %v10422_v21 = vadd.f32 %v18155_v35, %v10402_v24  ;;  %v10403_v41 = vadd.f32 %v10369_v43, %v18135_v58  ;;  %v12927_v32 = vpop.f32.mrb[91].mxu1  ;;  %v10564_v19 = vsel %vm412_vm0, %v10549_v39, 0.0 }
 0xada   : > { %v10563_v53 = vadd.f32 %v10562_v55, %v10561_v20 }
 0xadb   : > { %v10435_v26 = vmax.f32 %v10422_v21, 0.0  ;;  %v10423_v60 = vadd.f32 %v18155_v35, %v10403_v41 }
 0xadc   : > { %v10565_v38 = vadd.f32 %v10564_v19, %v10563_v53  ;;  %v10594_v19 = vld [vmem:[%s18271_s11] sm:$0x1] }
 0xadd   : > { %v10526_v15 = vmul.f32 %v10488_v36, %v10435_v26  ;;  %v10436_v12 = vmax.f32 %v10423_v60, 0.0 }
 0xade   : > { %v10374_v33 = vpop.f32.mrb[92].mxu1  ;;  %v10550_v25 = vld [vmem:[#allocation2 + $0x38] sm:$0xff] }
 0xadf   : > { %10539 = vst.msk [vmem:[#allocation2 + $0x48] sm:$0xff] %vm412_vm0, %v10526_v15  ;;  %v10527_v27 = vmul.f32 %v10493_v45, %v10436_v12  ;;  %v10404_v37 = vadd.f32 %v10374_v33, %v18138_v31  ;;  %v12930_v58 = vpop.f32.mrb[93].mxu1  ;;  %v10566_v62 = vsel %vm412_vm0, %v10550_v25, 0.0  ;;  %v10518_v15 = vpop.permute.xlu1 %10517 }
 0xae0   : > { %v10377_v61 = vpop.f32.mrb[94].mxu1  ;;  %v10551_v4 = vld [vmem:[#allocation2 + $0x40] sm:$0xff]  ;;  %v10567_v44 = vadd.f32 %v10566_v62, %v10565_v38 }
 0xae1   : > { %10540 = vst.msk [vmem:[#allocation2 + $0x50] sm:$0xff] %vm412_vm0, %v10527_v27  ;;  %v10424_v7 = vadd.f32 %v18155_v35, %v10404_v37  ;;  %v10405_v13 = vadd.f32 %v10377_v61, %v18141_v5  ;;  %v12931_v48 = vpop.f32.mrb[95].mxu1  ;;  %v10568_v59 = vsel %vm412_vm0, %v10551_v4, 0.0 }
 0xae2   : > { %v10569_v9 = vadd.f32 %v10568_v59, %v10567_v44 }
 0xae3   : > { %v10437_v42 = vmax.f32 %v10424_v7, 0.0  ;;  %v10425_v31 = vadd.f32 %v18155_v35, %v10405_v13 }
 0xae5   : > { %v10528_v50 = vmul.f32 %v10498_v14, %v10437_v42  ;;  %v10438_v63 = vmax.f32 %v10425_v31, 0.0 }
 0xae6   : > { %v10382_v23 = vpop.f32.mrb[96].mxu1  ;;  %v10552_v51 = vld [vmem:[#allocation2 + $0x48] sm:$0xff] }
 0xae7   : > { %10541 = vst.msk [vmem:[#allocation2 + $0x58] sm:$0xff] %vm412_vm0, %v10528_v50  ;;  %v10529_v5 = vmul.f32 %v10503_v11, %v10438_v63  ;;  %v10406_v22 = vadd.f32 %v10382_v23, %v18144_v28  ;;  %v12934_v17 = vpop.f32.mrb[97].mxu1  ;;  %v10570_v3 = vsel %vm412_vm0, %v10552_v51, 0.0 }
 0xae8   : > { %v10385_v8 = vpop.f32.mrb[98].mxu1  ;;  %v10553_v28 = vld [vmem:[#allocation2 + $0x50] sm:$0xff]  ;;  %v10571_v47 = vadd.f32 %v10570_v3, %v10569_v9 }
 0xae9   : > { %10542 = vst.msk [vmem:[#allocation2 + $0x60] sm:$0xff] %vm412_vm0, %v10529_v5  ;;  %v10426_v16 = vadd.f32 %v18155_v35, %v10406_v22  ;;  %v10407_v29 = vadd.f32 %v10385_v8, %v18147_v56  ;;  %v12935_v0 = vpop.f32.mrb[99].mxu1  ;;  %v10572_v41 = vsel %vm412_vm0, %v10553_v28, 0.0 }
 0xaea   : > { %v10573_v40 = vadd.f32 %v10572_v41, %v10571_v47 }
 0xaeb   : > { %v10439_v54 = vmax.f32 %v10426_v16, 0.0  ;;  %v10427_v10 = vadd.f32 %v18155_v35, %v10407_v29 }
 0xaed   : > { %v10530_v6 = vmul.f32 %v10508_v30, %v10439_v54  ;;  %v10440_v18 = vmax.f32 %v10427_v10, 0.0 }
 0xaee   : > { %v10390_v57 = vpop.f32.mrb[100].mxu1  ;;  %v10554_v24 = vld [vmem:[#allocation2 + $0x58] sm:$0xff] }
 0xaef   : > { %10543 = vst.msk [vmem:[#allocation2 + $0x68] sm:$0xff] %vm412_vm0, %v10530_v6  ;;  %v10531_v56 = vmul.f32 %v10513_v2, %v10440_v18  ;;  %v10408_v43 = vadd.f32 %v10390_v57, %v18150_v1  ;;  %v12938_v21 = vpop.f32.mrb[101].mxu1  ;;  %v10574_v60 = vsel %vm412_vm0, %v10554_v24, 0.0 }
 0xaf0   : > { %v10393_v32 = vpop.f32.mrb[102].mxu1  ;;  %v10555_v36 = vld [vmem:[#allocation2 + $0x60] sm:$0xff]  ;;  %v10575_v12 = vadd.f32 %v10574_v60, %v10573_v40 }
 0xaf1   : > { %10544 = vst.msk [vmem:[#allocation2 + $0x70] sm:$0xff] %vm412_vm0, %v10531_v56  ;;  %v10428_v52 = vadd.f32 %v18155_v35, %v10408_v43  ;;  %v12939_v26 = vpop.f32.mrb[103].mxu1  ;;  %v10576_v45 = vsel %vm412_vm0, %v10555_v36, 0.0 }
 0xaf2   : > { %v10577_v37 = vadd.f32 %v10576_v45, %v10575_v12 }
 0xaf3   : > { %v10441_v34 = vmax.f32 %v10428_v52, 0.0 }
 0xaf5   : > { %v10532_v46 = vmul.f32 %v10518_v15, %v10441_v34 }
 0xaf6   : > { %v10556_v1 = vld [vmem:[#allocation2 + $0x68] sm:$0xff] }
 0xaf7   : > { %10545 = vst.msk [vmem:[#allocation2 + $0x78] sm:$0xf] %vm459_vm9, %v10532_v46  ;;  %v10578_v33 = vsel %vm412_vm0, %v10556_v1, 0.0 }
 0xaf8   : > { %v10557_v27 = vld [vmem:[#allocation2 + $0x70] sm:$0xff]  ;;  %v10579_v35 = vadd.f32 %v10578_v33, %v10577_v37 }
 0xaf9   : > { %v10580_v58 = vsel %vm412_vm0, %v10557_v27, 0.0 }
 0xafa   : > { %v10581_v55 = vadd.f32 %v10580_v58, %v10579_v35 }
 0xafe   : > { %v10558_v49 = vld [vmem:[#allocation2 + $0x78] sm:$0xf] }
 0xaff   : > { %v10582_v61 = vsel %vm459_vm9, %v10558_v49, 0.0 }
 0xb00   : > { %v10583_v39 = vadd.f32 %v10582_v61, %v10581_v55 }
 0xb02   : > { %v10584_v20 = vrot.slane %v10583_v39, 4 }
 0xb04   : > { %v10585_v7 = vadd.f32 %v10584_v20, %v10583_v39 }
 0xb06   : > { %v10586_v13 = vrot.slane %v10585_v7, 2 }
 0xb08   : > { %v10587_v48 = vadd.f32 %v10586_v13, %v10585_v7 }
 0xb0a   : > { %v10588_v25 = vrot.slane %v10587_v48, 1 }
 0xb0c   : > { %v10589_v53 = vadd.f32 %v10588_v25, %v10587_v48 }
 0xb0e   : > { %v10590_v42 = vmul.f32 0.015625, %v10589_v53 }
 0xb10   : > { %v10591_v31 = vpack.c.bf16 %v10590_v42, %v10590_v42 }
 0xb12   : > { %12943 = vmatmul.mubr.msk.bf16.vlgmr.msra.gmra.mrb[104].mxu0 %vm412_vm0, %v10591_v31 }
 0xbe5   : > { %v10638_v14 = vpop.f32.mrb[104].mxu0 }
 0xbe6   : > { %v10639_v50 = vadd.f32 %v10638_v14, %v10594_v19  ;;  %v12944_v63 = vpop.f32.mrb[105].mxu0 }
 0xbe7   : > { %v10641_v62 = vpop.f32.mrb[106].mxu0 }
 0xbe8   : > { %10644 = vst [vmem:[%s405_s28] sm:$0x1] %v10639_v50  ;;  %v12945_v11 = vpop.f32.mrb[107].mxu0 }
 0xbe9   : > { %13116 = shalt.err (!%p13113_p3)
}
 0xbea   : > { %s13117_s17 = scalar_lea.hbm %s18218_s16, 16  ;;  %s13121_s15 = scalar_lea.hbm %s18272_s12, 32 }
 0xbeb   : > { %p13118_p4 = scmp.ne.s32.totalorder %s18218_s16, %s13117_s17  ;;  %p13122_p9 = scmp.lt.u32.totalorder %s18218_s16, %s18272_s12 }
 0xbec   : > { %p13123_p10 = scmp.lt.u32.totalorder %s13121_s15, %s13117_s17  ;;  %p13125_p12 = scmp.lt.u32.totalorder %s13117_s17, %s18218_s16 }
 0xbed   : > { %p13119_p7 = pnand %p13118_p4, %p13274_p5 }
 0xbee   : > { %p13124_p11 = por %p13123_p10, %p13122_p9 }
 0xbef   : > { %p13120_p8 = pneg %p13119_p7 }
 0xbf0   : > { %p13126_p13 = por %p13125_p12, %p13124_p11 }
 0xbf2   : > { %p13127_p0 = pnand %p13126_p13, %p13120_p8 }
 0xbf4   : > { %13130 = shalt.err (!%p13127_p0)
}
 0xbf5   : > { %12947 = dma.vmem_to_hbm [thread:$0]  (%p13274_p5), %s18220_s29, 16, %s18218_s16, %s10646_s18  }
 0xbf6 PF: > { %p12953_p1 = scmp.ge.s32.totalorder %s13165_s24, 2  ;;  %s10670_s25 = sand.u32 1, %s13153_s21  }
 0xbf7   : > { %s10671_s19 = scalar_lea.sflag [#allocation5], %s10670_s25 }
 0xbf8   : > { %p12950_p2 = pnand %p12953_p1, %p13278_p6 }
 0xbfa   : > { %13148 = dma.done.wait (!%p12950_p2), %s10671_s19, 16  }
 0xbfb   : > { %13150 = vsyncadd (!%p12950_p2), %s10671_s19, 4294967280  ;;  %p22_p3 = scmp.ge.s32.totalorder %s13261_s27, 4   ;;  %s18376_s21 = smov %s13157_s22 }
 0xbfc   : > { %s18377_s22 = smov %s13161_s23  ;;  %s18378_s23 = smov %s13272_s30 }
 0xbfd   : > { %s18379_s24 = smov %s13261_s27  ;;  %24 = sbr.rel (!%p22_p3) target bundleno = 5 (0x5), region = 130 }
 0xc04   :  { %10675 = vsyncpa [#allocation5], 1 }
 0xc05   :  { %10677 = vsyncpa [#allocation5 + $0x1], 1 }

</bundles_post_ra>
